<compile_context>
chip_gen: v7x
topology: tpu7x:2x2x1
jax: 0.10.0
libtpu: 0.0.40
codegen_flags: <defaults>
</compile_context>

<pallas_src>
import math

import jax
import jax.numpy as jnp
import numpy as np
from jax.experimental import pallas as pl
from jax.experimental.pallas import tpu as pltpu

C_IN = 28 * 28          # 784, fixed by get_mask()
C_PAD = 896             # next multiple of 128
N_HIDDEN = 1024
N_FLOWS = 4
N_LAYERS = 2 * N_FLOWS  # 8 coupling layers


def get_mask_np():
    mask = np.zeros((28, 28), dtype=np.float32)
    for i in range(28):
        for j in range(28):
            if (i + j) % 2 == 0:
                mask[i, j] = 1.0
    return mask.reshape(1, 28 * 28)


def _coupling_flow_kernel(mask_ref, z_in_ref, ldj_in_ref,
                          w1_ref, b1_ref, w2_ref, b2_ref,
                          wts_ref, bts_ref,
                          z_out_ref, ldj_out_ref):
    layer = pl.program_id(1)

    # Initialize the VMEM-resident carry (z, ldj) on the first layer of each
    # batch tile.
    @pl.when(layer == 0)
    def _():
        z_out_ref[...] = z_in_ref[...]
        ldj_out_ref[...] = ldj_in_ref[...]

    # Per-layer mask is selected by the index_map (row 0: mask, row 1: 1-mask),
    # so no parity arithmetic is needed in-kernel.
    m = mask_ref[0]                     # (1, C_PAD) f32
    one_m = 1.0 - m

    z = z_out_ref[...]                  # (TB, C_PAD) f32
    masked_z = m * z

    bf = jnp.bfloat16
    # shared_arch: Linear -> ReLU -> Linear -> ReLU  (bf16 MXU, f32 accumulate)
    h = jnp.dot(masked_z.astype(bf), w1_ref[0],
                preferred_element_type=jnp.float32) + b1_ref[0]
    h = jnp.maximum(h, 0.0)
    h = jnp.dot(h.astype(bf), w2_ref[0],
                preferred_element_type=jnp.float32) + b2_ref[0]
    h = jnp.maximum(h, 0.0)

    # fused translation/scale heads: one matmul producing [t | s_pre]
    ts = jnp.dot(h.astype(bf), wts_ref[0],
                 preferred_element_type=jnp.float32) + bts_ref[0]
    c = z.shape[-1]
    t_out = ts[:, :c]
    s_out = jnp.tanh(ts[:, c:])

    z_out_ref[...] = masked_z + one_m * (z * jnp.exp(s_out) + t_out)
    ldj_out_ref[...] = ldj_out_ref[...] + jnp.sum(one_m * s_out, axis=1,
                                                  keepdims=True)


def _pick_vmem_limit():
    limit = 48 * 1024 * 1024          # safe on v5e/v6e (128 MiB) and v7x (64 MiB)
    try:
        cap = pltpu.get_tpu_info().vmem_capacity_bytes
        limit = min(limit, int(cap * 3 // 4))
    except Exception:
        pass
    return limit


def flow_forward_pallas(z, logdet, mask, params, *, batch_tile=256):
    """Forward (non-reverse) pass of Flow.  z: (B, 784), logdet: (B,)."""
    B, C = z.shape
    assert C == C_IN
    H = N_HIDDEN
    L = N_LAYERS
    Cp = C_PAD
    pad_c = Cp - C

    W1, b1, W2, b2, Wt, bt, Ws, bs = params

    # --- feature-dim padding (pad columns are exactly 0 through all layers) ---
    mask_p = jnp.pad(mask.astype(jnp.float32), ((0, 0), (0, pad_c)))
    masks = jnp.stack([mask_p, 1.0 - mask_p], axis=0)            # (2, 1, Cp)

    W1p = jnp.pad(W1, ((0, 0), (0, pad_c), (0, 0))).astype(jnp.bfloat16)
    W2b = W2.astype(jnp.bfloat16)
    Wts = jnp.concatenate(
        [jnp.pad(Wt, ((0, 0), (0, 0), (0, pad_c))),
         jnp.pad(Ws, ((0, 0), (0, 0), (0, pad_c)))], axis=-1
    ).astype(jnp.bfloat16)                                        # (L, H, 2*Cp)
    bts = jnp.concatenate(
        [jnp.pad(bt, ((0, 0), (0, 0), (0, pad_c))),
         jnp.pad(bs, ((0, 0), (0, 0), (0, pad_c)))], axis=-1
    ).astype(jnp.float32)                                         # (L, 1, 2*Cp)
    b1f = b1.astype(jnp.float32)
    b2f = b2.astype(jnp.float32)

    # --- batch padding / tiling ---
    Bp8 = ((B + 7) // 8) * 8
    TB = min(batch_tile, Bp8)
    n_bt = -(-Bp8 // TB)
    Bp = n_bt * TB

    zp = jnp.pad(z.astype(jnp.float32), ((0, Bp - B), (0, pad_c)))
    ldjp = jnp.pad(logdet.astype(jnp.float32), (0, Bp - B)).reshape(Bp, 1)

    carry_spec_z = pl.BlockSpec((TB, Cp), lambda b, l: (b, 0))
    carry_spec_l = pl.BlockSpec((TB, 1), lambda b, l: (b, 0))

    def wspec(shape):
        return pl.BlockSpec((1,) + shape, lambda b, l: (l, 0, 0))

    z_out, ldj_out = pl.pallas_call(
        _coupling_flow_kernel,
        out_shape=(jax.ShapeDtypeStruct((Bp, Cp), jnp.float32),
                   jax.ShapeDtypeStruct((Bp, 1), jnp.float32)),
        grid_spec=pltpu.PrefetchScalarGridSpec(
            num_scalar_prefetch=0,
            grid=(n_bt, L),                    # batch tiles outer, layers inner
            in_specs=[
                pl.BlockSpec((1, 1, Cp), lambda b, l: (l % 2, 0, 0)),  # masks
                carry_spec_z,                                          # z (init)
                carry_spec_l,                                          # ldj (init)
                wspec((Cp, H)),                                        # W1 (bf16)
                wspec((1, H)),                                         # b1
                wspec((H, H)),                                         # W2 (bf16)
                wspec((1, H)),                                         # b2
                wspec((H, 2 * Cp)),                                    # [Wt|Ws] (bf16)
                wspec((1, 2 * Cp)),                                    # [bt|bs]
            ],
            out_specs=[carry_spec_z, carry_spec_l],
        ),
        compiler_params=pltpu.CompilerParams(
            dimension_semantics=("parallel", "arbitrary"),
            vmem_limit_bytes=_pick_vmem_limit(),
        ),
    )(masks, zp, ldjp, W1p, b1f, W2b, b2f, Wts, bts)

    return z_out[:B, :C], ldj_out[:B, 0]


def flow_forward_ref(z, logdet, mask, params):
    """Pure-JAX reference mirroring the kernel numerics (bf16 weights &
    activations at the matmul inputs, f32 accumulation / elementwise)."""
    W1, b1, W2, b2, Wt, bt, Ws, bs = params
    bf = jnp.bfloat16
    f32 = jnp.float32
    ldj = logdet
    for l in range(N_LAYERS):
        m = mask if l % 2 == 0 else 1.0 - mask
        mz = m * z
        h = jax.nn.relu(jnp.dot(mz.astype(bf), W1[l].astype(bf),
                                preferred_element_type=f32) + b1[l])
        h = jax.nn.relu(jnp.dot(h.astype(bf), W2[l].astype(bf),
                                preferred_element_type=f32) + b2[l])
        t = jnp.dot(h.astype(bf), Wt[l].astype(bf),
                    preferred_element_type=f32) + bt[l]
        s = jnp.tanh(jnp.dot(h.astype(bf), Ws[l].astype(bf),
                             preferred_element_type=f32) + bs[l])
        z = mz + (1.0 - m) * (z * jnp.exp(s) + t)
        ldj = ldj + jnp.sum((1.0 - m) * s, axis=1)
    return z, ldj


def make_params(key):
    """Deterministic small random weights, stacked over the 8 layers."""
    ks = jax.random.split(key, 8)
    s1 = 1.0 / math.sqrt(C_IN)
    s2 = 1.0 / math.sqrt(N_HIDDEN)
    W1 = jax.random.normal(ks[0], (N_LAYERS, C_IN, N_HIDDEN), jnp.float32) * s1
    b1 = jax.random.normal(ks[1], (N_LAYERS, 1, N_HIDDEN), jnp.float32) * 0.01
    W2 = jax.random.normal(ks[2], (N_LAYERS, N_HIDDEN, N_HIDDEN), jnp.float32) * s2
    b2 = jax.random.normal(ks[3], (N_LAYERS, 1, N_HIDDEN), jnp.float32) * 0.01
    # t / s heads: PyTorch zeros these; use small values to exercise the path.
    Wt = jax.random.normal(ks[4], (N_LAYERS, N_HIDDEN, C_IN), jnp.float32) * 0.01
    bt = jax.random.normal(ks[5], (N_LAYERS, 1, C_IN), jnp.float32) * 0.01
    Ws = jax.random.normal(ks[6], (N_LAYERS, N_HIDDEN, C_IN), jnp.float32) * 0.01
    bs = jax.random.normal(ks[7], (N_LAYERS, 1, C_IN), jnp.float32) * 0.01
    return (W1, b1, W2, b2, Wt, bt, Ws, bs)


if __name__ == "__main__":
    key = jax.random.PRNGKey(0)
    k_param, k_z = jax.random.split(key)

    B = 2
    mask = jnp.asarray(get_mask_np())                     # (1, 784)
    z = jax.random.normal(k_z, (B, C_IN), jnp.float32)    # (2, 784)
    logdet = jnp.zeros((B,), jnp.float32)
    params = make_params(k_param)

    z_out, ldj_out = flow_forward_pallas(z, logdet, mask, params)
    jax.block_until_ready((z_out, ldj_out))

    z_ref, ldj_ref = flow_forward_ref(z, logdet, mask, params)
    np.testing.assert_allclose(np.asarray(z_out), np.asarray(z_ref),
                               rtol=1e-3, atol=1e-3)
    np.testing.assert_allclose(np.asarray(ldj_out), np.asarray(ldj_ref),
                               rtol=1e-3, atol=1e-3)

    print("KERNEL_OK")
</pallas_src>

<mosaic_0001>
module attributes {stable_mosaic.version = 11 : i64} {
  func.func @_coupling_flow_kernel(%arg0: i32, %arg1: i32, %arg2: memref<1x1x896xf32, #tpu.memory_space<vmem>>, %arg3: memref<8x896xf32, #tpu.memory_space<vmem>>, %arg4: memref<8x1xf32, #tpu.memory_space<vmem>>, %arg5: memref<1x896x1024xbf16, #tpu.memory_space<vmem>>, %arg6: memref<1x1x1024xf32, #tpu.memory_space<vmem>>, %arg7: memref<1x1024x1024xbf16, #tpu.memory_space<vmem>>, %arg8: memref<1x1x1024xf32, #tpu.memory_space<vmem>>, %arg9: memref<1x1024x1792xbf16, #tpu.memory_space<vmem>>, %arg10: memref<1x1x1792xf32, #tpu.memory_space<vmem>>, %arg11: memref<8x896xf32, #tpu.memory_space<vmem>>, %arg12: memref<8x1xf32, #tpu.memory_space<vmem>>) attributes {dimension_semantics = [#tpu.dimension_semantics<parallel>, #tpu.dimension_semantics<arbitrary>], iteration_bounds = array<i64: 1, 8>, scalar_prefetch = 0 : i64, scratch_operands = 0 : i64, tpu.core_type = #tpu.core_type<tc>, window_params = [{transform_indices = @transform_0, window_bounds = array<i64: 1, 1, 896>}, {transform_indices = @transform_1, window_bounds = array<i64: 8, 896>}, {transform_indices = @transform_2, window_bounds = array<i64: 8, 1>}, {transform_indices = @transform_3, window_bounds = array<i64: 1, 896, 1024>}, {transform_indices = @transform_4, window_bounds = array<i64: 1, 1, 1024>}, {transform_indices = @transform_5, window_bounds = array<i64: 1, 1024, 1024>}, {transform_indices = @transform_6, window_bounds = array<i64: 1, 1, 1024>}, {transform_indices = @transform_7, window_bounds = array<i64: 1, 1024, 1792>}, {transform_indices = @transform_8, window_bounds = array<i64: 1, 1, 1792>}, {transform_indices = @transform_9, window_bounds = array<i64: 8, 896>}, {transform_indices = @transform_10, window_bounds = array<i64: 8, 1>}]} {
    %c0_i32 = arith.constant 0 : i32
    %0 = arith.cmpi eq, %arg1, %c0_i32 : i32
    %1 = arith.extui %0 : i1 to i32
    %c0_i32_0 = arith.constant 0 : i32
    %2 = arith.cmpi ne, %1, %c0_i32_0 : i32
    scf.if %2 {
      %c0_35 = arith.constant 0 : index
      %c0_36 = arith.constant 0 : index
      %55 = vector.load %arg3[%c0_35, %c0_36] : memref<8x896xf32, #tpu.memory_space<vmem>>, vector<8x896xf32>
      %c0_37 = arith.constant 0 : index
      %c0_38 = arith.constant 0 : index
      %56 = vector.load %arg11[%c0_37, %c0_38] : memref<8x896xf32, #tpu.memory_space<vmem>>, vector<8x896xf32>
      tpu.vector_store %arg11[%c0_37, %c0_38], %55 {strides = array<i32>} : memref<8x896xf32, #tpu.memory_space<vmem>>, vector<8x896xf32>,
      %c0_39 = arith.constant 0 : index
      %c0_40 = arith.constant 0 : index
      %57 = vector.load %arg4[%c0_39, %c0_40] : memref<8x1xf32, #tpu.memory_space<vmem>>, vector<8x1xf32>
      %c0_41 = arith.constant 0 : index
      %c0_42 = arith.constant 0 : index
      %58 = vector.load %arg12[%c0_41, %c0_42] : memref<8x1xf32, #tpu.memory_space<vmem>>, vector<8x1xf32>
      tpu.vector_store %arg12[%c0_41, %c0_42], %57 {strides = array<i32>} : memref<8x1xf32, #tpu.memory_space<vmem>>, vector<8x1xf32>,
    } else {
    }
    %c0 = arith.constant 0 : index
    %c0_1 = arith.constant 0 : index
    %c0_2 = arith.constant 0 : index
    %3 = vector.load %arg2[%c0, %c0_1, %c0_2] : memref<1x1x896xf32, #tpu.memory_space<vmem>>, vector<1x1x896xf32>
    %4 = vector.shape_cast %3 : vector<1x1x896xf32> to vector<1x896xf32>
    %cst = arith.constant 1.000000e+00 : f32
    %5 = vector.broadcast %cst : f32 to vector<1x896xf32>
    %6 = arith.subf %5, %4 : vector<1x896xf32>
    %c0_3 = arith.constant 0 : index
    %c0_4 = arith.constant 0 : index
    %7 = vector.load %arg11[%c0_3, %c0_4] : memref<8x896xf32, #tpu.memory_space<vmem>>, vector<8x896xf32>
    %8 = vector.broadcast %4 : vector<1x896xf32> to vector<8x896xf32>
    %9 = arith.mulf %8, %7 : vector<8x896xf32>
    %10 = arith.truncf %9 : vector<8x896xf32> to vector<8x896xbf16>
    %c0_5 = arith.constant 0 : index
    %c0_6 = arith.constant 0 : index
    %c0_7 = arith.constant 0 : index
    %11 = vector.load %arg5[%c0_5, %c0_6, %c0_7] : memref<1x896x1024xbf16, #tpu.memory_space<vmem>>, vector<1x896x1024xbf16>
    %12 = vector.shape_cast %11 : vector<1x896x1024xbf16> to vector<896x1024xbf16>
    %cst_8 = arith.constant dense<0.000000e+00> : vector<8x1024xf32>
    %13 = tpu.matmul %10, %12, %cst_8 {dimension_numbers = #tpu.dot_dimension_numbers<[1], [0], [0], [1], [0, 0, 1, 1], [], []>} : vector<8x896xbf16>, vector<896x1024xbf16>, vector<8x1024xf32> -> vector<8x1024xf32>
    %c0_9 = arith.constant 0 : index
    %c0_10 = arith.constant 0 : index
    %c0_11 = arith.constant 0 : index
    %14 = vector.load %arg6[%c0_9, %c0_10, %c0_11] : memref<1x1x1024xf32, #tpu.memory_space<vmem>>, vector<1x1x1024xf32>
    %15 = vector.shape_cast %14 : vector<1x1x1024xf32> to vector<1x1024xf32>
    %16 = vector.broadcast %15 : vector<1x1024xf32> to vector<8x1024xf32>
    %17 = arith.addf %13, %16 : vector<8x1024xf32>
    %cst_12 = arith.constant 0.000000e+00 : f32
    %18 = vector.broadcast %cst_12 : f32 to vector<8x1024xf32>
    %19 = arith.maximumf %17, %18 : vector<8x1024xf32>
    %20 = arith.truncf %19 : vector<8x1024xf32> to vector<8x1024xbf16>
    %c0_13 = arith.constant 0 : index
    %c0_14 = arith.constant 0 : index
    %c0_15 = arith.constant 0 : index
    %21 = vector.load %arg7[%c0_13, %c0_14, %c0_15] : memref<1x1024x1024xbf16, #tpu.memory_space<vmem>>, vector<1x1024x1024xbf16>
    %22 = vector.shape_cast %21 : vector<1x1024x1024xbf16> to vector<1024x1024xbf16>
    %cst_16 = arith.constant dense<0.000000e+00> : vector<8x1024xf32>
    %23 = tpu.matmul %20, %22, %cst_16 {dimension_numbers = #tpu.dot_dimension_numbers<[1], [0], [0], [1], [0, 0, 1, 1], [], []>} : vector<8x1024xbf16>, vector<1024x1024xbf16>, vector<8x1024xf32> -> vector<8x1024xf32>
    %c0_17 = arith.constant 0 : index
    %c0_18 = arith.constant 0 : index
    %c0_19 = arith.constant 0 : index
    %24 = vector.load %arg8[%c0_17, %c0_18, %c0_19] : memref<1x1x1024xf32, #tpu.memory_space<vmem>>, vector<1x1x1024xf32>
    %25 = vector.shape_cast %24 : vector<1x1x1024xf32> to vector<1x1024xf32>
    %26 = vector.broadcast %25 : vector<1x1024xf32> to vector<8x1024xf32>
    %27 = arith.addf %23, %26 : vector<8x1024xf32>
    %cst_20 = arith.constant 0.000000e+00 : f32
    %28 = vector.broadcast %cst_20 : f32 to vector<8x1024xf32>
    %29 = arith.maximumf %27, %28 : vector<8x1024xf32>
    %30 = arith.truncf %29 : vector<8x1024xf32> to vector<8x1024xbf16>
    %c0_21 = arith.constant 0 : index
    %c0_22 = arith.constant 0 : index
    %c0_23 = arith.constant 0 : index
    %31 = vector.load %arg9[%c0_21, %c0_22, %c0_23] : memref<1x1024x1792xbf16, #tpu.memory_space<vmem>>, vector<1x1024x1792xbf16>
    %32 = vector.shape_cast %31 : vector<1x1024x1792xbf16> to vector<1024x1792xbf16>
    %cst_24 = arith.constant dense<0.000000e+00> : vector<8x1792xf32>
    %33 = tpu.matmul %30, %32, %cst_24 {dimension_numbers = #tpu.dot_dimension_numbers<[1], [0], [0], [1], [0, 0, 1, 1], [], []>} : vector<8x1024xbf16>, vector<1024x1792xbf16>, vector<8x1792xf32> -> vector<8x1792xf32>
    %c0_25 = arith.constant 0 : index
    %c0_26 = arith.constant 0 : index
    %c0_27 = arith.constant 0 : index
    %34 = vector.load %arg10[%c0_25, %c0_26, %c0_27] : memref<1x1x1792xf32, #tpu.memory_space<vmem>>, vector<1x1x1792xf32>
    %35 = vector.shape_cast %34 : vector<1x1x1792xf32> to vector<1x1792xf32>
    %36 = vector.broadcast %35 : vector<1x1792xf32> to vector<8x1792xf32>
    %37 = arith.addf %33, %36 : vector<8x1792xf32>
    %38 = vector.extract_strided_slice %37 {offsets = [0, 0], sizes = [8, 896], strides = [1, 1]} : vector<8x1792xf32> to vector<8x896xf32>
    %39 = vector.extract_strided_slice %37 {offsets = [0, 896], sizes = [8, 896], strides = [1, 1]} : vector<8x1792xf32> to vector<8x896xf32>
    %40 = math.tanh %39 : vector<8x896xf32>
    %41 = math.exp %40 : vector<8x896xf32>
    %42 = arith.mulf %7, %41 : vector<8x896xf32>
    %43 = arith.addf %42, %38 : vector<8x896xf32>
    %44 = vector.broadcast %6 : vector<1x896xf32> to vector<8x896xf32>
    %45 = arith.mulf %44, %43 : vector<8x896xf32>
    %46 = arith.addf %9, %45 : vector<8x896xf32>
    %c0_28 = arith.constant 0 : index
    %c0_29 = arith.constant 0 : index
    %47 = vector.load %arg11[%c0_28, %c0_29] : memref<8x896xf32, #tpu.memory_space<vmem>>, vector<8x896xf32>
    tpu.vector_store %arg11[%c0_28, %c0_29], %46 {strides = array<i32>} : memref<8x896xf32, #tpu.memory_space<vmem>>, vector<8x896xf32>,
    %c0_30 = arith.constant 0 : index
    %c0_31 = arith.constant 0 : index
    %48 = vector.load %arg12[%c0_30, %c0_31] : memref<8x1xf32, #tpu.memory_space<vmem>>, vector<8x1xf32>
    %49 = vector.broadcast %6 : vector<1x896xf32> to vector<8x896xf32>
    %50 = arith.mulf %49, %40 : vector<8x896xf32>
    %cst_32 = arith.constant dense<0.000000e+00> : vector<8xf32>
    %51 = vector.multi_reduction <add>, %50, %cst_32 [1] : vector<8x896xf32> to vector<8xf32>
    %52 = vector.shape_cast %51 : vector<8xf32> to vector<8x1xf32>
    %53 = arith.addf %48, %52 : vector<8x1xf32>
    %c0_33 = arith.constant 0 : index
    %c0_34 = arith.constant 0 : index
    %54 = vector.load %arg12[%c0_33, %c0_34] : memref<8x1xf32, #tpu.memory_space<vmem>>, vector<8x1xf32>
    tpu.vector_store %arg12[%c0_33, %c0_34], %53 {strides = array<i32>} : memref<8x1xf32, #tpu.memory_space<vmem>>, vector<8x1xf32>,
    return
  }
  func.func @transform_0(%arg0: i32, %arg1: i32) -> (i32, i32, i32) {
    %c2_i32 = arith.constant 2 : i32
    %c0_i32 = arith.constant 0 : i32
    %0 = arith.cmpi eq, %c2_i32, %c0_i32 : i32
    %c1_i32 = arith.constant 1 : i32
    %1 = arith.select %0, %c1_i32, %c2_i32 : i32
    %2 = arith.remsi %arg1, %1 : i32
    %c0_i32_0 = arith.constant 0 : i32
    %3 = arith.cmpi ne, %2, %c0_i32_0 : i32
    %c0_i32_1 = arith.constant 0 : i32
    %4 = arith.cmpi slt, %2, %c0_i32_1 : i32
    %c0_i32_2 = arith.constant 0 : i32
    %5 = arith.cmpi slt, %1, %c0_i32_2 : i32
    %6 = arith.xori %4, %5 : i1
    %7 = arith.andi %6, %3 : i1
    %8 = arith.addi %2, %1 : i32
    %9 = arith.select %7, %8, %2 : i32
    %c0_i32_3 = arith.constant 0 : i32
    %c0_i32_4 = arith.constant 0 : i32
    %c0_i32_5 = arith.constant 0 : i32
    return %9, %c0_i32_3, %c0_i32_4 : i32, i32, i32
  }
  func.func @transform_1(%arg0: i32, %arg1: i32) -> (i32, i32) {
    %c0_i32 = arith.constant 0 : i32
    %c0_i32_0 = arith.constant 0 : i32
    return %arg0, %c0_i32 : i32, i32
  }
  func.func @transform_2(%arg0: i32, %arg1: i32) -> (i32, i32) {
    %c0_i32 = arith.constant 0 : i32
    %c0_i32_0 = arith.constant 0 : i32
    return %arg0, %c0_i32 : i32, i32
  }
  func.func @transform_3(%arg0: i32, %arg1: i32) -> (i32, i32, i32) {
    %c0_i32 = arith.constant 0 : i32
    %c0_i32_0 = arith.constant 0 : i32
    %c0_i32_1 = arith.constant 0 : i32
    return %arg1, %c0_i32, %c0_i32_0 : i32, i32, i32
  }
  func.func @transform_4(%arg0: i32, %arg1: i32) -> (i32, i32, i32) {
    %c0_i32 = arith.constant 0 : i32
    %c0_i32_0 = arith.constant 0 : i32
    %c0_i32_1 = arith.constant 0 : i32
    return %arg1, %c0_i32, %c0_i32_0 : i32, i32, i32
  }
  func.func @transform_5(%arg0: i32, %arg1: i32) -> (i32, i32, i32) {
    %c0_i32 = arith.constant 0 : i32
    %c0_i32_0 = arith.constant 0 : i32
    %c0_i32_1 = arith.constant 0 : i32
    return %arg1, %c0_i32, %c0_i32_0 : i32, i32, i32
  }
  func.func @transform_6(%arg0: i32, %arg1: i32) -> (i32, i32, i32) {
    %c0_i32 = arith.constant 0 : i32
    %c0_i32_0 = arith.constant 0 : i32
    %c0_i32_1 = arith.constant 0 : i32
    return %arg1, %c0_i32, %c0_i32_0 : i32, i32, i32
  }
  func.func @transform_7(%arg0: i32, %arg1: i32) -> (i32, i32, i32) {
    %c0_i32 = arith.constant 0 : i32
    %c0_i32_0 = arith.constant 0 : i32
    %c0_i32_1 = arith.constant 0 : i32
    return %arg1, %c0_i32, %c0_i32_0 : i32, i32, i32
  }
  func.func @transform_8(%arg0: i32, %arg1: i32) -> (i32, i32, i32) {
    %c0_i32 = arith.constant 0 : i32
    %c0_i32_0 = arith.constant 0 : i32
    %c0_i32_1 = arith.constant 0 : i32
    return %arg1, %c0_i32, %c0_i32_0 : i32, i32, i32
  }
  func.func @transform_9(%arg0: i32, %arg1: i32) -> (i32, i32) {
    %c0_i32 = arith.constant 0 : i32
    %c0_i32_0 = arith.constant 0 : i32
    return %arg0, %c0_i32 : i32, i32
  }
  func.func @transform_10(%arg0: i32, %arg1: i32) -> (i32, i32) {
    %c0_i32 = arith.constant 0 : i32
    %c0_i32_0 = arith.constant 0 : i32
    return %arg0, %c0_i32 : i32, i32
  }
}

</mosaic_0001>

<bundles_post_ra>
// kernel: tpu_custom_call.1
= control target key start
LH: loop header
LB: loop body
LE: loop exit
PB: predicated region body
PF: predicated region fallthrough
CT: control target
= control target key end

     0   :  { %s21705_s0 = inlined_call_operand.hbm [shape: f32[2,1,896], index: 0, kind: input, shape index: {}]   ;;  %s21706_s1 = inlined_call_operand.hbm [shape: f32[8,896], index: 1, kind: input, shape index: {}]   ;;  %s21707_s2 = inlined_call_operand.vmem [shape: f32[8,1], index: 2, kind: input, shape index: {}]   ;;  %s21708_s3 = inlined_call_operand.hbm [shape: bf16[8,896,1024], index: 3, kind: input, shape index: {}]   ;;  %s21709_s4 = inlined_call_operand.hbm [shape: f32[8,1,1024], index: 4, kind: input, shape index: {}]   ;;  %s21710_s5 = inlined_call_operand.hbm [shape: bf16[8,1024,1024], index: 5, kind: input, shape index: {}]   ;;  %s21711_s6 = inlined_call_operand.hbm [shape: f32[8,1,1024], index: 6, kind: input, shape index: {}]   ;;  %s21712_s7 = inlined_call_operand.hbm [shape: bf16[8,1024,1792], index: 7, kind: input, shape index: {}]   ;;  %s21713_s8 = inlined_call_operand.hbm [shape: f32[8,1,1792], index: 8, kind: input, shape index: {}]   ;;  %s21714_s9 = inlined_call_operand.hbm [shape: f32[8,896], index: 9, kind: output, shape index: {0}]   ;;  %s21715_s10 = inlined_call_operand.vmem [shape: f32[8,1], index: 10, kind: output, shape index: {1}]  }
   0x1   :  { %21732 = sst [smem:[#allocation22_spill]] %s21705_s0 }
   0x2   :  { %21733 = sst [smem:[#allocation23_spill]] %s21707_s2 }
   0x3   :  { %21734 = sst [smem:[#allocation24_spill]] %s21708_s3 }
   0x4   :  { %21735 = sst [smem:[#allocation25_spill]] %s21709_s4 }
   0x5   :  { %21736 = sst [smem:[#allocation26_spill]] %s21710_s5 }
   0x6   :  { %21737 = sst [smem:[#allocation27_spill]] %s21714_s9 }
   0x7   :  { %21738 = sst [smem:[#allocation28_spill]] %s21715_s10 }
   0x8   :  { %16 = vsyncpa [#allocation3], 0 }
   0x9   :  { %18 = vsyncpa [#allocation3 + $0x1], 0 }
   0xa   :  { %19 = vsyncpa [#allocation6], 0 }
   0xb   :  { %20 = vsyncpa [#allocation4], 0  ;;  %s18915_s13 = smov 0   ;;  %s18917_s14 = smov 0  }
   0xc   :  { %s18919_s15 = smov 0   ;;  %s18921_s16 = smov 0  }
   0xd   :  { %s18923_s17 = smov 0   ;;  %s18925_s18 = smov 0  }
   0xe   :  { %s18927_s19 = smov 0   ;;  %s18929_s20 = smov 0  }
   0xf   :  { %s18931_s21 = smov 0  }
  0x10 LB: > { %21739 = sst [smem:[#allocation18_spill]] %s18832_s18  ;;  %s35_s22 = sadd.s32 1, %s18840_s20  ;;  %s18844_s21 = sphi %s18931_s21, %s26_s21   ;;  %s18840_s20 = sphi %s18929_s20, %s21783_s20   ;;  %s18836_s19 = sphi %s18927_s19, %s21782_s19   ;;  %s18832_s18 = sphi %s18925_s18, %s21781_s18   ;;  %s18828_s17 = sphi %s18923_s17, %s21780_s17   ;;  %s18824_s16 = sphi %s18921_s16, %s21779_s16   ;;  %s18820_s15 = sphi %s18919_s15, %s21778_s15   ;;  %s18816_s14 = sphi %s18917_s14, %s21777_s14   ;;  %s18812_s13 = sphi %s18915_s13, %s21776_s13  }
  0x11   : > { %p36_p0 = scmp.ge.s32.totalorder %s35_s22, 8  ;;  %s43_s23 = ssub.s32 0, %s18840_s20 }
  0x12   : > { %s14919_s24 = smin.u32 %s18840_s20, %s43_s23  ;;  %s69_s25 = sadd.s32 1, %s18832_s18 }
  0x13   : > { %s21785_s22 = smov (%p36_p0, %s35_s22), 0  ;;  %s45_s26 = sand.u32 1, %s14919_s24  }
  0x14   : > { %21740 = sst [smem:[#allocation19_spill]] %s21785_s22  ;;  %p76_p1 = scmp.ne.s32.totalorder %s18832_s18, %s18828_s17 }
  0x15   : > { %s55_s27 = ssub.s32 0, %s21785_s22  ;;  %p77_p2 = scmp.eq.s32.totalorder %s18844_s21, 0 }
  0x16   : > { %p14921_p3 = scmp.lt.s32.totalorder %s45_s26, 0  ;;  %s52_s28 = sadd.s32 2, %s45_s26 }
  0x17   : > { %s14922_s29 = smin.u32 %s55_s27, %s21785_s22  ;;  %p18973_p4 = por %p77_p2, %p76_p1 }
  0x18   : > { %s21787_s28 = smov (!%p14921_p3, %s52_s28), %s45_s26  ;;  %s57_s11 = sand.u32 1, %s14922_s29  }
  0x19   : > { %s144_s12 = ssub.s32 %s18840_s20, %s21785_s22  ;;  %s147_s23 = sadd.s32 1, %s18820_s15 }
  0x1a   : > { %p145_p5 = scmp.eq.s32.totalorder %s144_s12, 0  ;;  %p154_p6 = scmp.ne.s32.totalorder %s18820_s15, %s18816_s14 }
  0x1b   : > { %p14924_p7 = scmp.lt.s32.totalorder %s57_s11, 0  ;;  %s64_s24 = sadd.s32 2, %s57_s11 }
  0x1c   : > { %s18983_s9 = scalar_select %p145_p5, %s18820_s15, %s147_s23  }
  0x1d   : > { %s21789_s24 = smov (!%p14924_p7, %s64_s24), %s57_s11  ;;  %p156_p8 = por %p154_p6, %p77_p2 }
  0x1e   : > { %21742 = sst [smem:[#allocation20_spill]] %s18983_s9  ;;  %s66_s27 = ssub.s32 %s21787_s28, %s21789_s24 }
  0x1f   : > { %p17028_p9 = scmp.lt.s32.totalorder %s18844_s21, 8  ;;  %p67_p10 = scmp.eq.s32.totalorder %s66_s27, 0 }
  0x20   : > { %s387_s10 = sand.u32 1, %s18844_s21   ;;  %s389_s2 = sand.u32 1, %s18832_s18  }
  0x21   : > { %s18991_s26 = scalar_select %p67_p10, %s18832_s18, %s69_s25  }
  0x22   : > { %s16967_s29 = smul.u32 7, %s389_s2  ;;  %p18995_p11 = pnand %p17028_p9, %p18973_p4 }
  0x23   : > { %21743 = sst [smem:[#allocation21_spill]] %s18991_s26  ;;  %s16968_s23 = smul.u32 112, %s21787_s28 }
  0x24   : > { %p18999_p12 = pnand %p17028_p9, %p156_p8  ;;  %s21746_s0 = sld [smem:[#allocation22_spill]] }
  0x25   : > { %s391_s2 = scalar_lea.vmem [#allocation2], %s16967_s29  ;;  %s19010_s30 = scalar_lea.sflag [#allocation3], %s387_s10 }
  0x26   : > { %s21745_s11 = scalar_select %p18999_p12, 1, 0 }
  0x27   : > { %s411_s25 = sshll.u32 %s391_s2, 4  ;;  %p18496_p0 = pneg %p18995_p11  ;;  %s19008_s25 = int_to_ptr.vmem [resolvable:$true] %s411_s25 }
  0x2a   : > { %s19006_s27 = scalar_lea.hbm %s21746_s0, %s16968_s23  ;;  %s18499_s24 = scalar_lea.hbm %s21746_s0, 224 }
  0x2b   : > { %s18494_s28 = scalar_lea.hbm %s19006_s27, 112  ;;  %p18500_p3 = scmp.lt.u32.totalorder %s19006_s27, %s21746_s0 }
  0x2c   : > { %p18495_p13 = scmp.ne.s32.totalorder %s19006_s27, %s18494_s28  ;;  %p18501_p4 = scmp.lt.u32.totalorder %s18499_s24, %s18494_s28 }
  0x2d   : > { %p18503_p6 = scmp.lt.u32.totalorder %s18494_s28, %s19006_s27 }
  0x2e   : > { %p18497_p1 = pnand %p18496_p0, %p18495_p13  ;;  %p18502_p5 = por %p18501_p4, %p18500_p3 }
  0x30   : > { %p18498_p2 = pneg %p18497_p1  ;;  %p18504_p7 = por %p18503_p6, %p18502_p5 }
  0x32   : > { %p18505_p8 = pnand %p18504_p7, %p18498_p2 }
  0x34   : > { %18508 = shalt.err (!%p18505_p8)
}
  0x35   : > { %s18509_s10 = scalar_lea.vmem %s19008_s25, 112  ;;  %s18846_s29 = smov [#allocation2]  }
  0x36   : > { %p18510_p9 = scmp.ne.s32.totalorder %s19008_s25, %s18509_s10  ;;  %s18514_s2 = sshll.u32 %s18846_s29, 4  ;;  %s18515_s2 = int_to_ptr.vmem [resolvable:$false] %s18514_s2 }
  0x37   : > { %s18516_s18 = scalar_lea.vmem %s18515_s2, 224  ;;  %p18517_p1 = scmp.lt.s32.totalorder %s19008_s25, %s18515_s2 }
  0x38   : > { %p18512_p10 = pnand %p18510_p9, %p18496_p0  ;;  %p18518_p3 = scmp.lt.s32.totalorder %s18516_s18, %s18509_s10 }
  0x3a   : > { %p18513_p13 = pneg %p18512_p10  ;;  %p18519_p4 = por %p18518_p3, %p18517_p1 }
  0x3c   : > { %p18520_p5 = pnand %p18519_p4, %p18513_p13 }
  0x3e   : > { %18523 = shalt.err (!%p18520_p5)
}
  0x3f   : > { %17008 = dma.hbm_to_vmem [thread:$0]  (!%p18995_p11), %s19006_s27, 112, %s19008_s25, %s19010_s30  }
  0x40   : > { %s19039_s26 = sand.u32 1, %s18820_s15   ;;  %s16970_s28 = smul.u32 57344, %s18840_s20 }
  0x41   : > { %s16969_s22 = smul.u32 3584, %s19039_s26  ;;  %s21747_s3 = sld [smem:[#allocation24_spill]] }
  0x42   : > { %s21720_s27 = sshll.u32 %s18840_s20, 7  ;;  %p19056_p0 = pneg %p18999_p12 }
  0x43   : > { %s422_s29 = scalar_lea.vmem [#allocation7], %s16969_s22 }
  0x44   : > { %s429_s2 = sshll.u32 %s422_s29, 4  ;;  %s19049_s2 = int_to_ptr.vmem [resolvable:$true] %s429_s2 }
  0x45   : > { %s21748_s18 = scalar_select %p19056_p0, 1, 0 }
  0x47   : > { %s19046_s10 = scalar_lea.hbm %s21747_s3, %s16970_s28  ;;  %s18529_s24 = scalar_lea.hbm %s21747_s3, 458752 }
  0x48   : > { %s18524_s25 = scalar_lea.hbm %s19046_s10, 57344  ;;  %p18530_p7 = scmp.lt.u32.totalorder %s19046_s10, %s21747_s3 }
  0x49   : > { %p18525_p11 = scmp.ne.s32.totalorder %s19046_s10, %s18524_s25  ;;  %p18531_p8 = scmp.lt.u32.totalorder %s18529_s24, %s18524_s25 }
  0x4a   : > { %p18533_p10 = scmp.lt.u32.totalorder %s18524_s25, %s19046_s10 }
  0x4b   : > { %p18527_p2 = pnand %p19056_p0, %p18525_p11  ;;  %p18532_p9 = por %p18531_p8, %p18530_p7 }
  0x4d   : > { %p18528_p6 = pneg %p18527_p2  ;;  %p18534_p13 = por %p18533_p10, %p18532_p9 }
  0x4f   : > { %p18535_p1 = pnand %p18534_p13, %p18528_p6 }
  0x51   : > { %18538 = shalt.err (!%p18535_p1)
}
  0x52   : > { %s18539_s12 = scalar_lea.vmem %s19049_s2, 57344  ;;  %s18847_s28 = smov [#allocation7]  }
  0x53   : > { %p18540_p3 = scmp.ne.s32.totalorder %s19049_s2, %s18539_s12  ;;  %s18544_s23 = sshll.u32 %s18847_s28, 4  ;;  %s18545_s23 = int_to_ptr.vmem [resolvable:$false] %s18544_s23 }
  0x54   : > { %s18546_s22 = scalar_lea.vmem %s18545_s23, 114688  ;;  %p18547_p11 = scmp.lt.s32.totalorder %s19049_s2, %s18545_s23 }
  0x55   : > { %p18542_p4 = pnand %p18540_p3, %p19056_p0  ;;  %p18548_p2 = scmp.lt.s32.totalorder %s18546_s22, %s18539_s12 }
  0x57   : > { %p18543_p5 = pneg %p18542_p4  ;;  %p18549_p7 = por %p18548_p2, %p18547_p11 }
  0x59   : > { %p18550_p8 = pnand %p18549_p7, %p18543_p5 }
  0x5b   : > { %18553 = shalt.err (!%p18550_p8)
}
  0x5c   : > { %s21721_s25 = smov 512   ;;  %s18849_s24 = smov 32  }
  0x5d   : > { %17011 = dma.hbm_to_vmem [thread:$0]  (!%p18999_p12), %s19046_s10, 57344, %s19049_s2, %s19010_s30, %s21721_s25, %s21721_s25, %s18849_s24  }
  0x5e   : > { %s21749_s4 = sld [smem:[#allocation25_spill]]  ;;  %s21750_s23 = sshll.u32 %s19039_s26, 3 }
  0x5f   : > { %s443_s22 = scalar_lea.vmem [#allocation8], %s21750_s23  ;;  %s14937_s3 = sshll.u32 %s19039_s26, 12 }
  0x60   : > { %s451_s0 = sshll.u32 %s443_s22, 4  ;;  %s452_s0 = int_to_ptr.vmem [resolvable:$true] %s451_s0 }
  0x64   : > { %s19088_s28 = scalar_lea.hbm %s21749_s4, %s21720_s27  ;;  %s18559_s12 = scalar_lea.hbm %s21749_s4, 1024 }
  0x65   : > { %s18554_s9 = scalar_lea.hbm %s19088_s28, 128  ;;  %p18560_p13 = scmp.lt.u32.totalorder %s19088_s28, %s21749_s4 }
  0x66   : > { %p18555_p6 = scmp.ne.s32.totalorder %s19088_s28, %s18554_s9  ;;  %p18561_p1 = scmp.lt.u32.totalorder %s18559_s12, %s18554_s9 }
  0x67   : > { %p18563_p4 = scmp.lt.u32.totalorder %s18554_s9, %s19088_s28 }
  0x68   : > { %p18557_p9 = pnand %p18555_p6, %p19056_p0  ;;  %p18562_p3 = por %p18561_p1, %p18560_p13 }
  0x6a   : > { %p18558_p10 = pneg %p18557_p9  ;;  %p18564_p5 = por %p18563_p4, %p18562_p3 }
  0x6c   : > { %p18565_p11 = pnand %p18564_p5, %p18558_p10 }
  0x6e   : > { %18568 = shalt.err (!%p18565_p11)
}
  0x6f   : > { %s18569_s23 = scalar_lea.vmem %s452_s0, 128  ;;  %s18850_s22 = smov [#allocation8]  }
  0x70   : > { %p18570_p2 = scmp.ne.s32.totalorder %s452_s0, %s18569_s23  ;;  %s18574_s25 = sshll.u32 %s18850_s22, 4  ;;  %s18575_s25 = int_to_ptr.vmem [resolvable:$false] %s18574_s25 }
  0x71   : > { %s18576_s10 = scalar_lea.vmem %s18575_s25, 256  ;;  %p18577_p6 = scmp.lt.s32.totalorder %s452_s0, %s18575_s25 }
  0x72   : > { %p18572_p7 = pnand %p18570_p2, %p19056_p0  ;;  %p18578_p9 = scmp.lt.s32.totalorder %s18576_s10, %s18569_s23 }
  0x74   : > { %p18573_p8 = pneg %p18572_p7  ;;  %p18579_p12 = por %p18578_p9, %p18577_p6 }
  0x76   : > { %p18580_p1 = pnand %p18579_p12, %p18573_p8 }
  0x78   : > { %18583 = shalt.err (!%p18580_p1)
}
  0x79   : > { %p21751_p13 = scmp.ne.s32.totalorder %s21745_s11, 0  ;;  %s16813_s9 = sshll.u32 %s18840_s20, 16 }
  0x7a   : > { %s21752_s5 = sld [smem:[#allocation26_spill]]  ;;  %s462_s25 = scalar_lea.vmem [#allocation9], %s14937_s3 }
  0x7b   : > { %17014 = dma.hbm_to_vmem [thread:$0]  (!%p21751_p13), %s19088_s28, 128, %s452_s0, %s19010_s30  }
  0x7c   : > { %s469_s29 = sshll.u32 %s462_s25, 4  ;;  %s19119_s29 = int_to_ptr.vmem [resolvable:$true] %s469_s29 }
  0x80   : > { %s19115_s12 = scalar_lea.hbm %s21752_s5, %s16813_s9  ;;  %s18589_s22 = scalar_lea.hbm %s21752_s5, 524288 }
  0x81   : > { %s18584_s23 = scalar_lea.hbm %s19115_s12, 65536  ;;  %p18590_p4 = scmp.lt.u32.totalorder %s19115_s12, %s21752_s5 }
  0x82   : > { %p18585_p12 = scmp.ne.s32.totalorder %s19115_s12, %s18584_s23  ;;  %p18591_p5 = scmp.lt.u32.totalorder %s18589_s22, %s18584_s23 }
  0x83   : > { %p18593_p2 = scmp.lt.u32.totalorder %s18584_s23, %s19115_s12 }
  0x84   : > { %p18587_p10 = pnand %p18585_p12, %p19056_p0  ;;  %p18592_p11 = por %p18591_p5, %p18590_p4 }
  0x86   : > { %p18588_p3 = pneg %p18587_p10  ;;  %p18594_p7 = por %p18593_p2, %p18592_p11 }
  0x88   : > { %p18595_p8 = pnand %p18594_p7, %p18588_p3 }
  0x8a   : > { %18598 = shalt.err (!%p18595_p8)
}
  0x8b   : > { %s18599_s3 = scalar_lea.vmem %s19119_s29, 65536  ;;  %s18851_s27 = smov [#allocation9]  }
  0x8c   : > { %p18600_p6 = scmp.ne.s32.totalorder %s19119_s29, %s18599_s3  ;;  %s18604_s2 = sshll.u32 %s18851_s27, 4  ;;  %s18605_s2 = int_to_ptr.vmem [resolvable:$false] %s18604_s2 }
  0x8d   : > { %s18606_s25 = scalar_lea.vmem %s18605_s2, 131072  ;;  %p18607_p12 = scmp.lt.s32.totalorder %s19119_s29, %s18605_s2 }
  0x8e   : > { %p18602_p9 = pnand %p18600_p6, %p19056_p0  ;;  %p18608_p10 = scmp.lt.s32.totalorder %s18606_s25, %s18599_s3 }
  0x90   : > { %p18603_p1 = pneg %p18602_p9  ;;  %p18609_p4 = por %p18608_p10, %p18607_p12 }
  0x92   : > { %p18610_p5 = pnand %p18609_p4, %p18603_p1 }
  0x94   : > { %18613 = shalt.err (!%p18610_p5)
}
  0x95   : > { %s21753_s23 = smov 512   ;;  %s21754_s0 = sshll.u32 %s18840_s20, 7 }
  0x96   : > { %17017 = dma.hbm_to_vmem [thread:$0]  (!%p21751_p13), %s19115_s12, 65536, %s19119_s29, %s19010_s30, %s21753_s23, %s21753_s23, %s18849_s24  }
  0x97   : > { %s19151_s10 = scalar_lea.hbm %s21711_s6, %s21754_s0  ;;  %s21755_s9 = sshll.u32 %s19039_s26, 3 }
  0x98   : > { %s483_s3 = scalar_lea.vmem [#allocation10], %s21755_s9  ;;  %s16971_s2 = smul.u32 7168, %s19039_s26 }
  0x99   : > { %s491_s27 = sshll.u32 %s483_s3, 4  ;;  %s18614_s25 = scalar_lea.hbm %s19151_s10, 128  ;;  %s492_s27 = int_to_ptr.vmem [resolvable:$true] %s491_s27 }
  0x9a   : > { %p18615_p3 = scmp.ne.s32.totalorder %s19151_s10, %s18614_s25  ;;  %s18619_s29 = scalar_lea.hbm %s21711_s6, 1024 }
  0x9b   : > { %p18620_p7 = scmp.lt.u32.totalorder %s19151_s10, %s21711_s6  ;;  %p18621_p8 = scmp.lt.u32.totalorder %s18619_s29, %s18614_s25 }
  0x9c   : > { %p18617_p11 = pnand %p18615_p3, %p19056_p0  ;;  %p18623_p9 = scmp.lt.u32.totalorder %s18614_s25, %s19151_s10 }
  0x9d   : > { %p18622_p6 = por %p18621_p8, %p18620_p7 }
  0x9e   : > { %p18618_p2 = pneg %p18617_p11 }
  0x9f   : > { %p18624_p1 = por %p18623_p9, %p18622_p6 }
  0xa1   : > { %p18625_p12 = pnand %p18624_p1, %p18618_p2 }
  0xa3   : > { %18628 = shalt.err (!%p18625_p12)
}
  0xa4   : > { %s18629_s28 = scalar_lea.vmem %s492_s27, 128  ;;  %s18852_s22 = smov [#allocation10]  }
  0xa5   : > { %p18630_p10 = scmp.ne.s32.totalorder %s492_s27, %s18629_s28  ;;  %s18634_s9 = sshll.u32 %s18852_s22, 4  ;;  %s18635_s9 = int_to_ptr.vmem [resolvable:$false] %s18634_s9 }
  0xa6   : > { %s18636_s3 = scalar_lea.vmem %s18635_s9, 256  ;;  %p18637_p3 = scmp.lt.s32.totalorder %s492_s27, %s18635_s9 }
  0xa7   : > { %p18632_p4 = pnand %p18630_p10, %p19056_p0  ;;  %p18638_p11 = scmp.lt.s32.totalorder %s18636_s3, %s18629_s28 }
  0xa9   : > { %p18633_p5 = pneg %p18632_p4  ;;  %p18639_p13 = por %p18638_p11, %p18637_p3 }
  0xab   : > { %p18640_p7 = pnand %p18639_p13, %p18633_p5 }
  0xad   : > { %18643 = shalt.err (!%p18640_p7)
}
  0xae   : > { %p21756_p8 = scmp.ne.s32.totalorder %s21745_s11, 0  ;;  %s16972_s25 = smul.u32 114688, %s18840_s20 }
  0xaf   : > { %s502_s24 = scalar_lea.vmem [#allocation11], %s16971_s2  ;;  %s18649_s2 = scalar_lea.hbm %s21712_s7, 917504 }
  0xb0   : > { %17020 = dma.hbm_to_vmem [thread:$0]  (!%p21756_p8), %s19151_s10, 128, %s492_s27, %s19010_s30  }
  0xb1   : > { %s509_s12 = sshll.u32 %s502_s24, 4  ;;  %s19178_s0 = scalar_lea.hbm %s21712_s7, %s16972_s25  ;;  %s19180_s12 = int_to_ptr.vmem [resolvable:$true] %s509_s12 }
  0xb2   : > { %s18644_s28 = scalar_lea.hbm %s19178_s0, 114688  ;;  %p18650_p9 = scmp.lt.u32.totalorder %s19178_s0, %s21712_s7 }
  0xb3   : > { %p18645_p13 = scmp.ne.s32.totalorder %s19178_s0, %s18644_s28  ;;  %p18651_p1 = scmp.lt.u32.totalorder %s18649_s2, %s18644_s28 }
  0xb4   : > { %p18653_p10 = scmp.lt.u32.totalorder %s18644_s28, %s19178_s0 }
  0xb5   : > { %p18647_p2 = pnand %p18645_p13, %p19056_p0  ;;  %p18652_p12 = por %p18651_p1, %p18650_p9 }
  0xb7   : > { %p18648_p6 = pneg %p18647_p2  ;;  %p18654_p4 = por %p18653_p10, %p18652_p12 }
  0xb9   : > { %p18655_p5 = pnand %p18654_p4, %p18648_p6 }
  0xbb   : > { %18658 = shalt.err (!%p18655_p5)
}
  0xbc   : > { %s18659_s3 = scalar_lea.vmem %s19180_s12, 114688  ;;  %s18853_s25 = smov [#allocation11]  }
  0xbd   : > { %p18660_p3 = scmp.ne.s32.totalorder %s19180_s12, %s18659_s3  ;;  %s18664_s24 = sshll.u32 %s18853_s25, 4  ;;  %s18665_s24 = int_to_ptr.vmem [resolvable:$false] %s18664_s24 }
  0xbe   : > { %s18666_s29 = scalar_lea.vmem %s18665_s24, 229376  ;;  %p18667_p13 = scmp.lt.s32.totalorder %s19180_s12, %s18665_s24 }
  0xbf   : > { %p18662_p11 = pnand %p18660_p3, %p19056_p0  ;;  %p18668_p2 = scmp.lt.s32.totalorder %s18666_s29, %s18659_s3 }
  0xc1   : > { %p18663_p7 = pneg %p18662_p11  ;;  %p18669_p9 = por %p18668_p2, %p18667_p13 }
  0xc3   : > { %p18670_p1 = pnand %p18669_p9, %p18663_p7 }
  0xc5   : > { %18673 = shalt.err (!%p18670_p1)
}
  0xc6   : > { %s18854_s23 = smov 896   ;;  %s18855_s28 = smov 56  }
  0xc7   : > { %17023 = dma.hbm_to_vmem [thread:$0]  (!%p21756_p8), %s19178_s0, 114688, %s19180_s12, %s19010_s30, %s18854_s23, %s18854_s23, %s18855_s28  }
  0xc8   : > { %s19205_s10 = sadd.s32 4294967295, %s18844_s21   ;;  %p82_p6 = scmp.ne.s32.totalorder %s18828_s17, %s18824_s16 }
  0xc9   : > { %p21725_p12 = scmp.eq.s32.totalorder %s19205_s10, 0  ;;  %p160_p10 = scmp.ne.s32.totalorder %s18816_s14, %s18812_s13 }
  0xca   : > { %p14925_p4 = scmp.ge.s32.totalorder %s18844_s21, 1  ;;  %p353_p3 = scmp.lt.s32.totalorder %s18844_s21, 9 }
  0xcb   : > { %p19215_p5 = por %p21725_p12, %p82_p6  ;;  %p19222_p11 = por %p160_p10, %p21725_p12 }
  0xcc   : > { %p19226_p7 = pnand %p14925_p4, %p353_p3  ;;  %s18856_s16 = smov [#allocation5]  }
  0xcd   : > { %s21757_s27 = scalar_select %p19215_p5, 1, 0 }
  0xce   : > { %s21758_s2 = scalar_select %p19222_p11, 1, 0 }
  0xcf   : > { %s21759_s12 = scalar_select %p19226_p7, 1, 0 }
  0xd0   : > { %s369_s0 = sshll.u32 %s18856_s16, 4  ;;  %s16973_s13 = smul.u32 14, %s19039_s26  ;;  %s370_s0 = int_to_ptr.vmem [resolvable:$true] %s369_s0 }
  0xd1   : > { %p17001_p13 = pneg %p19226_p7  ;;  %s16974_s22 = smul.u32 224, %s18840_s20 }
  0xd2   : > { %s523_s3 = scalar_lea.vmem [#allocation12], %s16973_s13  ;;  %s18674_s16 = scalar_lea.hbm %s21706_s1, 896 }
  0xd3   : > { %p19236_p2 = pnand %p17001_p13, %p21725_p12  ;;  %s531_s25 = sshll.u32 %s523_s3, 4  ;;  %s19245_s25 = int_to_ptr.vmem [resolvable:$true] %s531_s25 }
  0xd4   : > { %s19243_s23 = scalar_lea.hbm %s21713_s8, %s16974_s22  ;;  %p18675_p9 = scmp.ne.s32.totalorder %s21706_s1, %s18674_s16 }
  0xd5   : > { %p18676_p1 = pneg %p19236_p2  ;;  %p18681_p4 = scmp.lt.u32.totalorder %s18674_s16, %s21706_s1 }
  0xd7   : > { %p18677_p6 = pnand %p18676_p1, %p18675_p9 }
  0xd9   : > { %p18678_p10 = pneg %p18677_p6 }
  0xdb   : > { %p18683_p3 = pnand %p18681_p4, %p18678_p10 }
  0xdd   : > { %18686 = shalt.err (!%p18683_p3)
}
  0xde   : > { %s18687_s22 = scalar_lea.vmem %s370_s0, 896  ;;  %p18695_p5 = scmp.lt.s32.totalorder %s370_s0, %s370_s0 }
  0xdf   : > { %p18688_p13 = scmp.ne.s32.totalorder %s370_s0, %s18687_s22  ;;  %p18696_p7 = scmp.lt.s32.totalorder %s18687_s22, %s18687_s22 }
  0xe1   : > { %p18690_p12 = pnand %p18688_p13, %p18676_p1  ;;  %p18697_p8 = por %p18696_p7, %p18695_p5 }
  0xe3   : > { %p18691_p11 = pneg %p18690_p12 }
  0xe5   : > { %p18698_p0 = pnand %p18697_p8, %p18691_p11 }
  0xe7   : > { %18701 = shalt.err (!%p18698_p0)
}
  0xe8   : > { %17004 = dma.hbm_to_vmem [thread:$0]  (!%p19236_p2), %s21706_s1, 896, %s370_s0, [#allocation6]  }
  0xe9   : > { %s18702_s24 = scalar_lea.hbm %s19243_s23, 224  ;;  %p21761_p1 = scmp.ne.s32.totalorder %s21748_s18, 0 }
  0xea   : > { %p18703_p9 = scmp.ne.s32.totalorder %s19243_s23, %s18702_s24  ;;  %s18707_s28 = scalar_lea.hbm %s21713_s8, 1792 }
  0xeb   : > { %p18708_p0 = scmp.lt.u32.totalorder %s19243_s23, %s21713_s8  ;;  %p18709_p8 = scmp.lt.u32.totalorder %s18707_s28, %s18702_s24 }
  0xec   : > { %p18705_p12 = pnand %p18703_p9, %p21761_p1  ;;  %p18711_p11 = scmp.lt.u32.totalorder %s18702_s24, %s19243_s23 }
  0xed   : > { %p18710_p5 = por %p18709_p8, %p18708_p0 }
  0xee   : > { %p18706_p6 = pneg %p18705_p12 }
  0xef   : > { %p18712_p7 = por %p18711_p11, %p18710_p5 }
  0xf1   : > { %p18713_p10 = pnand %p18712_p7, %p18706_p6 }
  0xf3   : > { %18716 = shalt.err (!%p18713_p10)
}
  0xf4   : > { %s18717_s0 = scalar_lea.vmem %s19245_s25, 224  ;;  %s18857_s13 = smov [#allocation12]  }
  0xf5   : > { %p18718_p2 = scmp.ne.s32.totalorder %s19245_s25, %s18717_s0  ;;  %s18722_s3 = sshll.u32 %s18857_s13, 4  ;;  %s18723_s3 = int_to_ptr.vmem [resolvable:$false] %s18722_s3 }
  0xf6   : > { %s18724_s22 = scalar_lea.vmem %s18723_s3, 448  ;;  %p18725_p13 = scmp.lt.s32.totalorder %s19245_s25, %s18723_s3 }
  0xf7   : > { %p18720_p4 = pnand %p18718_p2, %p21761_p1  ;;  %p18726_p9 = scmp.lt.s32.totalorder %s18724_s22, %s18717_s0 }
  0xf9   : > { %p18721_p3 = pneg %p18720_p4  ;;  %p18727_p12 = por %p18726_p9, %p18725_p13 }
  0xfb   : > { %p18728_p0 = pnand %p18727_p12, %p18721_p3 }
  0xfd   : > { %18731 = shalt.err (!%p18728_p0)
}
  0xfe   : > { %p21762_p6 = scmp.ne.s32.totalorder %s21745_s11, 0  ;;  %p21763_p8 = scmp.ne.s32.totalorder %s21759_s12, 0 }
  0xff   : > { %s542_s18 = sand.u32 (!%p21763_p8), 1, %s19205_s10   ;;  %s544_s4 = sand.u32 (!%p21763_p8), 1, %s18828_s17  }
 0x100   : > { %17026 = dma.hbm_to_vmem [thread:$0]  (!%p21762_p6), %s19243_s23, 224, %s19245_s25, %s19010_s30  }
 0x101   : > { %540 = sbr.rel (%p21763_p8) target bundleno = 2841 (0xb19), region = 56  ;;  %s543_s24 = scalar_lea.sflag (!%p21763_p8), [#allocation3], %s542_s18 }
 0x102   : > { %s19289_s5 = smul.u32 (!%p21763_p8), 7, %s544_s4  ;;  %p21764_p1 = scmp.ne.s32.totalorder (!%p21763_p8), %s21757_s27, 0 }
 0x104   : > { %s546_s29 = scalar_lea.vmem (!%p21763_p8), [#allocation2], %s19289_s5 }
 0x108   : > { %18795 = dma.done.wait (%p21764_p1), %s543_s24, 112  }
 0x109   : > { %18797 = vsyncadd (%p21764_p1), %s543_s24, 4294967184  ;;  %p21765_p5 = scmp.eq.s32.totalorder %s19205_s10, 0 }
 0x10b   : > { %18799 = dma.done.wait (%p21765_p5), [#allocation6], 896   ;;  %p21766_p11 = pmov %p21765_p5 }
 0x10c   : > { %s557_s11 = sand.u32 1, %s18816_s14   ;;  %p21767_p7 = scmp.ne.s32.totalorder %s21758_s2, 0 }
 0x10d   : > { %18801 = vsyncadd (%p21766_p11), [#allocation6], 4294966400  ;;  %s16976_s30 = smul.u32 3584, %s557_s11 }
 0x10f   : > { %s19301_s12 = scalar_lea.vmem [#allocation7], %s16976_s30 }
 0x110   : > { %18803 = dma.done.wait (%p21767_p7), %s543_s24, 238048  }
 0x111   : > { %18805 = vsyncadd (%p21767_p7), %s543_s24, 4294729248  ;;  %s14947_s25 = sshll.u32 %s557_s11, 3  ;;  %s14948_s27 = sshll.u32 %s557_s11, 12 }
 0x112   : > { %s16977_s23 = smul.u32 7168, %s557_s11  ;;  %s19307_s28 = scalar_lea.vmem [#allocation8], %s14947_s25 }
 0x113   : > { %s16978_s26 = smul.u32 14, %s557_s11  ;;  %s19309_s16 = scalar_lea.vmem [#allocation9], %s14948_s27 }
 0x114   : > { %s19311_s9 = scalar_lea.vmem [#allocation10], %s14947_s25  ;;  %s19313_s0 = scalar_lea.vmem [#allocation11], %s16977_s23 }
 0x115   : > { %s19315_s13 = scalar_lea.vmem [#allocation12], %s16978_s26  ;;  %p14950_p10 = scmp.ne.s32.totalorder %s18836_s19, 0 }
 0x116   : > { %v699_v0 = vld [vmem:[#allocation5] sm:$0xff] (!%p14950_p10)  ;;  %v700_v1 = vld [vmem:[#allocation5 + $0x8] sm:$0xff] (!%p14950_p10)  ;;  %v701_v2 = vld [vmem:[#allocation5 + $0x10] sm:$0xff] (!%p14950_p10)  ;;  %vm714_vm0 = vcmask (!%p14950_p10), 7168   ;;  %s21768_s22 = sld [smem:[#allocation23_spill]] (!%p14950_p10)  ;;  %s21769_s4 = sld [smem:[#allocation28_spill]] (!%p14950_p10) }
 0x117   : > { %698 = sbr.rel (%p14950_p10) target bundleno = 286 (0x11e), region = 92  ;;  %706 = vst [vmem:[#allocation13] sm:$0xff] (!%p14950_p10), %v699_v0  ;;  %707 = vst [vmem:[#allocation13 + $0x8] sm:$0xff] (!%p14950_p10), %v700_v1  ;;  %v702_v3 = vld [vmem:[#allocation5 + $0x18] sm:$0xff] (!%p14950_p10)  ;;  %v703_v4 = vld [vmem:[#allocation5 + $0x20] sm:$0xff] (!%p14950_p10) }
 0x118   : > { %708 = vst [vmem:[#allocation13 + $0x10] sm:$0xff] (!%p14950_p10), %v701_v2  ;;  %v704_v5 = vld [vmem:[#allocation5 + $0x28] sm:$0xff] (!%p14950_p10)  ;;  %709 = vst [vmem:[#allocation13 + $0x18] sm:$0xff] (!%p14950_p10), %v702_v3  ;;  %v705_v6 = vld [vmem:[#allocation5 + $0x30] sm:$0xff] (!%p14950_p10) }
 0x119   : > { %710 = vst [vmem:[#allocation13 + $0x20] sm:$0xff] (!%p14950_p10), %v703_v4  ;;  %711 = vst [vmem:[#allocation13 + $0x28] sm:$0xff] (!%p14950_p10), %v704_v5 }
 0x11a   : > { %712 = vst [vmem:[#allocation13 + $0x30] sm:$0xff] (!%p14950_p10), %v705_v6 }
 0x11c   : > { %v713_v7 = vld [vmem:[%s21768_s22] sm:$0xff] (!%p14950_p10) }
 0x11d   : > { %715 = vst.msk [vmem:[%s21769_s4] sm:$0xff] (!%p14950_p10), %vm714_vm0, %v713_v7 }
 0x11e PF: > { %v775_v8 = vld [vmem:[%s19301_s12] sm:$0xff]  ;;  %v726_v40 = vlaneseq  ;;  %p17030_p2 = scmp.eq.s32.totalorder %s19205_s10, 7  ;;  %s18859_s5 = smov [#allocation13]  }
 0x11f   : > { %v779_v9 = vld [vmem:[%s19301_s12 + $0x20] sm:$0xff]  ;;  %s14686_s24 = sshll.u32 %s18859_s5, 4  ;;  %s14687_s24 = int_to_ptr.vmem [resolvable:$true] %s14686_s24 }
 0x120   : > { %v1031_v10 = vld [vmem:[%s19301_s12 + $0x800] sm:$0xff]  ;;  %v14952_v11 = vcombine.high %v775_v8, %v779_v9  ;;  %v14951_v13 = vcombine.low %v775_v8, %v779_v9  ;;  %v19346_v49 = vshrl.u32 %v726_v40, 7  ;;  %p18739_p9 = scmp.lt.s32.totalorder %s14687_s24, %s14687_s24 }
 0x121   : > { %v1035_v12 = vld [vmem:[%s19301_s12 + $0x820] sm:$0xff] }
 0x122   : > { %v783_v14 = vld [vmem:[%s19301_s12 + $0x40] sm:$0xff]  ;;  %v15208_v16 = vcombine.high %v1031_v10, %v1035_v12  ;;  %v15207_v17 = vcombine.low %v1031_v10, %v1035_v12  ;;  %3505 = vmatprep.subr.bf16.mxu1 %v14952_v11  ;;  %v19353_v58 = vsub.s32 1, %v19346_v49  ;;  %v19356_v59 = vsub.s32 5, %v19346_v49 }
 0x123   : > { %v787_v15 = vld [vmem:[%s19301_s12 + $0x60] sm:$0xff]  ;;  %3506 = vmatpush1.bf16.msra.mxu1 %v14951_v13 }
 0x124   : > { %v14960_v18 = vcombine.high %v783_v14, %v787_v15  ;;  %v1039_v19 = vld [vmem:[%s19301_s12 + $0x840] sm:$0xff]  ;;  %3587 = vmatprep.subr.bf16.mxu0 %v15208_v16  ;;  %v14959_v26 = vcombine.low %v783_v14, %v787_v15 }
 0x125   : > { %v1043_v20 = vld [vmem:[%s19301_s12 + $0x860] sm:$0xff]  ;;  %3588 = vmatpush1.bf16.msra.mxu0 %v15207_v17 }
 0x126   : > { %v791_v21 = vld [vmem:[%s19301_s12 + $0x80] sm:$0xff]  ;;  %v15216_v22 = vcombine.high %v1039_v19, %v1043_v20  ;;  %3507 = vmatprep.subr.bf16.mxu1 %v14960_v18  ;;  %v15215_v27 = vcombine.low %v1039_v19, %v1043_v20 }
 0x127   : > { %v795_v23 = vld [vmem:[%s19301_s12 + $0xa0] sm:$0xff]  ;;  %3508 = vmatpush1.bf16.msra.mxu1 %v14959_v26 }
 0x128   : > { %v1047_v24 = vld [vmem:[%s19301_s12 + $0x880] sm:$0xff]  ;;  %v14968_v28 = vcombine.high %v791_v21, %v795_v23  ;;  %3589 = vmatprep.subr.bf16.mxu0 %v15216_v22  ;;  %v14967_v34 = vcombine.low %v791_v21, %v795_v23 }
 0x129   : > { %v1051_v25 = vld [vmem:[%s19301_s12 + $0x8a0] sm:$0xff]  ;;  %3590 = vmatpush1.bf16.msra.mxu0 %v15215_v27 }
 0x12a   : > { %v15224_v29 = vcombine.high %v1047_v24, %v1051_v25  ;;  %v799_v30 = vld [vmem:[%s19301_s12 + $0xc0] sm:$0xff]  ;;  %3509 = vmatprep.subr.bf16.mxu1 %v14968_v28  ;;  %v15223_v35 = vcombine.low %v1047_v24, %v1051_v25 }
 0x12b   : > { %v803_v31 = vld [vmem:[%s19301_s12 + $0xe0] sm:$0xff]  ;;  %3510 = vmatpush1.bf16.msra.mxu1 %v14967_v34 }
 0x12c   : > { %v1055_v32 = vld [vmem:[%s19301_s12 + $0x8c0] sm:$0xff]  ;;  %v14976_v36 = vcombine.high %v799_v30, %v803_v31  ;;  %3591 = vmatprep.subr.bf16.mxu0 %v15224_v29  ;;  %v14975_v43 = vcombine.low %v799_v30, %v803_v31 }
 0x12d   : > { %v1059_v33 = vld [vmem:[%s19301_s12 + $0x8e0] sm:$0xff]  ;;  %3592 = vmatpush1.bf16.msra.mxu0 %v15223_v35 }
 0x12e   : > { %v15232_v37 = vcombine.high %v1055_v32, %v1059_v33  ;;  %v807_v38 = vld [vmem:[%s19301_s12 + $0x100] sm:$0xff]  ;;  %3511 = vmatprep.subr.bf16.mxu1 %v14976_v36  ;;  %v15231_v44 = vcombine.low %v1055_v32, %v1059_v33 }
 0x12f   : > { %v811_v39 = vld [vmem:[%s19301_s12 + $0x120] sm:$0xff]  ;;  %3512 = vmatpush1.bf16.msra.mxu1 %v14975_v43 }
 0x130   : > { %v1063_v41 = vld [vmem:[%s19301_s12 + $0x900] sm:$0xff]  ;;  %v14984_v45 = vcombine.high %v807_v38, %v811_v39  ;;  %3593 = vmatprep.subr.bf16.mxu0 %v15232_v37  ;;  %v14983_v52 = vcombine.low %v807_v38, %v811_v39 }
 0x131   : > { %v1067_v42 = vld [vmem:[%s19301_s12 + $0x920] sm:$0xff]  ;;  %3594 = vmatpush1.bf16.msra.mxu0 %v15231_v44 }
 0x132   : > { %v15240_v46 = vcombine.high %v1063_v41, %v1067_v42  ;;  %v815_v47 = vld [vmem:[%s19301_s12 + $0x140] sm:$0xff]  ;;  %3513 = vmatprep.subr.bf16.mxu1 %v14984_v45  ;;  %v15239_v53 = vcombine.low %v1063_v41, %v1067_v42 }
 0x133   : > { %v819_v48 = vld [vmem:[%s19301_s12 + $0x160] sm:$0xff]  ;;  %3514 = vmatpush1.bf16.msra.mxu1 %v14983_v52 }
 0x134   : > { %v1071_v50 = vld [vmem:[%s19301_s12 + $0x940] sm:$0xff]  ;;  %v14992_v54 = vcombine.high %v815_v47, %v819_v48  ;;  %3595 = vmatprep.subr.bf16.mxu0 %v15240_v46  ;;  %v14991_v62 = vcombine.low %v815_v47, %v819_v48 }
 0x135   : > { %v1075_v51 = vld [vmem:[%s19301_s12 + $0x960] sm:$0xff]  ;;  %3596 = vmatpush1.bf16.msra.mxu0 %v15239_v53 }
 0x136   : > { %v15248_v55 = vcombine.high %v1071_v50, %v1075_v51  ;;  %v823_v56 = vld [vmem:[%s19301_s12 + $0x180] sm:$0xff]  ;;  %3515 = vmatprep.subr.bf16.mxu1 %v14992_v54  ;;  %v15247_v63 = vcombine.low %v1071_v50, %v1075_v51 }
 0x137   : > { %v827_v57 = vld [vmem:[%s19301_s12 + $0x1a0] sm:$0xff]  ;;  %3516 = vmatpush1.bf16.msra.mxu1 %v14991_v62 }
 0x138   : > { %v1079_v60 = vld [vmem:[%s19301_s12 + $0x980] sm:$0xff]  ;;  %v15000_v0 = vcombine.high %v823_v56, %v827_v57  ;;  %3597 = vmatprep.subr.bf16.mxu0 %v15248_v55  ;;  %v14999_v11 = vcombine.low %v823_v56, %v827_v57 }
 0x139   : > { %v1083_v61 = vld [vmem:[%s19301_s12 + $0x9a0] sm:$0xff]  ;;  %3598 = vmatpush1.bf16.msra.mxu0 %v15247_v63 }
 0x13a   : > { %v19362_v1 = vld [vmem:[%s546_s29] sm:$0xff]  ;;  %v15256_v3 = vcombine.high %v1079_v60, %v1083_v61  ;;  %3517 = vmatprep.subr.bf16.mxu1 %v15000_v0  ;;  %v15255_v14 = vcombine.low %v1079_v60, %v1083_v61 }
 0x13b   : > { %v719_v2 = vld [vmem:[#allocation13 + $0x8] sm:$0xff]  ;;  %v733_v6 = vrot.slane %v19362_v1, %v19353_v58  ;;  %v749_v8 = vrot.slane %v19362_v1, %v19356_v59  ;;  %3518 = vmatpush1.bf16.msra.mxu1 %v14999_v11  ;;  %v19415_v11 = vsub.s32 0, %v19346_v49 }
 0x13c   : > { %v831_v4 = vld [vmem:[%s19301_s12 + $0x1c0] sm:$0xff]  ;;  %3599 = vmatprep.subr.bf16.mxu0 %v15256_v3 }
 0x13d   : > { %v835_v5 = vld [vmem:[%s19301_s12 + $0x1e0] sm:$0xff]  ;;  %v19372_v12 = vmul.f32 %v733_v6, %v719_v2  ;;  %3600 = vmatpush1.bf16.msra.mxu0 %v15255_v14 }
 0x13e   : > { %v723_v7 = vld [vmem:[#allocation13 + $0x28] sm:$0xff]  ;;  %v15008_v15 = vcombine.high %v831_v4, %v835_v5  ;;  %v15007_v23 = vcombine.low %v831_v4, %v835_v5 }
 0x13f   : > { %v1087_v9 = vld [vmem:[%s19301_s12 + $0x9c0] sm:$0xff]  ;;  %v19374_v13 = vmul.f32 %v749_v8, %v723_v7  ;;  %v19380_v19 = vpack.c.bf16 %v19372_v12, %v19372_v12 }
 0x140   : > { %v1091_v10 = vld [vmem:[%s19301_s12 + $0x9e0] sm:$0xff]  ;;  %3519 = vmatprep.subr.bf16.mxu1 %v15008_v15  ;;  %v19418_v15 = vsub.s32 4, %v19346_v49 }
 0x141   : > { %v15264_v16 = vcombine.high %v1087_v9, %v1091_v10  ;;  %v839_v17 = vld [vmem:[%s19301_s12 + $0x200] sm:$0xff]  ;;  %v19384_v20 = vpack.c.bf16 %v19374_v13, %v19374_v13  ;;  %3537 = vmatprep.mubr.bf16.mxu1 %v19380_v19  ;;  %v15263_v24 = vcombine.low %v1087_v9, %v1091_v10  ;;  %3520 = vmatpush1.bf16.msra.mxu1 %v15007_v23 }
 0x142   : > { %v843_v18 = vld [vmem:[%s19301_s12 + $0x220] sm:$0xff] }
 0x143   : > { %v1095_v21 = vld [vmem:[%s19301_s12 + $0xa00] sm:$0xff]  ;;  %v15016_v25 = vcombine.high %v839_v17, %v843_v18  ;;  %3601 = vmatprep.subr.bf16.mxu0 %v15264_v16  ;;  %3619 = vmatprep.mubr.bf16.mxu0 %v19384_v20  ;;  %v15015_v31 = vcombine.low %v839_v17, %v843_v18 }
 0x144   : > { %v1099_v22 = vld [vmem:[%s19301_s12 + $0xa20] sm:$0xff]  ;;  %3602 = vmatpush1.bf16.msra.mxu0 %v15263_v24 }
 0x145   : > { %v15272_v26 = vcombine.high %v1095_v21, %v1099_v22  ;;  %v847_v27 = vld [vmem:[%s19301_s12 + $0x240] sm:$0xff]  ;;  %3521 = vmatprep.subr.bf16.mxu1 %v15016_v25  ;;  %v15271_v32 = vcombine.low %v1095_v21, %v1099_v22  ;;  %v729_v25 = vrot.slane %v19362_v1, %v19415_v11 }
 0x146   : > { %v851_v28 = vld [vmem:[%s19301_s12 + $0x260] sm:$0xff]  ;;  %3522 = vmatpush1.bf16.msra.mxu1 %v15015_v31 }
 0x147   : > { %v1103_v29 = vld [vmem:[%s19301_s12 + $0xa40] sm:$0xff]  ;;  %v15024_v33 = vcombine.high %v847_v27, %v851_v28  ;;  %3603 = vmatprep.subr.bf16.mxu0 %v15272_v26  ;;  %v15023_v39 = vcombine.low %v847_v27, %v851_v28  ;;  %v19427_v26 = vsub.s32 3, %v19346_v49 }
 0x148   : > { %v1107_v30 = vld [vmem:[%s19301_s12 + $0xa60] sm:$0xff]  ;;  %3604 = vmatpush1.bf16.msra.mxu0 %v15271_v32 }
 0x149   : > { %v15280_v34 = vcombine.high %v1103_v29, %v1107_v30  ;;  %v855_v35 = vld [vmem:[%s19301_s12 + $0x280] sm:$0xff]  ;;  %3523 = vmatprep.subr.bf16.mxu1 %v15024_v33  ;;  %v15279_v40 = vcombine.low %v1103_v29, %v1107_v30  ;;  %v745_v29 = vrot.slane %v19362_v1, %v19418_v15 }
 0x14a   : > { %v859_v36 = vld [vmem:[%s19301_s12 + $0x2a0] sm:$0xff]  ;;  %3524 = vmatpush1.bf16.msra.mxu1 %v15023_v39  ;;  %v741_v39 = vrot.slane %v19362_v1, %v19427_v26 }
 0x14b   : > { %v1111_v37 = vld [vmem:[%s19301_s12 + $0xa80] sm:$0xff]  ;;  %v15032_v41 = vcombine.high %v855_v35, %v859_v36  ;;  %3605 = vmatprep.subr.bf16.mxu0 %v15280_v34  ;;  %v15031_v47 = vcombine.low %v855_v35, %v859_v36 }
 0x14c   : > { %v1115_v38 = vld [vmem:[%s19301_s12 + $0xaa0] sm:$0xff]  ;;  %3606 = vmatpush1.bf16.msra.mxu0 %v15279_v40 }
 0x14d   : > { %v15288_v42 = vcombine.high %v1111_v37, %v1115_v38  ;;  %v863_v43 = vld [vmem:[%s19301_s12 + $0x2c0] sm:$0xff]  ;;  %3525 = vmatprep.subr.bf16.mxu1 %v15032_v41  ;;  %v15287_v48 = vcombine.low %v1111_v37, %v1115_v38 }
 0x14e   : > { %v867_v44 = vld [vmem:[%s19301_s12 + $0x2e0] sm:$0xff]  ;;  %3526 = vmatpush1.bf16.msra.mxu1 %v15031_v47 }
 0x14f   : > { %v1119_v45 = vld [vmem:[%s19301_s12 + $0xac0] sm:$0xff]  ;;  %v15040_v50 = vcombine.high %v863_v43, %v867_v44  ;;  %3607 = vmatprep.subr.bf16.mxu0 %v15288_v42  ;;  %v15039_v56 = vcombine.low %v863_v43, %v867_v44  ;;  %v721_v42 = vld [vmem:[#allocation13 + $0x18] sm:$0xff] }
 0x150   : > { %v1123_v46 = vld [vmem:[%s19301_s12 + $0xae0] sm:$0xff]  ;;  %3608 = vmatpush1.bf16.msra.mxu0 %v15287_v48 }
 0x151   : > { %v15296_v51 = vcombine.high %v1119_v45, %v1123_v46  ;;  %v871_v52 = vld [vmem:[%s19301_s12 + $0x300] sm:$0xff]  ;;  %3527 = vmatprep.subr.bf16.mxu1 %v15040_v50  ;;  %v15295_v57 = vcombine.low %v1119_v45, %v1123_v46 }
 0x152   : > { %v875_v53 = vld [vmem:[%s19301_s12 + $0x320] sm:$0xff]  ;;  %3528 = vmatpush1.bf16.msra.mxu1 %v15039_v56 }
 0x153   : > { %v1127_v54 = vld [vmem:[%s19301_s12 + $0xb00] sm:$0xff]  ;;  %v15048_v60 = vcombine.high %v871_v52, %v875_v53  ;;  %3609 = vmatprep.subr.bf16.mxu0 %v15296_v51  ;;  %v15047_v3 = vcombine.low %v871_v52, %v875_v53  ;;  %v19449_v52 = vmul.f32 %v741_v39, %v721_v42 }
 0x154   : > { %v1131_v55 = vld [vmem:[%s19301_s12 + $0xb20] sm:$0xff]  ;;  %3610 = vmatpush1.bf16.msra.mxu0 %v15295_v57 }
 0x155   : > { %v15304_v61 = vcombine.high %v1127_v54, %v1131_v55  ;;  %v879_v62 = vld [vmem:[%s19301_s12 + $0x340] sm:$0xff]  ;;  %3529 = vmatprep.subr.bf16.mxu1 %v15048_v60  ;;  %v15303_v4 = vcombine.low %v1127_v54, %v1131_v55 }
 0x156   : > { %v883_v63 = vld [vmem:[%s19301_s12 + $0x360] sm:$0xff]  ;;  %3530 = vmatpush1.bf16.msra.mxu1 %v15047_v3 }
 0x157   : > { %v1135_v0 = vld [vmem:[%s19301_s12 + $0xb40] sm:$0xff]  ;;  %v15056_v5 = vcombine.high %v879_v62, %v883_v63  ;;  %3611 = vmatprep.subr.bf16.mxu0 %v15304_v61  ;;  %v15055_v14 = vcombine.low %v879_v62, %v883_v63 }
 0x158   : > { %v1139_v2 = vld [vmem:[%s19301_s12 + $0xb60] sm:$0xff]  ;;  %3612 = vmatpush1.bf16.msra.mxu0 %v15303_v4 }
 0x159   : > { %v15312_v6 = vcombine.high %v1135_v0, %v1139_v2  ;;  %v887_v7 = vld [vmem:[%s19301_s12 + $0x380] sm:$0xff]  ;;  %3531 = vmatprep.subr.bf16.mxu1 %v15056_v5  ;;  %v15311_v16 = vcombine.low %v1135_v0, %v1139_v2  ;;  %v19462_v0 = vpack.c.bf16 %v19449_v52, %v19449_v52 }
 0x15a   : > { %v891_v8 = vld [vmem:[%s19301_s12 + $0x3a0] sm:$0xff]  ;;  %3532 = vmatpush1.bf16.msra.mxu1 %v15055_v14 }
 0x15b   : > { %v1143_v9 = vld [vmem:[%s19301_s12 + $0xb80] sm:$0xff]  ;;  %v15064_v17 = vcombine.high %v887_v7, %v891_v8  ;;  %3613 = vmatprep.subr.bf16.mxu0 %v15312_v6  ;;  %v15063_v27 = vcombine.low %v887_v7, %v891_v8 }
 0x15c   : > { %v1147_v10 = vld [vmem:[%s19301_s12 + $0xba0] sm:$0xff]  ;;  %3614 = vmatpush1.bf16.msra.mxu0 %v15311_v16 }
 0x15d   : > { %v15320_v18 = vcombine.high %v1143_v9, %v1147_v10  ;;  %v895_v21 = vld [vmem:[%s19301_s12 + $0x3c0] sm:$0xff]  ;;  %3533 = vmatprep.subr.bf16.mxu1 %v15064_v17  ;;  %v15319_v30 = vcombine.low %v1143_v9, %v1147_v10  ;;  %v18858_v10 = vmov 0  }
 0x15e   : > { %v899_v22 = vld [vmem:[%s19301_s12 + $0x3e0] sm:$0xff]  ;;  %3534 = vmatpush1.bf16.msra.mxu1 %v15063_v27 }
 0x15f   : > { %v1151_v23 = vld [vmem:[%s19301_s12 + $0xbc0] sm:$0xff]  ;;  %v15072_v31 = vcombine.high %v895_v21, %v899_v22  ;;  %3615 = vmatprep.subr.bf16.mxu0 %v15320_v18  ;;  %v15071_v40 = vcombine.low %v895_v21, %v899_v22 }
 0x160   : > { %v1155_v24 = vld [vmem:[%s19301_s12 + $0xbe0] sm:$0xff]  ;;  %3616 = vmatpush1.bf16.msra.mxu0 %v15319_v30 }
 0x161   : > { %v718_v28 = vld [vmem:[#allocation13] sm:$0xff]  ;;  %v15328_v33 = vcombine.high %v1151_v23, %v1155_v24  ;;  %3535 = vmatprep.subr.bf16.mxu1 %v15072_v31  ;;  %v15327_v43 = vcombine.low %v1151_v23, %v1155_v24 }
 0x162   : > { %v722_v32 = vld [vmem:[#allocation13 + $0x20] sm:$0xff]  ;;  %v19435_v38 = vmul.f32 %v729_v25, %v718_v28  ;;  %3536 = vmatpush1.bf16.msra.mxu1 %v15071_v40 }
 0x163   : > { %v903_v34 = vld [vmem:[%s19301_s12 + $0x400] sm:$0xff]  ;;  %v19439_v41 = vmul.f32 %v745_v29, %v722_v32  ;;  %3617 = vmatprep.subr.bf16.mxu0 %v15328_v33 }
 0x164   : > { %v907_v35 = vld [vmem:[%s19301_s12 + $0x420] sm:$0xff]  ;;  %v19445_v48 = vpack.c.bf16 %v19435_v38, %v19435_v38  ;;  %3618 = vmatpush1.bf16.msra.mxu0 %v15327_v43 }
 0x165   : > { %v1159_v36 = vld [vmem:[%s19301_s12 + $0xc00] sm:$0xff]  ;;  %v15080_v44 = vcombine.high %v903_v34, %v907_v35  ;;  %v15079_v53 = vcombine.low %v903_v34, %v907_v35  ;;  %v19453_v54 = vpack.c.bf16 %v19439_v41, %v19439_v41 }
 0x166   : > { %v1163_v37 = vld [vmem:[%s19301_s12 + $0xc20] sm:$0xff]  ;;  %3538 = vmatmul.mubr.bf16.vlgmr.msra.gmra.mrb[0].mxu1 %v19445_v48 }
 0x167   : > { %v15336_v45 = vcombine.high %v1159_v36, %v1163_v37  ;;  %v911_v46 = vld [vmem:[%s19301_s12 + $0x440] sm:$0xff]  ;;  %3546 = vmatprep.subr.bf16.mxu1 %v15080_v44  ;;  %v15335_v55 = vcombine.low %v1159_v36, %v1163_v37  ;;  %3620 = vmatmul.mubr.bf16.vlgmr.msra.gmra.mrb[0].mxu0 %v19453_v54 }
 0x168   : > { %v915_v47 = vld [vmem:[%s19301_s12 + $0x460] sm:$0xff]  ;;  %3547 = vmatpush1.bf16.msra.mxu1 %v15079_v53  ;;  %3660 = vmatprep.mubr.bf16.mxu0 %v18858_v10 }
 0x169   : > { %v1167_v50 = vld [vmem:[%s19301_s12 + $0xc40] sm:$0xff]  ;;  %v15088_v56 = vcombine.high %v911_v46, %v915_v47  ;;  %3628 = vmatprep.subr.bf16.mxu0 %v15336_v45  ;;  %v15087_v2 = vcombine.low %v911_v46, %v915_v47  ;;  %3578 = vmatprep.mubr.bf16.mxu1 %v19462_v0  ;;  %v19484_v45 = vsub.s32 6, %v19346_v49 }
 0x16a   : > { %v1171_v51 = vld [vmem:[%s19301_s12 + $0xc60] sm:$0xff]  ;;  %3629 = vmatpush1.bf16.msra.mxu0 %v15335_v55 }
 0x16b   : > { %v15344_v57 = vcombine.high %v1167_v50, %v1171_v51  ;;  %v919_v60 = vld [vmem:[%s19301_s12 + $0x480] sm:$0xff]  ;;  %3548 = vmatprep.subr.bf16.mxu1 %v15088_v56  ;;  %v15343_v3 = vcombine.low %v1167_v50, %v1171_v51 }
 0x16c   : > { %v923_v61 = vld [vmem:[%s19301_s12 + $0x4a0] sm:$0xff]  ;;  %3549 = vmatpush1.bf16.msra.mxu1 %v15087_v2 }
 0x16d   : > { %v1175_v62 = vld [vmem:[%s19301_s12 + $0xc80] sm:$0xff]  ;;  %v15096_v4 = vcombine.high %v919_v60, %v923_v61  ;;  %3630 = vmatprep.subr.bf16.mxu0 %v15344_v57  ;;  %v15095_v14 = vcombine.low %v919_v60, %v923_v61  ;;  %v753_v61 = vrot.slane %v19362_v1, %v19484_v45 }
 0x16e   : > { %v1179_v63 = vld [vmem:[%s19301_s12 + $0xca0] sm:$0xff]  ;;  %3631 = vmatpush1.bf16.msra.mxu0 %v15343_v3  ;;  %v777_v3 = vld [vmem:[%s19301_s12 + $0x10] sm:$0xff] }
 0x16f   : > { %v927_v5 = vld [vmem:[%s19301_s12 + $0x4c0] sm:$0xff]  ;;  %v15352_v8 = vcombine.high %v1175_v62, %v1179_v63  ;;  %3550 = vmatprep.subr.bf16.mxu1 %v15096_v4  ;;  %v15351_v16 = vcombine.low %v1175_v62, %v1179_v63  ;;  %v724_v4 = vld [vmem:[#allocation13 + $0x30] sm:$0xff] }
 0x170   : > { %v931_v6 = vld [vmem:[%s19301_s12 + $0x4e0] sm:$0xff]  ;;  %3551 = vmatpush1.bf16.msra.mxu1 %v15095_v14 }
 0x171   : > { %v1183_v7 = vld [vmem:[%s19301_s12 + $0xcc0] sm:$0xff]  ;;  %v15104_v17 = vcombine.high %v927_v5, %v931_v6  ;;  %3632 = vmatprep.subr.bf16.mxu0 %v15352_v8  ;;  %v15103_v25 = vcombine.low %v927_v5, %v931_v6  ;;  %v781_v6 = vld [vmem:[%s19301_s12 + $0x30] sm:$0xff]  ;;  %v19496_v8 = vmul.f32 %v753_v61, %v724_v4 }
 0x172   : > { %v1187_v9 = vld [vmem:[%s19301_s12 + $0xce0] sm:$0xff]  ;;  %3633 = vmatpush1.bf16.msra.mxu0 %v15351_v16 }
 0x173   : > { %v935_v18 = vld [vmem:[%s19301_s12 + $0x500] sm:$0xff]  ;;  %v15360_v23 = vcombine.high %v1183_v7, %v1187_v9  ;;  %3552 = vmatprep.subr.bf16.mxu1 %v15104_v17  ;;  %v15359_v27 = vcombine.low %v1183_v7, %v1187_v9 }
 0x174   : > { %v939_v21 = vld [vmem:[%s19301_s12 + $0x520] sm:$0xff]  ;;  %3553 = vmatpush1.bf16.msra.mxu1 %v15103_v25  ;;  %v14955_v25 = vcombine.low %v777_v3, %v781_v6 }
 0x175   : > { %v1191_v22 = vld [vmem:[%s19301_s12 + $0xd00] sm:$0xff]  ;;  %v15112_v28 = vcombine.high %v935_v18, %v939_v21  ;;  %3634 = vmatprep.subr.bf16.mxu0 %v15360_v23  ;;  %v15111_v34 = vcombine.low %v935_v18, %v939_v21  ;;  %v785_v18 = vld [vmem:[%s19301_s12 + $0x50] sm:$0xff]  ;;  %v14956_v21 = vcombine.high %v777_v3, %v781_v6 }
 0x176   : > { %v1195_v24 = vld [vmem:[%s19301_s12 + $0xd20] sm:$0xff]  ;;  %3635 = vmatpush1.bf16.msra.mxu0 %v15359_v27  ;;  %v821_v3 = vld [vmem:[%s19301_s12 + $0x170] sm:$0xff] }
 0x177   : > { %v943_v29 = vld [vmem:[%s19301_s12 + $0x540] sm:$0xff]  ;;  %v15368_v32 = vcombine.high %v1191_v22, %v1195_v24  ;;  %3554 = vmatprep.subr.bf16.mxu1 %v15112_v28  ;;  %v15367_v35 = vcombine.low %v1191_v22, %v1195_v24  ;;  %v789_v22 = vld [vmem:[%s19301_s12 + $0x70] sm:$0xff]  ;;  %v19504_v24 = vpack.c.bf16 %v19496_v8, %v19496_v8 }
 0x178   : > { %v947_v30 = vld [vmem:[%s19301_s12 + $0x560] sm:$0xff]  ;;  %3555 = vmatpush1.bf16.msra.mxu1 %v15111_v34  ;;  %v14963_v34 = vcombine.low %v785_v18, %v789_v22 }
 0x179   : > { %v1199_v31 = vld [vmem:[%s19301_s12 + $0xd40] sm:$0xff]  ;;  %v15120_v36 = vcombine.high %v943_v29, %v947_v30  ;;  %3636 = vmatprep.subr.bf16.mxu0 %v15368_v32  ;;  %v15119_v44 = vcombine.low %v943_v29, %v947_v30  ;;  %v793_v30 = vld [vmem:[%s19301_s12 + $0x90] sm:$0xff] }
 0x17a   : > { %v1203_v33 = vld [vmem:[%s19301_s12 + $0xd60] sm:$0xff]  ;;  %3637 = vmatpush1.bf16.msra.mxu0 %v15367_v35  ;;  %v797_v32 = vld [vmem:[%s19301_s12 + $0xb0] sm:$0xff] }
 0x17b   : > { %v951_v37 = vld [vmem:[%s19301_s12 + $0x580] sm:$0xff]  ;;  %v15376_v42 = vcombine.high %v1199_v31, %v1203_v33  ;;  %3556 = vmatprep.subr.bf16.mxu1 %v15120_v36  ;;  %v15375_v46 = vcombine.low %v1199_v31, %v1203_v33  ;;  %v14964_v31 = vcombine.high %v785_v18, %v789_v22  ;;  %v19529_v18 = vsub.s32 2, %v19346_v49 }
 0x17c   : > { %v955_v39 = vld [vmem:[%s19301_s12 + $0x5a0] sm:$0xff]  ;;  %3557 = vmatpush1.bf16.msra.mxu1 %v15119_v44  ;;  %v14971_v44 = vcombine.low %v793_v30, %v797_v32 }
 0x17d   : > { %v1207_v40 = vld [vmem:[%s19301_s12 + $0xd80] sm:$0xff]  ;;  %v15128_v47 = vcombine.high %v951_v37, %v955_v39  ;;  %3638 = vmatprep.subr.bf16.mxu0 %v15376_v42  ;;  %v15127_v57 = vcombine.low %v951_v37, %v955_v39  ;;  %v801_v39 = vld [vmem:[%s19301_s12 + $0xd0] sm:$0xff] }
 0x17e   : > { %v1211_v43 = vld [vmem:[%s19301_s12 + $0xda0] sm:$0xff]  ;;  %3639 = vmatpush1.bf16.msra.mxu0 %v15375_v46  ;;  %v805_v42 = vld [vmem:[%s19301_s12 + $0xf0] sm:$0xff] }
 0x17f   : > { %v959_v50 = vld [vmem:[%s19301_s12 + $0x5c0] sm:$0xff]  ;;  %v15384_v55 = vcombine.high %v1207_v40, %v1211_v43  ;;  %3558 = vmatprep.subr.bf16.mxu1 %v15128_v47  ;;  %v15383_v62 = vcombine.low %v1207_v40, %v1211_v43  ;;  %v14972_v40 = vcombine.high %v793_v30, %v797_v32  ;;  %v737_v32 = vrot.slane %v19362_v1, %v19529_v18 }
 0x180   : > { %v963_v51 = vld [vmem:[%s19301_s12 + $0x5e0] sm:$0xff]  ;;  %3559 = vmatpush1.bf16.msra.mxu1 %v15127_v57  ;;  %v14979_v57 = vcombine.low %v801_v39, %v805_v42 }
 0x181   : > { %v1215_v53 = vld [vmem:[%s19301_s12 + $0xdc0] sm:$0xff]  ;;  %v15136_v63 = vcombine.high %v959_v50, %v963_v51  ;;  %3640 = vmatprep.subr.bf16.mxu0 %v15384_v55  ;;  %v15135_v7 = vcombine.low %v959_v50, %v963_v51  ;;  %v809_v51 = vld [vmem:[%s19301_s12 + $0x110] sm:$0xff] }
 0x182   : > { %v1219_v56 = vld [vmem:[%s19301_s12 + $0xde0] sm:$0xff]  ;;  %3641 = vmatpush1.bf16.msra.mxu0 %v15383_v62  ;;  %v813_v55 = vld [vmem:[%s19301_s12 + $0x130] sm:$0xff] }
 0x183   : > { %v967_v60 = vld [vmem:[%s19301_s12 + $0x600] sm:$0xff]  ;;  %v15392_v5 = vcombine.high %v1215_v53, %v1219_v56  ;;  %3560 = vmatprep.subr.bf16.mxu1 %v15136_v63  ;;  %v15391_v9 = vcombine.low %v1215_v53, %v1219_v56  ;;  %v14980_v53 = vcombine.high %v801_v39, %v805_v42  ;;  %v817_v63 = vld [vmem:[%s19301_s12 + $0x150] sm:$0xff] }
 0x184   : > { %v971_v2 = vld [vmem:[%s19301_s12 + $0x620] sm:$0xff]  ;;  %3561 = vmatpush1.bf16.msra.mxu1 %v15135_v7  ;;  %v841_v39 = vld [vmem:[%s19301_s12 + $0x210] sm:$0xff] }
 0x185   : > { %v15144_v14 = vcombine.high %v967_v60, %v971_v2  ;;  %v975_v16 = vld [vmem:[%s19301_s12 + $0x640] sm:$0xff]  ;;  %3642 = vmatprep.subr.bf16.mxu0 %v15392_v5  ;;  %v15143_v23 = vcombine.low %v967_v60, %v971_v2  ;;  %v14988_v2 = vcombine.high %v809_v51, %v813_v55  ;;  %v14987_v5 = vcombine.low %v809_v51, %v813_v55  ;;  %v845_v42 = vld [vmem:[%s19301_s12 + $0x230] sm:$0xff] }
 0x186   : > { %v979_v17 = vld [vmem:[%s19301_s12 + $0x660] sm:$0xff]  ;;  %3643 = vmatpush1.bf16.msra.mxu0 %v15391_v9  ;;  %v849_v51 = vld [vmem:[%s19301_s12 + $0x250] sm:$0xff] }
 0x187   : > { %3562 = vmatprep.subr.bf16.mxu1 %v15144_v14  ;;  %v15152_v27 = vcombine.high %v975_v16, %v979_v17  ;;  %v983_v28 = vld [vmem:[%s19301_s12 + $0x680] sm:$0xff]  ;;  %3833 = vmatprep.subr.bf16.mxu0 %v14956_v21  ;;  %v15151_v33 = vcombine.low %v975_v16, %v979_v17  ;;  %v825_v14 = vld [vmem:[%s19301_s12 + $0x190] sm:$0xff]  ;;  %v14996_v16 = vcombine.high %v817_v63, %v821_v3 }
 0x188   : > { %v987_v29 = vld [vmem:[%s19301_s12 + $0x6a0] sm:$0xff]  ;;  %3563 = vmatpush1.bf16.msra.mxu1 %v15143_v23  ;;  %v829_v17 = vld [vmem:[%s19301_s12 + $0x1b0] sm:$0xff]  ;;  %v14995_v23 = vcombine.low %v817_v63, %v821_v3  ;;  %v796_v63 = vld [vmem:[%s19301_s12 + $0xa8] sm:$0xff] }
 0x189   : > { %3661 = vmatmul.mubr.bf16.vlgmr.msra.gmra.mrb[0].mxu0 %v19504_v24  ;;  %3564 = vmatprep.subr.bf16.mxu1 %v15152_v27  ;;  %v15160_v35 = vcombine.high %v983_v28, %v987_v29  ;;  %v991_v36 = vld [vmem:[%s19301_s12 + $0x6c0] sm:$0xff]  ;;  %v15159_v43 = vcombine.low %v983_v28, %v987_v29  ;;  %v833_v28 = vld [vmem:[%s19301_s12 + $0x1d0] sm:$0xff]  ;;  %v15004_v30 = vcombine.high %v825_v14, %v829_v17 }
 0x18a   : > { %3834 = vmatpush1.bf16.msra.mxu0 %v14955_v25  ;;  %v995_v37 = vld [vmem:[%s19301_s12 + $0x6e0] sm:$0xff]  ;;  %3865 = vmatprep.mubr.bf16.mxu0 %v19380_v19  ;;  %v837_v29 = vld [vmem:[%s19301_s12 + $0x1f0] sm:$0xff] }
 0x18b   : > { %3835 = vmatprep.subr.bf16.mxu0 %v14964_v31  ;;  %v15168_v46 = vcombine.high %v991_v36, %v995_v37  ;;  %v999_v47 = vld [vmem:[%s19301_s12 + $0x700] sm:$0xff]  ;;  %v15167_v56 = vcombine.low %v991_v36, %v995_v37  ;;  %v720_v31 = vld [vmem:[#allocation13 + $0x10] sm:$0xff] }
 0x18c   : > { %3565 = vmatpush1.bf16.msra.mxu1 %v15151_v33  ;;  %v1003_v50 = vld [vmem:[%s19301_s12 + $0x720] sm:$0xff]  ;;  %v776_v36 = vld [vmem:[%s19301_s12 + $0x8] sm:$0xff]  ;;  %v853_v55 = vld [vmem:[%s19301_s12 + $0x270] sm:$0xff] }
 0x18d   : > { %3566 = vmatprep.subr.bf16.mxu1 %v15160_v35  ;;  %v15176_v60 = vcombine.high %v999_v47, %v1003_v50  ;;  %v1007_v61 = vld [vmem:[%s19301_s12 + $0x740] sm:$0xff]  ;;  %v15175_v4 = vcombine.low %v999_v47, %v1003_v50  ;;  %v780_v37 = vld [vmem:[%s19301_s12 + $0x28] sm:$0xff]  ;;  %v15028_v3 = vcombine.high %v849_v51, %v853_v55 }
 0x18e   : > { %3836 = vmatpush1.bf16.msra.mxu0 %v14963_v34  ;;  %v1011_v62 = vld [vmem:[%s19301_s12 + $0x760] sm:$0xff]  ;;  %v15003_v34 = vcombine.low %v825_v14, %v829_v17  ;;  %v784_v47 = vld [vmem:[%s19301_s12 + $0x48] sm:$0xff] }
 0x18f   : > { %3837 = vmatprep.subr.bf16.mxu0 %v14972_v40  ;;  %v15184_v6 = vcombine.high %v1007_v61, %v1011_v62  ;;  %v1015_v7 = vld [vmem:[%s19301_s12 + $0x780] sm:$0xff]  ;;  %v15183_v21 = vcombine.low %v1007_v61, %v1011_v62  ;;  %v15012_v40 = vcombine.high %v833_v28, %v837_v29  ;;  %v788_v50 = vld [vmem:[%s19301_s12 + $0x68] sm:$0xff] }
 0x190   : > { %3567 = vmatpush1.bf16.msra.mxu1 %v15159_v43  ;;  %v1019_v9 = vld [vmem:[%s19301_s12 + $0x7a0] sm:$0xff]  ;;  %v19541_v43 = vmul.f32 %v737_v32, %v720_v31  ;;  %v14962_v61 = vcombine.high %v784_v47, %v788_v50  ;;  %v792_v62 = vld [vmem:[%s19301_s12 + $0x88] sm:$0xff]  ;;  %v877_v31 = vld [vmem:[%s19301_s12 + $0x330] sm:$0xff] }
 0x191   : > { %3568 = vmatprep.subr.bf16.mxu1 %v15168_v46  ;;  %v1023_v22 = vld [vmem:[%s19301_s12 + $0x7c0] sm:$0xff]  ;;  %v15192_v25 = vcombine.high %v1015_v7, %v1019_v9  ;;  %v15191_v33 = vcombine.low %v1015_v7, %v1019_v9  ;;  %v14954_v46 = vcombine.high %v776_v36, %v780_v37  ;;  %v14970_v7 = vcombine.high %v792_v62, %v796_v63  ;;  %v800_v9 = vld [vmem:[%s19301_s12 + $0xc8] sm:$0xff] }
 0x192   : > { %3838 = vmatpush1.bf16.msra.mxu0 %v14971_v44  ;;  %v1027_v27 = vld [vmem:[%s19301_s12 + $0x7e0] sm:$0xff]  ;;  %v15011_v44 = vcombine.low %v833_v28, %v837_v29  ;;  %v804_v14 = vld [vmem:[%s19301_s12 + $0xe8] sm:$0xff]  ;;  %v873_v29 = vld [vmem:[%s19301_s12 + $0x310] sm:$0xff] }
 0x193   : > { %3839 = vmatprep.subr.bf16.mxu0 %v14980_v53  ;;  %v15200_v35 = vcombine.high %v1023_v22, %v1027_v27  ;;  %v15199_v1 = vcombine.low %v1023_v22, %v1027_v27  ;;  %v15020_v53 = vcombine.high %v841_v39, %v845_v42  ;;  %v14969_v22 = vcombine.low %v792_v62, %v796_v63  ;;  %v808_v27 = vld [vmem:[%s19301_s12 + $0x108] sm:$0xff]  ;;  %v897_v63 = vld [vmem:[%s19301_s12 + $0x3d0] sm:$0xff] }
 0x194   : > { %3569 = vmatpush1.bf16.msra.mxu1 %v15167_v56  ;;  %v19549_v56 = vpack.c.bf16 %v19541_v43, %v19541_v43  ;;  %v812_v28 = vld [vmem:[%s19301_s12 + $0x128] sm:$0xff]  ;;  %v14977_v32 = vcombine.low %v800_v9, %v804_v14 }
 0x195   : > { %3570 = vmatprep.subr.bf16.mxu1 %v15176_v60  ;;  %v15019_v60 = vcombine.low %v841_v39, %v845_v42  ;;  %v15052_v39 = vcombine.high %v873_v29, %v877_v31  ;;  %v14985_v42 = vcombine.low %v808_v27, %v812_v28  ;;  %v836_v62 = vld [vmem:[%s19301_s12 + $0x1e8] sm:$0xff] }
 0x196   : > { %3840 = vmatpush1.bf16.msra.mxu0 %v14979_v57  ;;  %v14953_v57 = vcombine.low %v776_v36, %v780_v37  ;;  %v820_v36 = vld [vmem:[%s19301_s12 + $0x168] sm:$0xff]  ;;  %v881_v37 = vld [vmem:[%s19301_s12 + $0x350] sm:$0xff] }
 0x197   : > { %3841 = vmatprep.subr.bf16.mxu0 %v14988_v2  ;;  %v857_v2 = vld [vmem:[%s19301_s12 + $0x290] sm:$0xff] }
 0x198   : > { %3571 = vmatpush1.bf16.msra.mxu1 %v15175_v4  ;;  %v861_v4 = vld [vmem:[%s19301_s12 + $0x2b0] sm:$0xff] }
 0x199   : > { %3572 = vmatprep.subr.bf16.mxu1 %v15184_v6  ;;  %v15027_v6 = vcombine.low %v849_v51, %v853_v55  ;;  %v15036_v17 = vcombine.high %v857_v2, %v861_v4 }
 0x19a   : > { %3842 = vmatpush1.bf16.msra.mxu0 %v14987_v5  ;;  %v14961_v5 = vcombine.low %v784_v47, %v788_v50  ;;  %v828_v47 = vld [vmem:[%s19301_s12 + $0x1a8] sm:$0xff]  ;;  %v889_v50 = vld [vmem:[%s19301_s12 + $0x390] sm:$0xff] }
 0x19b   : > { %3843 = vmatprep.subr.bf16.mxu0 %v14996_v16  ;;  %v865_v16 = vld [vmem:[%s19301_s12 + $0x2d0] sm:$0xff] }
 0x19c   : > { %3573 = vmatpush1.bf16.msra.mxu1 %v15183_v21  ;;  %v869_v21 = vld [vmem:[%s19301_s12 + $0x2f0] sm:$0xff] }
 0x19d   : > { %3574 = vmatprep.subr.bf16.mxu1 %v15192_v25  ;;  %v14978_v25 = vcombine.high %v800_v9, %v804_v14  ;;  %v844_v9 = vld [vmem:[%s19301_s12 + $0x228] sm:$0xff]  ;;  %v905_v14 = vld [vmem:[%s19301_s12 + $0x410] sm:$0xff] }
 0x19e   : > { %3844 = vmatpush1.bf16.msra.mxu0 %v14995_v23  ;;  %v15035_v23 = vcombine.low %v857_v2, %v861_v4 }
 0x19f   : > { %3845 = vmatprep.subr.bf16.mxu0 %v15004_v30  ;;  %v15044_v30 = vcombine.high %v865_v16, %v869_v21 }
 0x1a0   : > { %3575 = vmatpush1.bf16.msra.mxu1 %v15191_v33  ;;  %v15043_v33 = vcombine.low %v865_v16, %v869_v21 }
 0x1a1   : > { %3576 = vmatprep.subr.bf16.mxu1 %v15200_v35  ;;  %v816_v35 = vld [vmem:[%s19301_s12 + $0x148] sm:$0xff] }
 0x1a2   : > { %3846 = vmatpush1.bf16.msra.mxu0 %v15003_v34  ;;  %v14986_v34 = vcombine.high %v808_v27, %v812_v28  ;;  %v14993_v55 = vcombine.low %v816_v35, %v820_v36  ;;  %v852_v27 = vld [vmem:[%s19301_s12 + $0x268] sm:$0xff]  ;;  %v913_v28 = vld [vmem:[%s19301_s12 + $0x450] sm:$0xff] }
 0x1a3   : > { %3847 = vmatprep.subr.bf16.mxu0 %v15012_v40  ;;  %v885_v40 = vld [vmem:[%s19301_s12 + $0x370] sm:$0xff] }
 0x1a4   : > { %3577 = vmatpush1.bf16.msra.mxu1 %v15199_v1  ;;  %v15051_v1 = vcombine.low %v873_v29, %v877_v31  ;;  %v15060_v51 = vcombine.high %v881_v37, %v885_v40 }
 0x1a5   : > { %3669 = vmatprep.subr.bf16.mxu1 %v14954_v46  ;;  %v824_v46 = vld [vmem:[%s19301_s12 + $0x188] sm:$0xff] }
 0x1a6   : > { %3848 = vmatpush1.bf16.msra.mxu0 %v15011_v44  ;;  %v14994_v44 = vcombine.high %v816_v35, %v820_v36  ;;  %v15001_v4 = vcombine.low %v824_v46, %v828_v47  ;;  %v860_v35 = vld [vmem:[%s19301_s12 + $0x2a8] sm:$0xff]  ;;  %v921_v36 = vld [vmem:[%s19301_s12 + $0x490] sm:$0xff] }
 0x1a7   : > { %3849 = vmatprep.subr.bf16.mxu0 %v15020_v53  ;;  %3579 = vmatmul.mubr.bf16.vlgmr.msra.gmra.mrb[0].mxu1 %v19549_v56  ;;  %v893_v53 = vld [vmem:[%s19301_s12 + $0x3b0] sm:$0xff] }
 0x1a8   : > { %3670 = vmatpush1.bf16.msra.mxu1 %v14953_v57  ;;  %3701 = vmatprep.mubr.bf16.mxu1 %v19380_v19  ;;  %v15059_v57 = vcombine.low %v881_v37, %v885_v40  ;;  %v15068_v2 = vcombine.high %v889_v50, %v893_v53 }
 0x1a9   : > { %3671 = vmatprep.subr.bf16.mxu1 %v14962_v61  ;;  %v832_v61 = vld [vmem:[%s19301_s12 + $0x1c8] sm:$0xff] }
 0x1aa   : > { %3850 = vmatpush1.bf16.msra.mxu0 %v15019_v60  ;;  %v15002_v60 = vcombine.high %v824_v46, %v828_v47  ;;  %v15009_v21 = vcombine.low %v832_v61, %v836_v62  ;;  %v868_v46 = vld [vmem:[%s19301_s12 + $0x2e8] sm:$0xff]  ;;  %v929_v47 = vld [vmem:[%s19301_s12 + $0x4d0] sm:$0xff] }
 0x1ab   : > { %3851 = vmatprep.subr.bf16.mxu0 %v15028_v3  ;;  %v901_v3 = vld [vmem:[%s19301_s12 + $0x3f0] sm:$0xff] }
 0x1ac   : > { %3672 = vmatpush1.bf16.msra.mxu1 %v14961_v5  ;;  %v15067_v5 = vcombine.low %v889_v50, %v893_v53  ;;  %v15076_v16 = vcombine.high %v897_v63, %v901_v3 }
 0x1ad   : > { %3673 = vmatprep.subr.bf16.mxu1 %v14970_v7  ;;  %v840_v7 = vld [vmem:[%s19301_s12 + $0x208] sm:$0xff] }
 0x1ae   : > { %3852 = vmatpush1.bf16.msra.mxu0 %v15027_v6  ;;  %v15010_v6 = vcombine.high %v832_v61, %v836_v62  ;;  %v15017_v31 = vcombine.low %v840_v7, %v844_v9  ;;  %v876_v61 = vld [vmem:[%s19301_s12 + $0x328] sm:$0xff]  ;;  %v937_v62 = vld [vmem:[%s19301_s12 + $0x510] sm:$0xff] }
 0x1af   : > { %3853 = vmatprep.subr.bf16.mxu0 %v15036_v17  ;;  %v909_v17 = vld [vmem:[%s19301_s12 + $0x430] sm:$0xff] }
 0x1b0   : > { %3674 = vmatpush1.bf16.msra.mxu1 %v14969_v22  ;;  %v15075_v22 = vcombine.low %v897_v63, %v901_v3  ;;  %v15084_v29 = vcombine.high %v905_v14, %v909_v17 }
 0x1b1   : > { %3675 = vmatprep.subr.bf16.mxu1 %v14978_v25  ;;  %v848_v25 = vld [vmem:[%s19301_s12 + $0x248] sm:$0xff] }
 0x1b2   : > { %3854 = vmatpush1.bf16.msra.mxu0 %v15035_v23  ;;  %v15018_v23 = vcombine.high %v840_v7, %v844_v9  ;;  %v15025_v40 = vcombine.low %v848_v25, %v852_v27  ;;  %v884_v7 = vld [vmem:[%s19301_s12 + $0x368] sm:$0xff]  ;;  %v945_v9 = vld [vmem:[%s19301_s12 + $0x550] sm:$0xff] }
 0x1b3   : > { %3855 = vmatprep.subr.bf16.mxu0 %v15044_v30  ;;  %v917_v30 = vld [vmem:[%s19301_s12 + $0x470] sm:$0xff] }
 0x1b4   : > { %3676 = vmatpush1.bf16.msra.mxu1 %v14977_v32  ;;  %v15083_v32 = vcombine.low %v905_v14, %v909_v17  ;;  %v15092_v37 = vcombine.high %v913_v28, %v917_v30 }
 0x1b5   : > { %3677 = vmatprep.subr.bf16.mxu1 %v14986_v34  ;;  %v856_v34 = vld [vmem:[%s19301_s12 + $0x288] sm:$0xff] }
 0x1b6   : > { %3856 = vmatpush1.bf16.msra.mxu0 %v15043_v33  ;;  %v15026_v33 = vcombine.high %v848_v25, %v852_v27  ;;  %v15033_v53 = vcombine.low %v856_v34, %v860_v35  ;;  %v892_v25 = vld [vmem:[%s19301_s12 + $0x3a8] sm:$0xff]  ;;  %v953_v27 = vld [vmem:[%s19301_s12 + $0x590] sm:$0xff] }
 0x1b7   : > { %3857 = vmatprep.subr.bf16.mxu0 %v15052_v39  ;;  %v925_v39 = vld [vmem:[%s19301_s12 + $0x4b0] sm:$0xff] }
 0x1b8   : > { %3678 = vmatpush1.bf16.msra.mxu1 %v14985_v42  ;;  %v15091_v42 = vcombine.low %v913_v28, %v917_v30  ;;  %v15100_v50 = vcombine.high %v921_v36, %v925_v39 }
 0x1b9   : > { %3679 = vmatprep.subr.bf16.mxu1 %v14994_v44  ;;  %v864_v44 = vld [vmem:[%s19301_s12 + $0x2c8] sm:$0xff] }
 0x1ba   : > { %3858 = vmatpush1.bf16.msra.mxu0 %v15051_v1  ;;  %v15034_v1 = vcombine.high %v856_v34, %v860_v35  ;;  %v15041_v3 = vcombine.low %v864_v44, %v868_v46  ;;  %v900_v34 = vld [vmem:[%s19301_s12 + $0x3e8] sm:$0xff]  ;;  %v961_v35 = vld [vmem:[%s19301_s12 + $0x5d0] sm:$0xff] }
 0x1bb   : > { %3859 = vmatprep.subr.bf16.mxu0 %v15060_v51  ;;  %v933_v51 = vld [vmem:[%s19301_s12 + $0x4f0] sm:$0xff] }
 0x1bc   : > { %3680 = vmatpush1.bf16.msra.mxu1 %v14993_v55  ;;  %v15099_v55 = vcombine.low %v921_v36, %v925_v39  ;;  %v15108_v63 = vcombine.high %v929_v47, %v933_v51 }
 0x1bd   : > { %3681 = vmatprep.subr.bf16.mxu1 %v15002_v60  ;;  %v872_v60 = vld [vmem:[%s19301_s12 + $0x308] sm:$0xff] }
 0x1be   : > { %3860 = vmatpush1.bf16.msra.mxu0 %v15059_v57  ;;  %v15042_v57 = vcombine.high %v864_v44, %v868_v46  ;;  %v15049_v17 = vcombine.low %v872_v60, %v876_v61  ;;  %v908_v44 = vld [vmem:[%s19301_s12 + $0x428] sm:$0xff]  ;;  %v969_v46 = vld [vmem:[%s19301_s12 + $0x610] sm:$0xff] }
 0x1bf   : > { %3861 = vmatprep.subr.bf16.mxu0 %v15068_v2  ;;  %v941_v2 = vld [vmem:[%s19301_s12 + $0x530] sm:$0xff] }
 0x1c0   : > { %3682 = vmatpush1.bf16.msra.mxu1 %v15001_v4  ;;  %v15107_v4 = vcombine.low %v929_v47, %v933_v51  ;;  %v15116_v14 = vcombine.high %v937_v62, %v941_v2 }
 0x1c1   : > { %3683 = vmatprep.subr.bf16.mxu1 %v15010_v6  ;;  %v880_v6 = vld [vmem:[%s19301_s12 + $0x348] sm:$0xff] }
 0x1c2   : > { %3862 = vmatpush1.bf16.msra.mxu0 %v15067_v5  ;;  %v15050_v5 = vcombine.high %v872_v60, %v876_v61  ;;  %v15057_v30 = vcombine.low %v880_v6, %v884_v7  ;;  %v916_v60 = vld [vmem:[%s19301_s12 + $0x468] sm:$0xff]  ;;  %v977_v61 = vld [vmem:[%s19301_s12 + $0x650] sm:$0xff] }
 0x1c3   : > { %3863 = vmatprep.subr.bf16.mxu0 %v15076_v16  ;;  %v949_v16 = vld [vmem:[%s19301_s12 + $0x570] sm:$0xff] }
 0x1c4   : > { %3684 = vmatpush1.bf16.msra.mxu1 %v15009_v21  ;;  %v15115_v21 = vcombine.low %v937_v62, %v941_v2  ;;  %v15124_v28 = vcombine.high %v945_v9, %v949_v16 }
 0x1c5   : > { %3685 = vmatprep.subr.bf16.mxu1 %v15018_v23  ;;  %v888_v23 = vld [vmem:[%s19301_s12 + $0x388] sm:$0xff] }
 0x1c6   : > { %3864 = vmatpush1.bf16.msra.mxu0 %v15075_v22  ;;  %v15058_v22 = vcombine.high %v880_v6, %v884_v7  ;;  %v15065_v39 = vcombine.low %v888_v23, %v892_v25  ;;  %v924_v6 = vld [vmem:[%s19301_s12 + $0x4a8] sm:$0xff]  ;;  %v985_v7 = vld [vmem:[%s19301_s12 + $0x690] sm:$0xff] }
 0x1c7   : > { %3874 = vmatprep.subr.bf16.mxu0 %v15084_v29  ;;  %v957_v29 = vld [vmem:[%s19301_s12 + $0x5b0] sm:$0xff] }
 0x1c8   : > { %3686 = vmatpush1.bf16.msra.mxu1 %v15017_v31  ;;  %v15123_v31 = vcombine.low %v945_v9, %v949_v16  ;;  %v15132_v36 = vcombine.high %v953_v27, %v957_v29 }
 0x1c9   : > { %3866 = vmatmul.mubr.bf16.vlgmr.msra.gmra.mrb[4].mxu0 %v19445_v48  ;;  %3687 = vmatprep.subr.bf16.mxu1 %v15026_v33  ;;  %v896_v33 = vld [vmem:[%s19301_s12 + $0x3c8] sm:$0xff] }
 0x1ca   : > { %3875 = vmatpush1.bf16.msra.mxu0 %v15083_v32  ;;  %3906 = vmatprep.mubr.bf16.mxu0 %v19462_v0  ;;  %v15066_v32 = vcombine.high %v888_v23, %v892_v25  ;;  %v15073_v51 = vcombine.low %v896_v33, %v900_v34  ;;  %v932_v23 = vld [vmem:[%s19301_s12 + $0x4e8] sm:$0xff]  ;;  %v993_v25 = vld [vmem:[%s19301_s12 + $0x6d0] sm:$0xff] }
 0x1cb   : > { %3876 = vmatprep.subr.bf16.mxu0 %v15092_v37  ;;  %v965_v37 = vld [vmem:[%s19301_s12 + $0x5f0] sm:$0xff] }
 0x1cc   : > { %3688 = vmatpush1.bf16.msra.mxu1 %v15025_v40  ;;  %v15131_v40 = vcombine.low %v953_v27, %v957_v29  ;;  %v15140_v47 = vcombine.high %v961_v35, %v965_v37 }
 0x1cd   : > { %3689 = vmatprep.subr.bf16.mxu1 %v15034_v1  ;;  %v904_v1 = vld [vmem:[%s19301_s12 + $0x408] sm:$0xff] }
 0x1ce   : > { %3877 = vmatpush1.bf16.msra.mxu0 %v15091_v42  ;;  %v15074_v42 = vcombine.high %v896_v33, %v900_v34  ;;  %v15081_v2 = vcombine.low %v904_v1, %v908_v44  ;;  %v940_v33 = vld [vmem:[%s19301_s12 + $0x528] sm:$0xff]  ;;  %v1001_v34 = vld [vmem:[%s19301_s12 + $0x710] sm:$0xff] }
 0x1cf   : > { %3878 = vmatprep.subr.bf16.mxu0 %v15100_v50  ;;  %v973_v50 = vld [vmem:[%s19301_s12 + $0x630] sm:$0xff] }
 0x1d0   : > { %3690 = vmatpush1.bf16.msra.mxu1 %v15033_v53  ;;  %v15139_v53 = vcombine.low %v961_v35, %v965_v37  ;;  %v15148_v62 = vcombine.high %v969_v46, %v973_v50 }
 0x1d1   : > { %3691 = vmatprep.subr.bf16.mxu1 %v15042_v57  ;;  %v912_v57 = vld [vmem:[%s19301_s12 + $0x448] sm:$0xff] }
 0x1d2   : > { %3879 = vmatpush1.bf16.msra.mxu0 %v15099_v55  ;;  %v15082_v55 = vcombine.high %v904_v1, %v908_v44  ;;  %v15089_v16 = vcombine.low %v912_v57, %v916_v60  ;;  %v948_v1 = vld [vmem:[%s19301_s12 + $0x568] sm:$0xff]  ;;  %v1009_v44 = vld [vmem:[%s19301_s12 + $0x750] sm:$0xff] }
 0x1d3   : > { %3880 = vmatprep.subr.bf16.mxu0 %v15108_v63  ;;  %v981_v63 = vld [vmem:[%s19301_s12 + $0x670] sm:$0xff] }
 0x1d4   : > { %3692 = vmatpush1.bf16.msra.mxu1 %v15041_v3  ;;  %v15147_v3 = vcombine.low %v969_v46, %v973_v50  ;;  %v15156_v9 = vcombine.high %v977_v61, %v981_v63 }
 0x1d5   : > { %3693 = vmatprep.subr.bf16.mxu1 %v15050_v5  ;;  %v920_v5 = vld [vmem:[%s19301_s12 + $0x488] sm:$0xff] }
 0x1d6   : > { %3881 = vmatpush1.bf16.msra.mxu0 %v15107_v4  ;;  %v15090_v4 = vcombine.high %v912_v57, %v916_v60  ;;  %v15097_v29 = vcombine.low %v920_v5, %v924_v6  ;;  %v956_v57 = vld [vmem:[%s19301_s12 + $0x5a8] sm:$0xff]  ;;  %v1017_v60 = vld [vmem:[%s19301_s12 + $0x790] sm:$0xff] }
 0x1d7   : > { %3882 = vmatprep.subr.bf16.mxu0 %v15116_v14  ;;  %v989_v14 = vld [vmem:[%s19301_s12 + $0x6b0] sm:$0xff] }
 0x1d8   : > { %3694 = vmatpush1.bf16.msra.mxu1 %v15049_v17  ;;  %v15155_v17 = vcombine.low %v977_v61, %v981_v63  ;;  %v15164_v27 = vcombine.high %v985_v7, %v989_v14 }
 0x1d9   : > { %3695 = vmatprep.subr.bf16.mxu1 %v15058_v22  ;;  %v928_v22 = vld [vmem:[%s19301_s12 + $0x4c8] sm:$0xff] }
 0x1da   : > { %3883 = vmatpush1.bf16.msra.mxu0 %v15115_v21  ;;  %v15098_v21 = vcombine.high %v920_v5, %v924_v6  ;;  %v15105_v37 = vcombine.low %v928_v22, %v932_v23  ;;  %v964_v5 = vld [vmem:[%s19301_s12 + $0x5e8] sm:$0xff] }
 0x1db   : > { %3884 = vmatprep.subr.bf16.mxu0 %v15124_v28  ;;  %v997_v28 = vld [vmem:[%s19301_s12 + $0x6f0] sm:$0xff] }
 0x1dc   : > { %3696 = vmatpush1.bf16.msra.mxu1 %v15057_v30  ;;  %v15163_v30 = vcombine.low %v985_v7, %v989_v14  ;;  %v15172_v35 = vcombine.high %v993_v25, %v997_v28  ;;  %v1025_v7 = vld [vmem:[%s19301_s12 + $0x7d0] sm:$0xff] }
 0x1dd   : > { %3697 = vmatprep.subr.bf16.mxu1 %v15066_v32  ;;  %v936_v32 = vld [vmem:[%s19301_s12 + $0x508] sm:$0xff] }
 0x1de   : > { %3885 = vmatpush1.bf16.msra.mxu0 %v15123_v31  ;;  %v15106_v31 = vcombine.high %v928_v22, %v932_v23  ;;  %v15113_v50 = vcombine.low %v936_v32, %v940_v33  ;;  %v972_v22 = vld [vmem:[%s19301_s12 + $0x628] sm:$0xff]  ;;  %v1033_v23 = vld [vmem:[%s19301_s12 + $0x810] sm:$0xff] }
 0x1df   : > { %3886 = vmatprep.subr.bf16.mxu0 %v15132_v36  ;;  %v1005_v36 = vld [vmem:[%s19301_s12 + $0x730] sm:$0xff] }
 0x1e0   : > { %3698 = vmatpush1.bf16.msra.mxu1 %v15065_v39  ;;  %v15171_v39 = vcombine.low %v993_v25, %v997_v28  ;;  %v15180_v46 = vcombine.high %v1001_v34, %v1005_v36 }
 0x1e1   : > { %3699 = vmatprep.subr.bf16.mxu1 %v15074_v42  ;;  %v944_v42 = vld [vmem:[%s19301_s12 + $0x548] sm:$0xff] }
 0x1e2   : > { %3887 = vmatpush1.bf16.msra.mxu0 %v15131_v40  ;;  %v15114_v40 = vcombine.high %v936_v32, %v940_v33  ;;  %v15121_v63 = vcombine.low %v944_v42, %v948_v1  ;;  %v980_v32 = vld [vmem:[%s19301_s12 + $0x668] sm:$0xff]  ;;  %v1041_v33 = vld [vmem:[%s19301_s12 + $0x850] sm:$0xff] }
 0x1e3   : > { %3888 = vmatprep.subr.bf16.mxu0 %v15140_v47  ;;  %v1013_v47 = vld [vmem:[%s19301_s12 + $0x770] sm:$0xff] }
 0x1e4   : > { %3700 = vmatpush1.bf16.msra.mxu1 %v15073_v51  ;;  %v15179_v51 = vcombine.low %v1001_v34, %v1005_v36  ;;  %v15188_v61 = vcombine.high %v1009_v44, %v1013_v47 }
 0x1e5   : > { %3710 = vmatprep.subr.bf16.mxu1 %v15082_v55  ;;  %v952_v55 = vld [vmem:[%s19301_s12 + $0x588] sm:$0xff] }
 0x1e6   : > { %3889 = vmatpush1.bf16.msra.mxu0 %v15139_v53  ;;  %v15122_v53 = vcombine.high %v944_v42, %v948_v1  ;;  %v15129_v14 = vcombine.low %v952_v55, %v956_v57  ;;  %v988_v42 = vld [vmem:[%s19301_s12 + $0x6a8] sm:$0xff]  ;;  %v1049_v1 = vld [vmem:[%s19301_s12 + $0x890] sm:$0xff] }
 0x1e7   : > { %3890 = vmatprep.subr.bf16.mxu0 %v15148_v62  ;;  %3702 = vmatmul.mubr.bf16.vlgmr.msra.gmra.mrb[4].mxu1 %v19445_v48  ;;  %v1021_v62 = vld [vmem:[%s19301_s12 + $0x7b0] sm:$0xff] }
 0x1e8   : > { %3711 = vmatpush1.bf16.msra.mxu1 %v15081_v2  ;;  %3742 = vmatprep.mubr.bf16.mxu1 %v19462_v0  ;;  %v15187_v2 = vcombine.low %v1009_v44, %v1013_v47  ;;  %v15196_v6 = vcombine.high %v1017_v60, %v1021_v62 }
 0x1e9   : > { %3712 = vmatprep.subr.bf16.mxu1 %v15090_v4  ;;  %v960_v4 = vld [vmem:[%s19301_s12 + $0x5c8] sm:$0xff] }
 0x1ea   : > { %3891 = vmatpush1.bf16.msra.mxu0 %v15147_v3  ;;  %v15130_v3 = vcombine.high %v952_v55, %v956_v57  ;;  %v15137_v28 = vcombine.low %v960_v4, %v964_v5  ;;  %v996_v55 = vld [vmem:[%s19301_s12 + $0x6e8] sm:$0xff]  ;;  %v1057_v57 = vld [vmem:[%s19301_s12 + $0x8d0] sm:$0xff] }
 0x1eb   : > { %3892 = vmatprep.subr.bf16.mxu0 %v15156_v9  ;;  %v1029_v9 = vld [vmem:[%s19301_s12 + $0x7f0] sm:$0xff] }
 0x1ec   : > { %3713 = vmatpush1.bf16.msra.mxu1 %v15089_v16  ;;  %v15195_v16 = vcombine.low %v1017_v60, %v1021_v62  ;;  %v15204_v25 = vcombine.high %v1025_v7, %v1029_v9 }
 0x1ed   : > { %3714 = vmatprep.subr.bf16.mxu1 %v15098_v21  ;;  %v968_v21 = vld [vmem:[%s19301_s12 + $0x608] sm:$0xff] }
 0x1ee   : > { %3893 = vmatpush1.bf16.msra.mxu0 %v15155_v17  ;;  %v15138_v17 = vcombine.high %v960_v4, %v964_v5  ;;  %v15145_v36 = vcombine.low %v968_v21, %v972_v22  ;;  %v1004_v4 = vld [vmem:[%s19301_s12 + $0x728] sm:$0xff]  ;;  %v1065_v5 = vld [vmem:[%s19301_s12 + $0x910] sm:$0xff] }
 0x1ef   : > { %3894 = vmatprep.subr.bf16.mxu0 %v15164_v27  ;;  %v1037_v27 = vld [vmem:[%s19301_s12 + $0x830] sm:$0xff] }
 0x1f0   : > { %3715 = vmatpush1.bf16.msra.mxu1 %v15097_v29  ;;  %v15203_v29 = vcombine.low %v1025_v7, %v1029_v9  ;;  %v15212_v34 = vcombine.high %v1033_v23, %v1037_v27  ;;  %v1069_v7 = vld [vmem:[%s19301_s12 + $0x930] sm:$0xff] }
 0x1f1   : > { %3716 = vmatprep.subr.bf16.mxu1 %v15106_v31  ;;  %v976_v31 = vld [vmem:[%s19301_s12 + $0x648] sm:$0xff] }
 0x1f2   : > { %3895 = vmatpush1.bf16.msra.mxu0 %v15163_v30  ;;  %v15146_v30 = vcombine.high %v968_v21, %v972_v22  ;;  %v15153_v47 = vcombine.low %v976_v31, %v980_v32  ;;  %v1012_v21 = vld [vmem:[%s19301_s12 + $0x768] sm:$0xff]  ;;  %v1073_v22 = vld [vmem:[%s19301_s12 + $0x950] sm:$0xff] }
 0x1f3   : > { %3896 = vmatprep.subr.bf16.mxu0 %v15172_v35  ;;  %v1045_v35 = vld [vmem:[%s19301_s12 + $0x870] sm:$0xff] }
 0x1f4   : > { %3717 = vmatpush1.bf16.msra.mxu1 %v15105_v37  ;;  %v15211_v37 = vcombine.low %v1033_v23, %v1037_v27  ;;  %v15220_v44 = vcombine.high %v1041_v33, %v1045_v35  ;;  %v15244_v23 = vcombine.high %v1065_v5, %v1069_v7 }
 0x1f5   : > { %3718 = vmatprep.subr.bf16.mxu1 %v15114_v40  ;;  %v984_v40 = vld [vmem:[%s19301_s12 + $0x688] sm:$0xff] }
 0x1f6   : > { %3897 = vmatpush1.bf16.msra.mxu0 %v15171_v39  ;;  %v15154_v39 = vcombine.high %v976_v31, %v980_v32  ;;  %v15161_v62 = vcombine.low %v984_v40, %v988_v42  ;;  %v1020_v31 = vld [vmem:[%s19301_s12 + $0x7a8] sm:$0xff]  ;;  %v1081_v32 = vld [vmem:[%s19301_s12 + $0x990] sm:$0xff] }
 0x1f7   : > { %3898 = vmatprep.subr.bf16.mxu0 %v15180_v46  ;;  %v1053_v46 = vld [vmem:[%s19301_s12 + $0x8b0] sm:$0xff] }
 0x1f8   : > { %3719 = vmatpush1.bf16.msra.mxu1 %v15113_v50  ;;  %v15219_v50 = vcombine.low %v1041_v33, %v1045_v35  ;;  %v15228_v60 = vcombine.high %v1049_v1, %v1053_v46 }
 0x1f9   : > { %3720 = vmatprep.subr.bf16.mxu1 %v15122_v53  ;;  %v992_v53 = vld [vmem:[%s19301_s12 + $0x6c8] sm:$0xff] }
 0x1fa   : > { %3899 = vmatpush1.bf16.msra.mxu0 %v15179_v51  ;;  %v15162_v51 = vcombine.high %v984_v40, %v988_v42  ;;  %v15169_v9 = vcombine.low %v992_v53, %v996_v55  ;;  %v1028_v40 = vld [vmem:[%s19301_s12 + $0x7e8] sm:$0xff]  ;;  %v1089_v42 = vld [vmem:[%s19301_s12 + $0x9d0] sm:$0xff] }
 0x1fb   : > { %3900 = vmatprep.subr.bf16.mxu0 %v15188_v61  ;;  %v1061_v61 = vld [vmem:[%s19301_s12 + $0x8f0] sm:$0xff] }
 0x1fc   : > { %3721 = vmatpush1.bf16.msra.mxu1 %v15121_v63  ;;  %v15227_v63 = vcombine.low %v1049_v1, %v1053_v46 }
 0x1fd   : > { %3722 = vmatprep.subr.bf16.mxu1 %v15130_v3  ;;  %v1000_v3 = vld [vmem:[%s19301_s12 + $0x708] sm:$0xff] }
 0x1fe   : > { %3901 = vmatpush1.bf16.msra.mxu0 %v15187_v2  ;;  %v15170_v2 = vcombine.high %v992_v53, %v996_v55  ;;  %v15177_v27 = vcombine.low %v1000_v3, %v1004_v4  ;;  %v1036_v53 = vld [vmem:[%s19301_s12 + $0x828] sm:$0xff]  ;;  %v1097_v55 = vld [vmem:[%s19301_s12 + $0xa10] sm:$0xff] }
 0x1ff   : > { %3902 = vmatprep.subr.bf16.mxu0 %v15196_v6  ;;  %v15236_v6 = vcombine.high %v1057_v57, %v1061_v61 }
 0x200   : > { %3723 = vmatpush1.bf16.msra.mxu1 %v15129_v14  ;;  %v15235_v14 = vcombine.low %v1057_v57, %v1061_v61 }
 0x201   : > { %3724 = vmatprep.subr.bf16.mxu1 %v15138_v17  ;;  %v1008_v17 = vld [vmem:[%s19301_s12 + $0x748] sm:$0xff] }
 0x202   : > { %3903 = vmatpush1.bf16.msra.mxu0 %v15195_v16  ;;  %v15178_v16 = vcombine.high %v1000_v3, %v1004_v4  ;;  %v15185_v35 = vcombine.low %v1008_v17, %v1012_v21  ;;  %v1044_v3 = vld [vmem:[%s19301_s12 + $0x868] sm:$0xff]  ;;  %v1105_v4 = vld [vmem:[%s19301_s12 + $0xa50] sm:$0xff] }
 0x203   : > { %3904 = vmatprep.subr.bf16.mxu0 %v15204_v25  ;;  %v1077_v25 = vld [vmem:[%s19301_s12 + $0x970] sm:$0xff] }
 0x204   : > { %3725 = vmatpush1.bf16.msra.mxu1 %v15137_v28  ;;  %v15243_v28 = vcombine.low %v1065_v5, %v1069_v7  ;;  %v15252_v33 = vcombine.high %v1073_v22, %v1077_v25 }
 0x205   : > { %3726 = vmatprep.subr.bf16.mxu1 %v15146_v30  ;;  %v1016_v30 = vld [vmem:[%s19301_s12 + $0x788] sm:$0xff] }
 0x206   : > { %3905 = vmatpush1.bf16.msra.mxu0 %v15203_v29  ;;  %v15186_v29 = vcombine.high %v1008_v17, %v1012_v21  ;;  %v15193_v46 = vcombine.low %v1016_v30, %v1020_v31  ;;  %v1113_v21 = vld [vmem:[%s19301_s12 + $0xa90] sm:$0xff] }
 0x207   : > { %3915 = vmatprep.subr.bf16.mxu0 %v15212_v34  ;;  %v1085_v34 = vld [vmem:[%s19301_s12 + $0x9b0] sm:$0xff] }
 0x208   : > { %3727 = vmatpush1.bf16.msra.mxu1 %v15145_v36  ;;  %v15251_v36 = vcombine.low %v1073_v22, %v1077_v25  ;;  %v15260_v1 = vcombine.high %v1081_v32, %v1085_v34  ;;  %v1117_v22 = vld [vmem:[%s19301_s12 + $0xab0] sm:$0xff] }
 0x209   : > { %3907 = vmatmul.mubr.bf16.vlgmr.msra.gmra.mrb[4].mxu0 %v19549_v56  ;;  %3728 = vmatprep.subr.bf16.mxu1 %v15154_v39  ;;  %v1024_v39 = vld [vmem:[%s19301_s12 + $0x7c8] sm:$0xff] }
 0x20a   : > { %3916 = vmatpush1.bf16.msra.mxu0 %v15211_v37  ;;  %3947 = vmatprep.mubr.bf16.mxu0 %v19384_v20  ;;  %v15194_v37 = vcombine.high %v1016_v30, %v1020_v31  ;;  %v15201_v61 = vcombine.low %v1024_v39, %v1028_v40  ;;  %v1121_v31 = vld [vmem:[%s19301_s12 + $0xad0] sm:$0xff] }
 0x20b   : > { %3917 = vmatprep.subr.bf16.mxu0 %v15220_v44  ;;  %v1093_v44 = vld [vmem:[%s19301_s12 + $0x9f0] sm:$0xff] }
 0x20c   : > { %3729 = vmatpush1.bf16.msra.mxu1 %v15153_v47  ;;  %v15259_v47 = vcombine.low %v1081_v32, %v1085_v34  ;;  %v15268_v57 = vcombine.high %v1089_v42, %v1093_v44  ;;  %v1125_v32 = vld [vmem:[%s19301_s12 + $0xaf0] sm:$0xff] }
 0x20d   : > { %3730 = vmatprep.subr.bf16.mxu1 %v15162_v51  ;;  %v1032_v51 = vld [vmem:[%s19301_s12 + $0x808] sm:$0xff] }
 0x20e   : > { %3918 = vmatpush1.bf16.msra.mxu0 %v15219_v50  ;;  %v15202_v50 = vcombine.high %v1024_v39, %v1028_v40  ;;  %v15209_v7 = vcombine.low %v1032_v51, %v1036_v53  ;;  %v1129_v40 = vld [vmem:[%s19301_s12 + $0xb10] sm:$0xff] }
 0x20f   : > { %3919 = vmatprep.subr.bf16.mxu0 %v15228_v60  ;;  %v1101_v60 = vld [vmem:[%s19301_s12 + $0xa30] sm:$0xff] }
 0x210   : > { %3731 = vmatpush1.bf16.msra.mxu1 %v15161_v62  ;;  %v15267_v62 = vcombine.low %v1089_v42, %v1093_v44  ;;  %v15276_v5 = vcombine.high %v1097_v55, %v1101_v60  ;;  %v1133_v42 = vld [vmem:[%s19301_s12 + $0xb30] sm:$0xff] }
 0x211   : > { %3732 = vmatprep.subr.bf16.mxu1 %v15170_v2  ;;  %v1040_v2 = vld [vmem:[%s19301_s12 + $0x848] sm:$0xff] }
 0x212   : > { %3920 = vmatpush1.bf16.msra.mxu0 %v15227_v63  ;;  %v15210_v63 = vcombine.high %v1032_v51, %v1036_v53  ;;  %v15218_v17 = vcombine.high %v1040_v2, %v1044_v3  ;;  %v15217_v25 = vcombine.low %v1040_v2, %v1044_v3  ;;  %v1137_v53 = vld [vmem:[%s19301_s12 + $0xb50] sm:$0xff] }
 0x213   : > { %3921 = vmatprep.subr.bf16.mxu0 %v15236_v6  ;;  %v1109_v6 = vld [vmem:[%s19301_s12 + $0xa70] sm:$0xff] }
 0x214   : > { %3733 = vmatpush1.bf16.msra.mxu1 %v15169_v9  ;;  %v1048_v9 = vld [vmem:[%s19301_s12 + $0x888] sm:$0xff]  ;;  %v1145_v3 = vld [vmem:[%s19301_s12 + $0xb90] sm:$0xff] }
 0x215   : > { %3734 = vmatprep.subr.bf16.mxu1 %v15178_v16  ;;  %v15275_v16 = vcombine.low %v1097_v55, %v1101_v60  ;;  %v1141_v55 = vld [vmem:[%s19301_s12 + $0xb70] sm:$0xff] }
 0x216   : > { %3922 = vmatpush1.bf16.msra.mxu0 %v15235_v14  ;;  %v1052_v14 = vld [vmem:[%s19301_s12 + $0x8a8] sm:$0xff] }
 0x217   : > { %3923 = vmatprep.subr.bf16.mxu0 %v15244_v23  ;;  %v15284_v23 = vcombine.high %v1105_v4, %v1109_v6  ;;  %v15226_v30 = vcombine.high %v1048_v9, %v1052_v14  ;;  %v15225_v34 = vcombine.low %v1048_v9, %v1052_v14  ;;  %v1092_v9 = vld [vmem:[%s19301_s12 + $0x9e8] sm:$0xff]  ;;  %v15315_v14 = vcombine.low %v1137_v53, %v1141_v55 }
 0x218   : > { %3735 = vmatpush1.bf16.msra.mxu1 %v15177_v27  ;;  %v1056_v27 = vld [vmem:[%s19301_s12 + $0x8c8] sm:$0xff] }
 0x219   : > { %3736 = vmatprep.subr.bf16.mxu1 %v15186_v29  ;;  %v15283_v29 = vcombine.low %v1105_v4, %v1109_v6  ;;  %v1149_v4 = vld [vmem:[%s19301_s12 + $0xbb0] sm:$0xff] }
 0x21a   : > { %3924 = vmatpush1.bf16.msra.mxu0 %v15243_v28  ;;  %v1060_v28 = vld [vmem:[%s19301_s12 + $0x8e8] sm:$0xff] }
 0x21b   : > { %3925 = vmatprep.subr.bf16.mxu0 %v15252_v33  ;;  %v15292_v33 = vcombine.high %v1113_v21, %v1117_v22  ;;  %v15234_v39 = vcombine.high %v1056_v27, %v1060_v28  ;;  %v15233_v44 = vcombine.low %v1056_v27, %v1060_v28  ;;  %v1100_v27 = vld [vmem:[%s19301_s12 + $0xa28] sm:$0xff]  ;;  %v15323_v28 = vcombine.low %v1145_v3, %v1149_v4 }
 0x21c   : > { %3737 = vmatpush1.bf16.msra.mxu1 %v15185_v35  ;;  %v1064_v35 = vld [vmem:[%s19301_s12 + $0x908] sm:$0xff] }
 0x21d   : > { %3738 = vmatprep.subr.bf16.mxu1 %v15194_v37  ;;  %v15291_v37 = vcombine.low %v1113_v21, %v1117_v22  ;;  %v1157_v21 = vld [vmem:[%s19301_s12 + $0xbf0] sm:$0xff]  ;;  %v15324_v22 = vcombine.high %v1145_v3, %v1149_v4 }
 0x21e   : > { %3926 = vmatpush1.bf16.msra.mxu0 %v15251_v36  ;;  %v1068_v36 = vld [vmem:[%s19301_s12 + $0x928] sm:$0xff]  ;;  %v1189_v3 = vld [vmem:[%s19301_s12 + $0xcf0] sm:$0xff] }
 0x21f   : > { %3927 = vmatprep.subr.bf16.mxu0 %v15260_v1  ;;  %v15300_v1 = vcombine.high %v1121_v31, %v1125_v32  ;;  %v15242_v51 = vcombine.high %v1064_v35, %v1068_v36  ;;  %v15241_v60 = vcombine.low %v1064_v35, %v1068_v36  ;;  %v1108_v35 = vld [vmem:[%s19301_s12 + $0xa68] sm:$0xff] }
 0x220   : > { %3739 = vmatpush1.bf16.msra.mxu1 %v15193_v46  ;;  %v1072_v46 = vld [vmem:[%s19301_s12 + $0x948] sm:$0xff] }
 0x221   : > { %3740 = vmatprep.subr.bf16.mxu1 %v15202_v50  ;;  %v15299_v50 = vcombine.low %v1121_v31, %v1125_v32  ;;  %v1165_v31 = vld [vmem:[%s19301_s12 + $0xc30] sm:$0xff] }
 0x222   : > { %3928 = vmatpush1.bf16.msra.mxu0 %v15259_v47  ;;  %v1076_v47 = vld [vmem:[%s19301_s12 + $0x968] sm:$0xff] }
 0x223   : > { %3929 = vmatprep.subr.bf16.mxu0 %v15268_v57  ;;  %v15308_v57 = vcombine.high %v1129_v40, %v1133_v42  ;;  %v15250_v2 = vcombine.high %v1072_v46, %v1076_v47  ;;  %v15249_v6 = vcombine.low %v1072_v46, %v1076_v47  ;;  %v1116_v46 = vld [vmem:[%s19301_s12 + $0xaa8] sm:$0xff] }
 0x224   : > { %3741 = vmatpush1.bf16.msra.mxu1 %v15201_v61  ;;  %v1080_v61 = vld [vmem:[%s19301_s12 + $0x988] sm:$0xff] }
 0x225   : > { %3751 = vmatprep.subr.bf16.mxu1 %v15210_v63  ;;  %v15307_v63 = vcombine.low %v1129_v40, %v1133_v42  ;;  %v1173_v40 = vld [vmem:[%s19301_s12 + $0xc70] sm:$0xff] }
 0x226   : > { %3930 = vmatpush1.bf16.msra.mxu0 %v15267_v62  ;;  %v1084_v62 = vld [vmem:[%s19301_s12 + $0x9a8] sm:$0xff] }
 0x227   : > { %3931 = vmatprep.subr.bf16.mxu0 %v15276_v5  ;;  %3743 = vmatmul.mubr.bf16.vlgmr.msra.gmra.mrb[4].mxu1 %v19549_v56  ;;  %v15316_v5 = vcombine.high %v1137_v53, %v1141_v55  ;;  %v1181_v53 = vld [vmem:[%s19301_s12 + $0xcb0] sm:$0xff] }
 0x228   : > { %3752 = vmatpush1.bf16.msra.mxu1 %v15209_v7  ;;  %3783 = vmatprep.mubr.bf16.mxu1 %v19384_v20  ;;  %v1088_v7 = vld [vmem:[%s19301_s12 + $0x9c8] sm:$0xff] }
 0x229   : > { %3753 = vmatprep.subr.bf16.mxu1 %v15218_v17  ;;  %v1153_v17 = vld [vmem:[%s19301_s12 + $0xbd0] sm:$0xff] }
 0x22a   : > { %3932 = vmatpush1.bf16.msra.mxu0 %v15275_v16  ;;  %v15258_v16 = vcombine.high %v1080_v61, %v1084_v62  ;;  %v15332_v32 = vcombine.high %v1153_v17, %v1157_v21  ;;  %v15331_v36 = vcombine.low %v1153_v17, %v1157_v21  ;;  %v1197_v17 = vld [vmem:[%s19301_s12 + $0xd30] sm:$0xff] }
 0x22b   : > { %3933 = vmatprep.subr.bf16.mxu0 %v15284_v23  ;;  %v15257_v23 = vcombine.low %v1080_v61, %v1084_v62  ;;  %v1124_v61 = vld [vmem:[%s19301_s12 + $0xae8] sm:$0xff] }
 0x22c   : > { %3754 = vmatpush1.bf16.msra.mxu1 %v15217_v25  ;;  %v1096_v25 = vld [vmem:[%s19301_s12 + $0xa08] sm:$0xff] }
 0x22d   : > { %3755 = vmatprep.subr.bf16.mxu1 %v15226_v30  ;;  %v1161_v30 = vld [vmem:[%s19301_s12 + $0xc10] sm:$0xff] }
 0x22e   : > { %3934 = vmatpush1.bf16.msra.mxu0 %v15283_v29  ;;  %v15266_v29 = vcombine.high %v1088_v7, %v1092_v9  ;;  %v15340_v42 = vcombine.high %v1161_v30, %v1165_v31  ;;  %v15339_v47 = vcombine.low %v1161_v30, %v1165_v31  ;;  %v1205_v30 = vld [vmem:[%s19301_s12 + $0xd70] sm:$0xff] }
 0x22f   : > { %3935 = vmatprep.subr.bf16.mxu0 %v15292_v33  ;;  %v15265_v33 = vcombine.low %v1088_v7, %v1092_v9  ;;  %v1132_v7 = vld [vmem:[%s19301_s12 + $0xb28] sm:$0xff] }
 0x230   : > { %3756 = vmatpush1.bf16.msra.mxu1 %v15225_v34  ;;  %v1104_v34 = vld [vmem:[%s19301_s12 + $0xa48] sm:$0xff] }
 0x231   : > { %3757 = vmatprep.subr.bf16.mxu1 %v15234_v39  ;;  %v1169_v39 = vld [vmem:[%s19301_s12 + $0xc50] sm:$0xff] }
 0x232   : > { %3936 = vmatpush1.bf16.msra.mxu0 %v15291_v37  ;;  %v15274_v37 = vcombine.high %v1096_v25, %v1100_v27  ;;  %v15348_v55 = vcombine.high %v1169_v39, %v1173_v40  ;;  %v15347_v62 = vcombine.low %v1169_v39, %v1173_v40  ;;  %v1213_v39 = vld [vmem:[%s19301_s12 + $0xdb0] sm:$0xff] }
 0x233   : > { %3937 = vmatprep.subr.bf16.mxu0 %v15300_v1  ;;  %v15273_v1 = vcombine.low %v1096_v25, %v1100_v27  ;;  %v1140_v25 = vld [vmem:[%s19301_s12 + $0xb68] sm:$0xff] }
 0x234   : > { %3758 = vmatpush1.bf16.msra.mxu1 %v15233_v44  ;;  %v1112_v44 = vld [vmem:[%s19301_s12 + $0xa88] sm:$0xff] }
 0x235   : > { %3759 = vmatprep.subr.bf16.mxu1 %v15242_v51  ;;  %v1177_v51 = vld [vmem:[%s19301_s12 + $0xc90] sm:$0xff] }
 0x236   : > { %3938 = vmatpush1.bf16.msra.mxu0 %v15299_v50  ;;  %v15282_v50 = vcombine.high %v1104_v34, %v1108_v35  ;;  %v15356_v4 = vcombine.high %v1177_v51, %v1181_v53  ;;  %v15355_v9 = vcombine.low %v1177_v51, %v1181_v53  ;;  %v1221_v51 = vld [vmem:[%s19301_s12 + $0xdf0] sm:$0xff] }
 0x237   : > { %3939 = vmatprep.subr.bf16.mxu0 %v15308_v57  ;;  %v15281_v57 = vcombine.low %v1104_v34, %v1108_v35  ;;  %v1148_v34 = vld [vmem:[%s19301_s12 + $0xba8] sm:$0xff] }
 0x238   : > { %3760 = vmatpush1.bf16.msra.mxu1 %v15241_v60  ;;  %v1120_v60 = vld [vmem:[%s19301_s12 + $0xac8] sm:$0xff] }
 0x239   : > { %3761 = vmatprep.subr.bf16.mxu1 %v15250_v2  ;;  %v1185_v2 = vld [vmem:[%s19301_s12 + $0xcd0] sm:$0xff] }
 0x23a   : > { %3940 = vmatpush1.bf16.msra.mxu0 %v15307_v63  ;;  %v15290_v63 = vcombine.high %v1112_v44, %v1116_v46  ;;  %v15364_v21 = vcombine.high %v1185_v2, %v1189_v3  ;;  %v15363_v27 = vcombine.low %v1185_v2, %v1189_v3  ;;  %v4177_v3 = vld [vmem:[%s19309_s16] sm:$0xff] }
 0x23b   : > { %3941 = vmatprep.subr.bf16.mxu0 %v15316_v5  ;;  %v15289_v5 = vcombine.low %v1112_v44, %v1116_v46  ;;  %v1156_v44 = vld [vmem:[%s19301_s12 + $0xbe8] sm:$0xff] }
 0x23c   : > { %3762 = vmatpush1.bf16.msra.mxu1 %v15249_v6  ;;  %v1128_v6 = vld [vmem:[%s19301_s12 + $0xb08] sm:$0xff] }
 0x23d   : > { %3763 = vmatprep.subr.bf16.mxu1 %v15258_v16  ;;  %v1193_v16 = vld [vmem:[%s19301_s12 + $0xd10] sm:$0xff] }
 0x23e   : > { %3942 = vmatpush1.bf16.msra.mxu0 %v15315_v14  ;;  %v15298_v14 = vcombine.high %v1120_v60, %v1124_v61  ;;  %v15372_v31 = vcombine.high %v1193_v16, %v1197_v17  ;;  %v15371_v35 = vcombine.low %v1193_v16, %v1197_v17  ;;  %v1172_v16 = vld [vmem:[%s19301_s12 + $0xc68] sm:$0xff] }
 0x23f   : > { %3943 = vmatprep.subr.bf16.mxu0 %v15324_v22  ;;  %v15297_v22 = vcombine.low %v1120_v60, %v1124_v61  ;;  %v1160_v60 = vld [vmem:[%s19301_s12 + $0xc08] sm:$0xff] }
 0x240   : > { %3764 = vmatpush1.bf16.msra.mxu1 %v15257_v23  ;;  %v1136_v23 = vld [vmem:[%s19301_s12 + $0xb48] sm:$0xff] }
 0x241   : > { %3765 = vmatprep.subr.bf16.mxu1 %v15266_v29  ;;  %v1201_v29 = vld [vmem:[%s19301_s12 + $0xd50] sm:$0xff]  ;;  %v1164_v61 = vld [vmem:[%s19301_s12 + $0xc28] sm:$0xff] }
 0x242   : > { %3944 = vmatpush1.bf16.msra.mxu0 %v15323_v28  ;;  %v15306_v28 = vcombine.high %v1128_v6, %v1132_v7  ;;  %v15380_v40 = vcombine.high %v1201_v29, %v1205_v30  ;;  %v15379_v46 = vcombine.low %v1201_v29, %v1205_v30  ;;  %v1180_v29 = vld [vmem:[%s19301_s12 + $0xca8] sm:$0xff] }
 0x243   : > { %3945 = vmatprep.subr.bf16.mxu0 %v15332_v32  ;;  %v15305_v32 = vcombine.low %v1128_v6, %v1132_v7 }
 0x244   : > { %3766 = vmatpush1.bf16.msra.mxu1 %v15265_v33  ;;  %v1144_v33 = vld [vmem:[%s19301_s12 + $0xb88] sm:$0xff] }
 0x245   : > { %3767 = vmatprep.subr.bf16.mxu1 %v15274_v37  ;;  %v1209_v37 = vld [vmem:[%s19301_s12 + $0xd90] sm:$0xff] }
 0x246   : > { %3946 = vmatpush1.bf16.msra.mxu0 %v15331_v36  ;;  %v15314_v36 = vcombine.high %v1136_v23, %v1140_v25  ;;  %v15388_v53 = vcombine.high %v1209_v37, %v1213_v39 }
 0x247   : > { %3956 = vmatprep.subr.bf16.mxu0 %v15340_v42  ;;  %v15313_v42 = vcombine.low %v1136_v23, %v1140_v25  ;;  %v4189_v23 = vld [vmem:[%s19309_s16 + $0x60] sm:$0xff] }
 0x248   : > { %3768 = vmatpush1.bf16.msra.mxu1 %v15273_v1  ;;  %v1152_v1 = vld [vmem:[%s19301_s12 + $0xbc8] sm:$0xff] }
 0x249   : > { %3948 = vmatmul.mubr.bf16.vlgmr.msra.gmra.mrb[4].mxu0 %v19453_v54  ;;  %3769 = vmatprep.subr.bf16.mxu1 %v15282_v50  ;;  %v1217_v50 = vld [vmem:[%s19301_s12 + $0xdd0] sm:$0xff]  ;;  %v15330_v2 = vcombine.high %v1152_v1, %v1156_v44 }
 0x24a   : > { %3957 = vmatpush1.bf16.msra.mxu0 %v15339_v47  ;;  %3988 = vmatprep.mubr.bf16.mxu0 %v18858_v10  ;;  %v15322_v47 = vcombine.high %v1144_v33, %v1148_v34  ;;  %v15396_v6 = vcombine.high %v1217_v50, %v1221_v51  ;;  %v15395_v17 = vcombine.low %v1217_v50, %v1221_v51  ;;  %v1196_v50 = vld [vmem:[%s19301_s12 + $0xd28] sm:$0xff] }
 0x24b   : > { %3958 = vmatprep.subr.bf16.mxu0 %v15348_v55 }
 0x24c   : > { %3770 = vmatpush1.bf16.msra.mxu1 %v15281_v57  ;;  %v15321_v57 = vcombine.low %v1144_v33, %v1148_v34  ;;  %v4197_v33 = vld [vmem:[%s19309_s16 + $0xa0] sm:$0xff] }
 0x24d   : > { %3771 = vmatprep.subr.bf16.mxu1 %v15290_v63  ;;  %v15387_v63 = vcombine.low %v1209_v37, %v1213_v39  ;;  %v1188_v37 = vld [vmem:[%s19301_s12 + $0xce8] sm:$0xff] }
 0x24e   : > { %3959 = vmatpush1.bf16.msra.mxu0 %v15347_v62 }
 0x24f   : > { %3960 = vmatprep.subr.bf16.mxu0 %v15356_v4  ;;  %v4181_v4 = vld [vmem:[%s19309_s16 + $0x20] sm:$0xff] }
 0x250   : > { %3772 = vmatpush1.bf16.msra.mxu1 %v15289_v5  ;;  %v15400_v25 = vcombine.high %v4177_v3, %v4181_v4  ;;  %v15399_v30 = vcombine.low %v4177_v3, %v4181_v4  ;;  %v1204_v3 = vld [vmem:[%s19301_s12 + $0xd68] sm:$0xff] }
 0x251   : > { %3773 = vmatprep.subr.bf16.mxu1 %v15298_v14  ;;  %v1168_v14 = vld [vmem:[%s19301_s12 + $0xc48] sm:$0xff] }
 0x252   : > { %3961 = vmatpush1.bf16.msra.mxu0 %v15355_v9  ;;  %v15329_v9 = vcombine.low %v1152_v1, %v1156_v44  ;;  %v4205_v1 = vld [vmem:[%s19309_s16 + $0xe0] sm:$0xff] }
 0x253   : > { %3962 = vmatprep.subr.bf16.mxu0 %v15364_v21  ;;  %v15338_v21 = vcombine.high %v1160_v60, %v1164_v61 }
 0x254   : > { %3774 = vmatpush1.bf16.msra.mxu1 %v15297_v22  ;;  %v4185_v22 = vld [vmem:[%s19309_s16 + $0x40] sm:$0xff] }
 0x255   : > { %3775 = vmatprep.subr.bf16.mxu1 %v15306_v28  ;;  %v1176_v28 = vld [vmem:[%s19301_s12 + $0xc88] sm:$0xff]  ;;  %v15408_v34 = vcombine.high %v4185_v22, %v4189_v23  ;;  %v15407_v39 = vcombine.low %v4185_v22, %v4189_v23 }
 0x256   : > { %3963 = vmatpush1.bf16.msra.mxu0 %v15363_v27  ;;  %v15337_v27 = vcombine.low %v1160_v60, %v1164_v61  ;;  %v4213_v60 = vld [vmem:[%s19309_s16 + $0x120] sm:$0xff] }
 0x257   : > { %3964 = vmatprep.subr.bf16.mxu0 %v15372_v31  ;;  %v15346_v31 = vcombine.high %v1168_v14, %v1172_v16 }
 0x258   : > { %3776 = vmatpush1.bf16.msra.mxu1 %v15305_v32  ;;  %v4193_v32 = vld [vmem:[%s19309_s16 + $0x80] sm:$0xff] }
 0x259   : > { %3777 = vmatprep.subr.bf16.mxu1 %v15314_v36  ;;  %v1184_v36 = vld [vmem:[%s19301_s12 + $0xcc8] sm:$0xff]  ;;  %v15416_v44 = vcombine.high %v4193_v32, %v4197_v33  ;;  %v15415_v51 = vcombine.low %v4193_v32, %v4197_v33 }
 0x25a   : > { %3965 = vmatpush1.bf16.msra.mxu0 %v15371_v35  ;;  %v15345_v35 = vcombine.low %v1168_v14, %v1172_v16  ;;  %v1223_v14 = vld [vmem:[%s19307_s28] sm:$0xff] }
 0x25b   : > { %3966 = vmatprep.subr.bf16.mxu0 %v15380_v40  ;;  %v15354_v40 = vcombine.high %v1176_v28, %v1180_v29  ;;  %v1216_v32 = vld [vmem:[%s19301_s12 + $0xdc8] sm:$0xff] }
 0x25c   : > { %v19747_v55 = vpop.f32.mrb[0].mxu0  ;;  %3778 = vmatpush1.bf16.msra.mxu1 %v15313_v42  ;;  %v4201_v42 = vld [vmem:[%s19309_s16 + $0xc0] sm:$0xff]  ;;  %v1220_v33 = vld [vmem:[%s19301_s12 + $0xde8] sm:$0xff] }
 0x25d   : > { %v19751_v62 = vpop.f32.mrb[1].mxu0  ;;  %3779 = vmatprep.subr.bf16.mxu1 %v15322_v47  ;;  %v1192_v47 = vld [vmem:[%s19301_s12 + $0xd08] sm:$0xff]  ;;  %v15424_v61 = vcombine.high %v4201_v42, %v4205_v1  ;;  %v15423_v4 = vcombine.low %v4201_v42, %v4205_v1 }
 0x25e   : > { %3967 = vmatpush1.bf16.msra.mxu0 %v15379_v46  ;;  %v3666_v5 = vpop.f32.mrb[2].mxu0  ;;  %v15353_v46 = vcombine.low %v1176_v28, %v1180_v29  ;;  %v15369_v16 = vcombine.low %v1192_v47, %v1196_v50  ;;  %v1228_v29 = vrot.slane %v1223_v14, %v19415_v11 }
 0x25f   : > { %3968 = vmatprep.subr.bf16.mxu0 %v15388_v53  ;;  %v3667_v7 = vpop.f32.mrb[3].mxu0  ;;  %v15362_v53 = vcombine.high %v1184_v36, %v1188_v37  ;;  %v15370_v5 = vcombine.high %v1192_v47, %v1196_v50  ;;  %v778_v50 = vld [vmem:[%s19301_s12 + $0x18] sm:$0xff] }
 0x260   : > { %3780 = vmatpush1.bf16.msra.mxu1 %v15321_v57  ;;  %v4209_v57 = vld [vmem:[%s19309_s16 + $0x100] sm:$0xff] }
 0x261   : > { %3781 = vmatprep.subr.bf16.mxu1 %v15330_v2  ;;  %v1200_v2 = vld [vmem:[%s19301_s12 + $0xd48] sm:$0xff]  ;;  %v4221_v7 = vld [vmem:[%s19309_s16 + $0x160] sm:$0xff]  ;;  %v15431_v22 = vcombine.low %v4209_v57, %v4213_v60 }
 0x262   : > { %3969 = vmatpush1.bf16.msra.mxu0 %v15387_v63  ;;  %v15361_v63 = vcombine.low %v1184_v36, %v1188_v37  ;;  %v15378_v23 = vcombine.high %v1200_v2, %v1204_v3  ;;  %v4233_v36 = vld [vmem:[%s19309_s16 + $0x1c0] sm:$0xff] }
 0x263   : > { %3970 = vmatprep.subr.bf16.mxu0 %v15396_v6  ;;  %v4217_v6 = vld [vmem:[%s19309_s16 + $0x140] sm:$0xff] }
 0x264   : > { %3782 = vmatpush1.bf16.msra.mxu1 %v15329_v9  ;;  %v15432_v9 = vcombine.high %v4209_v57, %v4213_v60  ;;  %v15440_v28 = vcombine.high %v4217_v6, %v4221_v7  ;;  %v4237_v37 = vld [vmem:[%s19309_s16 + $0x1e0] sm:$0xff] }
 0x265   : > { %3792 = vmatprep.subr.bf16.mxu1 %v15338_v21  ;;  %v1212_v21 = vld [vmem:[%s19301_s12 + $0xda8] sm:$0xff] }
 0x266   : > { %3971 = vmatpush1.bf16.msra.mxu0 %v15395_v17  ;;  %v1208_v17 = vld [vmem:[%s19301_s12 + $0xd88] sm:$0xff] }
 0x267   : > { %7291 = vmatprep.subr.bf16.mxu0 %v15400_v25  ;;  %3784 = vmatmul.mubr.bf16.vlgmr.msra.gmra.mrb[4].mxu1 %v19453_v54  ;;  %v4225_v25 = vld [vmem:[%s19309_s16 + $0x180] sm:$0xff]  ;;  %v15385_v47 = vcombine.low %v1208_v17, %v1212_v21 }
 0x268   : > { %3793 = vmatpush1.bf16.msra.mxu1 %v15337_v27  ;;  %3824 = vmatprep.mubr.bf16.mxu1 %v18858_v10  ;;  %v4229_v27 = vld [vmem:[%s19309_s16 + $0x1a0] sm:$0xff] }
 0x269   : > { %3989 = vmatmul.mubr.bf16.vlgmr.msra.gmra.mrb[4].mxu0 %v19504_v24  ;;  %3794 = vmatprep.subr.bf16.mxu1 %v15346_v31  ;;  %v15377_v31 = vcombine.low %v1200_v2, %v1204_v3  ;;  %v15447_v60 = vcombine.low %v4225_v25, %v4229_v27  ;;  %v4245_v2 = vld [vmem:[%s19309_s16 + $0x220] sm:$0xff] }
 0x26a   : > { %7292 = vmatpush1.bf16.msra.mxu0 %v15399_v30  ;;  %v1232_v30 = vrot.slane %v1223_v14, %v19353_v58 }
 0x26b   : > { %7293 = vmatprep.subr.bf16.mxu0 %v15408_v34  ;;  %v15439_v34 = vcombine.low %v4217_v6, %v4221_v7  ;;  %v15393_v6 = vcombine.low %v1216_v32, %v1220_v33  ;;  %v790_v7 = vld [vmem:[%s19301_s12 + $0x78] sm:$0xff] }
 0x26c   : > { %3795 = vmatpush1.bf16.msra.mxu1 %v15345_v35  ;;  %v15386_v35 = vcombine.high %v1208_v17, %v1212_v21  ;;  %v4253_v17 = vld [vmem:[%s19309_s16 + $0x260] sm:$0xff] }
 0x26d   : > { %3796 = vmatprep.subr.bf16.mxu1 %v15354_v40  ;;  %v15448_v40 = vcombine.high %v4225_v25, %v4229_v27  ;;  %v798_v25 = vld [vmem:[%s19301_s12 + $0xb8] sm:$0xff] }
 0x26e   : > { %7294 = vmatpush1.bf16.msra.mxu0 %v15407_v39 }
 0x26f   : > { %7295 = vmatprep.subr.bf16.mxu0 %v15416_v44 }
 0x270   : > { %3797 = vmatpush1.bf16.msra.mxu1 %v15353_v46 }
 0x271   : > { %3798 = vmatprep.subr.bf16.mxu1 %v15362_v53 }
 0x272   : > { %7296 = vmatpush1.bf16.msra.mxu0 %v15415_v51  ;;  %v782_v51 = vld [vmem:[%s19301_s12 + $0x38] sm:$0xff] }
 0x273   : > { %7297 = vmatprep.subr.bf16.mxu0 %v15424_v61  ;;  %v15394_v61 = vcombine.high %v1216_v32, %v1220_v33  ;;  %v14958_v14 = vcombine.high %v778_v50, %v782_v51  ;;  %v802_v33 = vld [vmem:[%s19301_s12 + $0xd8] sm:$0xff] }
 0x274   : > { %3799 = vmatpush1.bf16.msra.mxu1 %v15361_v63  ;;  %v4241_v63 = vld [vmem:[%s19309_s16 + $0x200] sm:$0xff] }
 0x275   : > { %3800 = vmatprep.subr.bf16.mxu1 %v15370_v5  ;;  %v15463_v27 = vcombine.low %v4241_v63, %v4245_v2 }
 0x276   : > { %7298 = vmatpush1.bf16.msra.mxu0 %v15423_v4  ;;  %v15456_v4 = vcombine.high %v4233_v36, %v4237_v37 }
 0x277   : > { %7299 = vmatprep.subr.bf16.mxu0 %v15432_v9  ;;  %v15455_v9 = vcombine.low %v4233_v36, %v4237_v37  ;;  %v4265_v37 = vld [vmem:[%s19309_s16 + $0x2c0] sm:$0xff] }
 0x278   : > { %3801 = vmatpush1.bf16.msra.mxu1 %v15369_v16  ;;  %v4249_v16 = vld [vmem:[%s19309_s16 + $0x240] sm:$0xff] }
 0x279   : > { %3802 = vmatprep.subr.bf16.mxu1 %v15378_v23  ;;  %v794_v23 = vld [vmem:[%s19301_s12 + $0x98] sm:$0xff] }
 0x27a   : > { %7300 = vmatpush1.bf16.msra.mxu0 %v15431_v22  ;;  %v3580_v39 = vpop.f32.mrb[0].mxu1  ;;  %v14957_v22 = vcombine.low %v778_v50, %v782_v51  ;;  %v14974_v36 = vcombine.high %v794_v23, %v798_v25  ;;  %v4277_v50 = vld [vmem:[%s19309_s16 + $0x320] sm:$0xff] }
 0x27b   : > { %7301 = vmatprep.subr.bf16.mxu0 %v15440_v28  ;;  %v16815_v42 = vadd.f32 %v3580_v39, %v1228_v29  ;;  %v3582_v1 = vpop.f32.mrb[1].mxu1  ;;  %v4257_v29 = vld [vmem:[%s19309_s16 + $0x280] sm:$0xff] }
 0x27c   : > { %v16817_v44 = vadd.f32 %v3582_v1, %v1232_v30  ;;  %v3584_v46 = vpop.f32.mrb[2].mxu1  ;;  %3803 = vmatpush1.bf16.msra.mxu1 %v15377_v31  ;;  %v4261_v30 = vld [vmem:[%s19309_s16 + $0x2a0] sm:$0xff]  ;;  %v15472_v31 = vcombine.high %v4249_v16, %v4253_v17  ;;  %v810_v1 = vld [vmem:[%s19301_s12 + $0x118] sm:$0xff] }
 0x27d   : > { %v19792_v53 = vadd.f32 %v16815_v42, %v19747_v55  ;;  %v3585_v57 = vpop.f32.mrb[3].mxu1  ;;  %3804 = vmatprep.subr.bf16.mxu1 %v15386_v35  ;;  %v786_v55 = vld [vmem:[%s19301_s12 + $0x58] sm:$0xff]  ;;  %v15471_v35 = vcombine.low %v4249_v16, %v4253_v17  ;;  %v4269_v39 = vld [vmem:[%s19309_s16 + $0x2e0] sm:$0xff]  ;;  %v14973_v42 = vcombine.low %v794_v23, %v798_v25 }
 0x27e   : > { %7302 = vmatpush1.bf16.msra.mxu0 %v15439_v34  ;;  %v16818_v3 = vadd.f32 %v16817_v44, %v19751_v62  ;;  %v15464_v62 = vcombine.high %v4241_v63, %v4245_v2  ;;  %v14966_v28 = vcombine.high %v786_v55, %v790_v7  ;;  %v14965_v32 = vcombine.low %v786_v55, %v790_v7  ;;  %v806_v34 = vld [vmem:[%s19301_s12 + $0xf8] sm:$0xff]  ;;  %v4289_v16 = vld [vmem:[%s19309_s16 + $0x380] sm:$0xff] }
 0x27f   : > { %7303 = vmatprep.subr.bf16.mxu0 %v15448_v40  ;;  %v15480_v40 = vcombine.high %v4257_v29, %v4261_v30  ;;  %v814_v44 = vld [vmem:[%s19301_s12 + $0x138] sm:$0xff]  ;;  %v14982_v46 = vcombine.high %v802_v33, %v806_v34  ;;  %v15488_v51 = vcombine.high %v4265_v37, %v4269_v39  ;;  %v14981_v57 = vcombine.low %v802_v33, %v806_v34  ;;  %v4293_v17 = vld [vmem:[%s19309_s16 + $0x3a0] sm:$0xff] }
 0x280   : > { %v4162_v5 = vmax.f32 %v16818_v3, 0.0  ;;  %3805 = vmatpush1.bf16.msra.mxu1 %v15385_v47  ;;  %v4273_v47 = vld [vmem:[%s19309_s16 + $0x300] sm:$0xff]  ;;  %v15487_v63 = vcombine.low %v4265_v37, %v4269_v39  ;;  %v14990_v2 = vcombine.high %v810_v1, %v814_v44  ;;  %v826_v55 = vld [vmem:[%s19301_s12 + $0x198] sm:$0xff] }
 0x281   : > { %3806 = vmatprep.subr.bf16.mxu1 %v15394_v61  ;;  %v822_v61 = vld [vmem:[%s19301_s12 + $0x178] sm:$0xff]  ;;  %v4281_v3 = vld [vmem:[%s19309_s16 + $0x340] sm:$0xff] }
 0x282   : > { %7304 = vmatpush1.bf16.msra.mxu0 %v15447_v60  ;;  %v19801_v21 = vpack.c.bf16 %v4162_v5, %v4162_v5  ;;  %v818_v60 = vld [vmem:[%s19301_s12 + $0x158] sm:$0xff]  ;;  %v15496_v5 = vcombine.high %v4273_v47, %v4277_v50 }
 0x283   : > { %7305 = vmatprep.subr.bf16.mxu0 %v15456_v4  ;;  %v4285_v4 = vld [vmem:[%s19309_s16 + $0x360] sm:$0xff]  ;;  %v830_v7 = vld [vmem:[%s19301_s12 + $0x1b8] sm:$0xff] }
 0x284   : > { %3807 = vmatpush1.bf16.msra.mxu1 %v15393_v6  ;;  %7323 = vmatprep.mubr.bf16.mxu0 %v19801_v21  ;;  %v14989_v6 = vcombine.low %v810_v1, %v814_v44  ;;  %v834_v23 = vld [vmem:[%s19301_s12 + $0x1d8] sm:$0xff]  ;;  %v4309_v1 = vld [vmem:[%s19309_s16 + $0x420] sm:$0xff] }
 0x285   : > { %3997 = vmatprep.subr.bf16.mxu1 %v14958_v14  ;;  %v14998_v14 = vcombine.high %v818_v60, %v822_v61  ;;  %v838_v25 = vld [vmem:[%s19301_s12 + $0x1f8] sm:$0xff] }
 0x286   : > { %7306 = vmatpush1.bf16.msra.mxu0 %v15455_v9  ;;  %v15495_v9 = vcombine.low %v4273_v47, %v4277_v50  ;;  %v842_v33 = vld [vmem:[%s19301_s12 + $0x218] sm:$0xff]  ;;  %v15013_v39 = vcombine.low %v834_v23, %v838_v25  ;;  %v4161_v47 = vmax.f32 %v19792_v53, 0.0 }
 0x287   : > { %7307 = vmatprep.subr.bf16.mxu0 %v15464_v62  ;;  %3825 = vmatmul.mubr.bf16.vlgmr.msra.gmra.mrb[4].mxu1 %v19504_v24  ;;  %v15504_v62 = vcombine.high %v4281_v3, %v4285_v4  ;;  %v846_v34 = vld [vmem:[%s19301_s12 + $0x238] sm:$0xff] }
 0x288   : > { %3998 = vmatpush1.bf16.msra.mxu1 %v14957_v22  ;;  %4029 = vmatprep.mubr.bf16.mxu1 %v19380_v19  ;;  %v15479_v19 = vcombine.low %v4257_v29, %v4261_v30  ;;  %v14997_v22 = vcombine.low %v818_v60, %v822_v61  ;;  %v4297_v29 = vld [vmem:[%s19309_s16 + $0x3c0] sm:$0xff] }
 0x289   : > { %3999 = vmatprep.subr.bf16.mxu1 %v14966_v28  ;;  %v15006_v28 = vcombine.high %v826_v55, %v830_v7  ;;  %v4301_v30 = vld [vmem:[%s19309_s16 + $0x3e0] sm:$0xff] }
 0x28a   : > { %7308 = vmatpush1.bf16.msra.mxu0 %v15463_v27  ;;  %v15503_v27 = vcombine.low %v4281_v3, %v4285_v4  ;;  %v15520_v37 = vcombine.high %v4297_v29, %v4301_v30  ;;  %v15519_v44 = vcombine.low %v4297_v29, %v4301_v30  ;;  %v4313_v60 = vld [vmem:[%s19309_s16 + $0x440] sm:$0xff]  ;;  %v19841_v4 = vpack.c.bf16 %v4161_v47, %v4161_v47 }
 0x28b   : > { %7309 = vmatprep.subr.bf16.mxu0 %v15472_v31  ;;  %v15512_v31 = vcombine.high %v4289_v16, %v4293_v17  ;;  %v4317_v61 = vld [vmem:[%s19309_s16 + $0x460] sm:$0xff] }
 0x28c   : > { %4000 = vmatpush1.bf16.msra.mxu1 %v14965_v32  ;;  %v15005_v32 = vcombine.low %v826_v55, %v830_v7  ;;  %v15536_v53 = vcombine.high %v4313_v60, %v4317_v61  ;;  %v4321_v55 = vld [vmem:[%s19309_s16 + $0x480] sm:$0xff] }
 0x28d   : > { %4001 = vmatprep.subr.bf16.mxu1 %v14974_v36  ;;  %v15014_v36 = vcombine.high %v834_v23, %v838_v25  ;;  %v4325_v7 = vld [vmem:[%s19309_s16 + $0x4a0] sm:$0xff] }
 0x28e   : > { %7310 = vmatpush1.bf16.msra.mxu0 %v15471_v35  ;;  %v15511_v35 = vcombine.low %v4289_v16, %v4293_v17  ;;  %v15535_v16 = vcombine.low %v4313_v60, %v4317_v61  ;;  %v15544_v17 = vcombine.high %v4321_v55, %v4325_v7  ;;  %v4329_v23 = vld [vmem:[%s19309_s16 + $0x4c0] sm:$0xff]  ;;  %v15543_v29 = vcombine.low %v4321_v55, %v4325_v7 }
 0x28f   : > { %7311 = vmatprep.subr.bf16.mxu0 %v15480_v40  ;;  %v850_v40 = vld [vmem:[%s19301_s12 + $0x258] sm:$0xff]  ;;  %v4333_v25 = vld [vmem:[%s19309_s16 + $0x4e0] sm:$0xff] }
 0x290   : > { %4002 = vmatpush1.bf16.msra.mxu1 %v14973_v42  ;;  %v4305_v42 = vld [vmem:[%s19309_s16 + $0x400] sm:$0xff]  ;;  %v15552_v30 = vcombine.high %v4329_v23, %v4333_v25 }
 0x291   : > { %4003 = vmatprep.subr.bf16.mxu1 %v14982_v46  ;;  %v854_v46 = vld [vmem:[%s19301_s12 + $0x278] sm:$0xff]  ;;  %v15528_v50 = vcombine.high %v4305_v42, %v4309_v1  ;;  %v15527_v3 = vcombine.low %v4305_v42, %v4309_v1  ;;  %v4345_v1 = vld [vmem:[%s19309_s16 + $0x540] sm:$0xff] }
 0x292   : > { %7312 = vmatpush1.bf16.msra.mxu0 %v15479_v19  ;;  %v15022_v19 = vcombine.high %v842_v33, %v846_v34  ;;  %v890_v42 = vld [vmem:[%s19301_s12 + $0x398] sm:$0xff]  ;;  %v4353_v60 = vld [vmem:[%s19309_s16 + $0x580] sm:$0xff] }
 0x293   : > { %7313 = vmatprep.subr.bf16.mxu0 %v15488_v51  ;;  %v15021_v51 = vcombine.low %v842_v33, %v846_v34  ;;  %v4337_v33 = vld [vmem:[%s19309_s16 + $0x500] sm:$0xff] }
 0x294   : > { %4004 = vmatpush1.bf16.msra.mxu1 %v14981_v57  ;;  %v858_v57 = vld [vmem:[%s19301_s12 + $0x298] sm:$0xff]  ;;  %v4341_v34 = vld [vmem:[%s19309_s16 + $0x520] sm:$0xff] }
 0x295   : > { %4005 = vmatprep.subr.bf16.mxu1 %v14990_v2  ;;  %v862_v2 = vld [vmem:[%s19301_s12 + $0x2b8] sm:$0xff]  ;;  %v15559_v47 = vcombine.low %v4337_v33, %v4341_v34  ;;  %v4357_v61 = vld [vmem:[%s19309_s16 + $0x5a0] sm:$0xff] }
 0x296   : > { %7314 = vmatpush1.bf16.msra.mxu0 %v15487_v63  ;;  %v15030_v63 = vcombine.high %v850_v40, %v854_v46  ;;  %v4361_v55 = vld [vmem:[%s19309_s16 + $0x5c0] sm:$0xff] }
 0x297   : > { %7315 = vmatprep.subr.bf16.mxu0 %v15496_v5  ;;  %v15029_v5 = vcombine.low %v850_v40, %v854_v46  ;;  %v894_v46 = vld [vmem:[%s19301_s12 + $0x3b8] sm:$0xff]  ;;  %v4365_v7 = vld [vmem:[%s19309_s16 + $0x5e0] sm:$0xff] }
 0x298   : > { %4006 = vmatpush1.bf16.msra.mxu1 %v14989_v6  ;;  %v866_v6 = vld [vmem:[%s19301_s12 + $0x2d8] sm:$0xff] }
 0x299   : > { %4007 = vmatprep.subr.bf16.mxu1 %v14998_v14  ;;  %v870_v14 = vld [vmem:[%s19301_s12 + $0x2f8] sm:$0xff] }
 0x29a   : > { %7316 = vmatpush1.bf16.msra.mxu0 %v15495_v9  ;;  %v15038_v9 = vcombine.high %v858_v57, %v862_v2 }
 0x29b   : > { %7317 = vmatprep.subr.bf16.mxu0 %v15504_v62  ;;  %v15037_v62 = vcombine.low %v858_v57, %v862_v2  ;;  %v898_v57 = vld [vmem:[%s19301_s12 + $0x3d8] sm:$0xff] }
 0x29c   : > { %4008 = vmatpush1.bf16.msra.mxu1 %v14997_v22  ;;  %v874_v22 = vld [vmem:[%s19301_s12 + $0x318] sm:$0xff] }
 0x29d   : > { %4009 = vmatprep.subr.bf16.mxu1 %v15006_v28  ;;  %v878_v28 = vld [vmem:[%s19301_s12 + $0x338] sm:$0xff] }
 0x29e   : > { %7318 = vmatpush1.bf16.msra.mxu0 %v15503_v27  ;;  %v15046_v27 = vcombine.high %v866_v6, %v870_v14  ;;  %v15053_v40 = vcombine.low %v874_v22, %v878_v28  ;;  %v902_v2 = vld [vmem:[%s19301_s12 + $0x3f8] sm:$0xff] }
 0x29f   : > { %7319 = vmatprep.subr.bf16.mxu0 %v15512_v31  ;;  %v15045_v31 = vcombine.low %v866_v6, %v870_v14  ;;  %v906_v6 = vld [vmem:[%s19301_s12 + $0x418] sm:$0xff] }
 0x2a0   : > { %4010 = vmatpush1.bf16.msra.mxu1 %v15005_v32  ;;  %v882_v32 = vld [vmem:[%s19301_s12 + $0x358] sm:$0xff] }
 0x2a1   : > { %4011 = vmatprep.subr.bf16.mxu1 %v15014_v36  ;;  %v886_v36 = vld [vmem:[%s19301_s12 + $0x378] sm:$0xff] }
 0x2a2   : > { %7320 = vmatpush1.bf16.msra.mxu0 %v15511_v35  ;;  %v15054_v35 = vcombine.high %v874_v22, %v878_v28  ;;  %v910_v14 = vld [vmem:[%s19301_s12 + $0x438] sm:$0xff] }
 0x2a3   : > { %7321 = vmatprep.subr.bf16.mxu0 %v15520_v37  ;;  %v15551_v37 = vcombine.low %v4329_v23, %v4333_v25  ;;  %v914_v22 = vld [vmem:[%s19301_s12 + $0x458] sm:$0xff]  ;;  %v4369_v23 = vld [vmem:[%s19309_s16 + $0x600] sm:$0xff] }
 0x2a4   : > { %4012 = vmatpush1.bf16.msra.mxu1 %v15013_v39  ;;  %v15560_v39 = vcombine.high %v4337_v33, %v4341_v34  ;;  %v4373_v25 = vld [vmem:[%s19309_s16 + $0x620] sm:$0xff]  ;;  %v918_v28 = vld [vmem:[%s19301_s12 + $0x478] sm:$0xff] }
 0x2a5   : > { %4013 = vmatprep.subr.bf16.mxu1 %v15022_v19  ;;  %v15062_v19 = vcombine.high %v882_v32, %v886_v36  ;;  %v4377_v33 = vld [vmem:[%s19309_s16 + $0x640] sm:$0xff] }
 0x2a6   : > { %7322 = vmatpush1.bf16.msra.mxu0 %v15519_v44  ;;  %v4349_v44 = vld [vmem:[%s19309_s16 + $0x560] sm:$0xff] }
 0x2a7   : > { %7332 = vmatprep.subr.bf16.mxu0 %v15528_v50  ;;  %v15568_v50 = vcombine.high %v4345_v1, %v4349_v44  ;;  %v4381_v34 = vld [vmem:[%s19309_s16 + $0x660] sm:$0xff] }
 0x2a8   : > { %4014 = vmatpush1.bf16.msra.mxu1 %v15021_v51  ;;  %v15061_v51 = vcombine.low %v882_v32, %v886_v36  ;;  %v922_v32 = vld [vmem:[%s19301_s12 + $0x498] sm:$0xff] }
 0x2a9   : > { %7324 = vmatmul.mubr.bf16.vlgmr.msra.gmra.mrb[8].mxu0 %v19841_v4  ;;  %4015 = vmatprep.subr.bf16.mxu1 %v15030_v63  ;;  %v15070_v63 = vcombine.high %v890_v42, %v894_v46  ;;  %v926_v36 = vld [vmem:[%s19301_s12 + $0x4b8] sm:$0xff] }
 0x2aa   : > { %7333 = vmatpush1.bf16.msra.mxu0 %v15527_v3  ;;  %v15567_v3 = vcombine.low %v4345_v1, %v4349_v44  ;;  %v4385_v1 = vld [vmem:[%s19309_s16 + $0x680] sm:$0xff] }
 0x2ab   : > { %7334 = vmatprep.subr.bf16.mxu0 %v15536_v53  ;;  %v15576_v53 = vcombine.high %v4353_v60, %v4357_v61  ;;  %v4389_v44 = vld [vmem:[%s19309_s16 + $0x6a0] sm:$0xff] }
 0x2ac   : > { %4016 = vmatpush1.bf16.msra.mxu1 %v15029_v5  ;;  %v15069_v5 = vcombine.low %v890_v42, %v894_v46  ;;  %v930_v42 = vld [vmem:[%s19301_s12 + $0x4d8] sm:$0xff] }
 0x2ad   : > { %4017 = vmatprep.subr.bf16.mxu1 %v15038_v9  ;;  %v15078_v9 = vcombine.high %v898_v57, %v902_v2  ;;  %v934_v46 = vld [vmem:[%s19301_s12 + $0x4f8] sm:$0xff] }
 0x2ae   : > { %7335 = vmatpush1.bf16.msra.mxu0 %v15535_v16  ;;  %v15575_v16 = vcombine.low %v4353_v60, %v4357_v61  ;;  %v4397_v60 = vld [vmem:[%s19309_s16 + $0x6e0] sm:$0xff]  ;;  %v942_v61 = vld [vmem:[%s19301_s12 + $0x538] sm:$0xff] }
 0x2af   : > { %7336 = vmatprep.subr.bf16.mxu0 %v15544_v17  ;;  %v15584_v17 = vcombine.high %v4361_v55, %v4365_v7 }
 0x2b0   : > { %4018 = vmatpush1.bf16.msra.mxu1 %v15037_v62  ;;  %v15077_v62 = vcombine.low %v898_v57, %v902_v2  ;;  %v4393_v57 = vld [vmem:[%s19309_s16 + $0x6c0] sm:$0xff] }
 0x2b1   : > { %4019 = vmatprep.subr.bf16.mxu1 %v15046_v27  ;;  %v15086_v27 = vcombine.high %v906_v6, %v910_v14  ;;  %v15616_v2 = vcombine.high %v4393_v57, %v4397_v60 }
 0x2b2   : > { %7337 = vmatpush1.bf16.msra.mxu0 %v15543_v29  ;;  %v15583_v29 = vcombine.low %v4361_v55, %v4365_v7  ;;  %v950_v7 = vld [vmem:[%s19301_s12 + $0x578] sm:$0xff] }
 0x2b3   : > { %7338 = vmatprep.subr.bf16.mxu0 %v15552_v30  ;;  %v15592_v30 = vcombine.high %v4369_v23, %v4373_v25 }
 0x2b4   : > { %4020 = vmatpush1.bf16.msra.mxu1 %v15045_v31  ;;  %v15085_v31 = vcombine.low %v906_v6, %v910_v14  ;;  %v4405_v6 = vld [vmem:[%s19309_s16 + $0x720] sm:$0xff] }
 0x2b5   : > { %4021 = vmatprep.subr.bf16.mxu1 %v15054_v35  ;;  %v15094_v35 = vcombine.high %v914_v22, %v918_v28 }
 0x2b6   : > { %7339 = vmatpush1.bf16.msra.mxu0 %v15551_v37  ;;  %v15591_v37 = vcombine.low %v4369_v23, %v4373_v25  ;;  %v958_v25 = vld [vmem:[%s19301_s12 + $0x5b8] sm:$0xff] }
 0x2b7   : > { %7340 = vmatprep.subr.bf16.mxu0 %v15560_v39  ;;  %v15600_v39 = vcombine.high %v4377_v33, %v4381_v34 }
 0x2b8   : > { %4022 = vmatpush1.bf16.msra.mxu1 %v15053_v40  ;;  %v15093_v40 = vcombine.low %v914_v22, %v918_v28  ;;  %v4413_v22 = vld [vmem:[%s19309_s16 + $0x760] sm:$0xff] }
 0x2b9   : > { %4023 = vmatprep.subr.bf16.mxu1 %v15062_v19  ;;  %v15102_v19 = vcombine.high %v922_v32, %v926_v36 }
 0x2ba   : > { %7341 = vmatpush1.bf16.msra.mxu0 %v15559_v47  ;;  %v15599_v47 = vcombine.low %v4377_v33, %v4381_v34  ;;  %v962_v33 = vld [vmem:[%s19301_s12 + $0x5d8] sm:$0xff] }
 0x2bb   : > { %7342 = vmatprep.subr.bf16.mxu0 %v15568_v50  ;;  %v15608_v50 = vcombine.high %v4385_v1, %v4389_v44  ;;  %v966_v34 = vld [vmem:[%s19301_s12 + $0x5f8] sm:$0xff] }
 0x2bc   : > { %4024 = vmatpush1.bf16.msra.mxu1 %v15061_v51  ;;  %v938_v51 = vld [vmem:[%s19301_s12 + $0x518] sm:$0xff] }
 0x2bd   : > { %4025 = vmatprep.subr.bf16.mxu1 %v15070_v63  ;;  %v15607_v63 = vcombine.low %v4385_v1, %v4389_v44  ;;  %v15118_v55 = vcombine.high %v938_v51, %v942_v61  ;;  %v970_v1 = vld [vmem:[%s19301_s12 + $0x618] sm:$0xff] }
 0x2be   : > { %7343 = vmatpush1.bf16.msra.mxu0 %v15567_v3  ;;  %v15109_v3 = vcombine.low %v930_v42, %v934_v46  ;;  %v974_v44 = vld [vmem:[%s19301_s12 + $0x638] sm:$0xff] }
 0x2bf   : > { %7344 = vmatprep.subr.bf16.mxu0 %v15576_v53  ;;  %v946_v53 = vld [vmem:[%s19301_s12 + $0x558] sm:$0xff] }
 0x2c0   : > { %4026 = vmatpush1.bf16.msra.mxu1 %v15069_v5  ;;  %v4401_v5 = vld [vmem:[%s19309_s16 + $0x700] sm:$0xff]  ;;  %v15126_v23 = vcombine.high %v946_v53, %v950_v7 }
 0x2c1   : > { %4027 = vmatprep.subr.bf16.mxu1 %v15078_v9  ;;  %v15615_v9 = vcombine.low %v4393_v57, %v4397_v60  ;;  %v15624_v14 = vcombine.high %v4401_v5, %v4405_v6  ;;  %v978_v57 = vld [vmem:[%s19301_s12 + $0x658] sm:$0xff] }
 0x2c2   : > { %7345 = vmatpush1.bf16.msra.mxu0 %v15575_v16  ;;  %v15117_v16 = vcombine.low %v938_v51, %v942_v61  ;;  %v15150_v51 = vcombine.high %v970_v1, %v974_v44  ;;  %v982_v60 = vld [vmem:[%s19301_s12 + $0x678] sm:$0xff] }
 0x2c3   : > { %7346 = vmatprep.subr.bf16.mxu0 %v15584_v17  ;;  %v954_v17 = vld [vmem:[%s19301_s12 + $0x598] sm:$0xff] }
 0x2c4   : > { %4028 = vmatpush1.bf16.msra.mxu1 %v15077_v62  ;;  %v4409_v62 = vld [vmem:[%s19309_s16 + $0x740] sm:$0xff] }
 0x2c5   : > { %4038 = vmatprep.subr.bf16.mxu1 %v15086_v27  ;;  %v15623_v27 = vcombine.low %v4401_v5, %v4405_v6  ;;  %v15632_v28 = vcombine.high %v4409_v62, %v4413_v22  ;;  %v990_v5 = vld [vmem:[%s19301_s12 + $0x6b8] sm:$0xff]  ;;  %v15157_v6 = vcombine.low %v978_v57, %v982_v60 }
 0x2c6   : > { %7347 = vmatpush1.bf16.msra.mxu0 %v15583_v29  ;;  %v15125_v29 = vcombine.low %v946_v53, %v950_v7  ;;  %v986_v53 = vld [vmem:[%s19301_s12 + $0x698] sm:$0xff] }
 0x2c7   : > { %7348 = vmatprep.subr.bf16.mxu0 %v15592_v30  ;;  %4030 = vmatmul.mubr.bf16.vlgmr.msra.gmra.mrb[8].mxu1 %v19445_v48  ;;  %v15101_v48 = vcombine.low %v922_v32, %v926_v36  ;;  %v4417_v30 = vld [vmem:[%s19309_s16 + $0x780] sm:$0xff]  ;;  %v15134_v32 = vcombine.high %v954_v17, %v958_v25  ;;  %v994_v7 = vld [vmem:[%s19301_s12 + $0x6d8] sm:$0xff] }
 0x2c8   : > { %4039 = vmatpush1.bf16.msra.mxu1 %v15085_v31  ;;  %4070 = vmatprep.mubr.bf16.mxu1 %v19462_v0  ;;  %v15110_v0 = vcombine.high %v930_v42, %v934_v46  ;;  %v4421_v31 = vld [vmem:[%s19309_s16 + $0x7a0] sm:$0xff]  ;;  %v15142_v42 = vcombine.high %v962_v33, %v966_v34 }
 0x2c9   : > { %4040 = vmatprep.subr.bf16.mxu1 %v15094_v35  ;;  %v15631_v35 = vcombine.low %v4409_v62, %v4413_v22  ;;  %v15640_v36 = vcombine.high %v4417_v30, %v4421_v31  ;;  %v1006_v62 = vld [vmem:[%s19301_s12 + $0x738] sm:$0xff] }
 0x2ca   : > { %7349 = vmatpush1.bf16.msra.mxu0 %v15591_v37  ;;  %v15133_v37 = vcombine.low %v954_v17, %v958_v25  ;;  %v1002_v17 = vld [vmem:[%s19301_s12 + $0x718] sm:$0xff] }
 0x2cb   : > { %7350 = vmatprep.subr.bf16.mxu0 %v15600_v39  ;;  %v4425_v39 = vld [vmem:[%s19309_s16 + $0x7c0] sm:$0xff]  ;;  %v1010_v25 = vld [vmem:[%s19301_s12 + $0x758] sm:$0xff] }
 0x2cc   : > { %4041 = vmatpush1.bf16.msra.mxu1 %v15093_v40  ;;  %v4429_v40 = vld [vmem:[%s19309_s16 + $0x7e0] sm:$0xff] }
 0x2cd   : > { %4042 = vmatprep.subr.bf16.mxu1 %v15102_v19  ;;  %v15639_v19 = vcombine.low %v4417_v30, %v4421_v31  ;;  %v15648_v46 = vcombine.high %v4425_v39, %v4429_v40  ;;  %v1018_v30 = vld [vmem:[%s19301_s12 + $0x798] sm:$0xff] }
 0x2ce   : > { %7351 = vmatpush1.bf16.msra.mxu0 %v15599_v47  ;;  %v15141_v47 = vcombine.low %v962_v33, %v966_v34  ;;  %v1022_v31 = vld [vmem:[%s19301_s12 + $0x7b8] sm:$0xff] }
 0x2cf   : > { %7352 = vmatprep.subr.bf16.mxu0 %v15608_v50  ;;  %v19903_v50 = vld [vmem:[%s19309_s16 + $0x800] sm:$0xff]  ;;  %v15198_v33 = vcombine.high %v1018_v30, %v1022_v31  ;;  %v1026_v34 = vld [vmem:[%s19301_s12 + $0x7d8] sm:$0xff] }
 0x2d0   : > { %4043 = vmatpush1.bf16.msra.mxu1 %v15101_v48  ;;  %v19906_v48 = vld [vmem:[%s19309_s16 + $0x820] sm:$0xff] }
 0x2d1   : > { %4044 = vmatprep.subr.bf16.mxu1 %v15110_v0  ;;  %v15647_v0 = vcombine.low %v4425_v39, %v4429_v40  ;;  %v15655_v61 = vcombine.low %v19903_v50, %v19906_v48  ;;  %v1034_v39 = vld [vmem:[%s19301_s12 + $0x818] sm:$0xff] }
 0x2d2   : > { %7353 = vmatpush1.bf16.msra.mxu0 %v15607_v63  ;;  %v15656_v63 = vcombine.high %v19903_v50, %v19906_v48  ;;  %v1038_v40 = vld [vmem:[%s19301_s12 + $0x838] sm:$0xff] }
 0x2d3   : > { %7354 = vmatprep.subr.bf16.mxu0 %v15616_v2  ;;  %v15149_v2 = vcombine.low %v970_v1, %v974_v44  ;;  %v15214_v1 = vcombine.high %v1034_v39, %v1038_v40  ;;  %v1042_v44 = vld [vmem:[%s19301_s12 + $0x858] sm:$0xff] }
 0x2d4   : > { %4045 = vmatpush1.bf16.msra.mxu1 %v15109_v3  ;;  %v15158_v3 = vcombine.high %v978_v57, %v982_v60  ;;  %v1054_v57 = vld [vmem:[%s19301_s12 + $0x8b8] sm:$0xff] }
 0x2d5   : > { %4046 = vmatprep.subr.bf16.mxu1 %v15118_v55  ;;  %v15166_v55 = vcombine.high %v986_v53, %v990_v5 }
 0x2d6   : > { %7355 = vmatpush1.bf16.msra.mxu0 %v15615_v9  ;;  %v998_v9 = vld [vmem:[%s19301_s12 + $0x6f8] sm:$0xff] }
 0x2d7   : > { %7356 = vmatprep.subr.bf16.mxu0 %v15624_v14  ;;  %v15165_v14 = vcombine.low %v986_v53, %v990_v5  ;;  %v15173_v22 = vcombine.low %v994_v7, %v998_v9  ;;  %v1066_v5 = vld [vmem:[%s19301_s12 + $0x918] sm:$0xff] }
 0x2d8   : > { %4047 = vmatpush1.bf16.msra.mxu1 %v15117_v16  ;;  %v15174_v16 = vcombine.high %v994_v7, %v998_v9  ;;  %v1078_v7 = vld [vmem:[%s19301_s12 + $0x978] sm:$0xff] }
 0x2d9   : > { %4048 = vmatprep.subr.bf16.mxu1 %v15126_v23  ;;  %v15182_v23 = vcombine.high %v1002_v17, %v1006_v62 }
 0x2da   : > { %7357 = vmatpush1.bf16.msra.mxu0 %v15623_v27  ;;  %v1014_v27 = vld [vmem:[%s19301_s12 + $0x778] sm:$0xff] }
 0x2db   : > { %7358 = vmatprep.subr.bf16.mxu0 %v15632_v28  ;;  %v15181_v28 = vcombine.low %v1002_v17, %v1006_v62  ;;  %v1086_v17 = vld [vmem:[%s19301_s12 + $0x9b8] sm:$0xff] }
 0x2dc   : > { %4049 = vmatpush1.bf16.msra.mxu1 %v15125_v29  ;;  %v15190_v29 = vcombine.high %v1010_v25, %v1014_v27 }
 0x2dd   : > { %4050 = vmatprep.subr.bf16.mxu1 %v15134_v32  ;;  %v15189_v32 = vcombine.low %v1010_v25, %v1014_v27  ;;  %v1094_v25 = vld [vmem:[%s19301_s12 + $0x9f8] sm:$0xff] }
 0x2de   : > { %7359 = vmatpush1.bf16.msra.mxu0 %v15631_v35  ;;  %v1030_v35 = vld [vmem:[%s19301_s12 + $0x7f8] sm:$0xff] }
 0x2df   : > { %7360 = vmatprep.subr.bf16.mxu0 %v15640_v36  ;;  %v15197_v36 = vcombine.low %v1018_v30, %v1022_v31  ;;  %v1102_v30 = vld [vmem:[%s19301_s12 + $0xa38] sm:$0xff] }
 0x2e0   : > { %4051 = vmatpush1.bf16.msra.mxu1 %v15133_v37  ;;  %v15206_v37 = vcombine.high %v1026_v34, %v1030_v35 }
 0x2e1   : > { %4052 = vmatprep.subr.bf16.mxu1 %v15142_v42  ;;  %v15205_v42 = vcombine.low %v1026_v34, %v1030_v35  ;;  %v1110_v34 = vld [vmem:[%s19301_s12 + $0xa78] sm:$0xff] }
 0x2e2   : > { %7361 = vmatpush1.bf16.msra.mxu0 %v15639_v19  ;;  %v1046_v19 = vld [vmem:[%s19301_s12 + $0x878] sm:$0xff] }
 0x2e3   : > { %7362 = vmatprep.subr.bf16.mxu0 %v15648_v46  ;;  %v15213_v46 = vcombine.low %v1034_v39, %v1038_v40  ;;  %v15221_v60 = vcombine.low %v1042_v44, %v1046_v19  ;;  %v1118_v39 = vld [vmem:[%s19301_s12 + $0xab8] sm:$0xff] }
 0x2e4   : > { %4053 = vmatpush1.bf16.msra.mxu1 %v15141_v47  ;;  %v15222_v47 = vcombine.high %v1042_v44, %v1046_v19  ;;  %v1126_v44 = vld [vmem:[%s19301_s12 + $0xaf8] sm:$0xff] }
 0x2e5   : > { %4054 = vmatprep.subr.bf16.mxu1 %v15150_v51  ;;  %v1050_v51 = vld [vmem:[%s19301_s12 + $0x898] sm:$0xff] }
 0x2e6   : > { %7363 = vmatpush1.bf16.msra.mxu0 %v15647_v0  ;;  %v15230_v0 = vcombine.high %v1050_v51, %v1054_v57 }
 0x2e7   : > { %7373 = vmatprep.subr.bf16.mxu0 %v15656_v63  ;;  %v1058_v63 = vld [vmem:[%s19301_s12 + $0x8d8] sm:$0xff] }
 0x2e8   : > { %4055 = vmatpush1.bf16.msra.mxu1 %v15149_v2  ;;  %v1062_v2 = vld [vmem:[%s19301_s12 + $0x8f8] sm:$0xff] }
 0x2e9   : > { %4056 = vmatprep.subr.bf16.mxu1 %v15158_v3  ;;  %v15229_v3 = vcombine.low %v1050_v51, %v1054_v57  ;;  %v15238_v53 = vcombine.high %v1058_v63, %v1062_v2  ;;  %v1134_v51 = vld [vmem:[%s19301_s12 + $0xb38] sm:$0xff] }
 0x2ec   : > { %4057 = vmatpush1.bf16.msra.mxu1 %v15157_v6  ;;  %v1070_v6 = vld [vmem:[%s19301_s12 + $0x938] sm:$0xff] }
 0x2ed   : > { %4058 = vmatprep.subr.bf16.mxu1 %v15166_v55  ;;  %v15246_v55 = vcombine.high %v1066_v5, %v1070_v6  ;;  %v15245_v9 = vcombine.low %v1066_v5, %v1070_v6  ;;  %v1150_v5 = vld [vmem:[%s19301_s12 + $0xbb8] sm:$0xff] }
 0x2f0   : > { %4059 = vmatpush1.bf16.msra.mxu1 %v15165_v14 }
 0x2f1   : > { %4060 = vmatprep.subr.bf16.mxu1 %v15174_v16  ;;  %v1082_v16 = vld [vmem:[%s19301_s12 + $0x998] sm:$0xff] }
 0x2f2   : > { %v15261_v27 = vcombine.low %v1082_v16, %v1086_v17 }
 0x2f4   : > { %4061 = vmatpush1.bf16.msra.mxu1 %v15173_v22  ;;  %v15262_v22 = vcombine.high %v1082_v16, %v1086_v17 }
 0x2f5   : > { %4062 = vmatprep.subr.bf16.mxu1 %v15182_v23  ;;  %v1090_v23 = vld [vmem:[%s19301_s12 + $0x9d8] sm:$0xff] }
 0x2f6   : > { %v15269_v31 = vcombine.low %v1090_v23, %v1094_v25 }
 0x2f8   : > { %4063 = vmatpush1.bf16.msra.mxu1 %v15181_v28  ;;  %v15270_v28 = vcombine.high %v1090_v23, %v1094_v25 }
 0x2f9   : > { %4064 = vmatprep.subr.bf16.mxu1 %v15190_v29  ;;  %v1098_v29 = vld [vmem:[%s19301_s12 + $0xa18] sm:$0xff] }
 0x2fa   : > { %v15277_v35 = vcombine.low %v1098_v29, %v1102_v30 }
 0x2fc   : > { %4065 = vmatpush1.bf16.msra.mxu1 %v15189_v32  ;;  %v15278_v32 = vcombine.high %v1098_v29, %v1102_v30  ;;  %v1174_v29 = vld [vmem:[%s19301_s12 + $0xc78] sm:$0xff] }
 0x2fd   : > { %4066 = vmatprep.subr.bf16.mxu1 %v15198_v33  ;;  %v1106_v33 = vld [vmem:[%s19301_s12 + $0xa58] sm:$0xff] }
 0x2fe   : > { %v15285_v40 = vcombine.low %v1106_v33, %v1110_v34 }
 0x300   : > { %4067 = vmatpush1.bf16.msra.mxu1 %v15197_v36  ;;  %v15286_v36 = vcombine.high %v1106_v33, %v1110_v34  ;;  %v1182_v33 = vld [vmem:[%s19301_s12 + $0xcb8] sm:$0xff] }
 0x301   : > { %4068 = vmatprep.subr.bf16.mxu1 %v15206_v37  ;;  %v1114_v37 = vld [vmem:[%s19301_s12 + $0xa98] sm:$0xff] }
 0x302   : > { %v15293_v19 = vcombine.low %v1114_v37, %v1118_v39 }
 0x304   : > { %4069 = vmatpush1.bf16.msra.mxu1 %v15205_v42  ;;  %v15294_v42 = vcombine.high %v1114_v37, %v1118_v39  ;;  %v1190_v37 = vld [vmem:[%s19301_s12 + $0xcf8] sm:$0xff] }
 0x305   : > { %4079 = vmatprep.subr.bf16.mxu1 %v15214_v1  ;;  %v1122_v1 = vld [vmem:[%s19301_s12 + $0xad8] sm:$0xff] }
 0x306   : > { %v15301_v57 = vcombine.low %v1122_v1, %v1126_v44 }
 0x307   : > { %4071 = vmatmul.mubr.bf16.vlgmr.msra.gmra.mrb[8].mxu1 %v19549_v56  ;;  %v15237_v56 = vcombine.low %v1058_v63, %v1062_v2  ;;  %v1142_v63 = vld [vmem:[%s19301_s12 + $0xb78] sm:$0xff] }
 0x308   : > { %4080 = vmatpush1.bf16.msra.mxu1 %v15213_v46  ;;  %4111 = vmatprep.mubr.bf16.mxu1 %v19384_v20  ;;  %v1074_v20 = vld [vmem:[%s19301_s12 + $0x958] sm:$0xff]  ;;  %v15302_v46 = vcombine.high %v1122_v1, %v1126_v44 }
 0x309   : > { %4081 = vmatprep.subr.bf16.mxu1 %v15222_v47  ;;  %v15254_v14 = vcombine.high %v1074_v20, %v1078_v7  ;;  %v15253_v62 = vcombine.low %v1074_v20, %v1078_v7  ;;  %v1130_v47 = vld [vmem:[%s19301_s12 + $0xb18] sm:$0xff] }
 0x30a   : > { %v15309_v2 = vcombine.low %v1130_v47, %v1134_v51  ;;  %v1158_v20 = vld [vmem:[%s19301_s12 + $0xbf8] sm:$0xff] }
 0x30b   : > { %v1198_v1 = vld [vmem:[%s19301_s12 + $0xd38] sm:$0xff] }
 0x30c   : > { %4082 = vmatpush1.bf16.msra.mxu1 %v15221_v60  ;;  %v15310_v60 = vcombine.high %v1130_v47, %v1134_v51  ;;  %v1210_v51 = vld [vmem:[%s19301_s12 + $0xd98] sm:$0xff] }
 0x30d   : > { %4083 = vmatprep.subr.bf16.mxu1 %v15230_v0  ;;  %v1138_v0 = vld [vmem:[%s19301_s12 + $0xb58] sm:$0xff] }
 0x30e   : > { %v15317_v6 = vcombine.low %v1138_v0, %v1142_v63 }
 0x310   : > { %4084 = vmatpush1.bf16.msra.mxu1 %v15229_v3  ;;  %v15318_v3 = vcombine.high %v1138_v0, %v1142_v63 }
 0x311   : > { %4085 = vmatprep.subr.bf16.mxu1 %v15238_v53  ;;  %v1146_v53 = vld [vmem:[%s19301_s12 + $0xb98] sm:$0xff] }
 0x314   : > { %4086 = vmatpush1.bf16.msra.mxu1 %v15237_v56  ;;  %v15326_v56 = vcombine.high %v1146_v53, %v1150_v5 }
 0x315   : > { %4087 = vmatprep.subr.bf16.mxu1 %v15246_v55  ;;  %v1154_v55 = vld [vmem:[%s19301_s12 + $0xbd8] sm:$0xff] }
 0x316   : > { %v15334_v16 = vcombine.high %v1154_v55, %v1158_v20  ;;  %v15333_v25 = vcombine.low %v1154_v55, %v1158_v20 }
 0x318   : > { %4088 = vmatpush1.bf16.msra.mxu1 %v15245_v9  ;;  %v15325_v9 = vcombine.low %v1146_v53, %v1150_v5 }
 0x319   : > { %4089 = vmatprep.subr.bf16.mxu1 %v15254_v14 }
 0x31c   : > { %4090 = vmatpush1.bf16.msra.mxu1 %v15253_v62  ;;  %v1162_v62 = vld [vmem:[%s19301_s12 + $0xc18] sm:$0xff] }
 0x31d   : > { %4091 = vmatprep.subr.bf16.mxu1 %v15262_v22  ;;  %v1166_v22 = vld [vmem:[%s19301_s12 + $0xc38] sm:$0xff] }
 0x31e   : > { %v15341_v30 = vcombine.low %v1162_v62, %v1166_v22 }
 0x320   : > { %4092 = vmatpush1.bf16.msra.mxu1 %v15261_v27  ;;  %v15342_v27 = vcombine.high %v1162_v62, %v1166_v22 }
 0x321   : > { %4093 = vmatprep.subr.bf16.mxu1 %v15270_v28  ;;  %v1170_v28 = vld [vmem:[%s19301_s12 + $0xc58] sm:$0xff] }
 0x322   : > { %v15349_v34 = vcombine.low %v1170_v28, %v1174_v29 }
 0x324   : > { %4094 = vmatpush1.bf16.msra.mxu1 %v15269_v31  ;;  %v15350_v31 = vcombine.high %v1170_v28, %v1174_v29  ;;  %v4441_v28 = vld [vmem:[%s19309_s16 + $0x840] sm:$0xff] }
 0x325   : > { %4095 = vmatprep.subr.bf16.mxu1 %v15278_v32  ;;  %v1178_v32 = vld [vmem:[%s19301_s12 + $0xc98] sm:$0xff]  ;;  %v4445_v29 = vld [vmem:[%s19309_s16 + $0x860] sm:$0xff] }
 0x326   : > { %v15357_v39 = vcombine.low %v1178_v32, %v1182_v33 }
 0x328   : > { %4096 = vmatpush1.bf16.msra.mxu1 %v15277_v35  ;;  %v15358_v35 = vcombine.high %v1178_v32, %v1182_v33 }
 0x329   : > { %4097 = vmatprep.subr.bf16.mxu1 %v15286_v36  ;;  %v1186_v36 = vld [vmem:[%s19301_s12 + $0xcd8] sm:$0xff] }
 0x32c   : > { %4098 = vmatpush1.bf16.msra.mxu1 %v15285_v40  ;;  %v15366_v40 = vcombine.high %v1186_v36, %v1190_v37 }
 0x32d   : > { %4099 = vmatprep.subr.bf16.mxu1 %v15294_v42  ;;  %v1194_v42 = vld [vmem:[%s19301_s12 + $0xd18] sm:$0xff] }
 0x32e   : > { %v15374_v44 = vcombine.high %v1194_v42, %v1198_v1 }
 0x330   : > { %4100 = vmatpush1.bf16.msra.mxu1 %v15293_v19  ;;  %v1202_v19 = vld [vmem:[%s19301_s12 + $0xd58] sm:$0xff] }
 0x331   : > { %4101 = vmatprep.subr.bf16.mxu1 %v15302_v46  ;;  %v15373_v46 = vcombine.low %v1194_v42, %v1198_v1  ;;  %v4186_v42 = vld [vmem:[%s19309_s16 + $0x48] sm:$0xff] }
 0x332   : > { %v4190_v1 = vld [vmem:[%s19309_s16 + $0x68] sm:$0xff] }
 0x333   : > { %v15409_v48 = vcombine.low %v4186_v42, %v4190_v1 }
 0x334   : > { %4102 = vmatpush1.bf16.msra.mxu1 %v15301_v57  ;;  %v1214_v57 = vld [vmem:[%s19301_s12 + $0xdb8] sm:$0xff] }
 0x335   : > { %4103 = vmatprep.subr.bf16.mxu1 %v15310_v60  ;;  %v19979_v60 = vld [vmem:[%s19307_s28] sm:$0xff]  ;;  %v15390_v53 = vcombine.high %v1210_v51, %v1214_v57  ;;  %v15389_v62 = vcombine.low %v1210_v51, %v1214_v57  ;;  %v4194_v51 = vld [vmem:[%s19309_s16 + $0x88] sm:$0xff] }
 0x336   : > { %v1248_v0 = vrot.slane %v19979_v60, %v19356_v59  ;;  %v1236_v63 = vrot.slane %v19979_v60, %v19529_v18  ;;  %v4198_v57 = vld [vmem:[%s19309_s16 + $0xa8] sm:$0xff] }
 0x338   : > { %4104 = vmatpush1.bf16.msra.mxu1 %v15309_v2  ;;  %v1240_v2 = vrot.slane %v19979_v60, %v19427_v26 }
 0x339   : > { %4105 = vmatprep.subr.bf16.mxu1 %v15318_v3 }
 0x33c   : > { %v19960_v7 = vpop.f32.mrb[4].mxu0  ;;  %4106 = vmatpush1.bf16.msra.mxu1 %v15317_v6  ;;  %v1218_v6 = vld [vmem:[%s19301_s12 + $0xdd8] sm:$0xff] }
 0x33d   : > { %v3992_v14 = vpop.f32.mrb[5].mxu0  ;;  %4107 = vmatprep.subr.bf16.mxu1 %v15326_v56  ;;  %v1222_v56 = vld [vmem:[%s19301_s12 + $0xdf8] sm:$0xff] }
 0x33e   : > { %v3994_v17 = vpop.f32.mrb[6].mxu0  ;;  %v16822_v55 = vadd.f32 %v3992_v14, %v1248_v0  ;;  %v4178_v14 = vld [vmem:[%s19309_s16 + $0x8] sm:$0xff]  ;;  %v15397_v33 = vcombine.low %v1218_v6, %v1222_v56  ;;  %v15418_v0 = vcombine.high %v4194_v51, %v4198_v57 }
 0x33f   : > { %v3995_v23 = vpop.f32.mrb[7].mxu0 }
 0x340   : > { %4108 = vmatpush1.bf16.msra.mxu1 %v15325_v9 }
 0x341   : > { %4109 = vmatprep.subr.bf16.mxu1 %v15334_v16 }
 0x344   : > { %4110 = vmatpush1.bf16.msra.mxu1 %v15333_v25  ;;  %v15398_v25 = vcombine.high %v1218_v6, %v1222_v56 }
 0x345   : > { %4120 = vmatprep.subr.bf16.mxu1 %v15342_v27 }
 0x347   : > { %4112 = vmatmul.mubr.bf16.vlgmr.msra.gmra.mrb[8].mxu1 %v19453_v54  ;;  %v15365_v54 = vcombine.low %v1186_v36, %v1190_v37  ;;  %v4449_v37 = vld [vmem:[%s19309_s16 + $0x880] sm:$0xff] }
 0x348   : > { %4121 = vmatpush1.bf16.msra.mxu1 %v15341_v30  ;;  %4152 = vmatprep.mubr.bf16.mxu1 %v18858_v10  ;;  %v1206_v10 = vld [vmem:[%s19301_s12 + $0xd78] sm:$0xff]  ;;  %v4166_v30 = vmax.f32 %v16822_v55, 0.0  ;;  %v4473_v55 = vld [vmem:[%s19309_s16 + $0x940] sm:$0xff] }
 0x349   : > { %4122 = vmatprep.subr.bf16.mxu1 %v15350_v31  ;;  %v15382_v47 = vcombine.high %v1202_v19, %v1206_v10  ;;  %v15381_v3 = vcombine.low %v1202_v19, %v1206_v10  ;;  %v4182_v31 = vld [vmem:[%s19309_s16 + $0x28] sm:$0xff]  ;;  %v4457_v10 = vld [vmem:[%s19309_s16 + $0x8c0] sm:$0xff] }
 0x34a   : > { %v15402_v36 = vcombine.high %v4178_v14, %v4182_v31 }
 0x34c   : > { %4123 = vmatpush1.bf16.msra.mxu1 %v15349_v34 }
 0x34d   : > { %4124 = vmatprep.subr.bf16.mxu1 %v15358_v35  ;;  %v15664_v35 = vcombine.high %v4441_v28, %v4445_v29 }
 0x350   : > { %4125 = vmatpush1.bf16.msra.mxu1 %v15357_v39  ;;  %v4453_v39 = vld [vmem:[%s19309_s16 + $0x8a0] sm:$0xff] }
 0x351   : > { %4126 = vmatprep.subr.bf16.mxu1 %v15366_v40  ;;  %v20000_v40 = vpack.c.bf16 %v4166_v30, %v4166_v30  ;;  %v15672_v19 = vcombine.high %v4449_v37, %v4453_v39  ;;  %v15671_v50 = vcombine.low %v4449_v37, %v4453_v39  ;;  %v4226_v37 = vld [vmem:[%s19309_s16 + $0x188] sm:$0xff] }
 0x352   : > { %v4230_v39 = vld [vmem:[%s19309_s16 + $0x1a8] sm:$0xff] }
 0x354   : > { %4127 = vmatpush1.bf16.msra.mxu1 %v15365_v54  ;;  %v15663_v54 = vcombine.low %v4441_v28, %v4445_v29  ;;  %v4218_v28 = vld [vmem:[%s19309_s16 + $0x148] sm:$0xff] }
 0x355   : > { %4128 = vmatprep.subr.bf16.mxu1 %v15374_v44  ;;  %v15401_v44 = vcombine.low %v4178_v14, %v4182_v31  ;;  %v4222_v29 = vld [vmem:[%s19309_s16 + $0x168] sm:$0xff] }
 0x358   : > { %4129 = vmatpush1.bf16.msra.mxu1 %v15373_v46  ;;  %v15410_v46 = vcombine.high %v4186_v42, %v4190_v1  ;;  %v15441_v1 = vcombine.low %v4218_v28, %v4222_v29 }
 0x359   : > { %4130 = vmatprep.subr.bf16.mxu1 %v15382_v47  ;;  %v4461_v47 = vld [vmem:[%s19309_s16 + $0x8e0] sm:$0xff] }
 0x35a   : > { %v3826_v5 = vpop.f32.mrb[4].mxu1 }
 0x35b   : > { %v16819_v20 = vadd.f32 %v3826_v5, %v1236_v63  ;;  %v3828_v9 = vpop.f32.mrb[5].mxu1  ;;  %v4465_v63 = vld [vmem:[%s19309_s16 + $0x900] sm:$0xff]  ;;  %v15417_v5 = vcombine.low %v4194_v51, %v4198_v57  ;;  %v15449_v57 = vcombine.low %v4226_v37, %v4230_v39 }
 0x35c   : > { %v16820_v16 = vadd.f32 %v3828_v9, %v1240_v2  ;;  %v3830_v17 = vpop.f32.mrb[6].mxu1  ;;  %4131 = vmatpush1.bf16.msra.mxu1 %v15381_v3  ;;  %v4469_v2 = vld [vmem:[%s19309_s16 + $0x920] sm:$0xff]  ;;  %v4202_v3 = vld [vmem:[%s19309_s16 + $0xc8] sm:$0xff] }
 0x35d   : > { %v4163_v22 = vmax.f32 %v16819_v20, 0.0  ;;  %v3831_v23 = vpop.f32.mrb[7].mxu1  ;;  %4132 = vmatprep.subr.bf16.mxu1 %v15390_v53  ;;  %v4206_v53 = vld [vmem:[%s19309_s16 + $0xe8] sm:$0xff]  ;;  %v15688_v6 = vcombine.high %v4465_v63, %v4469_v2  ;;  %v4477_v20 = vld [vmem:[%s19309_s16 + $0x960] sm:$0xff]  ;;  %v15687_v17 = vcombine.low %v4465_v63, %v4469_v2 }
 0x35e   : > { %v4164_v27 = vmax.f32 %v16820_v16, 0.0  ;;  %v15426_v56 = vcombine.high %v4202_v3, %v4206_v53  ;;  %v4210_v9 = vld [vmem:[%s19309_s16 + $0x108] sm:$0xff]  ;;  %v15695_v30 = vcombine.low %v4473_v55, %v4477_v20 }
 0x35f   : > { %v19995_v34 = vpack.c.bf16 %v4163_v22, %v4163_v22  ;;  %v4214_v16 = vld [vmem:[%s19309_s16 + $0x128] sm:$0xff]  ;;  %v15696_v22 = vcombine.high %v4473_v55, %v4477_v20 }
 0x360   : > { %v19993_v32 = vpack.c.bf16 %v4164_v27, %v4164_v27  ;;  %4133 = vmatpush1.bf16.msra.mxu1 %v15389_v62  ;;  %v15425_v62 = vcombine.low %v4202_v3, %v4206_v53  ;;  %v15434_v23 = vcombine.high %v4210_v9, %v4214_v16  ;;  %v4485_v27 = vld [vmem:[%s19309_s16 + $0x9a0] sm:$0xff]  ;;  %v15433_v14 = vcombine.low %v4210_v9, %v4214_v16  ;;  %v4242_v63 = vld [vmem:[%s19309_s16 + $0x208] sm:$0xff] }
 0x361   : > { %4134 = vmatprep.subr.bf16.mxu1 %v15398_v25  ;;  %v4481_v25 = vld [vmem:[%s19309_s16 + $0x980] sm:$0xff]  ;;  %v4246_v2 = vld [vmem:[%s19309_s16 + $0x228] sm:$0xff] }
 0x362   : > { %7364 = vmatprep.mubr.bf16.mxu0 %v19993_v32  ;;  %v15704_v31 = vcombine.high %v4481_v25, %v4485_v27  ;;  %v15703_v42 = vcombine.low %v4481_v25, %v4485_v27  ;;  %v4250_v55 = vld [vmem:[%s19309_s16 + $0x248] sm:$0xff]  ;;  %v15465_v16 = vcombine.low %v4242_v63, %v4246_v2 }
 0x363   : > { %7365 = vmatmul.mubr.bf16.vlgmr.msra.gmra.mrb[8].mxu0 %v19995_v34  ;;  %v4254_v20 = vld [vmem:[%s19309_s16 + $0x268] sm:$0xff] }
 0x364   : > { %7374 = vmatpush1.bf16.msra.mxu0 %v15655_v61  ;;  %4135 = vmatpush1.bf16.msra.mxu1 %v15397_v33  ;;  %v15680_v61 = vcombine.high %v4457_v10, %v4461_v47  ;;  %v15442_v33 = vcombine.high %v4218_v28, %v4222_v29  ;;  %v4258_v25 = vld [vmem:[%s19309_s16 + $0x288] sm:$0xff]  ;;  %v15473_v29 = vcombine.low %v4250_v55, %v4254_v20 }
 0x365   : > { %7405 = vmatprep.mubr.bf16.mxu0 %v20000_v40  ;;  %7375 = vmatprep.subr.bf16.mxu0 %v15664_v35  ;;  %v4489_v35 = vld [vmem:[%s19309_s16 + $0x9c0] sm:$0xff]  ;;  %v4262_v27 = vld [vmem:[%s19309_s16 + $0x2a8] sm:$0xff] }
 0x366   : > { %7455 = vmatprep.subr.bf16.mxu1 %v15402_v36  ;;  %v4493_v36 = vld [vmem:[%s19309_s16 + $0x9e0] sm:$0xff] }
 0x367   : > { %4153 = vmatmul.mubr.bf16.vlgmr.msra.gmra.mrb[8].mxu1 %v19504_v24  ;;  %v15679_v24 = vcombine.low %v4457_v10, %v4461_v47  ;;  %v4501_v10 = vld [vmem:[%s19309_s16 + $0xa20] sm:$0xff]  ;;  %v4238_v47 = vld [vmem:[%s19309_s16 + $0x1e8] sm:$0xff]  ;;  %v15711_v51 = vcombine.low %v4489_v35, %v4493_v36 }
 0x368   : > { %7376 = vmatpush1.bf16.msra.mxu0 %v15663_v54  ;;  %7456 = vmatpush1.bf16.msra.mxu1 %v15401_v44  ;;  %v15712_v54 = vcombine.high %v4489_v35, %v4493_v36  ;;  %v15450_v44 = vcombine.high %v4226_v37, %v4230_v39  ;;  %v4266_v35 = vld [vmem:[%s19309_s16 + $0x2c8] sm:$0xff]  ;;  %v15481_v39 = vcombine.low %v4258_v25, %v4262_v27 }
 0x369   : > { %7487 = vmatprep.mubr.bf16.mxu1 %v19801_v21  ;;  %7377 = vmatprep.subr.bf16.mxu0 %v15672_v19  ;;  %v4497_v19 = vld [vmem:[%s19309_s16 + $0xa00] sm:$0xff]  ;;  %v4270_v36 = vld [vmem:[%s19309_s16 + $0x2e8] sm:$0xff] }
 0x36a   : > { %7457 = vmatprep.subr.bf16.mxu1 %v15410_v46  ;;  %v4234_v46 = vld [vmem:[%s19309_s16 + $0x1c8] sm:$0xff]  ;;  %v15719_v3 = vcombine.low %v4497_v19, %v4501_v10 }
 0x36b   : > { %v15457_v53 = vcombine.low %v4234_v46, %v4238_v47 }
 0x36c   : > { %7378 = vmatpush1.bf16.msra.mxu0 %v15671_v50  ;;  %7458 = vmatpush1.bf16.msra.mxu1 %v15409_v48  ;;  %v15720_v50 = vcombine.high %v4497_v19, %v4501_v10  ;;  %v15458_v48 = vcombine.high %v4234_v46, %v4238_v47  ;;  %v4274_v19 = vld [vmem:[%s19309_s16 + $0x308] sm:$0xff]  ;;  %v15489_v47 = vcombine.low %v4266_v35, %v4270_v36 }
 0x36d   : > { %7379 = vmatprep.subr.bf16.mxu0 %v15680_v61  ;;  %7459 = vmatprep.subr.bf16.mxu1 %v15418_v0  ;;  %v4505_v61 = vld [vmem:[%s19309_s16 + $0xa40] sm:$0xff]  ;;  %v4278_v10 = vld [vmem:[%s19309_s16 + $0x328] sm:$0xff] }
 0x36e   : > { %v4509_v0 = vld [vmem:[%s19309_s16 + $0xa60] sm:$0xff] }
 0x36f   : > { %v15727_v9 = vcombine.low %v4505_v61, %v4509_v0 }
 0x370   : > { %7380 = vmatpush1.bf16.msra.mxu0 %v15679_v24  ;;  %7460 = vmatpush1.bf16.msra.mxu1 %v15417_v5  ;;  %v15728_v24 = vcombine.high %v4505_v61, %v4509_v0  ;;  %v15466_v5 = vcombine.high %v4242_v63, %v4246_v2  ;;  %v4282_v61 = vld [vmem:[%s19309_s16 + $0x348] sm:$0xff]  ;;  %v15497_v2 = vcombine.low %v4274_v19, %v4278_v10 }
 0x371   : > { %7381 = vmatprep.subr.bf16.mxu0 %v15688_v6  ;;  %7461 = vmatprep.subr.bf16.mxu1 %v15426_v56  ;;  %v4513_v6 = vld [vmem:[%s19309_s16 + $0xa80] sm:$0xff]  ;;  %v4286_v0 = vld [vmem:[%s19309_s16 + $0x368] sm:$0xff] }
 0x372   : > { %v4517_v56 = vld [vmem:[%s19309_s16 + $0xaa0] sm:$0xff] }
 0x373   : > { %v15735_v28 = vcombine.low %v4513_v6, %v4517_v56 }
 0x374   : > { %7382 = vmatpush1.bf16.msra.mxu0 %v15687_v17  ;;  %7462 = vmatpush1.bf16.msra.mxu1 %v15425_v62  ;;  %v15736_v17 = vcombine.high %v4513_v6, %v4517_v56  ;;  %v15474_v62 = vcombine.high %v4250_v55, %v4254_v20  ;;  %v4557_v6 = vld [vmem:[%s19309_s16 + $0xbe0] sm:$0xff]  ;;  %v4290_v56 = vld [vmem:[%s19309_s16 + $0x388] sm:$0xff] }
 0x375   : > { %7383 = vmatprep.subr.bf16.mxu0 %v15696_v22  ;;  %7463 = vmatprep.subr.bf16.mxu1 %v15434_v23  ;;  %v4521_v22 = vld [vmem:[%s19309_s16 + $0xac0] sm:$0xff]  ;;  %v4294_v55 = vld [vmem:[%s19309_s16 + $0x3a8] sm:$0xff] }
 0x376   : > { %v4525_v23 = vld [vmem:[%s19309_s16 + $0xae0] sm:$0xff] }
 0x377   : > { %v15743_v37 = vcombine.low %v4521_v22, %v4525_v23 }
 0x378   : > { %7384 = vmatpush1.bf16.msra.mxu0 %v15695_v30  ;;  %7464 = vmatpush1.bf16.msra.mxu1 %v15433_v14  ;;  %v15744_v30 = vcombine.high %v4521_v22, %v4525_v23  ;;  %v15482_v14 = vcombine.high %v4258_v25, %v4262_v27  ;;  %v4302_v22 = vld [vmem:[%s19309_s16 + $0x3e8] sm:$0xff]  ;;  %v4561_v23 = vld [vmem:[%s19309_s16 + $0xc00] sm:$0xff] }
 0x379   : > { %7385 = vmatprep.subr.bf16.mxu0 %v15704_v31  ;;  %7465 = vmatprep.subr.bf16.mxu1 %v15442_v33  ;;  %v4529_v31 = vld [vmem:[%s19309_s16 + $0xb00] sm:$0xff] }
 0x37a   : > { %v4533_v33 = vld [vmem:[%s19309_s16 + $0xb20] sm:$0xff] }
 0x37b   : > { %v15751_v46 = vcombine.low %v4529_v31, %v4533_v33  ;;  %v4565_v25 = vld [vmem:[%s19309_s16 + $0xc20] sm:$0xff] }
 0x37c   : > { %7386 = vmatpush1.bf16.msra.mxu0 %v15703_v42  ;;  %7466 = vmatpush1.bf16.msra.mxu1 %v15441_v1  ;;  %v15752_v42 = vcombine.high %v4529_v31, %v4533_v33  ;;  %v15490_v1 = vcombine.high %v4266_v35, %v4270_v36  ;;  %v4310_v31 = vld [vmem:[%s19309_s16 + $0x428] sm:$0xff]  ;;  %v4569_v33 = vld [vmem:[%s19309_s16 + $0xc40] sm:$0xff] }
 0x37d   : > { %7387 = vmatprep.subr.bf16.mxu0 %v15712_v54  ;;  %7467 = vmatprep.subr.bf16.mxu1 %v15450_v44  ;;  %v4537_v54 = vld [vmem:[%s19309_s16 + $0xb40] sm:$0xff] }
 0x37e   : > { %v4541_v44 = vld [vmem:[%s19309_s16 + $0xb60] sm:$0xff] }
 0x37f   : > { %v15759_v63 = vcombine.low %v4537_v54, %v4541_v44  ;;  %v4573_v35 = vld [vmem:[%s19309_s16 + $0xc60] sm:$0xff] }
 0x380   : > { %7388 = vmatpush1.bf16.msra.mxu0 %v15711_v51  ;;  %7468 = vmatpush1.bf16.msra.mxu1 %v15449_v57  ;;  %v15760_v51 = vcombine.high %v4537_v54, %v4541_v44  ;;  %v15498_v57 = vcombine.high %v4274_v19, %v4278_v10  ;;  %v4314_v54 = vld [vmem:[%s19309_s16 + $0x448] sm:$0xff]  ;;  %v4577_v19 = vld [vmem:[%s19309_s16 + $0xc80] sm:$0xff] }
 0x381   : > { %7389 = vmatprep.subr.bf16.mxu0 %v15720_v50  ;;  %7469 = vmatprep.subr.bf16.mxu1 %v15458_v48  ;;  %v4545_v50 = vld [vmem:[%s19309_s16 + $0xb80] sm:$0xff]  ;;  %v4318_v44 = vld [vmem:[%s19309_s16 + $0x468] sm:$0xff] }
 0x382   : > { %v4549_v48 = vld [vmem:[%s19309_s16 + $0xba0] sm:$0xff] }
 0x383   : > { %v15767_v20 = vcombine.low %v4545_v50, %v4549_v48  ;;  %v4581_v10 = vld [vmem:[%s19309_s16 + $0xca0] sm:$0xff] }
 0x384   : > { %7390 = vmatpush1.bf16.msra.mxu0 %v15719_v3  ;;  %7470 = vmatpush1.bf16.msra.mxu1 %v15457_v53  ;;  %v1244_v3 = vrot.slane %v19979_v60, %v19418_v15  ;;  %v15768_v53 = vcombine.high %v4545_v50, %v4549_v48  ;;  %v4326_v50 = vld [vmem:[%s19309_s16 + $0x4a8] sm:$0xff]  ;;  %v15800_v48 = vcombine.high %v4577_v19, %v4581_v10 }
 0x385   : > { %7391 = vmatprep.subr.bf16.mxu0 %v15728_v24  ;;  %7471 = vmatprep.subr.bf16.mxu1 %v15466_v5  ;;  %v15506_v24 = vcombine.high %v4282_v61, %v4286_v0  ;;  %v4553_v5 = vld [vmem:[%s19309_s16 + $0xbc0] sm:$0xff] }
 0x386   : > { %v15776_v60 = vcombine.high %v4553_v5, %v4557_v6  ;;  %v15775_v27 = vcombine.low %v4553_v5, %v4557_v6  ;;  %v4593_v6 = vld [vmem:[%s19309_s16 + $0xd00] sm:$0xff] }
 0x388   : > { %7392 = vmatpush1.bf16.msra.mxu0 %v15727_v9  ;;  %7472 = vmatpush1.bf16.msra.mxu1 %v15465_v16  ;;  %v15505_v9 = vcombine.low %v4282_v61, %v4286_v0  ;;  %v16821_v16 = vadd.f32 %v19960_v7, %v1244_v3  ;;  %v4585_v61 = vld [vmem:[%s19309_s16 + $0xcc0] sm:$0xff]  ;;  %v15799_v3 = vcombine.low %v4577_v19, %v4581_v10 }
 0x389   : > { %7393 = vmatprep.subr.bf16.mxu0 %v15736_v17  ;;  %7473 = vmatprep.subr.bf16.mxu1 %v15474_v62  ;;  %v15514_v17 = vcombine.high %v4290_v56, %v4294_v55  ;;  %v4298_v62 = vld [vmem:[%s19309_s16 + $0x3c8] sm:$0xff]  ;;  %v4589_v0 = vld [vmem:[%s19309_s16 + $0xce0] sm:$0xff] }
 0x38a   : > { %v15522_v7 = vcombine.high %v4298_v62, %v4302_v22  ;;  %v15521_v36 = vcombine.low %v4298_v62, %v4302_v22  ;;  %v15808_v5 = vcombine.high %v4585_v61, %v4589_v0  ;;  %v4601_v62 = vld [vmem:[%s19309_s16 + $0xd40] sm:$0xff] }
 0x38b   : > { %v4605_v22 = vld [vmem:[%s19309_s16 + $0xd60] sm:$0xff] }
 0x38c   : > { %7394 = vmatpush1.bf16.msra.mxu0 %v15735_v28  ;;  %7474 = vmatpush1.bf16.msra.mxu1 %v15473_v29  ;;  %v15513_v28 = vcombine.low %v4290_v56, %v4294_v55  ;;  %v4165_v29 = vmax.f32 %v16821_v16, 0.0  ;;  %v4597_v56 = vld [vmem:[%s19309_s16 + $0xd20] sm:$0xff]  ;;  %v4338_v16 = vld [vmem:[%s19309_s16 + $0x508] sm:$0xff] }
 0x38d   : > { %7395 = vmatprep.subr.bf16.mxu0 %v15744_v30  ;;  %7475 = vmatprep.subr.bf16.mxu1 %v15482_v14  ;;  %v4306_v30 = vld [vmem:[%s19309_s16 + $0x408] sm:$0xff]  ;;  %v15784_v14 = vcombine.high %v4561_v23, %v4565_v25 }
 0x390   : > { %7396 = vmatpush1.bf16.msra.mxu0 %v15743_v37  ;;  %7476 = vmatpush1.bf16.msra.mxu1 %v15481_v39  ;;  %v15783_v37 = vcombine.low %v4561_v23, %v4565_v25  ;;  %v20074_v39 = vpack.c.bf16 %v4165_v29, %v4165_v29  ;;  %v4350_v29 = vld [vmem:[%s19309_s16 + $0x568] sm:$0xff] }
 0x391   : > { %7397 = vmatprep.subr.bf16.mxu0 %v15752_v42  ;;  %7477 = vmatprep.subr.bf16.mxu1 %v15490_v1  ;;  %v15530_v42 = vcombine.high %v4306_v30, %v4310_v31  ;;  %v15792_v1 = vcombine.high %v4569_v33, %v4573_v35 }
 0x394   : > { %7398 = vmatpush1.bf16.msra.mxu0 %v15751_v46  ;;  %7478 = vmatpush1.bf16.msra.mxu1 %v15489_v47  ;;  %v15529_v46 = vcombine.low %v4306_v30, %v4310_v31  ;;  %v15538_v47 = vcombine.high %v4314_v54, %v4318_v44  ;;  %v4609_v30 = vld [vmem:[%s19309_s16 + $0xd80] sm:$0xff] }
 0x395   : > { %7399 = vmatprep.subr.bf16.mxu0 %v15760_v51  ;;  %7479 = vmatprep.subr.bf16.mxu1 %v15498_v57  ;;  %v15791_v51 = vcombine.low %v4569_v33, %v4573_v35  ;;  %v4322_v57 = vld [vmem:[%s19309_s16 + $0x488] sm:$0xff]  ;;  %v15823_v35 = vcombine.low %v4601_v62, %v4605_v22 }
 0x396   : > { %v15545_v55 = vcombine.low %v4322_v57, %v4326_v50 }
 0x398   : > { %7400 = vmatpush1.bf16.msra.mxu0 %v15759_v63  ;;  %7480 = vmatpush1.bf16.msra.mxu1 %v15497_v2  ;;  %v15537_v63 = vcombine.low %v4314_v54, %v4318_v44  ;;  %v15546_v2 = vcombine.high %v4322_v57, %v4326_v50  ;;  %v4621_v54 = vld [vmem:[%s19309_s16 + $0xde0] sm:$0xff] }
 0x399   : > { %7401 = vmatprep.subr.bf16.mxu0 %v15768_v53  ;;  %7481 = vmatprep.subr.bf16.mxu1 %v15506_v24  ;;  %v4330_v53 = vld [vmem:[%s19309_s16 + $0x4c8] sm:$0xff]  ;;  %v4625_v57 = vld [vmem:[%s19309_s16 + $0xe00] sm:$0xff] }
 0x39a   : > { %v4334_v24 = vld [vmem:[%s19309_s16 + $0x4e8] sm:$0xff]  ;;  %v4629_v50 = vld [vmem:[%s19309_s16 + $0xe20] sm:$0xff] }
 0x39b   : > { %v15553_v23 = vcombine.low %v4330_v53, %v4334_v24 }
 0x39c   : > { %7402 = vmatpush1.bf16.msra.mxu0 %v15767_v20  ;;  %7482 = vmatpush1.bf16.msra.mxu1 %v15505_v9  ;;  %v15554_v20 = vcombine.high %v4330_v53, %v4334_v24  ;;  %v15807_v9 = vcombine.low %v4585_v61, %v4589_v0  ;;  %v4633_v53 = vld [vmem:[%s19309_s16 + $0xe40] sm:$0xff] }
 0x39d   : > { %7403 = vmatprep.subr.bf16.mxu0 %v15776_v60  ;;  %7483 = vmatprep.subr.bf16.mxu1 %v15514_v17  ;;  %v4342_v60 = vld [vmem:[%s19309_s16 + $0x528] sm:$0xff]  ;;  %v15816_v17 = vcombine.high %v4593_v6, %v4597_v56  ;;  %v4637_v24 = vld [vmem:[%s19309_s16 + $0xe60] sm:$0xff] }
 0x39e   : > { %v15562_v25 = vcombine.high %v4338_v16, %v4342_v60  ;;  %v15561_v31 = vcombine.low %v4338_v16, %v4342_v60  ;;  %v4382_v16 = vld [vmem:[%s19309_s16 + $0x668] sm:$0xff]  ;;  %v15856_v60 = vcombine.high %v4633_v53, %v4637_v24 }
 0x3a0   : > { %7404 = vmatpush1.bf16.msra.mxu0 %v15775_v27  ;;  %7484 = vmatpush1.bf16.msra.mxu1 %v15513_v28  ;;  %v15815_v27 = vcombine.low %v4593_v6, %v4597_v56  ;;  %v4346_v28 = vld [vmem:[%s19309_s16 + $0x548] sm:$0xff]  ;;  %v20112_v6 = vld [vmem:[%s19309_s16 + $0x10] sm:$0xff] }
 0x3a1   : > { %7485 = vmatprep.subr.bf16.mxu1 %v15522_v7  ;;  %7414 = vmatprep.subr.bf16.mxu0 %v15784_v14  ;;  %v15824_v7 = vcombine.high %v4601_v62, %v4605_v22  ;;  %v4613_v14 = vld [vmem:[%s19309_s16 + $0xda0] sm:$0xff]  ;;  %v15570_v33 = vcombine.high %v4346_v28, %v4350_v29  ;;  %v15569_v44 = vcombine.low %v4346_v28, %v4350_v29  ;;  %v20115_v56 = vld [vmem:[%s19309_s16 + $0x30] sm:$0xff]  ;;  %v4386_v28 = vld [vmem:[%s19309_s16 + $0x688] sm:$0xff] }
 0x3a2   : > { %v15831_v10 = vcombine.low %v4609_v30, %v4613_v14  ;;  %v4641_v62 = vld [vmem:[%s19309_s16 + $0xe80] sm:$0xff]  ;;  %v4390_v29 = vld [vmem:[%s19309_s16 + $0x6a8] sm:$0xff] }
 0x3a3   : > { %7406 = vmatmul.mubr.bf16.vlgmr.msra.gmra.mrb[8].mxu0 %v20074_v39  ;;  %v4645_v22 = vld [vmem:[%s19309_s16 + $0xea0] sm:$0xff] }
 0x3a4   : > { %7486 = vmatpush1.bf16.msra.mxu1 %v15521_v36  ;;  %7415 = vmatpush1.bf16.msra.mxu0 %v15783_v37  ;;  %v4354_v36 = vld [vmem:[%s19309_s16 + $0x588] sm:$0xff] }
 0x3a5   : > { %7496 = vmatprep.subr.bf16.mxu1 %v15530_v42  ;;  %7416 = vmatprep.subr.bf16.mxu0 %v15792_v1  ;;  %v4358_v37 = vld [vmem:[%s19309_s16 + $0x5a8] sm:$0xff]  ;;  %v15832_v42 = vcombine.high %v4609_v30, %v4613_v14  ;;  %v4617_v1 = vld [vmem:[%s19309_s16 + $0xdc0] sm:$0xff] }
 0x3a6   : > { %v15578_v19 = vcombine.high %v4354_v36, %v4358_v37  ;;  %v15839_v0 = vcombine.low %v4617_v1, %v4621_v54  ;;  %v4649_v30 = vld [vmem:[%s19309_s16 + $0xec0] sm:$0xff] }
 0x3a7   : > { %7488 = vmatmul.mubr.bf16.vlgmr.msra.gmra.mrb[12].mxu1 %v19841_v4  ;;  %v4653_v14 = vld [vmem:[%s19309_s16 + $0xee0] sm:$0xff] }
 0x3a8   : > { %7497 = vmatpush1.bf16.msra.mxu1 %v15529_v46  ;;  %7528 = vmatprep.mubr.bf16.mxu1 %v19993_v32  ;;  %v4362_v46 = vld [vmem:[%s19309_s16 + $0x5c8] sm:$0xff] }
 0x3a9   : > { %7498 = vmatprep.subr.bf16.mxu1 %v15538_v47  ;;  %7417 = vmatpush1.bf16.msra.mxu0 %v15791_v51  ;;  %v4366_v47 = vld [vmem:[%s19309_s16 + $0x5e8] sm:$0xff]  ;;  %v15840_v51 = vcombine.high %v4617_v1, %v4621_v54  ;;  %v4657_v1 = vld [vmem:[%s19309_s16 + $0xf00] sm:$0xff] }
 0x3aa   : > { %7418 = vmatprep.subr.bf16.mxu0 %v15800_v48  ;;  %v15577_v48 = vcombine.low %v4354_v36, %v4358_v37  ;;  %v15586_v61 = vcombine.high %v4362_v46, %v4366_v47  ;;  %v4394_v36 = vld [vmem:[%s19309_s16 + $0x6c8] sm:$0xff]  ;;  %v4661_v54 = vld [vmem:[%s19309_s16 + $0xf20] sm:$0xff] }
 0x3ab   : > { %v4398_v37 = vld [vmem:[%s19309_s16 + $0x6e8] sm:$0xff] }
 0x3ac   : > { %7499 = vmatpush1.bf16.msra.mxu1 %v15537_v63  ;;  %v4370_v63 = vld [vmem:[%s19309_s16 + $0x608] sm:$0xff] }
 0x3ad   : > { %7500 = vmatprep.subr.bf16.mxu1 %v15546_v2  ;;  %7419 = vmatpush1.bf16.msra.mxu0 %v15799_v3  ;;  %v4374_v2 = vld [vmem:[%s19309_s16 + $0x628] sm:$0xff]  ;;  %v15848_v3 = vcombine.high %v4625_v57, %v4629_v50 }
 0x3ae   : > { %7420 = vmatprep.subr.bf16.mxu0 %v15808_v5  ;;  %v15585_v5 = vcombine.low %v4362_v46, %v4366_v47  ;;  %v4402_v46 = vld [vmem:[%s19309_s16 + $0x708] sm:$0xff] }
 0x3af   : > { %v4406_v47 = vld [vmem:[%s19309_s16 + $0x728] sm:$0xff] }
 0x3b0   : > { %7501 = vmatpush1.bf16.msra.mxu1 %v15545_v55  ;;  %v15594_v55 = vcombine.high %v4370_v63, %v4374_v2 }
 0x3b1   : > { %7502 = vmatprep.subr.bf16.mxu1 %v15554_v20  ;;  %7421 = vmatpush1.bf16.msra.mxu0 %v15807_v9  ;;  %v15847_v20 = vcombine.low %v4625_v57, %v4629_v50  ;;  %v4378_v9 = vld [vmem:[%s19309_s16 + $0x648] sm:$0xff]  ;;  %v4665_v57 = vld [vmem:[%s19309_s16 + $0xf40] sm:$0xff] }
 0x3b2   : > { %7422 = vmatprep.subr.bf16.mxu0 %v15816_v17  ;;  %v15403_v17 = vcombine.low %v20112_v6, %v20115_v56  ;;  %v4669_v50 = vld [vmem:[%s19309_s16 + $0xf60] sm:$0xff] }
 0x3b4   : > { %7503 = vmatpush1.bf16.msra.mxu1 %v15553_v23  ;;  %v15593_v23 = vcombine.low %v4370_v63, %v4374_v2  ;;  %v4410_v63 = vld [vmem:[%s19309_s16 + $0x748] sm:$0xff] }
 0x3b5   : > { %7504 = vmatprep.subr.bf16.mxu1 %v15562_v25  ;;  %7423 = vmatpush1.bf16.msra.mxu0 %v15815_v27  ;;  %v15602_v25 = vcombine.high %v4378_v9, %v4382_v16  ;;  %v15855_v27 = vcombine.low %v4633_v53, %v4637_v24  ;;  %v4414_v2 = vld [vmem:[%s19309_s16 + $0x768] sm:$0xff]  ;;  %v4673_v53 = vld [vmem:[%s19309_s16 + $0xf80] sm:$0xff] }
 0x3b6   : > { %7424 = vmatprep.subr.bf16.mxu0 %v15824_v7  ;;  %v15864_v7 = vcombine.high %v4641_v62, %v4645_v22  ;;  %v4677_v24 = vld [vmem:[%s19309_s16 + $0xfa0] sm:$0xff] }
 0x3b8   : > { %7505 = vmatpush1.bf16.msra.mxu1 %v15561_v31  ;;  %v15601_v31 = vcombine.low %v4378_v9, %v4382_v16  ;;  %v4418_v9 = vld [vmem:[%s19309_s16 + $0x788] sm:$0xff] }
 0x3b9   : > { %7506 = vmatprep.subr.bf16.mxu1 %v15570_v33  ;;  %7425 = vmatpush1.bf16.msra.mxu0 %v15823_v35  ;;  %v15610_v33 = vcombine.high %v4386_v28, %v4390_v29  ;;  %v15863_v35 = vcombine.low %v4641_v62, %v4645_v22  ;;  %v4422_v16 = vld [vmem:[%s19309_s16 + $0x7a8] sm:$0xff]  ;;  %v4681_v62 = vld [vmem:[%s19309_s16 + $0xfc0] sm:$0xff] }
 0x3ba   : > { %7426 = vmatprep.subr.bf16.mxu0 %v15832_v42  ;;  %v15872_v42 = vcombine.high %v4649_v30, %v4653_v14  ;;  %v4685_v22 = vld [vmem:[%s19309_s16 + $0xfe0] sm:$0xff] }
 0x3bc   : > { %7507 = vmatpush1.bf16.msra.mxu1 %v15569_v44  ;;  %v15609_v44 = vcombine.low %v4386_v28, %v4390_v29  ;;  %v4426_v28 = vld [vmem:[%s19309_s16 + $0x7c8] sm:$0xff] }
 0x3bd   : > { %7508 = vmatprep.subr.bf16.mxu1 %v15578_v19  ;;  %7427 = vmatpush1.bf16.msra.mxu0 %v15831_v10  ;;  %v15618_v19 = vcombine.high %v4394_v36, %v4398_v37  ;;  %v15871_v10 = vcombine.low %v4649_v30, %v4653_v14  ;;  %v4430_v29 = vld [vmem:[%s19309_s16 + $0x7e8] sm:$0xff]  ;;  %v15641_v30 = vcombine.low %v4418_v9, %v4422_v16 }
 0x3be   : > { %7428 = vmatprep.subr.bf16.mxu0 %v15840_v51  ;;  %v15880_v51 = vcombine.high %v4657_v1, %v4661_v54  ;;  %v15650_v14 = vcombine.high %v4426_v28, %v4430_v29 }
 0x3c0   : > { %7509 = vmatpush1.bf16.msra.mxu1 %v15577_v48  ;;  %v15617_v48 = vcombine.low %v4394_v36, %v4398_v37  ;;  %v15404_v36 = vcombine.high %v20112_v6, %v20115_v56  ;;  %v15649_v37 = vcombine.low %v4426_v28, %v4430_v29  ;;  %v4502_v28 = vld [vmem:[%s19309_s16 + $0xa28] sm:$0xff] }
 0x3c1   : > { %7510 = vmatprep.subr.bf16.mxu1 %v15586_v61  ;;  %7429 = vmatpush1.bf16.msra.mxu0 %v15839_v0  ;;  %v15626_v61 = vcombine.high %v4402_v46, %v4406_v47  ;;  %v15879_v0 = vcombine.low %v4657_v1, %v4661_v54  ;;  %v4442_v1 = vld [vmem:[%s19309_s16 + $0x848] sm:$0xff] }
 0x3c2   : > { %7430 = vmatprep.subr.bf16.mxu0 %v15848_v3  ;;  %v15888_v3 = vcombine.high %v4665_v57, %v4669_v50  ;;  %v4446_v54 = vld [vmem:[%s19309_s16 + $0x868] sm:$0xff] }
 0x3c4   : > { %7511 = vmatpush1.bf16.msra.mxu1 %v15585_v5  ;;  %v15625_v5 = vcombine.low %v4402_v46, %v4406_v47  ;;  %v4454_v46 = vld [vmem:[%s19309_s16 + $0x8a8] sm:$0xff]  ;;  %v15665_v47 = vcombine.low %v4442_v1, %v4446_v54 }
 0x3c5   : > { %7512 = vmatprep.subr.bf16.mxu1 %v15594_v55  ;;  %7431 = vmatpush1.bf16.msra.mxu0 %v15847_v20  ;;  %v15634_v55 = vcombine.high %v4410_v63, %v4414_v2  ;;  %v15887_v20 = vcombine.low %v4665_v57, %v4669_v50  ;;  %v4458_v57 = vld [vmem:[%s19309_s16 + $0x8c8] sm:$0xff] }
 0x3c6   : > { %7432 = vmatprep.subr.bf16.mxu0 %v15856_v60  ;;  %v15896_v60 = vcombine.high %v4673_v53, %v4677_v24  ;;  %v4462_v50 = vld [vmem:[%s19309_s16 + $0x8e8] sm:$0xff] }
 0x3c8   : > { %7513 = vmatpush1.bf16.msra.mxu1 %v15593_v23  ;;  %v15633_v23 = vcombine.low %v4410_v63, %v4414_v2  ;;  %v4470_v63 = vld [vmem:[%s19309_s16 + $0x928] sm:$0xff]  ;;  %v15681_v2 = vcombine.low %v4458_v57, %v4462_v50 }
 0x3c9   : > { %7514 = vmatprep.subr.bf16.mxu1 %v15602_v25  ;;  %7433 = vmatpush1.bf16.msra.mxu0 %v15855_v27  ;;  %v15642_v25 = vcombine.high %v4418_v9, %v4422_v16  ;;  %v15895_v27 = vcombine.low %v4673_v53, %v4677_v24  ;;  %v4474_v53 = vld [vmem:[%s19309_s16 + $0x948] sm:$0xff] }
 0x3ca   : > { %7434 = vmatprep.subr.bf16.mxu0 %v15864_v7  ;;  %v15904_v7 = vcombine.high %v4681_v62, %v4685_v22  ;;  %v4478_v24 = vld [vmem:[%s19309_s16 + $0x968] sm:$0xff] }
 0x3cb   : > { %v4486_v9 = vld [vmem:[%s19309_s16 + $0x9a8] sm:$0xff]  ;;  %v15697_v16 = vcombine.low %v4474_v53, %v4478_v24 }
 0x3cc   : > { %7515 = vmatpush1.bf16.msra.mxu1 %v15601_v31  ;;  %v15903_v31 = vcombine.low %v4681_v62, %v4685_v22  ;;  %v4490_v62 = vld [vmem:[%s19309_s16 + $0x9c8] sm:$0xff] }
 0x3cd   : > { %7516 = vmatprep.subr.bf16.mxu1 %v15610_v33  ;;  %7435 = vmatpush1.bf16.msra.mxu0 %v15863_v35  ;;  %v4434_v33 = vld [vmem:[%s19309_s16 + $0x808] sm:$0xff] }
 0x3ce   : > { %7436 = vmatprep.subr.bf16.mxu0 %v15872_v42  ;;  %v4438_v35 = vld [vmem:[%s19309_s16 + $0x828] sm:$0xff] }
 0x3cf   : > { %v15658_v42 = vcombine.high %v4434_v33, %v4438_v35  ;;  %v4494_v22 = vld [vmem:[%s19309_s16 + $0x9e8] sm:$0xff] }
 0x3d0   : > { %7517 = vmatpush1.bf16.msra.mxu1 %v15609_v44  ;;  %v15657_v44 = vcombine.low %v4434_v33, %v4438_v35  ;;  %v15713_v29 = vcombine.low %v4490_v62, %v4494_v22  ;;  %v4514_v35 = vld [vmem:[%s19309_s16 + $0xa88] sm:$0xff] }
 0x3d1   : > { %7518 = vmatprep.subr.bf16.mxu1 %v15618_v19  ;;  %7437 = vmatpush1.bf16.msra.mxu0 %v15871_v10  ;;  %v15666_v19 = vcombine.high %v4442_v1, %v4446_v54  ;;  %v4450_v10 = vld [vmem:[%s19309_s16 + $0x888] sm:$0xff] }
 0x3d2   : > { %7438 = vmatprep.subr.bf16.mxu0 %v15880_v51  ;;  %v15674_v51 = vcombine.high %v4450_v10, %v4454_v46  ;;  %v4522_v1 = vld [vmem:[%s19309_s16 + $0xac8] sm:$0xff] }
 0x3d3   : > { %v4526_v54 = vld [vmem:[%s19309_s16 + $0xae8] sm:$0xff] }
 0x3d4   : > { %7519 = vmatpush1.bf16.msra.mxu1 %v15617_v48  ;;  %v15673_v48 = vcombine.low %v4450_v10, %v4454_v46  ;;  %v4530_v10 = vld [vmem:[%s19309_s16 + $0xb08] sm:$0xff] }
 0x3d5   : > { %7520 = vmatprep.subr.bf16.mxu1 %v15626_v61  ;;  %7439 = vmatpush1.bf16.msra.mxu0 %v15879_v0  ;;  %v15682_v61 = vcombine.high %v4458_v57, %v4462_v50  ;;  %v4466_v0 = vld [vmem:[%s19309_s16 + $0x908] sm:$0xff] }
 0x3d6   : > { %7440 = vmatprep.subr.bf16.mxu0 %v15888_v3  ;;  %v15690_v3 = vcombine.high %v4466_v0, %v4470_v63  ;;  %v4534_v46 = vld [vmem:[%s19309_s16 + $0xb28] sm:$0xff] }
 0x3d7   : > { %v4538_v57 = vld [vmem:[%s19309_s16 + $0xb48] sm:$0xff] }
 0x3d8   : > { %7521 = vmatpush1.bf16.msra.mxu1 %v15625_v5  ;;  %v15689_v5 = vcombine.low %v4466_v0, %v4470_v63  ;;  %v4542_v50 = vld [vmem:[%s19309_s16 + $0xb68] sm:$0xff] }
 0x3d9   : > { %7522 = vmatprep.subr.bf16.mxu1 %v15634_v55  ;;  %7441 = vmatpush1.bf16.msra.mxu0 %v15887_v20  ;;  %v15698_v55 = vcombine.high %v4474_v53, %v4478_v24  ;;  %v4482_v20 = vld [vmem:[%s19309_s16 + $0x988] sm:$0xff] }
 0x3da   : > { %7442 = vmatprep.subr.bf16.mxu0 %v15896_v60  ;;  %v15706_v60 = vcombine.high %v4482_v20, %v4486_v9  ;;  %v4546_v0 = vld [vmem:[%s19309_s16 + $0xb88] sm:$0xff] }
 0x3db   : > { %v4550_v63 = vld [vmem:[%s19309_s16 + $0xba8] sm:$0xff] }
 0x3dc   : > { %7523 = vmatpush1.bf16.msra.mxu1 %v15633_v23  ;;  %v15705_v23 = vcombine.low %v4482_v20, %v4486_v9  ;;  %v4554_v53 = vld [vmem:[%s19309_s16 + $0xbc8] sm:$0xff] }
 0x3dd   : > { %7524 = vmatprep.subr.bf16.mxu1 %v15642_v25  ;;  %7443 = vmatpush1.bf16.msra.mxu0 %v15895_v27  ;;  %v15714_v25 = vcombine.high %v4490_v62, %v4494_v22  ;;  %v4498_v27 = vld [vmem:[%s19309_s16 + $0xa08] sm:$0xff] }
 0x3de   : > { %7444 = vmatprep.subr.bf16.mxu0 %v15904_v7  ;;  %v15722_v7 = vcombine.high %v4498_v27, %v4502_v28  ;;  %v4558_v24 = vld [vmem:[%s19309_s16 + $0xbe8] sm:$0xff] }
 0x3df   : > { %v4562_v20 = vld [vmem:[%s19309_s16 + $0xc08] sm:$0xff] }
 0x3e0   : > { %7525 = vmatpush1.bf16.msra.mxu1 %v15641_v30  ;;  %v4506_v30 = vld [vmem:[%s19309_s16 + $0xa48] sm:$0xff] }
 0x3e1   : > { %7526 = vmatprep.subr.bf16.mxu1 %v15650_v14  ;;  %7445 = vmatpush1.bf16.msra.mxu0 %v15903_v31  ;;  %v4510_v14 = vld [vmem:[%s19309_s16 + $0xa68] sm:$0xff]  ;;  %v15721_v31 = vcombine.low %v4498_v27, %v4502_v28 }
 0x3e2   : > { %7619 = vmatprep.subr.bf16.mxu0 %v15404_v36  ;;  %v15730_v33 = vcombine.high %v4506_v30, %v4510_v14  ;;  %v4518_v36 = vld [vmem:[%s19309_s16 + $0xaa8] sm:$0xff] }
 0x3e3   : > { %v4566_v9 = vld [vmem:[%s19309_s16 + $0xc28] sm:$0xff] }
 0x3e4   : > { %7527 = vmatpush1.bf16.msra.mxu1 %v15649_v37  ;;  %v15729_v37 = vcombine.low %v4506_v30, %v4510_v14  ;;  %v4570_v62 = vld [vmem:[%s19309_s16 + $0xc48] sm:$0xff] }
 0x3e5   : > { %7537 = vmatprep.subr.bf16.mxu1 %v15658_v42  ;;  %v15738_v42 = vcombine.high %v4514_v35, %v4518_v36  ;;  %v4574_v22 = vld [vmem:[%s19309_s16 + $0xc68] sm:$0xff] }
 0x3e6   : > { %v4578_v27 = vld [vmem:[%s19309_s16 + $0xc88] sm:$0xff] }
 0x3e7   : > { %7529 = vmatmul.mubr.bf16.vlgmr.msra.gmra.mrb[12].mxu1 %v19995_v34  ;;  %v4582_v28 = vld [vmem:[%s19309_s16 + $0xca8] sm:$0xff] }
 0x3e8   : > { %7538 = vmatpush1.bf16.msra.mxu1 %v15657_v44  ;;  %7569 = vmatprep.mubr.bf16.mxu1 %v20000_v40  ;;  %v15737_v44 = vcombine.low %v4514_v35, %v4518_v36  ;;  %v4586_v30 = vld [vmem:[%s19309_s16 + $0xcc8] sm:$0xff] }
 0x3e9   : > { %7539 = vmatprep.subr.bf16.mxu1 %v15666_v19  ;;  %v15746_v19 = vcombine.high %v4522_v1, %v4526_v54  ;;  %v4590_v14 = vld [vmem:[%s19309_s16 + $0xce8] sm:$0xff] }
 0x3ea   : > { %v4594_v35 = vld [vmem:[%s19309_s16 + $0xd08] sm:$0xff] }
 0x3eb   : > { %v4598_v36 = vld [vmem:[%s19309_s16 + $0xd28] sm:$0xff] }
 0x3ec   : > { %7540 = vmatpush1.bf16.msra.mxu1 %v15665_v47  ;;  %v15745_v47 = vcombine.low %v4522_v1, %v4526_v54  ;;  %v4602_v1 = vld [vmem:[%s19309_s16 + $0xd48] sm:$0xff] }
 0x3ed   : > { %7541 = vmatprep.subr.bf16.mxu1 %v15674_v51  ;;  %v15754_v51 = vcombine.high %v4530_v10, %v4534_v46  ;;  %v4606_v54 = vld [vmem:[%s19309_s16 + $0xd68] sm:$0xff] }
 0x3f0   : > { %7542 = vmatpush1.bf16.msra.mxu1 %v15673_v48  ;;  %v15753_v48 = vcombine.low %v4530_v10, %v4534_v46  ;;  %v15826_v10 = vcombine.high %v4602_v1, %v4606_v54  ;;  %v4610_v46 = vld [vmem:[%s19309_s16 + $0xd88] sm:$0xff] }
 0x3f1   : > { %7543 = vmatprep.subr.bf16.mxu1 %v15682_v61  ;;  %v15762_v61 = vcombine.high %v4538_v57, %v4542_v50 }
 0x3f4   : > { %7544 = vmatpush1.bf16.msra.mxu1 %v15681_v2  ;;  %v15761_v2 = vcombine.low %v4538_v57, %v4542_v50 }
 0x3f5   : > { %7545 = vmatprep.subr.bf16.mxu1 %v15690_v3  ;;  %v15770_v3 = vcombine.high %v4546_v0, %v4550_v63 }
 0x3f8   : > { %7546 = vmatpush1.bf16.msra.mxu1 %v15689_v5  ;;  %v15769_v5 = vcombine.low %v4546_v0, %v4550_v63  ;;  %v4618_v63 = vld [vmem:[%s19309_s16 + $0xdc8] sm:$0xff] }
 0x3f9   : > { %7547 = vmatprep.subr.bf16.mxu1 %v15698_v55  ;;  %v15778_v55 = vcombine.high %v4554_v53, %v4558_v24 }
 0x3fc   : > { %7548 = vmatpush1.bf16.msra.mxu1 %v15697_v16  ;;  %v15777_v16 = vcombine.low %v4554_v53, %v4558_v24 }
 0x3fd   : > { %7549 = vmatprep.subr.bf16.mxu1 %v15706_v60  ;;  %v15786_v60 = vcombine.high %v4562_v20, %v4566_v9 }
 0x400   : > { %7550 = vmatpush1.bf16.msra.mxu1 %v15705_v23  ;;  %v15785_v23 = vcombine.low %v4562_v20, %v4566_v9 }
 0x401   : > { %7551 = vmatprep.subr.bf16.mxu1 %v15714_v25  ;;  %v15794_v25 = vcombine.high %v4570_v62, %v4574_v22 }
 0x404   : > { %7552 = vmatpush1.bf16.msra.mxu1 %v15713_v29  ;;  %v15793_v29 = vcombine.low %v4570_v62, %v4574_v22  ;;  %v4191_v62 = vld [vmem:[%s19309_s16 + $0x70] sm:$0xff]  ;;  %v4626_v22 = vld [vmem:[%s19309_s16 + $0xe08] sm:$0xff] }
 0x405   : > { %7553 = vmatprep.subr.bf16.mxu1 %v15722_v7  ;;  %v15802_v7 = vcombine.high %v4578_v27, %v4582_v28 }
 0x408   : > { %7554 = vmatpush1.bf16.msra.mxu1 %v15721_v31  ;;  %v15801_v31 = vcombine.low %v4578_v27, %v4582_v28 }
 0x409   : > { %7555 = vmatprep.subr.bf16.mxu1 %v15730_v33  ;;  %v15810_v33 = vcombine.high %v4586_v30, %v4590_v14 }
 0x40c   : > { %7556 = vmatpush1.bf16.msra.mxu1 %v15729_v37  ;;  %v15809_v37 = vcombine.low %v4586_v30, %v4590_v14  ;;  %v4199_v14 = vld [vmem:[%s19309_s16 + $0xb0] sm:$0xff] }
 0x40d   : > { %7557 = vmatprep.subr.bf16.mxu1 %v15738_v42  ;;  %v15818_v42 = vcombine.high %v4594_v35, %v4598_v36 }
 0x410   : > { %7558 = vmatpush1.bf16.msra.mxu1 %v15737_v44  ;;  %v15817_v44 = vcombine.low %v4594_v35, %v4598_v36 }
 0x411   : > { %7559 = vmatprep.subr.bf16.mxu1 %v15746_v19  ;;  %v20195_v19 = vsub.s32 7, %v19346_v49  ;;  %v4622_v49 = vld [vmem:[%s19309_s16 + $0xde8] sm:$0xff] }
 0x412   : > { %v15842_v9 = vcombine.high %v4618_v63, %v4622_v49  ;;  %v15841_v27 = vcombine.low %v4618_v63, %v4622_v49  ;;  %v4219_v49 = vld [vmem:[%s19309_s16 + $0x150] sm:$0xff] }
 0x414   : > { %7560 = vmatpush1.bf16.msra.mxu1 %v15745_v47  ;;  %v4614_v47 = vld [vmem:[%s19309_s16 + $0xda8] sm:$0xff] }
 0x415   : > { %7561 = vmatprep.subr.bf16.mxu1 %v15754_v51  ;;  %v18484_v51 = vld [vmem:[%s19307_s28] sm:$0xff] }
 0x416   : > { %v1252_v57 = vrot.slane %v18484_v51, %v19484_v45  ;;  %v1256_v50 = vrot.slane %v18484_v51, %v20195_v19  ;;  %v4215_v51 = vld [vmem:[%s19309_s16 + $0x130] sm:$0xff] }
 0x418   : > { %7562 = vmatpush1.bf16.msra.mxu1 %v15753_v48  ;;  %v15825_v48 = vcombine.low %v4602_v1, %v4606_v54  ;;  %v4203_v1 = vld [vmem:[%s19309_s16 + $0xd0] sm:$0xff] }
 0x419   : > { %7563 = vmatprep.subr.bf16.mxu1 %v15762_v61  ;;  %v15834_v61 = vcombine.high %v4610_v46, %v4614_v47  ;;  %v4207_v54 = vld [vmem:[%s19309_s16 + $0xf0] sm:$0xff] }
 0x41c   : > { %7564 = vmatpush1.bf16.msra.mxu1 %v15761_v2 }
 0x41d   : > { %7565 = vmatprep.subr.bf16.mxu1 %v15770_v3 }
 0x420   : > { %7566 = vmatpush1.bf16.msra.mxu1 %v15769_v5  ;;  %v15833_v5 = vcombine.low %v4610_v46, %v4614_v47  ;;  %v4211_v47 = vld [vmem:[%s19309_s16 + $0x110] sm:$0xff] }
 0x421   : > { %7567 = vmatprep.subr.bf16.mxu1 %v15778_v55 }
 0x424   : > { %7568 = vmatpush1.bf16.msra.mxu1 %v15777_v16 }
 0x425   : > { %7578 = vmatprep.subr.bf16.mxu1 %v15786_v60  ;;  %v4187_v60 = vld [vmem:[%s19309_s16 + $0x50] sm:$0xff] }
 0x426   : > { %v15411_v35 = vcombine.low %v4187_v60, %v4191_v62 }
 0x427   : > { %7570 = vmatmul.mubr.bf16.vlgmr.msra.gmra.mrb[12].mxu1 %v20074_v39 }
 0x428   : > { %7579 = vmatpush1.bf16.msra.mxu1 %v15785_v23  ;;  %v4630_v23 = vld [vmem:[%s19309_s16 + $0xe28] sm:$0xff] }
 0x429   : > { %7580 = vmatprep.subr.bf16.mxu1 %v15794_v25  ;;  %v15850_v30 = vcombine.high %v4626_v22, %v4630_v23  ;;  %v15849_v36 = vcombine.low %v4626_v22, %v4630_v23 }
 0x42c   : > { %7581 = vmatpush1.bf16.msra.mxu1 %v15793_v29  ;;  %v15412_v29 = vcombine.high %v4187_v60, %v4191_v62  ;;  %v4666_v60 = vld [vmem:[%s19309_s16 + $0xf48] sm:$0xff] }
 0x42d   : > { %7582 = vmatprep.subr.bf16.mxu1 %v15802_v7  ;;  %v4195_v7 = vld [vmem:[%s19309_s16 + $0x90] sm:$0xff]  ;;  %v4670_v62 = vld [vmem:[%s19309_s16 + $0xf68] sm:$0xff] }
 0x42e   : > { %v15419_v6 = vcombine.low %v4195_v7, %v4199_v14 }
 0x430   : > { %7583 = vmatpush1.bf16.msra.mxu1 %v15801_v31  ;;  %v4634_v31 = vld [vmem:[%s19309_s16 + $0xe48] sm:$0xff] }
 0x431   : > { %7584 = vmatprep.subr.bf16.mxu1 %v15810_v33  ;;  %v4638_v33 = vld [vmem:[%s19309_s16 + $0xe68] sm:$0xff] }
 0x432   : > { %v15857_v56 = vcombine.low %v4634_v31, %v4638_v33 }
 0x434   : > { %7585 = vmatpush1.bf16.msra.mxu1 %v15809_v37  ;;  %v15420_v37 = vcombine.high %v4195_v7, %v4199_v14  ;;  %v4235_v7 = vld [vmem:[%s19309_s16 + $0x1d0] sm:$0xff]  ;;  %v4674_v14 = vld [vmem:[%s19309_s16 + $0xf88] sm:$0xff] }
 0x435   : > { %7586 = vmatprep.subr.bf16.mxu1 %v15818_v42  ;;  %v15858_v42 = vcombine.high %v4634_v31, %v4638_v33  ;;  %v4678_v31 = vld [vmem:[%s19309_s16 + $0xfa8] sm:$0xff] }
 0x438   : > { %7587 = vmatpush1.bf16.msra.mxu1 %v15817_v44  ;;  %v4642_v44 = vld [vmem:[%s19309_s16 + $0xe88] sm:$0xff] }
 0x439   : > { %7588 = vmatprep.subr.bf16.mxu1 %v15826_v10  ;;  %v4646_v10 = vld [vmem:[%s19309_s16 + $0xea8] sm:$0xff] }
 0x43a   : > { %v4154_v0 = vpop.f32.mrb[8].mxu1  ;;  %v15866_v46 = vcombine.high %v4642_v44, %v4646_v10 }
 0x43b   : > { %v16823_v2 = vadd.f32 %v4154_v0, %v1252_v57  ;;  %v4156_v3 = vpop.f32.mrb[9].mxu1  ;;  %v4650_v57 = vld [vmem:[%s19309_s16 + $0xec8] sm:$0xff]  ;;  %v15436_v0 = vcombine.high %v4211_v47, %v4215_v51 }
 0x43c   : > { %v16824_v53 = vadd.f32 %v4156_v3, %v1256_v50  ;;  %v4158_v24 = vpop.f32.mrb[10].mxu1  ;;  %7589 = vmatpush1.bf16.msra.mxu1 %v15825_v48  ;;  %v4654_v50 = vld [vmem:[%s19309_s16 + $0xee8] sm:$0xff]  ;;  %v15427_v48 = vcombine.low %v4203_v1, %v4207_v54 }
 0x43d   : > { %v4167_v55 = vmax.f32 %v16823_v2, 0.0  ;;  %v4159_v20 = vpop.f32.mrb[11].mxu1  ;;  %7590 = vmatprep.subr.bf16.mxu1 %v15834_v61  ;;  %v15865_v61 = vcombine.low %v4642_v44, %v4646_v10  ;;  %v15874_v63 = vcombine.high %v4650_v57, %v4654_v50  ;;  %v4223_v2 = vld [vmem:[%s19309_s16 + $0x170] sm:$0xff]  ;;  %v4658_v3 = vld [vmem:[%s19309_s16 + $0xf08] sm:$0xff]  ;;  %v15435_v24 = vcombine.low %v4211_v47, %v4215_v51  ;;  %v4180_v51 = vld [vmem:[%s19309_s16 + $0x18] sm:$0xff] }
 0x43e   : > { %v4168_v16 = vmax.f32 %v16824_v53, 0.0  ;;  %v4662_v53 = vld [vmem:[%s19309_s16 + $0xf28] sm:$0xff]  ;;  %v15443_v22 = vcombine.low %v4219_v49, %v4223_v2  ;;  %v4255_v47 = vld [vmem:[%s19309_s16 + $0x270] sm:$0xff] }
 0x43f   : > { %v20210_v28 = vpack.c.bf16 %v4167_v55, %v4167_v55  ;;  %v15444_v55 = vcombine.high %v4219_v49, %v4223_v2  ;;  %v15882_v20 = vcombine.high %v4658_v3, %v4662_v53  ;;  %v15881_v23 = vcombine.low %v4658_v3, %v4662_v53  ;;  %v4686_v44 = vld [vmem:[%s19309_s16 + $0xfe8] sm:$0xff]  ;;  %v4263_v49 = vld [vmem:[%s19309_s16 + $0x2b0] sm:$0xff]  ;;  %v4188_v2 = vld [vmem:[%s19309_s16 + $0x58] sm:$0xff] }
 0x440   : > { %v20208_v25 = vpack.c.bf16 %v4168_v16, %v4168_v16  ;;  %7591 = vmatpush1.bf16.msra.mxu1 %v15833_v5  ;;  %v15873_v5 = vcombine.low %v4650_v57, %v4654_v50  ;;  %v4231_v16 = vld [vmem:[%s19309_s16 + $0x1b0] sm:$0xff]  ;;  %v4184_v57 = vld [vmem:[%s19309_s16 + $0x38] sm:$0xff] }
 0x441   : > { %7592 = vmatprep.subr.bf16.mxu1 %v15842_v9  ;;  %v4227_v9 = vld [vmem:[%s19309_s16 + $0x190] sm:$0xff]  ;;  %v4192_v3 = vld [vmem:[%s19309_s16 + $0x78] sm:$0xff] }
 0x442   : > { %7446 = vmatprep.mubr.bf16.mxu0 %v20208_v25  ;;  %7610 = vmatprep.mubr.bf16.mxu1 %v20208_v25  ;;  %v15451_v33 = vcombine.low %v4227_v9, %v4231_v16 }
 0x443   : > { %7447 = vmatmul.mubr.bf16.vlgmr.msra.gmra.mrb[8].mxu0 %v20210_v28 }
 0x444   : > { %7620 = vmatpush1.bf16.msra.mxu0 %v15403_v17  ;;  %7593 = vmatpush1.bf16.msra.mxu1 %v15841_v27  ;;  %v15428_v17 = vcombine.high %v4203_v1, %v4207_v54  ;;  %v15452_v27 = vcombine.high %v4227_v9, %v4231_v16  ;;  %v4247_v1 = vld [vmem:[%s19309_s16 + $0x230] sm:$0xff]  ;;  %v4682_v54 = vld [vmem:[%s19309_s16 + $0xfc8] sm:$0xff]  ;;  %v4196_v16 = vld [vmem:[%s19309_s16 + $0x98] sm:$0xff] }
 0x445   : > { %7651 = vmatprep.mubr.bf16.mxu0 %v19801_v21  ;;  %7621 = vmatprep.subr.bf16.mxu0 %v15412_v29  ;;  %v15890_v29 = vcombine.high %v4666_v60, %v4670_v62  ;;  %v4271_v9 = vld [vmem:[%s19309_s16 + $0x2f0] sm:$0xff] }
 0x446   : > { %7594 = vmatprep.subr.bf16.mxu1 %v15850_v30  ;;  %v4239_v30 = vld [vmem:[%s19309_s16 + $0x1f0] sm:$0xff] }
 0x447   : > { %v15459_v10 = vcombine.low %v4235_v7, %v4239_v30 }
 0x448   : > { %7622 = vmatpush1.bf16.msra.mxu0 %v15411_v35  ;;  %7595 = vmatpush1.bf16.msra.mxu1 %v15849_v36  ;;  %v15889_v35 = vcombine.low %v4666_v60, %v4670_v62  ;;  %v15460_v36 = vcombine.high %v4235_v7, %v4239_v30  ;;  %v4200_v60 = vld [vmem:[%s19309_s16 + $0xb8] sm:$0xff]  ;;  %v4279_v7 = vld [vmem:[%s19309_s16 + $0x330] sm:$0xff] }
 0x449   : > { %7623 = vmatprep.subr.bf16.mxu0 %v15420_v37  ;;  %7596 = vmatprep.subr.bf16.mxu1 %v15858_v42  ;;  %v15898_v37 = vcombine.high %v4674_v14, %v4678_v31  ;;  %v4243_v42 = vld [vmem:[%s19309_s16 + $0x210] sm:$0xff]  ;;  %v4204_v30 = vld [vmem:[%s19309_s16 + $0xd8] sm:$0xff] }
 0x44a   : > { %v15467_v50 = vcombine.low %v4243_v42, %v4247_v1 }
 0x44c   : > { %7624 = vmatpush1.bf16.msra.mxu0 %v15419_v6  ;;  %7597 = vmatpush1.bf16.msra.mxu1 %v15857_v56  ;;  %v15897_v6 = vcombine.low %v4674_v14, %v4678_v31  ;;  %v15468_v56 = vcombine.high %v4243_v42, %v4247_v1  ;;  %v4208_v14 = vld [vmem:[%s19309_s16 + $0xf8] sm:$0xff] }
 0x44d   : > { %7625 = vmatprep.subr.bf16.mxu0 %v15428_v17  ;;  %7598 = vmatprep.subr.bf16.mxu1 %v15866_v46  ;;  %v15906_v17 = vcombine.high %v4682_v54, %v4686_v44  ;;  %v4251_v46 = vld [vmem:[%s19309_s16 + $0x250] sm:$0xff]  ;;  %v4212_v42 = vld [vmem:[%s19309_s16 + $0x118] sm:$0xff] }
 0x44e   : > { %v15475_v53 = vcombine.low %v4251_v46, %v4255_v47  ;;  %v4216_v1 = vld [vmem:[%s19309_s16 + $0x138] sm:$0xff] }
 0x450   : > { %7626 = vmatpush1.bf16.msra.mxu0 %v15427_v48  ;;  %7599 = vmatpush1.bf16.msra.mxu1 %v15865_v61  ;;  %v15905_v48 = vcombine.low %v4682_v54, %v4686_v44  ;;  %v15476_v61 = vcombine.high %v4251_v46, %v4255_v47  ;;  %v15429_v44 = vcombine.low %v4204_v30, %v4208_v14  ;;  %v4220_v46 = vld [vmem:[%s19309_s16 + $0x158] sm:$0xff] }
 0x451   : > { %7627 = vmatprep.subr.bf16.mxu0 %v15436_v0  ;;  %7600 = vmatprep.subr.bf16.mxu1 %v15874_v63  ;;  %v15406_v0 = vcombine.high %v4180_v51, %v4184_v57  ;;  %v4259_v63 = vld [vmem:[%s19309_s16 + $0x290] sm:$0xff]  ;;  %v4224_v47 = vld [vmem:[%s19309_s16 + $0x178] sm:$0xff] }
 0x452   : > { %v15483_v62 = vcombine.low %v4259_v63, %v4263_v49 }
 0x454   : > { %7628 = vmatpush1.bf16.msra.mxu0 %v15435_v24  ;;  %7601 = vmatpush1.bf16.msra.mxu1 %v15873_v5  ;;  %v15405_v24 = vcombine.low %v4180_v51, %v4184_v57  ;;  %v15484_v5 = vcombine.high %v4259_v63, %v4263_v49  ;;  %v15437_v57 = vcombine.low %v4212_v42, %v4216_v1  ;;  %v4228_v63 = vld [vmem:[%s19309_s16 + $0x198] sm:$0xff] }
 0x455   : > { %7629 = vmatprep.subr.bf16.mxu0 %v15444_v55  ;;  %7602 = vmatprep.subr.bf16.mxu1 %v15882_v20  ;;  %v4267_v55 = vld [vmem:[%s19309_s16 + $0x2d0] sm:$0xff]  ;;  %v15414_v20 = vcombine.high %v4188_v2, %v4192_v3  ;;  %v4232_v49 = vld [vmem:[%s19309_s16 + $0x1b8] sm:$0xff] }
 0x456   : > { %v15491_v31 = vcombine.low %v4267_v55, %v4271_v9 }
 0x458   : > { %7630 = vmatpush1.bf16.msra.mxu0 %v15443_v22  ;;  %7603 = vmatpush1.bf16.msra.mxu1 %v15881_v23  ;;  %v15413_v22 = vcombine.low %v4188_v2, %v4192_v3  ;;  %v15492_v23 = vcombine.high %v4267_v55, %v4271_v9  ;;  %v15445_v3 = vcombine.low %v4220_v46, %v4224_v47  ;;  %v4311_v55 = vld [vmem:[%s19309_s16 + $0x430] sm:$0xff]  ;;  %v4240_v9 = vld [vmem:[%s19309_s16 + $0x1f8] sm:$0xff] }
 0x459   : > { %7631 = vmatprep.subr.bf16.mxu0 %v15452_v27  ;;  %7604 = vmatprep.subr.bf16.mxu1 %v15890_v29  ;;  %v15422_v27 = vcombine.high %v4196_v16, %v4200_v60  ;;  %v4275_v29 = vld [vmem:[%s19309_s16 + $0x310] sm:$0xff] }
 0x45a   : > { %v15499_v54 = vcombine.low %v4275_v29, %v4279_v7 }
 0x45c   : > { %7632 = vmatpush1.bf16.msra.mxu0 %v15451_v33  ;;  %7605 = vmatpush1.bf16.msra.mxu1 %v15889_v35  ;;  %v15421_v33 = vcombine.low %v4196_v16, %v4200_v60  ;;  %v15430_v35 = vcombine.high %v4204_v30, %v4208_v14  ;;  %v15453_v60 = vcombine.low %v4228_v63, %v4232_v49 }
 0x45d   : > { %7633 = vmatprep.subr.bf16.mxu0 %v15460_v36  ;;  %7606 = vmatprep.subr.bf16.mxu1 %v15898_v37  ;;  %v4283_v36 = vld [vmem:[%s19309_s16 + $0x350] sm:$0xff] }
 0x45e   : > { %v4287_v37 = vld [vmem:[%s19309_s16 + $0x370] sm:$0xff] }
 0x45f   : > { %v15507_v51 = vcombine.low %v4283_v36, %v4287_v37 }
 0x460   : > { %7634 = vmatpush1.bf16.msra.mxu0 %v15459_v10  ;;  %7607 = vmatpush1.bf16.msra.mxu1 %v15897_v6  ;;  %v15508_v10 = vcombine.high %v4283_v36, %v4287_v37  ;;  %v15438_v6 = vcombine.high %v4212_v42, %v4216_v1  ;;  %v4252_v36 = vld [vmem:[%s19309_s16 + $0x258] sm:$0xff] }
 0x461   : > { %7635 = vmatprep.subr.bf16.mxu0 %v15468_v56  ;;  %7608 = vmatprep.subr.bf16.mxu1 %v15906_v17  ;;  %v4291_v56 = vld [vmem:[%s19309_s16 + $0x390] sm:$0xff]  ;;  %v4256_v37 = vld [vmem:[%s19309_s16 + $0x278] sm:$0xff] }
 0x462   : > { %v4295_v17 = vld [vmem:[%s19309_s16 + $0x3b0] sm:$0xff] }
 0x463   : > { %v15515_v2 = vcombine.low %v4291_v56, %v4295_v17 }
 0x464   : > { %7636 = vmatpush1.bf16.msra.mxu0 %v15467_v50  ;;  %7609 = vmatpush1.bf16.msra.mxu1 %v15905_v48  ;;  %v15516_v50 = vcombine.high %v4291_v56, %v4295_v17  ;;  %v15446_v48 = vcombine.high %v4220_v46, %v4224_v47  ;;  %v4260_v56 = vld [vmem:[%s19309_s16 + $0x298] sm:$0xff]  ;;  %v15477_v47 = vcombine.low %v4252_v36, %v4256_v37 }
 0x465   : > { %7637 = vmatprep.subr.bf16.mxu0 %v15476_v61  ;;  %7783 = vmatprep.subr.bf16.mxu1 %v15406_v0  ;;  %v4299_v61 = vld [vmem:[%s19309_s16 + $0x3d0] sm:$0xff]  ;;  %v4264_v17 = vld [vmem:[%s19309_s16 + $0x2b8] sm:$0xff] }
 0x466   : > { %v4303_v0 = vld [vmem:[%s19309_s16 + $0x3f0] sm:$0xff] }
 0x467   : > { %7611 = vmatmul.mubr.bf16.vlgmr.msra.gmra.mrb[12].mxu1 %v20210_v28  ;;  %v15523_v16 = vcombine.low %v4299_v61, %v4303_v0 }
 0x468   : > { %7638 = vmatpush1.bf16.msra.mxu0 %v15475_v53  ;;  %7784 = vmatpush1.bf16.msra.mxu1 %v15405_v24  ;;  %v15524_v53 = vcombine.high %v4299_v61, %v4303_v0  ;;  %v15454_v24 = vcombine.high %v4228_v63, %v4232_v49  ;;  %v4268_v61 = vld [vmem:[%s19309_s16 + $0x2d8] sm:$0xff]  ;;  %v15485_v49 = vcombine.low %v4260_v56, %v4264_v17 }
 0x469   : > { %7815 = vmatprep.mubr.bf16.mxu1 %v19801_v21  ;;  %7639 = vmatprep.subr.bf16.mxu0 %v15484_v5  ;;  %v15500_v21 = vcombine.high %v4275_v29, %v4279_v7  ;;  %v4307_v5 = vld [vmem:[%s19309_s16 + $0x410] sm:$0xff]  ;;  %v4244_v29 = vld [vmem:[%s19309_s16 + $0x218] sm:$0xff] }
 0x46a   : > { %7785 = vmatprep.subr.bf16.mxu1 %v15414_v20  ;;  %v4236_v20 = vld [vmem:[%s19309_s16 + $0x1d8] sm:$0xff]  ;;  %v15531_v30 = vcombine.low %v4307_v5, %v4311_v55 }
 0x46b   : > { %v4248_v7 = vld [vmem:[%s19309_s16 + $0x238] sm:$0xff]  ;;  %v15461_v14 = vcombine.low %v4236_v20, %v4240_v9 }
 0x46c   : > { %7640 = vmatpush1.bf16.msra.mxu0 %v15483_v62  ;;  %7786 = vmatpush1.bf16.msra.mxu1 %v15413_v22  ;;  %v15532_v62 = vcombine.high %v4307_v5, %v4311_v55  ;;  %v15462_v22 = vcombine.high %v4236_v20, %v4240_v9  ;;  %v15469_v1 = vcombine.low %v4244_v29, %v4248_v7  ;;  %v4272_v0 = vld [vmem:[%s19309_s16 + $0x2f8] sm:$0xff] }
 0x46d   : > { %7641 = vmatprep.subr.bf16.mxu0 %v15492_v23  ;;  %7787 = vmatprep.subr.bf16.mxu1 %v15422_v27  ;;  %v4315_v23 = vld [vmem:[%s19309_s16 + $0x450] sm:$0xff]  ;;  %v4276_v5 = vld [vmem:[%s19309_s16 + $0x318] sm:$0xff]  ;;  %v15493_v9 = vcombine.low %v4268_v61, %v4272_v0 }
 0x46e   : > { %v4319_v27 = vld [vmem:[%s19309_s16 + $0x470] sm:$0xff]  ;;  %v4280_v55 = vld [vmem:[%s19309_s16 + $0x338] sm:$0xff] }
 0x46f   : > { %v15539_v42 = vcombine.low %v4315_v23, %v4319_v27 }
 0x470   : > { %7642 = vmatpush1.bf16.msra.mxu0 %v15491_v31  ;;  %7788 = vmatpush1.bf16.msra.mxu1 %v15421_v33  ;;  %v15540_v31 = vcombine.high %v4315_v23, %v4319_v27  ;;  %v15470_v33 = vcombine.high %v4244_v29, %v4248_v7  ;;  %v4284_v23 = vld [vmem:[%s19309_s16 + $0x358] sm:$0xff]  ;;  %v15501_v7 = vcombine.low %v4276_v5, %v4280_v55 }
 0x471   : > { %7643 = vmatprep.subr.bf16.mxu0 %v15500_v21  ;;  %7789 = vmatprep.subr.bf16.mxu1 %v15430_v35  ;;  %v4323_v21 = vld [vmem:[%s19309_s16 + $0x490] sm:$0xff]  ;;  %v4288_v27 = vld [vmem:[%s19309_s16 + $0x378] sm:$0xff] }
 0x472   : > { %v4327_v35 = vld [vmem:[%s19309_s16 + $0x4b0] sm:$0xff] }
 0x473   : > { %v15547_v46 = vcombine.low %v4323_v21, %v4327_v35 }
 0x474   : > { %7644 = vmatpush1.bf16.msra.mxu0 %v15499_v54  ;;  %7790 = vmatpush1.bf16.msra.mxu1 %v15429_v44  ;;  %v15548_v54 = vcombine.high %v4323_v21, %v4327_v35  ;;  %v15478_v44 = vcombine.high %v4252_v36, %v4256_v37  ;;  %v4292_v21 = vld [vmem:[%s19309_s16 + $0x398] sm:$0xff]  ;;  %v15509_v37 = vcombine.low %v4284_v23, %v4288_v27 }
 0x475   : > { %7645 = vmatprep.subr.bf16.mxu0 %v15508_v10  ;;  %7791 = vmatprep.subr.bf16.mxu1 %v15438_v6  ;;  %v4331_v10 = vld [vmem:[%s19309_s16 + $0x4d0] sm:$0xff]  ;;  %v4296_v35 = vld [vmem:[%s19309_s16 + $0x3b8] sm:$0xff] }
 0x476   : > { %v4335_v6 = vld [vmem:[%s19309_s16 + $0x4f0] sm:$0xff] }
 0x477   : > { %v15555_v63 = vcombine.low %v4331_v10, %v4335_v6 }
 0x478   : > { %7646 = vmatpush1.bf16.msra.mxu0 %v15507_v51  ;;  %7792 = vmatpush1.bf16.msra.mxu1 %v15437_v57  ;;  %v15556_v51 = vcombine.high %v4331_v10, %v4335_v6  ;;  %v15486_v57 = vcombine.high %v4260_v56, %v4264_v17  ;;  %v4300_v10 = vld [vmem:[%s19309_s16 + $0x3d8] sm:$0xff]  ;;  %v15517_v17 = vcombine.low %v4292_v21, %v4296_v35 }
 0x479   : > { %7647 = vmatprep.subr.bf16.mxu0 %v15516_v50  ;;  %7793 = vmatprep.subr.bf16.mxu1 %v15446_v48  ;;  %v4339_v50 = vld [vmem:[%s19309_s16 + $0x510] sm:$0xff]  ;;  %v4304_v6 = vld [vmem:[%s19309_s16 + $0x3f8] sm:$0xff] }
 0x47a   : > { %v4343_v48 = vld [vmem:[%s19309_s16 + $0x530] sm:$0xff] }
 0x47b   : > { %v15563_v20 = vcombine.low %v4339_v50, %v4343_v48 }
 0x47c   : > { %7648 = vmatpush1.bf16.msra.mxu0 %v15515_v2  ;;  %7794 = vmatpush1.bf16.msra.mxu1 %v15445_v3  ;;  %v15564_v2 = vcombine.high %v4339_v50, %v4343_v48  ;;  %v15494_v3 = vcombine.high %v4268_v61, %v4272_v0  ;;  %v4308_v50 = vld [vmem:[%s19309_s16 + $0x418] sm:$0xff]  ;;  %v15525_v0 = vcombine.low %v4300_v10, %v4304_v6 }
 0x47d   : > { %7649 = vmatprep.subr.bf16.mxu0 %v15524_v53  ;;  %7795 = vmatprep.subr.bf16.mxu1 %v15454_v24  ;;  %v4347_v53 = vld [vmem:[%s19309_s16 + $0x550] sm:$0xff]  ;;  %v4312_v48 = vld [vmem:[%s19309_s16 + $0x438] sm:$0xff] }
 0x47e   : > { %v4351_v24 = vld [vmem:[%s19309_s16 + $0x570] sm:$0xff] }
 0x47f   : > { %v15571_v29 = vcombine.low %v4347_v53, %v4351_v24 }
 0x480   : > { %7650 = vmatpush1.bf16.msra.mxu0 %v15523_v16  ;;  %7796 = vmatpush1.bf16.msra.mxu1 %v15453_v60  ;;  %v15572_v16 = vcombine.high %v4347_v53, %v4351_v24  ;;  %v15502_v60 = vcombine.high %v4276_v5, %v4280_v55  ;;  %v4316_v53 = vld [vmem:[%s19309_s16 + $0x458] sm:$0xff]  ;;  %v15533_v55 = vcombine.low %v4308_v50, %v4312_v48 }
 0x481   : > { %7660 = vmatprep.subr.bf16.mxu0 %v15532_v62  ;;  %7797 = vmatprep.subr.bf16.mxu1 %v15462_v22  ;;  %v4355_v62 = vld [vmem:[%s19309_s16 + $0x590] sm:$0xff]  ;;  %v4320_v24 = vld [vmem:[%s19309_s16 + $0x478] sm:$0xff] }
 0x482   : > { %v4359_v22 = vld [vmem:[%s19309_s16 + $0x5b0] sm:$0xff] }
 0x483   : > { %7652 = vmatmul.mubr.bf16.vlgmr.msra.gmra.mrb[12].mxu0 %v19841_v4  ;;  %v15579_v36 = vcombine.low %v4355_v62, %v4359_v22 }
 0x484   : > { %7661 = vmatpush1.bf16.msra.mxu0 %v15531_v30  ;;  %7692 = vmatprep.mubr.bf16.mxu0 %v19993_v32  ;;  %v15580_v30 = vcombine.high %v4355_v62, %v4359_v22  ;;  %v4324_v62 = vld [vmem:[%s19309_s16 + $0x498] sm:$0xff] }
 0x485   : > { %7798 = vmatpush1.bf16.msra.mxu1 %v15461_v14  ;;  %7662 = vmatprep.subr.bf16.mxu0 %v15540_v31  ;;  %v15510_v14 = vcombine.high %v4284_v23, %v4288_v27  ;;  %v4363_v31 = vld [vmem:[%s19309_s16 + $0x5d0] sm:$0xff]  ;;  %v4328_v22 = vld [vmem:[%s19309_s16 + $0x4b8] sm:$0xff]  ;;  %v15541_v27 = vcombine.low %v4316_v53, %v4320_v24 }
 0x486   : > { %7799 = vmatprep.subr.bf16.mxu1 %v15470_v33  ;;  %v4367_v33 = vld [vmem:[%s19309_s16 + $0x5f0] sm:$0xff] }
 0x487   : > { %v15587_v56 = vcombine.low %v4363_v31, %v4367_v33 }
 0x488   : > { %7663 = vmatpush1.bf16.msra.mxu0 %v15539_v42  ;;  %v15588_v42 = vcombine.high %v4363_v31, %v4367_v33  ;;  %v4332_v31 = vld [vmem:[%s19309_s16 + $0x4d8] sm:$0xff] }
 0x489   : > { %7800 = vmatpush1.bf16.msra.mxu1 %v15469_v1  ;;  %7664 = vmatprep.subr.bf16.mxu0 %v15548_v54  ;;  %v15518_v1 = vcombine.high %v4292_v21, %v4296_v35  ;;  %v4371_v54 = vld [vmem:[%s19309_s16 + $0x610] sm:$0xff]  ;;  %v4336_v33 = vld [vmem:[%s19309_s16 + $0x4f8] sm:$0xff] }
 0x48a   : > { %7801 = vmatprep.subr.bf16.mxu1 %v15478_v44  ;;  %v4375_v44 = vld [vmem:[%s19309_s16 + $0x630] sm:$0xff]  ;;  %v15558_v35 = vcombine.high %v4332_v31, %v4336_v33 }
 0x48b   : > { %v15595_v61 = vcombine.low %v4371_v54, %v4375_v44 }
 0x48c   : > { %7665 = vmatpush1.bf16.msra.mxu0 %v15547_v46  ;;  %v15596_v46 = vcombine.high %v4371_v54, %v4375_v44  ;;  %v15557_v44 = vcombine.low %v4332_v31, %v4336_v33 }
 0x48d   : > { %7802 = vmatpush1.bf16.msra.mxu1 %v15477_v47  ;;  %7666 = vmatprep.subr.bf16.mxu0 %v15556_v51  ;;  %v15526_v47 = vcombine.high %v4300_v10, %v4304_v6  ;;  %v4379_v51 = vld [vmem:[%s19309_s16 + $0x650] sm:$0xff] }
 0x48e   : > { %7803 = vmatprep.subr.bf16.mxu1 %v15486_v57  ;;  %v4383_v57 = vld [vmem:[%s19309_s16 + $0x670] sm:$0xff] }
 0x48f   : > { %v15603_v5 = vcombine.low %v4379_v51, %v4383_v57 }
 0x490   : > { %7667 = vmatpush1.bf16.msra.mxu0 %v15555_v63  ;;  %v15604_v63 = vcombine.high %v4379_v51, %v4383_v57 }
 0x491   : > { %7804 = vmatpush1.bf16.msra.mxu1 %v15485_v49  ;;  %7668 = vmatprep.subr.bf16.mxu0 %v15564_v2  ;;  %v15534_v49 = vcombine.high %v4308_v50, %v4312_v48  ;;  %v4387_v2 = vld [vmem:[%s19309_s16 + $0x690] sm:$0xff] }
 0x492   : > { %7805 = vmatprep.subr.bf16.mxu1 %v15494_v3  ;;  %v4391_v3 = vld [vmem:[%s19309_s16 + $0x6b0] sm:$0xff] }
 0x493   : > { %v15611_v23 = vcombine.low %v4387_v2, %v4391_v3 }
 0x494   : > { %7669 = vmatpush1.bf16.msra.mxu0 %v15563_v20  ;;  %v15612_v20 = vcombine.high %v4387_v2, %v4391_v3 }
 0x495   : > { %7806 = vmatpush1.bf16.msra.mxu1 %v15493_v9  ;;  %7670 = vmatprep.subr.bf16.mxu0 %v15572_v16  ;;  %v15542_v9 = vcombine.high %v4316_v53, %v4320_v24  ;;  %v4395_v16 = vld [vmem:[%s19309_s16 + $0x6d0] sm:$0xff] }
 0x496   : > { %7807 = vmatprep.subr.bf16.mxu1 %v15502_v60  ;;  %v4399_v60 = vld [vmem:[%s19309_s16 + $0x6f0] sm:$0xff] }
 0x497   : > { %v15619_v21 = vcombine.low %v4395_v16, %v4399_v60 }
 0x498   : > { %7671 = vmatpush1.bf16.msra.mxu0 %v15571_v29  ;;  %v15620_v29 = vcombine.high %v4395_v16, %v4399_v60 }
 0x499   : > { %7808 = vmatpush1.bf16.msra.mxu1 %v15501_v7  ;;  %7672 = vmatprep.subr.bf16.mxu0 %v15580_v30  ;;  %v15550_v7 = vcombine.high %v4324_v62, %v4328_v22  ;;  %v4403_v30 = vld [vmem:[%s19309_s16 + $0x710] sm:$0xff] }
 0x49a   : > { %7809 = vmatprep.subr.bf16.mxu1 %v15510_v14  ;;  %v4407_v14 = vld [vmem:[%s19309_s16 + $0x730] sm:$0xff] }
 0x49b   : > { %v15627_v54 = vcombine.low %v4403_v30, %v4407_v14 }
 0x49c   : > { %7673 = vmatpush1.bf16.msra.mxu0 %v15579_v36  ;;  %v4411_v36 = vld [vmem:[%s19309_s16 + $0x750] sm:$0xff] }
 0x49d   : > { %7810 = vmatpush1.bf16.msra.mxu1 %v15509_v37  ;;  %7674 = vmatprep.subr.bf16.mxu0 %v15588_v42  ;;  %v4415_v37 = vld [vmem:[%s19309_s16 + $0x770] sm:$0xff]  ;;  %v4340_v42 = vld [vmem:[%s19309_s16 + $0x518] sm:$0xff] }
 0x49e   : > { %7811 = vmatprep.subr.bf16.mxu1 %v15518_v1  ;;  %v4344_v1 = vld [vmem:[%s19309_s16 + $0x538] sm:$0xff]  ;;  %v15636_v10 = vcombine.high %v4411_v36, %v4415_v37  ;;  %v15635_v51 = vcombine.low %v4411_v36, %v4415_v37 }
 0x49f   : > { %v15566_v6 = vcombine.high %v4340_v42, %v4344_v1  ;;  %v15565_v57 = vcombine.low %v4340_v42, %v4344_v1 }
 0x4a0   : > { %7675 = vmatpush1.bf16.msra.mxu0 %v15587_v56  ;;  %v4419_v56 = vld [vmem:[%s19309_s16 + $0x790] sm:$0xff] }
 0x4a1   : > { %7812 = vmatpush1.bf16.msra.mxu1 %v15517_v17  ;;  %7676 = vmatprep.subr.bf16.mxu0 %v15596_v46  ;;  %v4423_v17 = vld [vmem:[%s19309_s16 + $0x7b0] sm:$0xff]  ;;  %v4348_v46 = vld [vmem:[%s19309_s16 + $0x558] sm:$0xff] }
 0x4a2   : > { %7813 = vmatprep.subr.bf16.mxu1 %v15526_v47  ;;  %v4352_v47 = vld [vmem:[%s19309_s16 + $0x578] sm:$0xff]  ;;  %v15644_v50 = vcombine.high %v4419_v56, %v4423_v17  ;;  %v15643_v2 = vcombine.low %v4419_v56, %v4423_v17 }
 0x4a3   : > { %v15574_v48 = vcombine.high %v4348_v46, %v4352_v47  ;;  %v15573_v3 = vcombine.low %v4348_v46, %v4352_v47 }
 0x4a4   : > { %7677 = vmatpush1.bf16.msra.mxu0 %v15595_v61  ;;  %v4427_v61 = vld [vmem:[%s19309_s16 + $0x7d0] sm:$0xff] }
 0x4a5   : > { %7814 = vmatpush1.bf16.msra.mxu1 %v15525_v0  ;;  %7678 = vmatprep.subr.bf16.mxu0 %v15604_v63  ;;  %v4431_v0 = vld [vmem:[%s19309_s16 + $0x7f0] sm:$0xff]  ;;  %v4356_v63 = vld [vmem:[%s19309_s16 + $0x598] sm:$0xff] }
 0x4a6   : > { %7824 = vmatprep.subr.bf16.mxu1 %v15534_v49  ;;  %v4360_v49 = vld [vmem:[%s19309_s16 + $0x5b8] sm:$0xff]  ;;  %v15652_v53 = vcombine.high %v4427_v61, %v4431_v0  ;;  %v15651_v16 = vcombine.low %v4427_v61, %v4431_v0 }
 0x4a7   : > { %v15582_v24 = vcombine.high %v4356_v63, %v4360_v49  ;;  %v15581_v60 = vcombine.low %v4356_v63, %v4360_v49 }
 0x4a8   : > { %7679 = vmatpush1.bf16.msra.mxu0 %v15603_v5  ;;  %7816 = vmatmul.mubr.bf16.vlgmr.msra.gmra.mrb[16].mxu1 %v19841_v4  ;;  %v15549_v4 = vcombine.low %v4324_v62, %v4328_v22  ;;  %v4435_v5 = vld [vmem:[%s19309_s16 + $0x810] sm:$0xff] }
 0x4a9   : > { %7825 = vmatpush1.bf16.msra.mxu1 %v15533_v55  ;;  %7856 = vmatprep.mubr.bf16.mxu1 %v19993_v32  ;;  %v15628_v32 = vcombine.high %v4403_v30, %v4407_v14  ;;  %v4439_v55 = vld [vmem:[%s19309_s16 + $0x830] sm:$0xff] }
 0x4aa   : > { %7680 = vmatprep.subr.bf16.mxu0 %v15612_v20  ;;  %7826 = vmatprep.subr.bf16.mxu1 %v15542_v9  ;;  %v4364_v20 = vld [vmem:[%s19309_s16 + $0x5d8] sm:$0xff]  ;;  %v15660_v62 = vcombine.high %v4435_v5, %v4439_v55  ;;  %v15659_v30 = vcombine.low %v4435_v5, %v4439_v55 }
 0x4ab   : > { %v4368_v9 = vld [vmem:[%s19309_s16 + $0x5f8] sm:$0xff] }
 0x4ac   : > { %7681 = vmatpush1.bf16.msra.mxu0 %v15611_v23  ;;  %v15590_v22 = vcombine.high %v4364_v20, %v4368_v9  ;;  %v4443_v23 = vld [vmem:[%s19309_s16 + $0x850] sm:$0xff]  ;;  %v15589_v14 = vcombine.low %v4364_v20, %v4368_v9 }
 0x4ad   : > { %7827 = vmatpush1.bf16.msra.mxu1 %v15541_v27  ;;  %7682 = vmatprep.subr.bf16.mxu0 %v15620_v29  ;;  %v4447_v27 = vld [vmem:[%s19309_s16 + $0x870] sm:$0xff]  ;;  %v4372_v29 = vld [vmem:[%s19309_s16 + $0x618] sm:$0xff] }
 0x4ae   : > { %7828 = vmatprep.subr.bf16.mxu1 %v15550_v7  ;;  %v4376_v7 = vld [vmem:[%s19309_s16 + $0x638] sm:$0xff]  ;;  %v15668_v31 = vcombine.high %v4443_v23, %v4447_v27  ;;  %v15667_v36 = vcombine.low %v4443_v23, %v4447_v27 }
 0x4af   : > { %v15598_v33 = vcombine.high %v4372_v29, %v4376_v7  ;;  %v15597_v37 = vcombine.low %v4372_v29, %v4376_v7 }
 0x4b0   : > { %7683 = vmatpush1.bf16.msra.mxu0 %v15619_v21  ;;  %v4451_v21 = vld [vmem:[%s19309_s16 + $0x890] sm:$0xff] }
 0x4b1   : > { %7829 = vmatpush1.bf16.msra.mxu1 %v15549_v4  ;;  %7684 = vmatprep.subr.bf16.mxu0 %v15628_v32  ;;  %v4455_v4 = vld [vmem:[%s19309_s16 + $0x8b0] sm:$0xff]  ;;  %v4380_v32 = vld [vmem:[%s19309_s16 + $0x658] sm:$0xff] }
 0x4b2   : > { %7830 = vmatprep.subr.bf16.mxu1 %v15558_v35  ;;  %v4384_v35 = vld [vmem:[%s19309_s16 + $0x678] sm:$0xff]  ;;  %v15676_v42 = vcombine.high %v4451_v21, %v4455_v4  ;;  %v15675_v56 = vcombine.low %v4451_v21, %v4455_v4 }
 0x4b3   : > { %v15606_v1 = vcombine.high %v4380_v32, %v4384_v35  ;;  %v15605_v17 = vcombine.low %v4380_v32, %v4384_v35 }
 0x4b4   : > { %7685 = vmatpush1.bf16.msra.mxu0 %v15627_v54  ;;  %v4459_v54 = vld [vmem:[%s19309_s16 + $0x8d0] sm:$0xff] }
 0x4b5   : > { %7831 = vmatpush1.bf16.msra.mxu1 %v15557_v44  ;;  %7686 = vmatprep.subr.bf16.mxu0 %v15636_v10  ;;  %v4463_v44 = vld [vmem:[%s19309_s16 + $0x8f0] sm:$0xff]  ;;  %v4388_v10 = vld [vmem:[%s19309_s16 + $0x698] sm:$0xff] }
 0x4b6   : > { %7832 = vmatprep.subr.bf16.mxu1 %v15566_v6  ;;  %v4392_v6 = vld [vmem:[%s19309_s16 + $0x6b8] sm:$0xff]  ;;  %v15684_v46 = vcombine.high %v4459_v54, %v4463_v44  ;;  %v15683_v61 = vcombine.low %v4459_v54, %v4463_v44 }
 0x4b7   : > { %v15614_v47 = vcombine.high %v4388_v10, %v4392_v6  ;;  %v15613_v0 = vcombine.low %v4388_v10, %v4392_v6 }
 0x4b8   : > { %7687 = vmatpush1.bf16.msra.mxu0 %v15635_v51  ;;  %v4467_v51 = vld [vmem:[%s19309_s16 + $0x910] sm:$0xff] }
 0x4b9   : > { %7833 = vmatpush1.bf16.msra.mxu1 %v15565_v57  ;;  %7688 = vmatprep.subr.bf16.mxu0 %v15644_v50  ;;  %v4471_v57 = vld [vmem:[%s19309_s16 + $0x930] sm:$0xff]  ;;  %v4396_v50 = vld [vmem:[%s19309_s16 + $0x6d8] sm:$0xff] }
 0x4ba   : > { %7834 = vmatprep.subr.bf16.mxu1 %v15574_v48  ;;  %v4400_v48 = vld [vmem:[%s19309_s16 + $0x6f8] sm:$0xff]  ;;  %v15692_v63 = vcombine.high %v4467_v51, %v4471_v57  ;;  %v15691_v5 = vcombine.low %v4467_v51, %v4471_v57 }
 0x4bb   : > { %v15622_v49 = vcombine.high %v4396_v50, %v4400_v48  ;;  %v15621_v55 = vcombine.low %v4396_v50, %v4400_v48 }
 0x4bc   : > { %7689 = vmatpush1.bf16.msra.mxu0 %v15643_v2  ;;  %v4475_v2 = vld [vmem:[%s19309_s16 + $0x950] sm:$0xff] }
 0x4bd   : > { %7835 = vmatpush1.bf16.msra.mxu1 %v15573_v3  ;;  %7690 = vmatprep.subr.bf16.mxu0 %v15652_v53  ;;  %v4479_v3 = vld [vmem:[%s19309_s16 + $0x970] sm:$0xff]  ;;  %v4404_v53 = vld [vmem:[%s19309_s16 + $0x718] sm:$0xff] }
 0x4be   : > { %7836 = vmatprep.subr.bf16.mxu1 %v15582_v24  ;;  %v4408_v24 = vld [vmem:[%s19309_s16 + $0x738] sm:$0xff]  ;;  %v15700_v20 = vcombine.high %v4475_v2, %v4479_v3  ;;  %v15699_v23 = vcombine.low %v4475_v2, %v4479_v3 }
 0x4bf   : > { %v15630_v9 = vcombine.high %v4404_v53, %v4408_v24  ;;  %v15629_v27 = vcombine.low %v4404_v53, %v4408_v24 }
 0x4c0   : > { %7691 = vmatpush1.bf16.msra.mxu0 %v15651_v16  ;;  %v4483_v16 = vld [vmem:[%s19309_s16 + $0x990] sm:$0xff] }
 0x4c1   : > { %7837 = vmatpush1.bf16.msra.mxu1 %v15581_v60  ;;  %7701 = vmatprep.subr.bf16.mxu0 %v15660_v62  ;;  %v4487_v60 = vld [vmem:[%s19309_s16 + $0x9b0] sm:$0xff]  ;;  %v4412_v62 = vld [vmem:[%s19309_s16 + $0x758] sm:$0xff] }
 0x4c2   : > { %7838 = vmatprep.subr.bf16.mxu1 %v15590_v22  ;;  %v4416_v22 = vld [vmem:[%s19309_s16 + $0x778] sm:$0xff]  ;;  %v15708_v29 = vcombine.high %v4483_v16, %v4487_v60  ;;  %v15707_v21 = vcombine.low %v4483_v16, %v4487_v60 }
 0x4c3   : > { %7693 = vmatmul.mubr.bf16.vlgmr.msra.gmra.mrb[12].mxu0 %v19995_v34  ;;  %v15638_v7 = vcombine.high %v4412_v62, %v4416_v22  ;;  %v15637_v4 = vcombine.low %v4412_v62, %v4416_v22 }
 0x4c4   : > { %7702 = vmatpush1.bf16.msra.mxu0 %v15659_v30  ;;  %7733 = vmatprep.mubr.bf16.mxu0 %v20000_v40  ;;  %v4491_v30 = vld [vmem:[%s19309_s16 + $0x9d0] sm:$0xff] }
 0x4c5   : > { %7839 = vmatpush1.bf16.msra.mxu1 %v15589_v14  ;;  %7703 = vmatprep.subr.bf16.mxu0 %v15668_v31  ;;  %v4495_v14 = vld [vmem:[%s19309_s16 + $0x9f0] sm:$0xff]  ;;  %v4420_v31 = vld [vmem:[%s19309_s16 + $0x798] sm:$0xff] }
 0x4c6   : > { %7840 = vmatprep.subr.bf16.mxu1 %v15598_v33  ;;  %v4424_v33 = vld [vmem:[%s19309_s16 + $0x7b8] sm:$0xff]  ;;  %v15716_v32 = vcombine.high %v4491_v30, %v4495_v14  ;;  %v15715_v54 = vcombine.low %v4491_v30, %v4495_v14 }
 0x4c7   : > { %v15646_v35 = vcombine.high %v4420_v31, %v4424_v33  ;;  %v15645_v44 = vcombine.low %v4420_v31, %v4424_v33  ;;  %v4539_v31 = vld [vmem:[%s19309_s16 + $0xb50] sm:$0xff] }
 0x4c8   : > { %7704 = vmatpush1.bf16.msra.mxu0 %v15667_v36  ;;  %v4499_v36 = vld [vmem:[%s19309_s16 + $0xa10] sm:$0xff] }
 0x4c9   : > { %7841 = vmatpush1.bf16.msra.mxu1 %v15597_v37  ;;  %7705 = vmatprep.subr.bf16.mxu0 %v15676_v42  ;;  %v4503_v37 = vld [vmem:[%s19309_s16 + $0xa30] sm:$0xff]  ;;  %v4428_v42 = vld [vmem:[%s19309_s16 + $0x7d8] sm:$0xff] }
 0x4ca   : > { %7842 = vmatprep.subr.bf16.mxu1 %v15606_v1  ;;  %v4432_v1 = vld [vmem:[%s19309_s16 + $0x7f8] sm:$0xff]  ;;  %v15724_v10 = vcombine.high %v4499_v36, %v4503_v37  ;;  %v15723_v51 = vcombine.low %v4499_v36, %v4503_v37  ;;  %v4543_v33 = vld [vmem:[%s19309_s16 + $0xb70] sm:$0xff] }
 0x4cb   : > { %v15654_v6 = vcombine.high %v4428_v42, %v4432_v1  ;;  %v15653_v57 = vcombine.low %v4428_v42, %v4432_v1  ;;  %v15764_v36 = vcombine.high %v4539_v31, %v4543_v33  ;;  %v4547_v42 = vld [vmem:[%s19309_s16 + $0xb90] sm:$0xff] }
 0x4cc   : > { %7706 = vmatpush1.bf16.msra.mxu0 %v15675_v56  ;;  %v4507_v56 = vld [vmem:[%s19309_s16 + $0xa50] sm:$0xff] }
 0x4cd   : > { %7843 = vmatpush1.bf16.msra.mxu1 %v15605_v17  ;;  %7707 = vmatprep.subr.bf16.mxu0 %v15684_v46  ;;  %v4511_v17 = vld [vmem:[%s19309_s16 + $0xa70] sm:$0xff]  ;;  %v4436_v46 = vld [vmem:[%s19309_s16 + $0x818] sm:$0xff] }
 0x4ce   : > { %7844 = vmatprep.subr.bf16.mxu1 %v15614_v47  ;;  %v4440_v47 = vld [vmem:[%s19309_s16 + $0x838] sm:$0xff]  ;;  %v15732_v50 = vcombine.high %v4507_v56, %v4511_v17  ;;  %v15731_v2 = vcombine.low %v4507_v56, %v4511_v17  ;;  %v4551_v1 = vld [vmem:[%s19309_s16 + $0xbb0] sm:$0xff] }
 0x4cf   : > { %v15662_v48 = vcombine.high %v4436_v46, %v4440_v47  ;;  %v15661_v3 = vcombine.low %v4436_v46, %v4440_v47  ;;  %v15772_v56 = vcombine.high %v4547_v42, %v4551_v1  ;;  %v4555_v46 = vld [vmem:[%s19309_s16 + $0xbd0] sm:$0xff] }
 0x4d0   : > { %7708 = vmatpush1.bf16.msra.mxu0 %v15683_v61  ;;  %v4515_v61 = vld [vmem:[%s19309_s16 + $0xa90] sm:$0xff] }
 0x4d1   : > { %7845 = vmatpush1.bf16.msra.mxu1 %v15613_v0  ;;  %7709 = vmatprep.subr.bf16.mxu0 %v15692_v63  ;;  %v4519_v0 = vld [vmem:[%s19309_s16 + $0xab0] sm:$0xff]  ;;  %v4444_v63 = vld [vmem:[%s19309_s16 + $0x858] sm:$0xff] }
 0x4d2   : > { %7846 = vmatprep.subr.bf16.mxu1 %v15622_v49  ;;  %v4448_v49 = vld [vmem:[%s19309_s16 + $0x878] sm:$0xff]  ;;  %v15740_v53 = vcombine.high %v4515_v61, %v4519_v0  ;;  %v15739_v16 = vcombine.low %v4515_v61, %v4519_v0  ;;  %v4559_v47 = vld [vmem:[%s19309_s16 + $0xbf0] sm:$0xff] }
 0x4d3   : > { %v15670_v24 = vcombine.high %v4444_v63, %v4448_v49  ;;  %v15669_v60 = vcombine.low %v4444_v63, %v4448_v49  ;;  %v15780_v61 = vcombine.high %v4555_v46, %v4559_v47  ;;  %v4563_v63 = vld [vmem:[%s19309_s16 + $0xc10] sm:$0xff] }
 0x4d4   : > { %7710 = vmatpush1.bf16.msra.mxu0 %v15691_v5  ;;  %v4523_v5 = vld [vmem:[%s19309_s16 + $0xad0] sm:$0xff] }
 0x4d5   : > { %7847 = vmatpush1.bf16.msra.mxu1 %v15621_v55  ;;  %7711 = vmatprep.subr.bf16.mxu0 %v15700_v20  ;;  %v4527_v55 = vld [vmem:[%s19309_s16 + $0xaf0] sm:$0xff]  ;;  %v4452_v20 = vld [vmem:[%s19309_s16 + $0x898] sm:$0xff] }
 0x4d6   : > { %7848 = vmatprep.subr.bf16.mxu1 %v15630_v9  ;;  %v4456_v9 = vld [vmem:[%s19309_s16 + $0x8b8] sm:$0xff]  ;;  %v15748_v62 = vcombine.high %v4523_v5, %v4527_v55  ;;  %v15747_v30 = vcombine.low %v4523_v5, %v4527_v55  ;;  %v4567_v49 = vld [vmem:[%s19309_s16 + $0xc30] sm:$0xff] }
 0x4d7   : > { %v15678_v22 = vcombine.high %v4452_v20, %v4456_v9  ;;  %v15788_v5 = vcombine.high %v4563_v63, %v4567_v49 }
 0x4d8   : > { %7712 = vmatpush1.bf16.msra.mxu0 %v15699_v23  ;;  %v4531_v23 = vld [vmem:[%s19309_s16 + $0xb10] sm:$0xff] }
 0x4d9   : > { %7849 = vmatpush1.bf16.msra.mxu1 %v15629_v27  ;;  %7713 = vmatprep.subr.bf16.mxu0 %v15708_v29  ;;  %v4535_v27 = vld [vmem:[%s19309_s16 + $0xb30] sm:$0xff]  ;;  %v4460_v29 = vld [vmem:[%s19309_s16 + $0x8d8] sm:$0xff] }
 0x4da   : > { %7850 = vmatprep.subr.bf16.mxu1 %v15638_v7  ;;  %v4464_v7 = vld [vmem:[%s19309_s16 + $0x8f8] sm:$0xff] }
 0x4db   : > { %v15686_v14 = vcombine.high %v4460_v29, %v4464_v7 }
 0x4dc   : > { %7714 = vmatpush1.bf16.msra.mxu0 %v15707_v21  ;;  %v4468_v21 = vld [vmem:[%s19309_s16 + $0x918] sm:$0xff] }
 0x4dd   : > { %7851 = vmatpush1.bf16.msra.mxu1 %v15637_v4  ;;  %7715 = vmatprep.subr.bf16.mxu0 %v15716_v32  ;;  %v4472_v4 = vld [vmem:[%s19309_s16 + $0x938] sm:$0xff]  ;;  %v15755_v32 = vcombine.low %v4531_v23, %v4535_v27 }
 0x4de   : > { %7852 = vmatprep.subr.bf16.mxu1 %v15646_v35  ;;  %v15685_v35 = vcombine.low %v4460_v29, %v4464_v7  ;;  %v15694_v37 = vcombine.high %v4468_v21, %v4472_v4  ;;  %v4579_v29 = vld [vmem:[%s19309_s16 + $0xc90] sm:$0xff] }
 0x4df   : > { %v4583_v7 = vld [vmem:[%s19309_s16 + $0xcb0] sm:$0xff] }
 0x4e0   : > { %7716 = vmatpush1.bf16.msra.mxu0 %v15715_v54  ;;  %v4476_v54 = vld [vmem:[%s19309_s16 + $0x958] sm:$0xff] }
 0x4e1   : > { %7853 = vmatpush1.bf16.msra.mxu1 %v15645_v44  ;;  %7717 = vmatprep.subr.bf16.mxu0 %v15724_v10  ;;  %v4480_v44 = vld [vmem:[%s19309_s16 + $0x978] sm:$0xff]  ;;  %v15763_v10 = vcombine.low %v4539_v31, %v4543_v33  ;;  %v15804_v31 = vcombine.high %v4579_v29, %v4583_v7 }
 0x4e2   : > { %7854 = vmatprep.subr.bf16.mxu1 %v15654_v6  ;;  %v15693_v6 = vcombine.low %v4468_v21, %v4472_v4  ;;  %v15702_v17 = vcombine.high %v4476_v54, %v4480_v44  ;;  %v4587_v21 = vld [vmem:[%s19309_s16 + $0xcd0] sm:$0xff] }
 0x4e3   : > { %v4591_v4 = vld [vmem:[%s19309_s16 + $0xcf0] sm:$0xff] }
 0x4e4   : > { %7718 = vmatpush1.bf16.msra.mxu0 %v15723_v51  ;;  %v4484_v51 = vld [vmem:[%s19309_s16 + $0x998] sm:$0xff] }
 0x4e5   : > { %7855 = vmatpush1.bf16.msra.mxu1 %v15653_v57  ;;  %7719 = vmatprep.subr.bf16.mxu0 %v15732_v50  ;;  %v4488_v57 = vld [vmem:[%s19309_s16 + $0x9b8] sm:$0xff]  ;;  %v15771_v50 = vcombine.low %v4547_v42, %v4551_v1  ;;  %v15812_v42 = vcombine.high %v4587_v21, %v4591_v4 }
 0x4e6   : > { %7865 = vmatprep.subr.bf16.mxu1 %v15662_v48  ;;  %v15701_v48 = vcombine.low %v4476_v54, %v4480_v44  ;;  %v15710_v0 = vcombine.high %v4484_v51, %v4488_v57  ;;  %v4595_v54 = vld [vmem:[%s19309_s16 + $0xd10] sm:$0xff] }
 0x4e7   : > { %v4599_v44 = vld [vmem:[%s19309_s16 + $0xd30] sm:$0xff] }
 0x4e8   : > { %7720 = vmatpush1.bf16.msra.mxu0 %v15731_v2  ;;  %7857 = vmatmul.mubr.bf16.vlgmr.msra.gmra.mrb[16].mxu1 %v19995_v34  ;;  %v15677_v34 = vcombine.low %v4452_v20, %v4456_v9  ;;  %v4492_v2 = vld [vmem:[%s19309_s16 + $0x9d8] sm:$0xff]  ;;  %v4571_v20 = vld [vmem:[%s19309_s16 + $0xc50] sm:$0xff] }
 0x4e9   : > { %7866 = vmatpush1.bf16.msra.mxu1 %v15661_v3  ;;  %7897 = vmatprep.mubr.bf16.mxu1 %v20000_v40  ;;  %v15756_v40 = vcombine.high %v4531_v23, %v4535_v27  ;;  %v4496_v3 = vld [vmem:[%s19309_s16 + $0x9f8] sm:$0xff]  ;;  %v4575_v9 = vld [vmem:[%s19309_s16 + $0xc70] sm:$0xff] }
 0x4ea   : > { %7721 = vmatprep.subr.bf16.mxu0 %v15740_v53  ;;  %7867 = vmatprep.subr.bf16.mxu1 %v15670_v24  ;;  %v15779_v53 = vcombine.low %v4555_v46, %v4559_v47  ;;  %v15709_v24 = vcombine.low %v4484_v51, %v4488_v57  ;;  %v15718_v55 = vcombine.high %v4492_v2, %v4496_v3  ;;  %v4603_v51 = vld [vmem:[%s19309_s16 + $0xd50] sm:$0xff] }
 0x4eb   : > { %v15796_v23 = vcombine.high %v4571_v20, %v4575_v9  ;;  %v15820_v46 = vcombine.high %v4595_v54, %v4599_v44  ;;  %v4607_v57 = vld [vmem:[%s19309_s16 + $0xd70] sm:$0xff] }
 0x4ec   : > { %7722 = vmatpush1.bf16.msra.mxu0 %v15739_v16  ;;  %v4500_v16 = vld [vmem:[%s19309_s16 + $0xa18] sm:$0xff] }
 0x4ed   : > { %7868 = vmatpush1.bf16.msra.mxu1 %v15669_v60  ;;  %7723 = vmatprep.subr.bf16.mxu0 %v15748_v62  ;;  %v4504_v60 = vld [vmem:[%s19309_s16 + $0xa38] sm:$0xff]  ;;  %v15787_v62 = vcombine.low %v4563_v63, %v4567_v49  ;;  %v15828_v63 = vcombine.high %v4603_v51, %v4607_v57 }
 0x4ee   : > { %7869 = vmatprep.subr.bf16.mxu1 %v15678_v22  ;;  %v15717_v22 = vcombine.low %v4492_v2, %v4496_v3  ;;  %v15726_v27 = vcombine.high %v4500_v16, %v4504_v60  ;;  %v4611_v2 = vld [vmem:[%s19309_s16 + $0xd90] sm:$0xff] }
 0x4ef   : > { %v4615_v3 = vld [vmem:[%s19309_s16 + $0xdb0] sm:$0xff] }
 0x4f0   : > { %7724 = vmatpush1.bf16.msra.mxu0 %v15747_v30  ;;  %v4508_v30 = vld [vmem:[%s19309_s16 + $0xa58] sm:$0xff] }
 0x4f1   : > { %7870 = vmatpush1.bf16.msra.mxu1 %v15677_v34  ;;  %7725 = vmatprep.subr.bf16.mxu0 %v15756_v40  ;;  %v4512_v34 = vld [vmem:[%s19309_s16 + $0xa78] sm:$0xff]  ;;  %v15795_v40 = vcombine.low %v4571_v20, %v4575_v9  ;;  %v15836_v20 = vcombine.high %v4611_v2, %v4615_v3 }
 0x4f2   : > { %7871 = vmatprep.subr.bf16.mxu1 %v15686_v14  ;;  %v15725_v14 = vcombine.low %v4500_v16, %v4504_v60  ;;  %v15734_v33 = vcombine.high %v4508_v30, %v4512_v34  ;;  %v4619_v60 = vld [vmem:[%s19309_s16 + $0xdd0] sm:$0xff] }
 0x4f4   : > { %7726 = vmatpush1.bf16.msra.mxu0 %v15755_v32  ;;  %v4516_v32 = vld [vmem:[%s19309_s16 + $0xa98] sm:$0xff] }
 0x4f5   : > { %7872 = vmatpush1.bf16.msra.mxu1 %v15685_v35  ;;  %7727 = vmatprep.subr.bf16.mxu0 %v15764_v36  ;;  %v4520_v35 = vld [vmem:[%s19309_s16 + $0xab8] sm:$0xff]  ;;  %v15803_v36 = vcombine.low %v4579_v29, %v4583_v7  ;;  %v15835_v7 = vcombine.low %v4611_v2, %v4615_v3 }
 0x4f6   : > { %7873 = vmatprep.subr.bf16.mxu1 %v15694_v37  ;;  %v15733_v37 = vcombine.low %v4508_v30, %v4512_v34  ;;  %v15742_v1 = vcombine.high %v4516_v32, %v4520_v35  ;;  %v4580_v2 = vld [vmem:[%s19309_s16 + $0xc98] sm:$0xff] }
 0x4f7   : > { %v4584_v3 = vld [vmem:[%s19309_s16 + $0xcb8] sm:$0xff] }
 0x4f8   : > { %7728 = vmatpush1.bf16.msra.mxu0 %v15763_v10  ;;  %v4524_v10 = vld [vmem:[%s19309_s16 + $0xad8] sm:$0xff] }
 0x4f9   : > { %7874 = vmatpush1.bf16.msra.mxu1 %v15693_v6  ;;  %7729 = vmatprep.subr.bf16.mxu0 %v15772_v56  ;;  %v4528_v6 = vld [vmem:[%s19309_s16 + $0xaf8] sm:$0xff]  ;;  %v15811_v56 = vcombine.low %v4587_v21, %v4591_v4 }
 0x4fa   : > { %7875 = vmatprep.subr.bf16.mxu1 %v15702_v17  ;;  %v15741_v17 = vcombine.low %v4516_v32, %v4520_v35  ;;  %v15750_v47 = vcombine.high %v4524_v10, %v4528_v6  ;;  %v4556_v21 = vld [vmem:[%s19309_s16 + $0xbd8] sm:$0xff] }
 0x4fb   : > { %v4560_v4 = vld [vmem:[%s19309_s16 + $0xbf8] sm:$0xff] }
 0x4fc   : > { %7730 = vmatpush1.bf16.msra.mxu0 %v15771_v50  ;;  %v4532_v50 = vld [vmem:[%s19309_s16 + $0xb18] sm:$0xff] }
 0x4fd   : > { %7876 = vmatpush1.bf16.msra.mxu1 %v15701_v48  ;;  %7731 = vmatprep.subr.bf16.mxu0 %v15780_v61  ;;  %v4536_v48 = vld [vmem:[%s19309_s16 + $0xb38] sm:$0xff]  ;;  %v15819_v61 = vcombine.low %v4595_v54, %v4599_v44 }
 0x4fe   : > { %7877 = vmatprep.subr.bf16.mxu1 %v15710_v0  ;;  %v15749_v0 = vcombine.low %v4524_v10, %v4528_v6  ;;  %v15758_v49 = vcombine.high %v4532_v50, %v4536_v48  ;;  %v4564_v54 = vld [vmem:[%s19309_s16 + $0xc18] sm:$0xff]  ;;  %v15781_v6 = vcombine.low %v4556_v21, %v4560_v4 }
 0x4ff   : > { %v4568_v44 = vld [vmem:[%s19309_s16 + $0xc38] sm:$0xff] }
 0x500   : > { %7732 = vmatpush1.bf16.msra.mxu0 %v15779_v53  ;;  %v4540_v53 = vld [vmem:[%s19309_s16 + $0xb58] sm:$0xff] }
 0x501   : > { %7878 = vmatpush1.bf16.msra.mxu1 %v15709_v24  ;;  %7742 = vmatprep.subr.bf16.mxu0 %v15788_v5  ;;  %v4544_v24 = vld [vmem:[%s19309_s16 + $0xb78] sm:$0xff]  ;;  %v15827_v5 = vcombine.low %v4603_v51, %v4607_v57 }
 0x502   : > { %7879 = vmatprep.subr.bf16.mxu1 %v15718_v55  ;;  %v15757_v55 = vcombine.low %v4532_v50, %v4536_v48  ;;  %v15766_v16 = vcombine.high %v4540_v53, %v4544_v24  ;;  %v15765_v34 = vcombine.low %v4540_v53, %v4544_v24  ;;  %v4572_v51 = vld [vmem:[%s19309_s16 + $0xc58] sm:$0xff]  ;;  %v15789_v48 = vcombine.low %v4564_v54, %v4568_v44 }
 0x503   : > { %7734 = vmatmul.mubr.bf16.vlgmr.msra.gmra.mrb[12].mxu0 %v20074_v39  ;;  %v4576_v57 = vld [vmem:[%s19309_s16 + $0xc78] sm:$0xff] }
 0x504   : > { %7743 = vmatpush1.bf16.msra.mxu0 %v15787_v62  ;;  %7774 = vmatprep.mubr.bf16.mxu0 %v20208_v25  ;;  %v4623_v62 = vld [vmem:[%s19309_s16 + $0xdf0] sm:$0xff]  ;;  %v15797_v24 = vcombine.low %v4572_v51, %v4576_v57 }
 0x505   : > { %7880 = vmatpush1.bf16.msra.mxu1 %v15717_v22  ;;  %7744 = vmatprep.subr.bf16.mxu0 %v15796_v23  ;;  %v4548_v23 = vld [vmem:[%s19309_s16 + $0xb98] sm:$0xff]  ;;  %v15843_v32 = vcombine.low %v4619_v60, %v4623_v62 }
 0x506   : > { %7881 = vmatprep.subr.bf16.mxu1 %v15726_v27  ;;  %v4552_v27 = vld [vmem:[%s19309_s16 + $0xbb8] sm:$0xff] }
 0x507   : > { %v15773_v35 = vcombine.low %v4548_v23, %v4552_v27 }
 0x508   : > { %7745 = vmatpush1.bf16.msra.mxu0 %v15795_v40  ;;  %v15844_v40 = vcombine.high %v4619_v60, %v4623_v62  ;;  %v4588_v60 = vld [vmem:[%s19309_s16 + $0xcd8] sm:$0xff] }
 0x509   : > { %7882 = vmatpush1.bf16.msra.mxu1 %v15725_v14  ;;  %7746 = vmatprep.subr.bf16.mxu0 %v15804_v31  ;;  %v15774_v14 = vcombine.high %v4548_v23, %v4552_v27  ;;  %v4627_v31 = vld [vmem:[%s19309_s16 + $0xe10] sm:$0xff]  ;;  %v4592_v62 = vld [vmem:[%s19309_s16 + $0xcf8] sm:$0xff] }
 0x50a   : > { %7883 = vmatprep.subr.bf16.mxu1 %v15734_v33  ;;  %v4631_v33 = vld [vmem:[%s19309_s16 + $0xe30] sm:$0xff]  ;;  %v15814_v27 = vcombine.high %v4588_v60, %v4592_v62 }
 0x50b   : > { %v15851_v10 = vcombine.low %v4627_v31, %v4631_v33 }
 0x50c   : > { %7747 = vmatpush1.bf16.msra.mxu0 %v15803_v36  ;;  %v15852_v36 = vcombine.high %v4627_v31, %v4631_v33 }
 0x50d   : > { %7884 = vmatpush1.bf16.msra.mxu1 %v15733_v37  ;;  %7748 = vmatprep.subr.bf16.mxu0 %v15812_v42  ;;  %v15782_v37 = vcombine.high %v4556_v21, %v4560_v4  ;;  %v4635_v42 = vld [vmem:[%s19309_s16 + $0xe50] sm:$0xff] }
 0x50e   : > { %7885 = vmatprep.subr.bf16.mxu1 %v15742_v1  ;;  %v4639_v1 = vld [vmem:[%s19309_s16 + $0xe70] sm:$0xff] }
 0x50f   : > { %v15859_v50 = vcombine.low %v4635_v42, %v4639_v1  ;;  %v4675_v21 = vld [vmem:[%s19309_s16 + $0xf90] sm:$0xff] }
 0x510   : > { %7749 = vmatpush1.bf16.msra.mxu0 %v15811_v56  ;;  %v15860_v56 = vcombine.high %v4635_v42, %v4639_v1  ;;  %v4679_v4 = vld [vmem:[%s19309_s16 + $0xfb0] sm:$0xff] }
 0x511   : > { %7886 = vmatpush1.bf16.msra.mxu1 %v15741_v17  ;;  %7750 = vmatprep.subr.bf16.mxu0 %v15820_v46  ;;  %v15790_v17 = vcombine.high %v4564_v54, %v4568_v44  ;;  %v4643_v46 = vld [vmem:[%s19309_s16 + $0xe90] sm:$0xff]  ;;  %v15900_v1 = vcombine.high %v4675_v21, %v4679_v4 }
 0x512   : > { %7887 = vmatprep.subr.bf16.mxu1 %v15750_v47  ;;  %v4647_v47 = vld [vmem:[%s19309_s16 + $0xeb0] sm:$0xff] }
 0x513   : > { %v15867_v53 = vcombine.low %v4643_v46, %v4647_v47 }
 0x514   : > { %7751 = vmatpush1.bf16.msra.mxu0 %v15819_v61  ;;  %v15868_v61 = vcombine.high %v4643_v46, %v4647_v47  ;;  %v15899_v46 = vcombine.low %v4675_v21, %v4679_v4  ;;  %v17122_v21 = vld [vmem:[%s19313_s0 + $0x154] ss:$56 sps:$4 sm:$0xff]  }
 0x515   : > { %7888 = vmatpush1.bf16.msra.mxu1 %v15749_v0  ;;  %7752 = vmatprep.subr.bf16.mxu0 %v15828_v63  ;;  %v15798_v0 = vcombine.high %v4572_v51, %v4576_v57  ;;  %v4651_v63 = vld [vmem:[%s19309_s16 + $0xed0] sm:$0xff] }
 0x516   : > { %v20443_v9 = vpop.f32.mrb[8].mxu0  ;;  %7889 = vmatprep.subr.bf16.mxu1 %v15758_v49  ;;  %v4655_v49 = vld [vmem:[%s19309_s16 + $0xef0] sm:$0xff] }
 0x517   : > { %v20447_v22 = vpop.f32.mrb[9].mxu0  ;;  %v15875_v23 = vcombine.low %v4651_v63, %v4655_v49 }
 0x518   : > { %7753 = vmatpush1.bf16.msra.mxu0 %v15827_v5  ;;  %v7452_v29 = vpop.f32.mrb[10].mxu0  ;;  %v15876_v5 = vcombine.high %v4651_v63, %v4655_v49  ;;  %v4624_v63 = vld [vmem:[%s19309_s16 + $0xdf8] sm:$0xff] }
 0x519   : > { %7890 = vmatpush1.bf16.msra.mxu1 %v15757_v55  ;;  %v7453_v30 = vpop.f32.mrb[11].mxu0  ;;  %7754 = vmatprep.subr.bf16.mxu0 %v15836_v20  ;;  %v15806_v55 = vcombine.high %v4580_v2, %v4584_v3  ;;  %v4659_v20 = vld [vmem:[%s19309_s16 + $0xf10] sm:$0xff] }
 0x51a   : > { %7891 = vmatprep.subr.bf16.mxu1 %v15766_v16  ;;  %v4663_v16 = vld [vmem:[%s19309_s16 + $0xf30] sm:$0xff]  ;;  %v4596_v30 = vld [vmem:[%s19309_s16 + $0xd18] sm:$0xff] }
 0x51b   : > { %v4667_v29 = vld [vmem:[%s19309_s16 + $0xf50] sm:$0xff] }
 0x51c   : > { %7755 = vmatpush1.bf16.msra.mxu0 %v15835_v7  ;;  %v4671_v7 = vld [vmem:[%s19309_s16 + $0xf70] sm:$0xff] }
 0x51d   : > { %7892 = vmatpush1.bf16.msra.mxu1 %v15765_v34  ;;  %7756 = vmatprep.subr.bf16.mxu0 %v15844_v40  ;;  %v4600_v34 = vld [vmem:[%s19309_s16 + $0xd38] sm:$0xff]  ;;  %v15883_v40 = vcombine.low %v4659_v20, %v4663_v16  ;;  %v15892_v31 = vcombine.high %v4667_v29, %v4671_v7 }
 0x51e   : > { %7893 = vmatprep.subr.bf16.mxu1 %v15774_v14  ;;  %v15813_v14 = vcombine.low %v4588_v60, %v4592_v62  ;;  %v15822_v33 = vcombine.high %v4596_v30, %v4600_v34  ;;  %v15821_v42 = vcombine.low %v4596_v30, %v4600_v34  ;;  %v17116_v62 = vld [vmem:[%s19313_s0 + $0x74] ss:$56 sps:$4 sm:$0xff]   ;;  %v17119_v30 = vld [vmem:[%s19313_s0 + $0xe4] ss:$56 sps:$4 sm:$0xff]  }
 0x520   : > { %7757 = vmatpush1.bf16.msra.mxu0 %v15843_v32  ;;  %v20480_v32 = vld [vmem:[%s19311_s9] sm:$0xff] }
 0x521   : > { %7894 = vmatpush1.bf16.msra.mxu1 %v15773_v35  ;;  %7758 = vmatprep.subr.bf16.mxu0 %v15852_v36  ;;  %v4604_v35 = vld [vmem:[%s19309_s16 + $0xd58] sm:$0xff]  ;;  %v4698_v54 = vrot.slane %v20480_v32, %v19353_v58 }
 0x522   : > { %7895 = vmatprep.subr.bf16.mxu1 %v15782_v37  ;;  %v4608_v36 = vld [vmem:[%s19309_s16 + $0xd78] sm:$0xff]  ;;  %v15891_v37 = vcombine.low %v4667_v29, %v4671_v7 }
 0x523   : > { %v15830_v44 = vcombine.high %v4604_v35, %v4608_v36  ;;  %v15829_v47 = vcombine.low %v4604_v35, %v4608_v36  ;;  %v16826_v57 = vadd.f32 %v20447_v22, %v4698_v54  ;;  %v17113_v22 = vld [vmem:[%s19313_s0 + $0x4] ss:$56 sps:$4 sm:$0xff]   ;;  %v17114_v29 = vld [vmem:[%s19313_s0 + $0x70] ss:$56 sps:$4 sm:$0xff]  }
 0x524   : > { %7759 = vmatpush1.bf16.msra.mxu0 %v15851_v10  ;;  %v4683_v10 = vld [vmem:[%s19309_s16 + $0xfd0] sm:$0xff]  ;;  %v4652_v35 = vld [vmem:[%s19309_s16 + $0xed8] sm:$0xff] }
 0x525   : > { %7896 = vmatpush1.bf16.msra.mxu1 %v15781_v6  ;;  %7760 = vmatprep.subr.bf16.mxu0 %v15860_v56  ;;  %v4687_v6 = vld [vmem:[%s19309_s16 + $0xff0] sm:$0xff]  ;;  %v4612_v56 = vld [vmem:[%s19309_s16 + $0xd98] sm:$0xff] }
 0x526   : > { %7906 = vmatprep.subr.bf16.mxu1 %v15790_v17  ;;  %v4616_v17 = vld [vmem:[%s19309_s16 + $0xdb8] sm:$0xff]  ;;  %v15908_v51 = vcombine.high %v4683_v10, %v4687_v6 }
 0x527   : > { %v4656_v36 = vld [vmem:[%s19309_s16 + $0xef8] sm:$0xff] }
 0x528   : > { %7761 = vmatpush1.bf16.msra.mxu0 %v15859_v50  ;;  %7898 = vmatmul.mubr.bf16.vlgmr.msra.gmra.mrb[16].mxu1 %v20074_v39  ;;  %v15805_v39 = vcombine.low %v4580_v2, %v4584_v3  ;;  %v15907_v2 = vcombine.low %v4683_v10, %v4687_v6  ;;  %v15878_v54 = vcombine.high %v4652_v35, %v4656_v36  ;;  %v4664_v10 = vld [vmem:[%s19309_s16 + $0xf38] sm:$0xff]  ;;  %v17123_v6 = vld [vmem:[%s19313_s0 + $0x1c0] ss:$56 sps:$4 sm:$0xff]  }
 0x529   : > { %7907 = vmatpush1.bf16.msra.mxu1 %v15789_v48  ;;  %7938 = vmatprep.mubr.bf16.mxu1 %v20208_v25  ;;  %v15884_v25 = vcombine.high %v4659_v20, %v4663_v16  ;;  %v15838_v48 = vcombine.high %v4612_v56, %v4616_v17  ;;  %v4632_v20 = vld [vmem:[%s19309_s16 + $0xe38] sm:$0xff]  ;;  %v17111_v16 = vld [vmem:[%s19313_s0] ss:$56 sps:$4 sm:$0xff]  }
 0x52a   : > { %7762 = vmatprep.subr.bf16.mxu0 %v15868_v61  ;;  %7908 = vmatprep.subr.bf16.mxu1 %v15798_v0  ;;  %v4620_v0 = vld [vmem:[%s19309_s16 + $0xdd8] sm:$0xff] }
 0x52b   : > { %v15845_v60 = vcombine.low %v4620_v0, %v4624_v63 }
 0x52c   : > { %7763 = vmatpush1.bf16.msra.mxu0 %v15867_v53  ;;  %v15837_v53 = vcombine.low %v4612_v56, %v4616_v17  ;;  %v15877_v56 = vcombine.low %v4652_v35, %v4656_v36  ;;  %v17128_v17 = vld [vmem:[%s19313_s0 + $0x234] ss:$56 sps:$4 sm:$0xff]   ;;  %v17155_v36 = vld [vmem:[%s19313_s0 + $0x7e4] ss:$56 sps:$4 sm:$0xff]  }
 0x52d   : > { %7909 = vmatpush1.bf16.msra.mxu1 %v15797_v24  ;;  %7764 = vmatprep.subr.bf16.mxu0 %v15876_v5  ;;  %v7948_v24 = vmax.f32 %v16826_v57, 0.0  ;;  %v15846_v5 = vcombine.high %v4620_v0, %v4624_v63  ;;  %v17126_v57 = vld [vmem:[%s19313_s0 + $0x230] ss:$56 sps:$4 sm:$0xff]   ;;  %v17131_v0 = vld [vmem:[%s19313_s0 + $0x2a4] ss:$56 sps:$4 sm:$0xff]  }
 0x52e   : > { %7910 = vmatprep.subr.bf16.mxu1 %v15806_v55  ;;  %v4628_v55 = vld [vmem:[%s19309_s16 + $0xe18] sm:$0xff] }
 0x52f   : > { %v15853_v7 = vcombine.low %v4628_v55, %v4632_v20  ;;  %v17152_v35 = vld [vmem:[%s19313_s0 + $0x4d4] ss:$56 sps:$4 sm:$0xff]  }
 0x530   : > { %7765 = vmatpush1.bf16.msra.mxu0 %v15875_v23  ;;  %v20502_v23 = vpack.c.bf16 %v7948_v24, %v7948_v24 }
 0x531   : > { %7911 = vmatpush1.bf16.msra.mxu1 %v15805_v39  ;;  %7766 = vmatprep.subr.bf16.mxu0 %v15884_v25  ;;  %v15854_v39 = vcombine.high %v4628_v55, %v4632_v20  ;;  %v4636_v25 = vld [vmem:[%s19309_s16 + $0xe58] sm:$0xff] }
 0x532   : > { %7912 = vmatprep.subr.bf16.mxu1 %v15814_v27  ;;  %v4640_v27 = vld [vmem:[%s19309_s16 + $0xe78] sm:$0xff] }
 0x533   : > { %v15862_v34 = vcombine.high %v4636_v25, %v4640_v27  ;;  %v4684_v55 = vld [vmem:[%s19309_s16 + $0xfd8] sm:$0xff] }
 0x534   : > { %7767 = vmatpush1.bf16.msra.mxu0 %v15883_v40  ;;  %v4644_v40 = vld [vmem:[%s19309_s16 + $0xe98] sm:$0xff] }
 0x535   : > { %7913 = vmatpush1.bf16.msra.mxu1 %v15813_v14  ;;  %7768 = vmatprep.subr.bf16.mxu0 %v15892_v31  ;;  %v4648_v14 = vld [vmem:[%s19309_s16 + $0xeb8] sm:$0xff]  ;;  %v17117_v31 = vld [vmem:[%s19313_s0 + $0xe0] ss:$56 sps:$4 sm:$0xff]  }
 0x536   : > { %7914 = vmatprep.subr.bf16.mxu1 %v15822_v33  ;;  %v15861_v33 = vcombine.low %v4636_v25, %v4640_v27  ;;  %v15870_v4 = vcombine.high %v4644_v40, %v4648_v14  ;;  %v4688_v20 = vld [vmem:[%s19309_s16 + $0xff8] sm:$0xff]  ;;  %v17135_v27 = vld [vmem:[%s19313_s0 + $0x380] ss:$56 sps:$4 sm:$0xff]  }
 0x538   : > { %7769 = vmatpush1.bf16.msra.mxu0 %v15891_v37  ;;  %v17120_v37 = vld [vmem:[%s19313_s0 + $0x150] ss:$56 sps:$4 sm:$0xff]  }
 0x539   : > { %7915 = vmatpush1.bf16.msra.mxu1 %v15821_v42  ;;  %7770 = vmatprep.subr.bf16.mxu0 %v15900_v1  ;;  %v15869_v42 = vcombine.low %v4644_v40, %v4648_v14  ;;  %v17125_v1 = vld [vmem:[%s19313_s0 + $0x1c4] ss:$56 sps:$4 sm:$0xff]   ;;  %v17138_v40 = vld [vmem:[%s19313_s0 + $0x3f0] ss:$56 sps:$4 sm:$0xff]  }
 0x53a   : > { %v20491_v50 = vpop.f32.mrb[12].mxu1  ;;  %7916 = vmatprep.subr.bf16.mxu1 %v15830_v44  ;;  %v4660_v44 = vld [vmem:[%s19309_s16 + $0xf18] sm:$0xff]  ;;  %v17146_v14 = vld [vmem:[%s19313_s0 + $0x464] ss:$56 sps:$4 sm:$0xff]  }
 0x53b   : > { %v20493_v61 = vpop.f32.mrb[13].mxu1 }
 0x53c   : > { %7771 = vmatpush1.bf16.msra.mxu0 %v15899_v46  ;;  %v7616_v49 = vpop.f32.mrb[14].mxu1  ;;  %v15886_v46 = vcombine.high %v4660_v44, %v4664_v10 }
 0x53d   : > { %7917 = vmatpush1.bf16.msra.mxu1 %v15829_v47  ;;  %v7617_v3 = vpop.f32.mrb[15].mxu1  ;;  %7772 = vmatprep.subr.bf16.mxu0 %v15908_v51  ;;  %v4668_v47 = vld [vmem:[%s19309_s16 + $0xf58] sm:$0xff] }
 0x53e   : > { %7918 = vmatprep.subr.bf16.mxu1 %v15838_v48  ;;  %v4672_v51 = vld [vmem:[%s19309_s16 + $0xf78] sm:$0xff]  ;;  %v15885_v48 = vcombine.low %v4660_v44, %v4664_v10  ;;  %v17129_v3 = vld [vmem:[%s19313_s0 + $0x2a0] ss:$56 sps:$4 sm:$0xff]  }
 0x53f   : > { %v15894_v63 = vcombine.high %v4668_v47, %v4672_v51  ;;  %v4676_v49 = vld [vmem:[%s19309_s16 + $0xf98] sm:$0xff] }
 0x540   : > { %7773 = vmatpush1.bf16.msra.mxu0 %v15907_v2  ;;  %v4680_v2 = vld [vmem:[%s19309_s16 + $0xfb8] sm:$0xff] }
 0x541   : > { %7919 = vmatpush1.bf16.msra.mxu1 %v15837_v53  ;;  %13413 = vmatprep.subr.bf16.mxu0 %v17113_v22  ;;  %v15893_v53 = vcombine.low %v4668_v47, %v4672_v51  ;;  %v17134_v22 = vld [vmem:[%s19313_s0 + $0x314] ss:$56 sps:$4 sm:$0xff]   ;;  %v15902_v24 = vcombine.high %v4676_v49, %v4680_v2  ;;  %v17159_v44 = vld [vmem:[%s19313_s0 + $0x850] ss:$56 sps:$4 sm:$0xff]   ;;  %v17170_v47 = vld [vmem:[%s19313_s0 + $0x624] ss:$56 sps:$4 sm:$0xff]  }
 0x542   : > { %7920 = vmatprep.subr.bf16.mxu1 %v15846_v5  ;;  %v4706_v5 = vrot.slane %v20480_v32, %v19427_v26  ;;  %v17164_v10 = vld [vmem:[%s19313_s0 + $0x5b4] ss:$56 sps:$4 sm:$0xff]  }
 0x543   : > { %7775 = vmatmul.mubr.bf16.vlgmr.msra.gmra.mrb[12].mxu0 %v20210_v28  ;;  %v17173_v51 = vld [vmem:[%s19313_s0 + $0x934] ss:$56 sps:$4 sm:$0xff]  }
 0x544   : > { %13414 = vmatpush1.bf16.msra.mxu0 %v17111_v16  ;;  %13445 = vmatprep.mubr.bf16.mxu0 %v20502_v23  ;;  %v17132_v16 = vld [vmem:[%s19313_s0 + $0x310] ss:$56 sps:$4 sm:$0xff]   ;;  %v16828_v25 = vadd.f32 %v20493_v61, %v4706_v5  ;;  %v17141_v61 = vld [vmem:[%s19313_s0 + $0x700] ss:$56 sps:$4 sm:$0xff]  }
 0x545   : > { %7921 = vmatpush1.bf16.msra.mxu1 %v15845_v60  ;;  %13415 = vmatprep.subr.bf16.mxu0 %v17116_v62  ;;  %v15901_v60 = vcombine.low %v4676_v49, %v4680_v2  ;;  %v17137_v62 = vld [vmem:[%s19313_s0 + $0x384] ss:$56 sps:$4 sm:$0xff]   ;;  %v17174_v2 = vld [vmem:[%s19313_s0 + $0x690] ss:$56 sps:$4 sm:$0xff]  }
 0x546   : > { %7922 = vmatprep.subr.bf16.mxu1 %v15854_v39  ;;  %v15910_v39 = vcombine.high %v4684_v55, %v4688_v20  ;;  %v17179_v49 = vld [vmem:[%s19313_s0 + $0x9a4] ss:$56 sps:$4 sm:$0xff]  }
 0x548   : > { %13416 = vmatpush1.bf16.msra.mxu0 %v17114_v29  ;;  %v15909_v29 = vcombine.low %v4684_v55, %v4688_v20  ;;  %v17180_v55 = vld [vmem:[%s19313_s0 + $0xa10] ss:$56 sps:$4 sm:$0xff]   ;;  %v17212_v20 = vld [vmem:[%s19313_s0 + $0xe74] ss:$56 sps:$4 sm:$0xff]  }
 0x549   : > { %7923 = vmatpush1.bf16.msra.mxu1 %v15853_v7  ;;  %13417 = vmatprep.subr.bf16.mxu0 %v17119_v30  ;;  %v17140_v7 = vld [vmem:[%s19313_s0 + $0x3f4] ss:$56 sps:$4 sm:$0xff]   ;;  %v17143_v30 = vld [vmem:[%s19313_s0 + $0x704] ss:$56 sps:$4 sm:$0xff]  }
 0x54a   : > { %7924 = vmatprep.subr.bf16.mxu1 %v15862_v34  ;;  %v7950_v34 = vmax.f32 %v16828_v25, 0.0  ;;  %v17188_v25 = vld [vmem:[%s19313_s0 + $0xaf4] ss:$56 sps:$4 sm:$0xff]  }
 0x54c   : > { %13418 = vmatpush1.bf16.msra.mxu0 %v17117_v31  ;;  %v17149_v31 = vld [vmem:[%s19313_s0 + $0x774] ss:$56 sps:$4 sm:$0xff]  }
 0x54d   : > { %7925 = vmatpush1.bf16.msra.mxu1 %v15861_v33  ;;  %13419 = vmatprep.subr.bf16.mxu0 %v17122_v21  ;;  %v20544_v33 = vpack.c.bf16 %v7950_v34, %v7950_v34  ;;  %v17144_v21 = vld [vmem:[%s19313_s0 + $0x460] ss:$56 sps:$4 sm:$0xff]   ;;  %v17216_v34 = vld [vmem:[%s19313_s0 + $0xf50] ss:$56 sps:$4 sm:$0xff]  }
 0x54e   : > { %7926 = vmatprep.subr.bf16.mxu1 %v15870_v4  ;;  %v17147_v4 = vld [vmem:[%s19313_s0 + $0x770] ss:$56 sps:$4 sm:$0xff]  }
 0x550   : > { %13420 = vmatpush1.bf16.msra.mxu0 %v17120_v37  ;;  %v17150_v37 = vld [vmem:[%s19313_s0 + $0x4d0] ss:$56 sps:$4 sm:$0xff]  }
 0x551   : > { %7927 = vmatpush1.bf16.msra.mxu1 %v15869_v42  ;;  %13421 = vmatprep.subr.bf16.mxu0 %v17125_v1  ;;  %v17158_v42 = vld [vmem:[%s19313_s0 + $0x544] ss:$56 sps:$4 sm:$0xff]   ;;  %v17161_v1 = vld [vmem:[%s19313_s0 + $0x854] ss:$56 sps:$4 sm:$0xff]  }
 0x552   : > { %7928 = vmatprep.subr.bf16.mxu1 %v15878_v54  ;;  %v17156_v54 = vld [vmem:[%s19313_s0 + $0x540] ss:$56 sps:$4 sm:$0xff]  }
 0x554   : > { %13422 = vmatpush1.bf16.msra.mxu0 %v17123_v6  ;;  %v17167_v6 = vld [vmem:[%s19313_s0 + $0x8c4] ss:$56 sps:$4 sm:$0xff]  }
 0x555   : > { %7929 = vmatpush1.bf16.msra.mxu1 %v15877_v56  ;;  %13423 = vmatprep.subr.bf16.mxu0 %v17128_v17  ;;  %v17162_v56 = vld [vmem:[%s19313_s0 + $0x5b0] ss:$56 sps:$4 sm:$0xff]   ;;  %v4694_v17 = vrot.slane %v20480_v32, %v19415_v11 }
 0x556   : > { %7930 = vmatprep.subr.bf16.mxu1 %v15886_v46  ;;  %v17165_v46 = vld [vmem:[%s19313_s0 + $0x8c0] ss:$56 sps:$4 sm:$0xff]  }
 0x558   : > { %13424 = vmatpush1.bf16.msra.mxu0 %v17126_v57  ;;  %v17168_v57 = vld [vmem:[%s19313_s0 + $0x620] ss:$56 sps:$4 sm:$0xff]  }
 0x559   : > { %7931 = vmatpush1.bf16.msra.mxu1 %v15885_v48  ;;  %13425 = vmatprep.subr.bf16.mxu0 %v17131_v0  ;;  %v16825_v48 = vadd.f32 %v20443_v9, %v4694_v17  ;;  %v17171_v0 = vld [vmem:[%s19313_s0 + $0x930] ss:$56 sps:$4 sm:$0xff]   ;;  %v17182_v9 = vld [vmem:[%s19313_s0 + $0xa14] ss:$56 sps:$4 sm:$0xff]   ;;  %v17201_v17 = vld [vmem:[%s19313_s0 + $0xd20] ss:$56 sps:$4 sm:$0xff]  }
 0x55a   : > { %7932 = vmatprep.subr.bf16.mxu1 %v15894_v63  ;;  %v17176_v63 = vld [vmem:[%s19313_s0 + $0x694] ss:$56 sps:$4 sm:$0xff]  }
 0x55c   : > { %13426 = vmatpush1.bf16.msra.mxu0 %v17129_v3  ;;  %v7947_v3 = vmax.f32 %v16825_v48, 0.0  ;;  %v17204_v48 = vld [vmem:[%s19313_s0 + $0xd90] ss:$56 sps:$4 sm:$0xff]  }
 0x55d   : > { %7933 = vmatpush1.bf16.msra.mxu1 %v15893_v53  ;;  %13427 = vmatprep.subr.bf16.mxu0 %v17134_v22  ;;  %v17177_v53 = vld [vmem:[%s19313_s0 + $0x9a0] ss:$56 sps:$4 sm:$0xff]   ;;  %v17209_v22 = vld [vmem:[%s19313_s0 + $0xe04] ss:$56 sps:$4 sm:$0xff]  }
 0x55e   : > { %7934 = vmatprep.subr.bf16.mxu1 %v15902_v24  ;;  %v17207_v24 = vld [vmem:[%s19313_s0 + $0xe00] ss:$56 sps:$4 sm:$0xff]   ;;  %v20576_v5 = vpack.c.bf16 %v7947_v3, %v7947_v3  ;;  %v17242_v3 = vld [vmem:[%s19313_s0 + $0x1264] ss:$56 sps:$4 sm:$0xff]  }
 0x560   : > { %13428 = vmatpush1.bf16.msra.mxu0 %v17132_v16  ;;  %v17185_v16 = vld [vmem:[%s19313_s0 + $0xa84] ss:$56 sps:$4 sm:$0xff]  }
 0x561   : > { %7935 = vmatpush1.bf16.msra.mxu1 %v15901_v60  ;;  %13429 = vmatprep.subr.bf16.mxu0 %v17137_v62  ;;  %v17210_v60 = vld [vmem:[%s19313_s0 + $0xe70] ss:$56 sps:$4 sm:$0xff]   ;;  %v17183_v62 = vld [vmem:[%s19313_s0 + $0xa80] ss:$56 sps:$4 sm:$0xff]  }
 0x562   : > { %7936 = vmatprep.subr.bf16.mxu1 %v15910_v39  ;;  %v17215_v39 = vld [vmem:[%s19313_s0 + $0xee4] ss:$56 sps:$4 sm:$0xff]  }
 0x564   : > { %13430 = vmatpush1.bf16.msra.mxu0 %v17135_v27  ;;  %v17213_v27 = vld [vmem:[%s19313_s0 + $0xee0] ss:$56 sps:$4 sm:$0xff]  }
 0x565   : > { %7937 = vmatpush1.bf16.msra.mxu1 %v15909_v29  ;;  %13431 = vmatprep.subr.bf16.mxu0 %v17140_v7  ;;  %v17186_v29 = vld [vmem:[%s19313_s0 + $0xaf0] ss:$56 sps:$4 sm:$0xff]   ;;  %v17218_v7 = vld [vmem:[%s19313_s0 + $0xf54] ss:$56 sps:$4 sm:$0xff]  }
 0x566   : > { %13454 = vmatprep.subr.bf16.mxu1 %v17143_v30  ;;  %v17191_v30 = vld [vmem:[%s19313_s0 + $0xb64] ss:$56 sps:$4 sm:$0xff]  }
 0x568   : > { %7939 = vmatmul.mubr.bf16.vlgmr.msra.gmra.mrb[16].mxu1 %v20210_v28  ;;  %13432 = vmatpush1.bf16.msra.mxu0 %v17138_v40  ;;  %v17153_v28 = vld [vmem:[%s19313_s0 + $0x7e0] ss:$56 sps:$4 sm:$0xff]  }
 0x569   : > { %13455 = vmatpush1.bf16.msra.mxu1 %v17141_v61  ;;  %13486 = vmatprep.mubr.bf16.mxu1 %v20544_v33  ;;  %v17189_v40 = vld [vmem:[%s19313_s0 + $0xb60] ss:$56 sps:$4 sm:$0xff]   ;;  %v17221_v61 = vld [vmem:[%s19313_s0 + $0xfc4] ss:$56 sps:$4 sm:$0xff]  }
 0x56a   : > { %13433 = vmatprep.subr.bf16.mxu0 %v17146_v14  ;;  %13456 = vmatprep.subr.bf16.mxu1 %v17149_v31  ;;  %v17194_v14 = vld [vmem:[%s19313_s0 + $0xbd4] ss:$56 sps:$4 sm:$0xff]   ;;  %v17219_v31 = vld [vmem:[%s19313_s0 + $0xfc0] ss:$56 sps:$4 sm:$0xff]  }
 0x56c   : > { %13434 = vmatpush1.bf16.msra.mxu0 %v17144_v21  ;;  %v17192_v21 = vld [vmem:[%s19313_s0 + $0xbd0] ss:$56 sps:$4 sm:$0xff]  }
 0x56d   : > { %13457 = vmatpush1.bf16.msra.mxu1 %v17147_v4  ;;  %13435 = vmatprep.subr.bf16.mxu0 %v17152_v35  ;;  %v17224_v4 = vld [vmem:[%s19313_s0 + $0x1034] ss:$56 sps:$4 sm:$0xff]   ;;  %v17197_v35 = vld [vmem:[%s19313_s0 + $0xc44] ss:$56 sps:$4 sm:$0xff]  }
 0x56e   : > { %13458 = vmatprep.subr.bf16.mxu1 %v17155_v36  ;;  %v17222_v36 = vld [vmem:[%s19313_s0 + $0x1030] ss:$56 sps:$4 sm:$0xff]  }
 0x570   : > { %13436 = vmatpush1.bf16.msra.mxu0 %v17150_v37  ;;  %v17195_v37 = vld [vmem:[%s19313_s0 + $0xc40] ss:$56 sps:$4 sm:$0xff]  }
 0x571   : > { %13459 = vmatpush1.bf16.msra.mxu1 %v17153_v28  ;;  %13437 = vmatprep.subr.bf16.mxu0 %v17158_v42  ;;  %v17227_v28 = vld [vmem:[%s19313_s0 + $0x10a4] ss:$56 sps:$4 sm:$0xff]   ;;  %v17200_v42 = vld [vmem:[%s19313_s0 + $0xcb4] ss:$56 sps:$4 sm:$0xff]  }
 0x572   : > { %13460 = vmatprep.subr.bf16.mxu1 %v17161_v1  ;;  %v17225_v1 = vld [vmem:[%s19313_s0 + $0x10a0] ss:$56 sps:$4 sm:$0xff]  }
 0x574   : > { %13438 = vmatpush1.bf16.msra.mxu0 %v17156_v54  ;;  %v17198_v54 = vld [vmem:[%s19313_s0 + $0xcb0] ss:$56 sps:$4 sm:$0xff]  }
 0x575   : > { %13461 = vmatpush1.bf16.msra.mxu1 %v17159_v44  ;;  %13439 = vmatprep.subr.bf16.mxu0 %v17164_v10  ;;  %v17230_v44 = vld [vmem:[%s19313_s0 + $0x1114] ss:$56 sps:$4 sm:$0xff]   ;;  %v4702_v10 = vrot.slane %v20480_v32, %v19529_v18 }
 0x576   : > { %13462 = vmatprep.subr.bf16.mxu1 %v17167_v6  ;;  %v17203_v6 = vld [vmem:[%s19313_s0 + $0xd24] ss:$56 sps:$4 sm:$0xff]  }
 0x578   : > { %13440 = vmatpush1.bf16.msra.mxu0 %v17162_v56  ;;  %v17228_v56 = vld [vmem:[%s19313_s0 + $0x1110] ss:$56 sps:$4 sm:$0xff]  }
 0x579   : > { %13463 = vmatpush1.bf16.msra.mxu1 %v17165_v46  ;;  %13441 = vmatprep.subr.bf16.mxu0 %v17170_v47  ;;  %v17233_v46 = vld [vmem:[%s19313_s0 + $0x1184] ss:$56 sps:$4 sm:$0xff]   ;;  %v16827_v47 = vadd.f32 %v20491_v50, %v4702_v10  ;;  %v17237_v50 = vld [vmem:[%s19313_s0 + $0x1500] ss:$56 sps:$4 sm:$0xff]   ;;  %v17291_v10 = vld [vmem:[%s19313_s0 + $0x18f0] ss:$56 sps:$4 sm:$0xff]  }
 0x57a   : > { %13464 = vmatprep.subr.bf16.mxu1 %v17173_v51  ;;  %v17206_v51 = vld [vmem:[%s19313_s0 + $0xd94] ss:$56 sps:$4 sm:$0xff]  }
 0x57c   : > { %13442 = vmatpush1.bf16.msra.mxu0 %v17168_v57  ;;  %v17231_v57 = vld [vmem:[%s19313_s0 + $0x1180] ss:$56 sps:$4 sm:$0xff]  }
 0x57d   : > { %13465 = vmatpush1.bf16.msra.mxu1 %v17171_v0  ;;  %13443 = vmatprep.subr.bf16.mxu0 %v17176_v63  ;;  %v17236_v0 = vld [vmem:[%s19313_s0 + $0x11f4] ss:$56 sps:$4 sm:$0xff]   ;;  %v7949_v63 = vmax.f32 %v16827_v47, 0.0  ;;  %v17311_v47 = vld [vmem:[%s19313_s0 + $0x1a44] ss:$56 sps:$4 sm:$0xff]  }
 0x57e   : > { %13466 = vmatprep.subr.bf16.mxu1 %v17179_v49  ;;  %v17239_v49 = vld [vmem:[%s19313_s0 + $0x1504] ss:$56 sps:$4 sm:$0xff]  }
 0x580   : > { %13444 = vmatpush1.bf16.msra.mxu0 %v17174_v2  ;;  %v17234_v2 = vld [vmem:[%s19313_s0 + $0x11f0] ss:$56 sps:$4 sm:$0xff]  }
 0x581   : > { %13467 = vmatpush1.bf16.msra.mxu1 %v17177_v53  ;;  %13495 = vmatprep.subr.bf16.mxu0 %v17209_v22  ;;  %v20620_v53 = vpack.c.bf16 %v7949_v63, %v7949_v63  ;;  %v17245_v22 = vld [vmem:[%s19313_s0 + $0x1574] ss:$56 sps:$4 sm:$0xff]   ;;  %v17321_v63 = vld [vmem:[%s19313_s0 + $0x1b20] ss:$56 sps:$4 sm:$0xff]  }
 0x582   : > { %13468 = vmatprep.subr.bf16.mxu1 %v17182_v9  ;;  %v17240_v9 = vld [vmem:[%s19313_s0 + $0x1260] ss:$56 sps:$4 sm:$0xff]  }
 0x583   : > { %13446 = vmatmul.mubr.bf16.vlgmr.msra.gmra.mrb[16].mxu0 %v20576_v5 }
 0x584   : > { %13496 = vmatpush1.bf16.msra.mxu0 %v17207_v24  ;;  %v17243_v24 = vld [vmem:[%s19313_s0 + $0x1570] ss:$56 sps:$4 sm:$0xff]  }
 0x585   : > { %13469 = vmatpush1.bf16.msra.mxu1 %v17180_v55  ;;  %13497 = vmatprep.subr.bf16.mxu0 %v17212_v20  ;;  %v17248_v55 = vld [vmem:[%s19313_s0 + $0x12d4] ss:$56 sps:$4 sm:$0xff]   ;;  %v17251_v20 = vld [vmem:[%s19313_s0 + $0x15e4] ss:$56 sps:$4 sm:$0xff]  }
 0x586   : > { %13470 = vmatprep.subr.bf16.mxu1 %v17185_v16  ;;  %v17246_v16 = vld [vmem:[%s19313_s0 + $0x12d0] ss:$56 sps:$4 sm:$0xff]  }
 0x588   : > { %13498 = vmatpush1.bf16.msra.mxu0 %v17210_v60  ;;  %v17249_v60 = vld [vmem:[%s19313_s0 + $0x15e0] ss:$56 sps:$4 sm:$0xff]  }
 0x589   : > { %13471 = vmatpush1.bf16.msra.mxu1 %v17183_v62  ;;  %13499 = vmatprep.subr.bf16.mxu0 %v17215_v39  ;;  %v17254_v62 = vld [vmem:[%s19313_s0 + $0x1344] ss:$56 sps:$4 sm:$0xff]   ;;  %v17257_v39 = vld [vmem:[%s19313_s0 + $0x1654] ss:$56 sps:$4 sm:$0xff]  }
 0x58a   : > { %13472 = vmatprep.subr.bf16.mxu1 %v17188_v25  ;;  %v17252_v25 = vld [vmem:[%s19313_s0 + $0x1340] ss:$56 sps:$4 sm:$0xff]  }
 0x58c   : > { %13500 = vmatpush1.bf16.msra.mxu0 %v17213_v27  ;;  %v17255_v27 = vld [vmem:[%s19313_s0 + $0x1650] ss:$56 sps:$4 sm:$0xff]  }
 0x58d   : > { %13473 = vmatpush1.bf16.msra.mxu1 %v17186_v29  ;;  %13501 = vmatprep.subr.bf16.mxu0 %v17218_v7  ;;  %v17260_v29 = vld [vmem:[%s19313_s0 + $0x13b4] ss:$56 sps:$4 sm:$0xff]   ;;  %v17263_v7 = vld [vmem:[%s19313_s0 + $0x16c4] ss:$56 sps:$4 sm:$0xff]  }
 0x58e   : > { %13474 = vmatprep.subr.bf16.mxu1 %v17191_v30  ;;  %v17258_v30 = vld [vmem:[%s19313_s0 + $0x13b0] ss:$56 sps:$4 sm:$0xff]  }
 0x590   : > { %13502 = vmatpush1.bf16.msra.mxu0 %v17216_v34  ;;  %v17261_v34 = vld [vmem:[%s19313_s0 + $0x16c0] ss:$56 sps:$4 sm:$0xff]  }
 0x591   : > { %13475 = vmatpush1.bf16.msra.mxu1 %v17189_v40  ;;  %13503 = vmatprep.subr.bf16.mxu0 %v17221_v61  ;;  %v17266_v40 = vld [vmem:[%s19313_s0 + $0x1424] ss:$56 sps:$4 sm:$0xff]   ;;  %v17269_v61 = vld [vmem:[%s19313_s0 + $0x1734] ss:$56 sps:$4 sm:$0xff]  }
 0x592   : > { %13476 = vmatprep.subr.bf16.mxu1 %v17194_v14  ;;  %v17264_v14 = vld [vmem:[%s19313_s0 + $0x1420] ss:$56 sps:$4 sm:$0xff]  }
 0x594   : > { %13504 = vmatpush1.bf16.msra.mxu0 %v17219_v31  ;;  %v17267_v31 = vld [vmem:[%s19313_s0 + $0x1730] ss:$56 sps:$4 sm:$0xff]  }
 0x595   : > { %13477 = vmatpush1.bf16.msra.mxu1 %v17192_v21  ;;  %13505 = vmatprep.subr.bf16.mxu0 %v17224_v4  ;;  %v17272_v21 = vld [vmem:[%s19313_s0 + $0x1494] ss:$56 sps:$4 sm:$0xff]   ;;  %v17275_v4 = vld [vmem:[%s19313_s0 + $0x17a4] ss:$56 sps:$4 sm:$0xff]  }
 0x596   : > { %13478 = vmatprep.subr.bf16.mxu1 %v17197_v35  ;;  %v17270_v35 = vld [vmem:[%s19313_s0 + $0x1490] ss:$56 sps:$4 sm:$0xff]  }
 0x598   : > { %13506 = vmatpush1.bf16.msra.mxu0 %v17222_v36  ;;  %v17273_v36 = vld [vmem:[%s19313_s0 + $0x17a0] ss:$56 sps:$4 sm:$0xff]  }
 0x599   : > { %13479 = vmatpush1.bf16.msra.mxu1 %v17195_v37  ;;  %13507 = vmatprep.subr.bf16.mxu0 %v17227_v28  ;;  %v17278_v37 = vld [vmem:[%s19313_s0 + $0xc] ss:$56 sps:$4 sm:$0xff]  }
 0x59a   : > { %13480 = vmatprep.subr.bf16.mxu1 %v17200_v42  ;;  %v17281_v28 = vld [vmem:[%s19313_s0 + $0x1814] ss:$56 sps:$4 sm:$0xff]   ;;  %v17279_v42 = vld [vmem:[%s19313_s0 + $0x1810] ss:$56 sps:$4 sm:$0xff]  }
 0x59c   : > { %13508 = vmatpush1.bf16.msra.mxu0 %v17225_v1  ;;  %v17287_v1 = vld [vmem:[%s19313_s0 + $0x1884] ss:$56 sps:$4 sm:$0xff]  }
 0x59d   : > { %13481 = vmatpush1.bf16.msra.mxu1 %v17198_v54  ;;  %13509 = vmatprep.subr.bf16.mxu0 %v17230_v44  ;;  %v17285_v54 = vld [vmem:[%s19313_s0 + $0x1880] ss:$56 sps:$4 sm:$0xff]   ;;  %v17293_v44 = vld [vmem:[%s19313_s0 + $0x18f4] ss:$56 sps:$4 sm:$0xff]  }
 0x59e   : > { %13482 = vmatprep.subr.bf16.mxu1 %v17203_v6  ;;  %v17299_v6 = vld [vmem:[%s19313_s0 + $0x1964] ss:$56 sps:$4 sm:$0xff]  }
 0x5a0   : > { %13510 = vmatpush1.bf16.msra.mxu0 %v17228_v56  ;;  %v17297_v56 = vld [vmem:[%s19313_s0 + $0x1960] ss:$56 sps:$4 sm:$0xff]  }
 0x5a1   : > { %13483 = vmatpush1.bf16.msra.mxu1 %v17201_v17  ;;  %13511 = vmatprep.subr.bf16.mxu0 %v17233_v46  ;;  %v17305_v17 = vld [vmem:[%s19313_s0 + $0x19d4] ss:$56 sps:$4 sm:$0xff]   ;;  %v17303_v46 = vld [vmem:[%s19313_s0 + $0x19d0] ss:$56 sps:$4 sm:$0xff]  }
 0x5a2   : > { %13484 = vmatprep.subr.bf16.mxu1 %v17206_v51  ;;  %v17309_v51 = vld [vmem:[%s19313_s0 + $0x1a40] ss:$56 sps:$4 sm:$0xff]  }
 0x5a4   : > { %13512 = vmatpush1.bf16.msra.mxu0 %v17231_v57  ;;  %v17317_v57 = vld [vmem:[%s19313_s0 + $0x1ab4] ss:$56 sps:$4 sm:$0xff]  }
 0x5a5   : > { %13485 = vmatpush1.bf16.msra.mxu1 %v17204_v48  ;;  %13513 = vmatprep.subr.bf16.mxu0 %v17236_v0  ;;  %v17315_v48 = vld [vmem:[%s19313_s0 + $0x1ab0] ss:$56 sps:$4 sm:$0xff]   ;;  %v17323_v0 = vld [vmem:[%s19313_s0 + $0x1b24] ss:$56 sps:$4 sm:$0xff]  }
 0x5a6   : > { %13536 = vmatprep.subr.bf16.mxu1 %v17239_v49  ;;  %v17329_v49 = vld [vmem:[%s19313_s0 + $0x1b94] ss:$56 sps:$4 sm:$0xff]  }
 0x5a8   : > { %13487 = vmatmul.mubr.bf16.vlgmr.msra.gmra.mrb[20].mxu1 %v20620_v53  ;;  %13514 = vmatpush1.bf16.msra.mxu0 %v17234_v2  ;;  %v17327_v2 = vld [vmem:[%s19313_s0 + $0x1b90] ss:$56 sps:$4 sm:$0xff]  }
 0x5a9   : > { %13537 = vmatpush1.bf16.msra.mxu1 %v17237_v50  ;;  %13515 = vmatprep.subr.bf16.mxu0 %v17242_v3  ;;  %v17335_v50 = vld [vmem:[%s19313_s0 + $0x70c] ss:$56 sps:$4 sm:$0xff]   ;;  %v4710_v3 = vrot.slane %v20480_v32, %v19418_v15 }
 0x5aa   : > { %13538 = vmatprep.subr.bf16.mxu1 %v17245_v22  ;;  %v4714_v22 = vrot.slane %v20480_v32, %v19356_v59 }
 0x5ac   : > { %13516 = vmatpush1.bf16.msra.mxu0 %v17240_v9 }
 0x5ad   : > { %13539 = vmatpush1.bf16.msra.mxu1 %v17243_v24  ;;  %13517 = vmatprep.subr.bf16.mxu0 %v17248_v55 }
 0x5ae   : > { %13540 = vmatprep.subr.bf16.mxu1 %v17251_v20 }
 0x5b0   : > { %13518 = vmatpush1.bf16.msra.mxu0 %v17246_v16 }
 0x5b1   : > { %13541 = vmatpush1.bf16.msra.mxu1 %v17249_v60  ;;  %13519 = vmatprep.subr.bf16.mxu0 %v17254_v62 }
 0x5b2   : > { %13542 = vmatprep.subr.bf16.mxu1 %v17257_v39 }
 0x5b4   : > { %13520 = vmatpush1.bf16.msra.mxu0 %v17252_v25 }
 0x5b5   : > { %13543 = vmatpush1.bf16.msra.mxu1 %v17255_v27  ;;  %13521 = vmatprep.subr.bf16.mxu0 %v17260_v29  ;;  %v17276_v27 = vld [vmem:[%s19313_s0 + $0x8] ss:$56 sps:$4 sm:$0xff]  }
 0x5b6   : > { %13544 = vmatprep.subr.bf16.mxu1 %v17263_v7  ;;  %v17284_v7 = vld [vmem:[%s19313_s0 + $0x7c] ss:$56 sps:$4 sm:$0xff]  }
 0x5b8   : > { %13522 = vmatpush1.bf16.msra.mxu0 %v17258_v30  ;;  %v17282_v30 = vld [vmem:[%s19313_s0 + $0x78] ss:$56 sps:$4 sm:$0xff]  }
 0x5b9   : > { %13545 = vmatpush1.bf16.msra.mxu1 %v17261_v34  ;;  %13523 = vmatprep.subr.bf16.mxu0 %v17266_v40  ;;  %v17290_v34 = vld [vmem:[%s19313_s0 + $0xec] ss:$56 sps:$4 sm:$0xff]   ;;  %v17288_v40 = vld [vmem:[%s19313_s0 + $0xe8] ss:$56 sps:$4 sm:$0xff]  }
 0x5ba   : > { %13546 = vmatprep.subr.bf16.mxu1 %v17269_v61  ;;  %v17296_v61 = vld [vmem:[%s19313_s0 + $0x15c] ss:$56 sps:$4 sm:$0xff]  }
 0x5bc   : > { %13524 = vmatpush1.bf16.msra.mxu0 %v17264_v14  ;;  %v17294_v14 = vld [vmem:[%s19313_s0 + $0x158] ss:$56 sps:$4 sm:$0xff]  }
 0x5bd   : > { %13547 = vmatpush1.bf16.msra.mxu1 %v17267_v31  ;;  %13525 = vmatprep.subr.bf16.mxu0 %v17272_v21  ;;  %v17302_v31 = vld [vmem:[%s19313_s0 + $0x1cc] ss:$56 sps:$4 sm:$0xff]   ;;  %v17300_v21 = vld [vmem:[%s19313_s0 + $0x1c8] ss:$56 sps:$4 sm:$0xff]  }
 0x5be   : > { %13548 = vmatprep.subr.bf16.mxu1 %v17275_v4  ;;  %v17308_v4 = vld [vmem:[%s19313_s0 + $0x23c] ss:$56 sps:$4 sm:$0xff]  }
 0x5c0   : > { %13526 = vmatpush1.bf16.msra.mxu0 %v17270_v35  ;;  %v17306_v35 = vld [vmem:[%s19313_s0 + $0x238] ss:$56 sps:$4 sm:$0xff]  }
 0x5c1   : > { %13549 = vmatpush1.bf16.msra.mxu1 %v17273_v36  ;;  %13577 = vmatprep.subr.bf16.mxu0 %v17278_v37  ;;  %v17314_v36 = vld [vmem:[%s19313_s0 + $0x2ac] ss:$56 sps:$4 sm:$0xff]   ;;  %v17312_v37 = vld [vmem:[%s19313_s0 + $0x2a8] ss:$56 sps:$4 sm:$0xff]  }
 0x5c2   : > { %13550 = vmatprep.subr.bf16.mxu1 %v17281_v28  ;;  %v17320_v28 = vld [vmem:[%s19313_s0 + $0x31c] ss:$56 sps:$4 sm:$0xff]  }
 0x5c5   : > { %13551 = vmatpush1.bf16.msra.mxu1 %v17279_v42  ;;  %v17318_v42 = vld [vmem:[%s19313_s0 + $0x318] ss:$56 sps:$4 sm:$0xff]  }
 0x5c6   : > { %13552 = vmatprep.subr.bf16.mxu1 %v17287_v1  ;;  %v4718_v1 = vrot.slane %v20480_v32, %v19484_v45 }
 0x5c9   : > { %13553 = vmatpush1.bf16.msra.mxu1 %v17285_v54  ;;  %v4722_v54 = vrot.slane %v20480_v32, %v20195_v19  ;;  %v17330_v32 = vld [vmem:[%s19313_s0 + $0x3f8] ss:$56 sps:$4 sm:$0xff]  }
 0x5ca   : > { %13554 = vmatprep.subr.bf16.mxu1 %v17293_v44  ;;  %v17326_v44 = vld [vmem:[%s19313_s0 + $0x38c] ss:$56 sps:$4 sm:$0xff]  }
 0x5cd   : > { %13555 = vmatpush1.bf16.msra.mxu1 %v17291_v10 }
 0x5ce   : > { %13556 = vmatprep.subr.bf16.mxu1 %v17299_v6 }
 0x5d1   : > { %13557 = vmatpush1.bf16.msra.mxu1 %v17297_v56 }
 0x5d2   : > { %13558 = vmatprep.subr.bf16.mxu1 %v17305_v17  ;;  %v17324_v17 = vld [vmem:[%s19313_s0 + $0x388] ss:$56 sps:$4 sm:$0xff]  }
 0x5d5   : > { %13559 = vmatpush1.bf16.msra.mxu1 %v17303_v46 }
 0x5d6   : > { %13560 = vmatprep.subr.bf16.mxu1 %v17311_v47 }
 0x5d9   : > { %13561 = vmatpush1.bf16.msra.mxu1 %v17309_v51  ;;  %v17332_v51 = vld [vmem:[%s19313_s0 + $0x3fc] ss:$56 sps:$4 sm:$0xff]  }
 0x5da   : > { %13562 = vmatprep.subr.bf16.mxu1 %v17317_v57 }
 0x5dd   : > { %13563 = vmatpush1.bf16.msra.mxu1 %v17315_v48 }
 0x5de   : > { %13564 = vmatprep.subr.bf16.mxu1 %v17323_v0 }
 0x5e1   : > { %13565 = vmatpush1.bf16.msra.mxu1 %v17321_v63 }
 0x5e2   : > { %13566 = vmatprep.subr.bf16.mxu1 %v17329_v49  ;;  %v17333_v49 = vld [vmem:[%s19313_s0 + $0x708] ss:$56 sps:$4 sm:$0xff]  }
 0x5e5   : > { %13567 = vmatpush1.bf16.msra.mxu1 %v17327_v2 }
 0x5e6   : > { %13618 = vmatprep.subr.bf16.mxu1 %v17335_v50  ;;  %v17338_v50 = vld [vmem:[%s19313_s0 + $0x46c] ss:$56 sps:$4 sm:$0xff]  }
 0x616   : > { %v7776_v9 = vpop.f32.mrb[12].mxu0 }
 0x617   : > { %v16829_v24 = vadd.f32 %v7776_v9, %v4710_v3  ;;  %v7778_v55 = vpop.f32.mrb[13].mxu0  ;;  %v17341_v3 = vld [vmem:[%s19313_s0 + $0x77c] ss:$56 sps:$4 sm:$0xff]   ;;  %v17339_v9 = vld [vmem:[%s19313_s0 + $0x778] ss:$56 sps:$4 sm:$0xff]  }
 0x618   : > { %v16830_v20 = vadd.f32 %v7778_v55, %v4714_v22  ;;  %v7780_v16 = vpop.f32.mrb[14].mxu0  ;;  %v17336_v22 = vld [vmem:[%s19313_s0 + $0x468] ss:$56 sps:$4 sm:$0xff]   ;;  %v17347_v55 = vld [vmem:[%s19313_s0 + $0x7ec] ss:$56 sps:$4 sm:$0xff]  }
 0x619   : > { %v7951_v60 = vmax.f32 %v16829_v24, 0.0  ;;  %v7781_v62 = vpop.f32.mrb[15].mxu0  ;;  %v17344_v24 = vld [vmem:[%s19313_s0 + $0x4dc] ss:$56 sps:$4 sm:$0xff]   ;;  %v17345_v16 = vld [vmem:[%s19313_s0 + $0x7e8] ss:$56 sps:$4 sm:$0xff]  }
 0x61a   : > { %v7952_v39 = vmax.f32 %v16830_v20, 0.0  ;;  %v17342_v20 = vld [vmem:[%s19313_s0 + $0x4d8] ss:$56 sps:$4 sm:$0xff]   ;;  %v17353_v62 = vld [vmem:[%s19313_s0 + $0x85c] ss:$56 sps:$4 sm:$0xff]  }
 0x61b   : > { %v20673_v29 = vpack.c.bf16 %v7951_v60, %v7951_v60  ;;  %v17350_v60 = vld [vmem:[%s19313_s0 + $0x54c] ss:$56 sps:$4 sm:$0xff]  }
 0x61c   : > { %v20670_v25 = vpack.c.bf16 %v7952_v39, %v7952_v39  ;;  %v17348_v39 = vld [vmem:[%s19313_s0 + $0x548] ss:$56 sps:$4 sm:$0xff]  }
 0x61e   : > { %13527 = vmatprep.mubr.bf16.mxu0 %v20670_v25 }
 0x61f   : > { %13528 = vmatmul.mubr.bf16.vlgmr.msra.gmra.mrb[20].mxu0 %v20673_v29 }
 0x620   : > { %13578 = vmatpush1.bf16.msra.mxu0 %v17276_v27  ;;  %13609 = vmatprep.mubr.bf16.mxu0 %v20502_v23  ;;  %v17351_v27 = vld [vmem:[%s19313_s0 + $0x858] ss:$56 sps:$4 sm:$0xff]  }
 0x621   : > { %13579 = vmatprep.subr.bf16.mxu0 %v17284_v7  ;;  %v17356_v7 = vld [vmem:[%s19313_s0 + $0x5bc] ss:$56 sps:$4 sm:$0xff]  }
 0x624   : > { %13580 = vmatpush1.bf16.msra.mxu0 %v17282_v30  ;;  %v17359_v30 = vld [vmem:[%s19313_s0 + $0x8cc] ss:$56 sps:$4 sm:$0xff]  }
 0x625   : > { %13581 = vmatprep.subr.bf16.mxu0 %v17290_v34  ;;  %v17354_v34 = vld [vmem:[%s19313_s0 + $0x5b8] ss:$56 sps:$4 sm:$0xff]  }
 0x628   : > { %13582 = vmatpush1.bf16.msra.mxu0 %v17288_v40  ;;  %v17357_v40 = vld [vmem:[%s19313_s0 + $0x8c8] ss:$56 sps:$4 sm:$0xff]  }
 0x629   : > { %13583 = vmatprep.subr.bf16.mxu0 %v17296_v61  ;;  %v17362_v61 = vld [vmem:[%s19313_s0 + $0x62c] ss:$56 sps:$4 sm:$0xff]  }
 0x62c   : > { %13584 = vmatpush1.bf16.msra.mxu0 %v17294_v14  ;;  %v17365_v14 = vld [vmem:[%s19313_s0 + $0x93c] ss:$56 sps:$4 sm:$0xff]  }
 0x62d   : > { %13585 = vmatprep.subr.bf16.mxu0 %v17302_v31  ;;  %v17360_v31 = vld [vmem:[%s19313_s0 + $0x628] ss:$56 sps:$4 sm:$0xff]  }
 0x630   : > { %13586 = vmatpush1.bf16.msra.mxu0 %v17300_v21  ;;  %v17363_v21 = vld [vmem:[%s19313_s0 + $0x938] ss:$56 sps:$4 sm:$0xff]  }
 0x631   : > { %13587 = vmatprep.subr.bf16.mxu0 %v17308_v4  ;;  %v17368_v4 = vld [vmem:[%s19313_s0 + $0x69c] ss:$56 sps:$4 sm:$0xff]  }
 0x634   : > { %13588 = vmatpush1.bf16.msra.mxu0 %v17306_v35 }
 0x635   : > { %13589 = vmatprep.subr.bf16.mxu0 %v17314_v36  ;;  %v17371_v36 = vld [vmem:[%s19313_s0 + $0x9ac] ss:$56 sps:$4 sm:$0xff]  }
 0x638   : > { %13590 = vmatpush1.bf16.msra.mxu0 %v17312_v37 }
 0x639   : > { %13591 = vmatprep.subr.bf16.mxu0 %v17320_v28 }
 0x63b   : > { %v7940_v10 = vpop.f32.mrb[16].mxu1 }
 0x63c   : > { %v16831_v6 = vadd.f32 %v7940_v10, %v4718_v1  ;;  %13592 = vmatpush1.bf16.msra.mxu0 %v17318_v42  ;;  %v7942_v56 = vpop.f32.mrb[17].mxu1  ;;  %v17366_v42 = vld [vmem:[%s19313_s0 + $0x698] ss:$56 sps:$4 sm:$0xff]   ;;  %v17377_v10 = vld [vmem:[%s19313_s0 + $0xa1c] ss:$56 sps:$4 sm:$0xff]  }
 0x63d   : > { %v16832_v46 = vadd.f32 %v7942_v56, %v4722_v54  ;;  %v7944_v47 = vpop.f32.mrb[18].mxu1  ;;  %13593 = vmatprep.subr.bf16.mxu0 %v17326_v44  ;;  %v17369_v54 = vld [vmem:[%s19313_s0 + $0x9a8] ss:$56 sps:$4 sm:$0xff]   ;;  %v17374_v44 = vld [vmem:[%s19313_s0 + $0xe0c] ss:$56 sps:$4 sm:$0xff]  }
 0x63e   : > { %v7953_v57 = vmax.f32 %v16831_v6, 0.0  ;;  %v7945_v48 = vpop.f32.mrb[19].mxu1  ;;  %v17372_v6 = vld [vmem:[%s19313_s0 + $0xe08] ss:$56 sps:$4 sm:$0xff]   ;;  %v17375_v56 = vld [vmem:[%s19313_s0 + $0xa18] ss:$56 sps:$4 sm:$0xff]  }
 0x63f   : > { %v7954_v0 = vmax.f32 %v16832_v46, 0.0  ;;  %v17383_v46 = vld [vmem:[%s19313_s0 + $0xa8c] ss:$56 sps:$4 sm:$0xff]   ;;  %v17378_v47 = vld [vmem:[%s19313_s0 + $0xe78] ss:$56 sps:$4 sm:$0xff]  }
 0x640   : > { %13594 = vmatpush1.bf16.msra.mxu0 %v17324_v17  ;;  %v20703_v2 = vpack.c.bf16 %v7953_v57, %v7953_v57  ;;  %v17380_v17 = vld [vmem:[%s19313_s0 + $0xe7c] ss:$56 sps:$4 sm:$0xff]   ;;  %v17386_v57 = vld [vmem:[%s19313_s0 + $0xeec] ss:$56 sps:$4 sm:$0xff]  }
 0x641   : > { %v20700_v63 = vpack.c.bf16 %v7954_v0, %v7954_v0  ;;  %13595 = vmatprep.subr.bf16.mxu0 %v17332_v51  ;;  %v17381_v51 = vld [vmem:[%s19313_s0 + $0xa88] ss:$56 sps:$4 sm:$0xff]   ;;  %v17389_v48 = vld [vmem:[%s19313_s0 + $0xafc] ss:$56 sps:$4 sm:$0xff]  }
 0x642   : > { %v17384_v0 = vld [vmem:[%s19313_s0 + $0xee8] ss:$56 sps:$4 sm:$0xff]  }
 0x643   : > { %13568 = vmatprep.mubr.bf16.mxu1 %v20700_v63 }
 0x644   : > { %13596 = vmatpush1.bf16.msra.mxu0 %v17330_v32  ;;  %13569 = vmatmul.mubr.bf16.vlgmr.msra.gmra.mrb[24].mxu1 %v20703_v2  ;;  %v17387_v32 = vld [vmem:[%s19313_s0 + $0xaf8] ss:$56 sps:$4 sm:$0xff]  }
 0x645   : > { %13619 = vmatpush1.bf16.msra.mxu1 %v17333_v49  ;;  %13650 = vmatprep.mubr.bf16.mxu1 %v20544_v33  ;;  %v17392_v49 = vld [vmem:[%s19313_s0 + $0xf5c] ss:$56 sps:$4 sm:$0xff]  }
 0x646   : > { %13597 = vmatprep.subr.bf16.mxu0 %v17338_v50  ;;  %13620 = vmatprep.subr.bf16.mxu1 %v17341_v3  ;;  %v17395_v50 = vld [vmem:[%s19313_s0 + $0xb6c] ss:$56 sps:$4 sm:$0xff]   ;;  %v17390_v3 = vld [vmem:[%s19313_s0 + $0xf58] ss:$56 sps:$4 sm:$0xff]  }
 0x648   : > { %13598 = vmatpush1.bf16.msra.mxu0 %v17336_v22  ;;  %v17393_v22 = vld [vmem:[%s19313_s0 + $0xb68] ss:$56 sps:$4 sm:$0xff]  }
 0x649   : > { %13621 = vmatpush1.bf16.msra.mxu1 %v17339_v9  ;;  %13599 = vmatprep.subr.bf16.mxu0 %v17344_v24  ;;  %v17398_v9 = vld [vmem:[%s19313_s0 + $0xfcc] ss:$56 sps:$4 sm:$0xff]   ;;  %v17401_v24 = vld [vmem:[%s19313_s0 + $0xbdc] ss:$56 sps:$4 sm:$0xff]  }
 0x64a   : > { %13622 = vmatprep.subr.bf16.mxu1 %v17347_v55  ;;  %v17396_v55 = vld [vmem:[%s19313_s0 + $0xfc8] ss:$56 sps:$4 sm:$0xff]  }
 0x64c   : > { %13600 = vmatpush1.bf16.msra.mxu0 %v17342_v20  ;;  %v17399_v20 = vld [vmem:[%s19313_s0 + $0xbd8] ss:$56 sps:$4 sm:$0xff]  }
 0x64d   : > { %13623 = vmatpush1.bf16.msra.mxu1 %v17345_v16  ;;  %13601 = vmatprep.subr.bf16.mxu0 %v17350_v60  ;;  %v17404_v16 = vld [vmem:[%s19313_s0 + $0x103c] ss:$56 sps:$4 sm:$0xff]   ;;  %v17407_v60 = vld [vmem:[%s19313_s0 + $0xc4c] ss:$56 sps:$4 sm:$0xff]  }
 0x64e   : > { %13624 = vmatprep.subr.bf16.mxu1 %v17353_v62  ;;  %v17402_v62 = vld [vmem:[%s19313_s0 + $0x1038] ss:$56 sps:$4 sm:$0xff]  }
 0x650   : > { %13602 = vmatpush1.bf16.msra.mxu0 %v17348_v39  ;;  %v17405_v39 = vld [vmem:[%s19313_s0 + $0xc48] ss:$56 sps:$4 sm:$0xff]  }
 0x651   : > { %13625 = vmatpush1.bf16.msra.mxu1 %v17351_v27  ;;  %13603 = vmatprep.subr.bf16.mxu0 %v17356_v7  ;;  %v17410_v27 = vld [vmem:[%s19313_s0 + $0x10ac] ss:$56 sps:$4 sm:$0xff]   ;;  %v17413_v7 = vld [vmem:[%s19313_s0 + $0xcbc] ss:$56 sps:$4 sm:$0xff]  }
 0x652   : > { %13626 = vmatprep.subr.bf16.mxu1 %v17359_v30  ;;  %v20765_v30 = vld [vmem:[%s19315_s13] sm:$0xff] }
 0x654   : > { %13604 = vmatpush1.bf16.msra.mxu0 %v17354_v34  ;;  %v17408_v34 = vld [vmem:[%s19313_s0 + $0x10a8] ss:$56 sps:$4 sm:$0xff]  }
 0x655   : > { %13627 = vmatpush1.bf16.msra.mxu1 %v17357_v40  ;;  %13605 = vmatprep.subr.bf16.mxu0 %v17362_v61  ;;  %v17411_v40 = vld [vmem:[%s19313_s0 + $0xcb8] ss:$56 sps:$4 sm:$0xff]   ;;  %v17416_v61 = vld [vmem:[%s19313_s0 + $0x111c] ss:$56 sps:$4 sm:$0xff]  }
 0x656   : > { %v20729_v35 = vpop.f32.mrb[16].mxu0  ;;  %13628 = vmatprep.subr.bf16.mxu1 %v17365_v14  ;;  %v8866_v14 = vrot.slane %v20765_v30, %v19415_v11 }
 0x657   : > { %v20732_v37 = vpop.f32.mrb[17].mxu0 }
 0x658   : > { %13606 = vmatpush1.bf16.msra.mxu0 %v17360_v31  ;;  %v13451_v28 = vpop.f32.mrb[18].mxu0  ;;  %v17419_v31 = vld [vmem:[%s19313_s0 + $0xd2c] ss:$56 sps:$4 sm:$0xff]  }
 0x659   : > { %13629 = vmatpush1.bf16.msra.mxu1 %v17363_v21  ;;  %v13452_v1 = vpop.f32.mrb[19].mxu0  ;;  %13607 = vmatprep.subr.bf16.mxu0 %v17368_v4  ;;  %v8870_v21 = vrot.slane %v20765_v30, %v19353_v58  ;;  %v17414_v4 = vld [vmem:[%s19313_s0 + $0x1118] ss:$56 sps:$4 sm:$0xff]   ;;  %v17422_v28 = vld [vmem:[%s19313_s0 + $0x118c] ss:$56 sps:$4 sm:$0xff]  }
 0x65a   : > { %13630 = vmatprep.subr.bf16.mxu1 %v17371_v36  ;;  %v17417_v36 = vld [vmem:[%s19313_s0 + $0xd28] ss:$56 sps:$4 sm:$0xff]   ;;  %v17425_v1 = vld [vmem:[%s19313_s0 + $0xd9c] ss:$56 sps:$4 sm:$0xff]  }
 0x65c   : > { %13608 = vmatpush1.bf16.msra.mxu0 %v17366_v42  ;;  %v13448_v42 = vadd.f32 %v20729_v35, %v8866_v14  ;;  %v17423_v35 = vld [vmem:[%s19313_s0 + $0xd98] ss:$56 sps:$4 sm:$0xff]  }
 0x65d   : > { %13631 = vmatpush1.bf16.msra.mxu1 %v17369_v54  ;;  %13659 = vmatprep.subr.bf16.mxu0 %v17374_v44  ;;  %v13450_v54 = vadd.f32 %v20732_v37, %v8870_v21  ;;  %v17431_v37 = vld [vmem:[%s19313_s0 + $0x150c] ss:$56 sps:$4 sm:$0xff]   ;;  %v17459_v14 = vld [vmem:[%s19313_s0 + $0x1738] ss:$56 sps:$4 sm:$0xff]  }
 0x65e   : > { %13632 = vmatprep.subr.bf16.mxu1 %v17377_v10  ;;  %v17467_v21 = vld [vmem:[%s19313_s0 + $0x17ac] ss:$56 sps:$4 sm:$0xff]  }
 0x65f   : > { %13610 = vmatmul.mubr.bf16.vlgmr.msra.gmra.mrb[24].mxu0 %v20576_v5 }
 0x660   : > { %13660 = vmatpush1.bf16.msra.mxu0 %v17372_v6  ;;  %13691 = vmatprep.mubr.bf16.mxu0 %v20670_v25 }
 0x661   : > { %13633 = vmatpush1.bf16.msra.mxu1 %v17375_v56  ;;  %13661 = vmatprep.subr.bf16.mxu0 %v17380_v17  ;;  %v17420_v56 = vld [vmem:[%s19313_s0 + $0x1188] ss:$56 sps:$4 sm:$0xff]  }
 0x662   : > { %13634 = vmatprep.subr.bf16.mxu1 %v17383_v46 }
 0x664   : > { %13662 = vmatpush1.bf16.msra.mxu0 %v17378_v47  ;;  %v17428_v47 = vld [vmem:[%s19313_s0 + $0x11fc] ss:$56 sps:$4 sm:$0xff]  }
 0x665   : > { %13635 = vmatpush1.bf16.msra.mxu1 %v17381_v51  ;;  %13663 = vmatprep.subr.bf16.mxu0 %v17386_v57  ;;  %v17426_v57 = vld [vmem:[%s19313_s0 + $0x11f8] ss:$56 sps:$4 sm:$0xff]  }
 0x666   : > { %13636 = vmatprep.subr.bf16.mxu1 %v17389_v48  ;;  %v17429_v48 = vld [vmem:[%s19313_s0 + $0x1508] ss:$56 sps:$4 sm:$0xff]  }
 0x668   : > { %13664 = vmatpush1.bf16.msra.mxu0 %v17384_v0  ;;  %v17434_v0 = vld [vmem:[%s19313_s0 + $0x126c] ss:$56 sps:$4 sm:$0xff]  }
 0x669   : > { %13637 = vmatpush1.bf16.msra.mxu1 %v17387_v32  ;;  %13665 = vmatprep.subr.bf16.mxu0 %v17392_v49  ;;  %v17437_v32 = vld [vmem:[%s19313_s0 + $0x157c] ss:$56 sps:$4 sm:$0xff]   ;;  %v17432_v49 = vld [vmem:[%s19313_s0 + $0x1268] ss:$56 sps:$4 sm:$0xff]  }
 0x66a   : > { %13638 = vmatprep.subr.bf16.mxu1 %v17395_v50  ;;  %v17435_v50 = vld [vmem:[%s19313_s0 + $0x1578] ss:$56 sps:$4 sm:$0xff]  }
 0x66c   : > { %13666 = vmatpush1.bf16.msra.mxu0 %v17390_v3  ;;  %v17440_v3 = vld [vmem:[%s19313_s0 + $0x12dc] ss:$56 sps:$4 sm:$0xff]  }
 0x66d   : > { %13639 = vmatpush1.bf16.msra.mxu1 %v17393_v22  ;;  %13667 = vmatprep.subr.bf16.mxu0 %v17398_v9  ;;  %v17443_v22 = vld [vmem:[%s19313_s0 + $0x15ec] ss:$56 sps:$4 sm:$0xff]   ;;  %v17438_v9 = vld [vmem:[%s19313_s0 + $0x12d8] ss:$56 sps:$4 sm:$0xff]  }
 0x66e   : > { %13640 = vmatprep.subr.bf16.mxu1 %v17401_v24  ;;  %v17441_v24 = vld [vmem:[%s19313_s0 + $0x15e8] ss:$56 sps:$4 sm:$0xff]  }
 0x670   : > { %13668 = vmatpush1.bf16.msra.mxu0 %v17396_v55  ;;  %v17446_v55 = vld [vmem:[%s19313_s0 + $0x134c] ss:$56 sps:$4 sm:$0xff]  }
 0x671   : > { %13641 = vmatpush1.bf16.msra.mxu1 %v17399_v20  ;;  %13669 = vmatprep.subr.bf16.mxu0 %v17404_v16  ;;  %v17449_v20 = vld [vmem:[%s19313_s0 + $0x165c] ss:$56 sps:$4 sm:$0xff]   ;;  %v17444_v16 = vld [vmem:[%s19313_s0 + $0x1348] ss:$56 sps:$4 sm:$0xff]  }
 0x672   : > { %13642 = vmatprep.subr.bf16.mxu1 %v17407_v60  ;;  %v17447_v60 = vld [vmem:[%s19313_s0 + $0x1658] ss:$56 sps:$4 sm:$0xff]  }
 0x674   : > { %13670 = vmatpush1.bf16.msra.mxu0 %v17402_v62  ;;  %v17452_v62 = vld [vmem:[%s19313_s0 + $0x13bc] ss:$56 sps:$4 sm:$0xff]  }
 0x675   : > { %13643 = vmatpush1.bf16.msra.mxu1 %v17405_v39  ;;  %13671 = vmatprep.subr.bf16.mxu0 %v17410_v27  ;;  %v17455_v39 = vld [vmem:[%s19313_s0 + $0x16cc] ss:$56 sps:$4 sm:$0xff]   ;;  %v17450_v27 = vld [vmem:[%s19313_s0 + $0x13b8] ss:$56 sps:$4 sm:$0xff]  }
 0x676   : > { %13644 = vmatprep.subr.bf16.mxu1 %v17413_v7  ;;  %v17453_v7 = vld [vmem:[%s19313_s0 + $0x16c8] ss:$56 sps:$4 sm:$0xff]  }
 0x678   : > { %13672 = vmatpush1.bf16.msra.mxu0 %v17408_v34  ;;  %v17458_v34 = vld [vmem:[%s19313_s0 + $0x142c] ss:$56 sps:$4 sm:$0xff]  }
 0x679   : > { %13645 = vmatpush1.bf16.msra.mxu1 %v17411_v40  ;;  %13673 = vmatprep.subr.bf16.mxu0 %v17416_v61  ;;  %v17461_v40 = vld [vmem:[%s19313_s0 + $0x173c] ss:$56 sps:$4 sm:$0xff]   ;;  %v17456_v61 = vld [vmem:[%s19313_s0 + $0x1428] ss:$56 sps:$4 sm:$0xff]  }
 0x67a   : > { %13646 = vmatprep.subr.bf16.mxu1 %v17419_v31  ;;  %v17464_v31 = vld [vmem:[%s19313_s0 + $0x149c] ss:$56 sps:$4 sm:$0xff]  }
 0x67b   : > { %v13488_v44 = vpop.f32.mrb[20].mxu1 }
 0x67c   : > { %v20781_v10 = vadd.f32 %v13488_v44, %v13448_v42  ;;  %13674 = vmatpush1.bf16.msra.mxu0 %v17414_v4  ;;  %v13490_v6 = vpop.f32.mrb[21].mxu1  ;;  %v17462_v4 = vld [vmem:[%s19313_s0 + $0x1498] ss:$56 sps:$4 sm:$0xff]   ;;  %v17473_v42 = vld [vmem:[%s19313_s0 + $0x181c] ss:$56 sps:$4 sm:$0xff]  }
 0x67d   : > { %v20784_v17 = vadd.f32 %v13490_v6, %v13450_v54  ;;  %13647 = vmatpush1.bf16.msra.mxu1 %v17417_v36  ;;  %v13492_v46 = vpop.f32.mrb[22].mxu1  ;;  %13675 = vmatprep.subr.bf16.mxu0 %v17422_v28  ;;  %v17465_v36 = vld [vmem:[%s19313_s0 + $0x17a8] ss:$56 sps:$4 sm:$0xff]   ;;  %v17470_v28 = vld [vmem:[%s19313_s0 + $0x14] ss:$56 sps:$4 sm:$0xff]  }
 0x67e   : > { %v13493_v51 = vpop.f32.mrb[23].mxu1  ;;  %13648 = vmatprep.subr.bf16.mxu1 %v17425_v1  ;;  %v17468_v1 = vld [vmem:[%s19313_s0 + $0x10] ss:$56 sps:$4 sm:$0xff]   ;;  %v17476_v44 = vld [vmem:[%s19313_s0 + $0x84] ss:$56 sps:$4 sm:$0xff]  }
 0x67f   : > { %v17471_v54 = vld [vmem:[%s19313_s0 + $0x1818] ss:$56 sps:$4 sm:$0xff]   ;;  %v17479_v6 = vld [vmem:[%s19313_s0 + $0x188c] ss:$56 sps:$4 sm:$0xff]   ;;  %v17477_v46 = vld [vmem:[%s19313_s0 + $0x1888] ss:$56 sps:$4 sm:$0xff]  }
 0x680   : > { %13676 = vmatpush1.bf16.msra.mxu0 %v17420_v56  ;;  %v17474_v56 = vld [vmem:[%s19313_s0 + $0x80] ss:$56 sps:$4 sm:$0xff]   ;;  %v17480_v51 = vld [vmem:[%s19313_s0 + $0xf0] ss:$56 sps:$4 sm:$0xff]  }
 0x681   : > { %13649 = vmatpush1.bf16.msra.mxu1 %v17423_v35  ;;  %13677 = vmatprep.subr.bf16.mxu0 %v17428_v47  ;;  %v17482_v35 = vld [vmem:[%s19313_s0 + $0xf4] ss:$56 sps:$4 sm:$0xff]  }
 0x682   : > { %13700 = vmatprep.subr.bf16.mxu1 %v17431_v37  ;;  %v17485_v47 = vld [vmem:[%s19313_s0 + $0x18fc] ss:$56 sps:$4 sm:$0xff]   ;;  %v17483_v37 = vld [vmem:[%s19313_s0 + $0x18f8] ss:$56 sps:$4 sm:$0xff]  }
 0x684   : > { %13651 = vmatmul.mubr.bf16.vlgmr.msra.gmra.mrb[28].mxu1 %v20620_v53  ;;  %13678 = vmatpush1.bf16.msra.mxu0 %v17426_v57  ;;  %v17488_v57 = vld [vmem:[%s19313_s0 + $0x164] ss:$56 sps:$4 sm:$0xff]  }
 0x685   : > { %13701 = vmatpush1.bf16.msra.mxu1 %v17429_v48  ;;  %13732 = vmatprep.mubr.bf16.mxu1 %v20700_v63  ;;  %v17491_v48 = vld [vmem:[%s19313_s0 + $0x196c] ss:$56 sps:$4 sm:$0xff]  }
 0x686   : > { %13679 = vmatprep.subr.bf16.mxu0 %v17434_v0  ;;  %13702 = vmatprep.subr.bf16.mxu1 %v17437_v32  ;;  %v17486_v0 = vld [vmem:[%s19313_s0 + $0x160] ss:$56 sps:$4 sm:$0xff]  }
 0x687   : > { %v17489_v32 = vld [vmem:[%s19313_s0 + $0x1968] ss:$56 sps:$4 sm:$0xff]  }
 0x688   : > { %13680 = vmatpush1.bf16.msra.mxu0 %v17432_v49  ;;  %v17494_v49 = vld [vmem:[%s19313_s0 + $0x1d4] ss:$56 sps:$4 sm:$0xff]  }
 0x689   : > { %13703 = vmatpush1.bf16.msra.mxu1 %v17435_v50  ;;  %13681 = vmatprep.subr.bf16.mxu0 %v17440_v3  ;;  %v17497_v50 = vld [vmem:[%s19313_s0 + $0x19dc] ss:$56 sps:$4 sm:$0xff]   ;;  %v17492_v3 = vld [vmem:[%s19313_s0 + $0x1d0] ss:$56 sps:$4 sm:$0xff]  }
 0x68a   : > { %13704 = vmatprep.subr.bf16.mxu1 %v17443_v22  ;;  %v17495_v22 = vld [vmem:[%s19313_s0 + $0x19d8] ss:$56 sps:$4 sm:$0xff]  }
 0x68c   : > { %13682 = vmatpush1.bf16.msra.mxu0 %v17438_v9  ;;  %v17500_v9 = vld [vmem:[%s19313_s0 + $0x244] ss:$56 sps:$4 sm:$0xff]  }
 0x68d   : > { %13705 = vmatpush1.bf16.msra.mxu1 %v17441_v24  ;;  %13683 = vmatprep.subr.bf16.mxu0 %v17446_v55  ;;  %v17503_v24 = vld [vmem:[%s19313_s0 + $0x1a4c] ss:$56 sps:$4 sm:$0xff]   ;;  %v17498_v55 = vld [vmem:[%s19313_s0 + $0x240] ss:$56 sps:$4 sm:$0xff]  }
 0x68e   : > { %13706 = vmatprep.subr.bf16.mxu1 %v17449_v20  ;;  %v17501_v20 = vld [vmem:[%s19313_s0 + $0x1a48] ss:$56 sps:$4 sm:$0xff]  }
 0x690   : > { %13684 = vmatpush1.bf16.msra.mxu0 %v17444_v16  ;;  %v17506_v16 = vld [vmem:[%s19313_s0 + $0x2b4] ss:$56 sps:$4 sm:$0xff]  }
 0x691   : > { %13707 = vmatpush1.bf16.msra.mxu1 %v17447_v60  ;;  %13685 = vmatprep.subr.bf16.mxu0 %v17452_v62  ;;  %v17509_v60 = vld [vmem:[%s19313_s0 + $0x1abc] ss:$56 sps:$4 sm:$0xff]   ;;  %v17504_v62 = vld [vmem:[%s19313_s0 + $0x2b0] ss:$56 sps:$4 sm:$0xff]  }
 0x692   : > { %13708 = vmatprep.subr.bf16.mxu1 %v17455_v39  ;;  %v17507_v39 = vld [vmem:[%s19313_s0 + $0x1ab8] ss:$56 sps:$4 sm:$0xff]  }
 0x694   : > { %13686 = vmatpush1.bf16.msra.mxu0 %v17450_v27  ;;  %v17512_v27 = vld [vmem:[%s19313_s0 + $0x324] ss:$56 sps:$4 sm:$0xff]  }
 0x695   : > { %13709 = vmatpush1.bf16.msra.mxu1 %v17453_v7  ;;  %13687 = vmatprep.subr.bf16.mxu0 %v17458_v34  ;;  %v17515_v7 = vld [vmem:[%s19313_s0 + $0x1b2c] ss:$56 sps:$4 sm:$0xff]   ;;  %v17510_v34 = vld [vmem:[%s19313_s0 + $0x320] ss:$56 sps:$4 sm:$0xff]  }
 0x696   : > { %13710 = vmatprep.subr.bf16.mxu1 %v17461_v40  ;;  %v17513_v40 = vld [vmem:[%s19313_s0 + $0x1b28] ss:$56 sps:$4 sm:$0xff]  }
 0x698   : > { %13688 = vmatpush1.bf16.msra.mxu0 %v17456_v61  ;;  %v17518_v61 = vld [vmem:[%s19313_s0 + $0x394] ss:$56 sps:$4 sm:$0xff]  }
 0x699   : > { %13711 = vmatpush1.bf16.msra.mxu1 %v17459_v14  ;;  %13689 = vmatprep.subr.bf16.mxu0 %v17464_v31  ;;  %v17521_v14 = vld [vmem:[%s19313_s0 + $0x1b9c] ss:$56 sps:$4 sm:$0xff]   ;;  %v17516_v31 = vld [vmem:[%s19313_s0 + $0x390] ss:$56 sps:$4 sm:$0xff]  }
 0x69a   : > { %13712 = vmatprep.subr.bf16.mxu1 %v17467_v21  ;;  %v17519_v21 = vld [vmem:[%s19313_s0 + $0x1b98] ss:$56 sps:$4 sm:$0xff]  }
 0x69c   : > { %13690 = vmatpush1.bf16.msra.mxu0 %v17462_v4  ;;  %v17524_v4 = vld [vmem:[%s19313_s0 + $0x404] ss:$56 sps:$4 sm:$0xff]  }
 0x69d   : > { %13713 = vmatpush1.bf16.msra.mxu1 %v17465_v36  ;;  %13741 = vmatprep.subr.bf16.mxu0 %v17470_v28  ;;  %v17527_v36 = vld [vmem:[%s19313_s0 + $0x714] ss:$56 sps:$4 sm:$0xff]   ;;  %v17522_v28 = vld [vmem:[%s19313_s0 + $0x400] ss:$56 sps:$4 sm:$0xff]  }
 0x69e   : > { %13714 = vmatprep.subr.bf16.mxu1 %v17473_v42  ;;  %v17525_v42 = vld [vmem:[%s19313_s0 + $0x710] ss:$56 sps:$4 sm:$0xff]  }
 0x69f   : > { %13692 = vmatmul.mubr.bf16.vlgmr.msra.gmra.mrb[28].mxu0 %v20673_v29 }
 0x6a0   : > { %13742 = vmatpush1.bf16.msra.mxu0 %v17468_v1  ;;  %13773 = vmatprep.mubr.bf16.mxu0 %v20502_v23  ;;  %v17530_v1 = vld [vmem:[%s19313_s0 + $0x474] ss:$56 sps:$4 sm:$0xff]  }
 0x6a1   : > { %13715 = vmatpush1.bf16.msra.mxu1 %v17471_v54  ;;  %13743 = vmatprep.subr.bf16.mxu0 %v17476_v44  ;;  %v17533_v54 = vld [vmem:[%s19313_s0 + $0x784] ss:$56 sps:$4 sm:$0xff]   ;;  %v17528_v44 = vld [vmem:[%s19313_s0 + $0x470] ss:$56 sps:$4 sm:$0xff]  }
 0x6a2   : > { %13716 = vmatprep.subr.bf16.mxu1 %v17479_v6  ;;  %v17531_v6 = vld [vmem:[%s19313_s0 + $0x780] ss:$56 sps:$4 sm:$0xff]  }
 0x6a4   : > { %13744 = vmatpush1.bf16.msra.mxu0 %v17474_v56  ;;  %v17536_v56 = vld [vmem:[%s19313_s0 + $0x4e4] ss:$56 sps:$4 sm:$0xff]  }
 0x6a5   : > { %13717 = vmatpush1.bf16.msra.mxu1 %v17477_v46  ;;  %13745 = vmatprep.subr.bf16.mxu0 %v17482_v35  ;;  %v17539_v46 = vld [vmem:[%s19313_s0 + $0x7f4] ss:$56 sps:$4 sm:$0xff]   ;;  %v17534_v35 = vld [vmem:[%s19313_s0 + $0x4e0] ss:$56 sps:$4 sm:$0xff]  }
 0x6a6   : > { %13718 = vmatprep.subr.bf16.mxu1 %v17485_v47  ;;  %v17537_v47 = vld [vmem:[%s19313_s0 + $0x7f0] ss:$56 sps:$4 sm:$0xff]  }
 0x6a8   : > { %13746 = vmatpush1.bf16.msra.mxu0 %v17480_v51  ;;  %v17542_v51 = vld [vmem:[%s19313_s0 + $0x554] ss:$56 sps:$4 sm:$0xff]  }
 0x6a9   : > { %13719 = vmatpush1.bf16.msra.mxu1 %v17483_v37  ;;  %13747 = vmatprep.subr.bf16.mxu0 %v17488_v57  ;;  %v17545_v37 = vld [vmem:[%s19313_s0 + $0x864] ss:$56 sps:$4 sm:$0xff]   ;;  %v17540_v57 = vld [vmem:[%s19313_s0 + $0x550] ss:$56 sps:$4 sm:$0xff]  }
 0x6aa   : > { %13720 = vmatprep.subr.bf16.mxu1 %v17491_v48  ;;  %v17543_v48 = vld [vmem:[%s19313_s0 + $0x860] ss:$56 sps:$4 sm:$0xff]  }
 0x6ac   : > { %13748 = vmatpush1.bf16.msra.mxu0 %v17486_v0  ;;  %v17548_v0 = vld [vmem:[%s19313_s0 + $0x5c4] ss:$56 sps:$4 sm:$0xff]  }
 0x6ad   : > { %13721 = vmatpush1.bf16.msra.mxu1 %v17489_v32  ;;  %13749 = vmatprep.subr.bf16.mxu0 %v17494_v49  ;;  %v17551_v32 = vld [vmem:[%s19313_s0 + $0x8d4] ss:$56 sps:$4 sm:$0xff]   ;;  %v17546_v49 = vld [vmem:[%s19313_s0 + $0x5c0] ss:$56 sps:$4 sm:$0xff]  }
 0x6ae   : > { %13722 = vmatprep.subr.bf16.mxu1 %v17497_v50  ;;  %v17549_v50 = vld [vmem:[%s19313_s0 + $0x8d0] ss:$56 sps:$4 sm:$0xff]  }
 0x6b0   : > { %13750 = vmatpush1.bf16.msra.mxu0 %v17492_v3  ;;  %v17554_v3 = vld [vmem:[%s19313_s0 + $0x634] ss:$56 sps:$4 sm:$0xff]  }
 0x6b1   : > { %13723 = vmatpush1.bf16.msra.mxu1 %v17495_v22  ;;  %13751 = vmatprep.subr.bf16.mxu0 %v17500_v9  ;;  %v17557_v22 = vld [vmem:[%s19313_s0 + $0x944] ss:$56 sps:$4 sm:$0xff]   ;;  %v17552_v9 = vld [vmem:[%s19313_s0 + $0x630] ss:$56 sps:$4 sm:$0xff]  }
 0x6b2   : > { %13724 = vmatprep.subr.bf16.mxu1 %v17503_v24  ;;  %v17555_v24 = vld [vmem:[%s19313_s0 + $0x940] ss:$56 sps:$4 sm:$0xff]  }
 0x6b4   : > { %13752 = vmatpush1.bf16.msra.mxu0 %v17498_v55  ;;  %v17560_v55 = vld [vmem:[%s19313_s0 + $0x6a4] ss:$56 sps:$4 sm:$0xff]  }
 0x6b5   : > { %13725 = vmatpush1.bf16.msra.mxu1 %v17501_v20  ;;  %13753 = vmatprep.subr.bf16.mxu0 %v17506_v16  ;;  %v17563_v20 = vld [vmem:[%s19313_s0 + $0x9b4] ss:$56 sps:$4 sm:$0xff]   ;;  %v17558_v16 = vld [vmem:[%s19313_s0 + $0x6a0] ss:$56 sps:$4 sm:$0xff]  }
 0x6b6   : > { %13726 = vmatprep.subr.bf16.mxu1 %v17509_v60  ;;  %v17561_v60 = vld [vmem:[%s19313_s0 + $0x9b0] ss:$56 sps:$4 sm:$0xff]  }
 0x6b8   : > { %13754 = vmatpush1.bf16.msra.mxu0 %v17504_v62  ;;  %v17566_v62 = vld [vmem:[%s19313_s0 + $0xe14] ss:$56 sps:$4 sm:$0xff]  }
 0x6b9   : > { %13727 = vmatpush1.bf16.msra.mxu1 %v17507_v39  ;;  %13755 = vmatprep.subr.bf16.mxu0 %v17512_v27  ;;  %v17569_v39 = vld [vmem:[%s19313_s0 + $0xa24] ss:$56 sps:$4 sm:$0xff]   ;;  %v17564_v27 = vld [vmem:[%s19313_s0 + $0xe10] ss:$56 sps:$4 sm:$0xff]  }
 0x6ba   : > { %13728 = vmatprep.subr.bf16.mxu1 %v17515_v7  ;;  %v17567_v7 = vld [vmem:[%s19313_s0 + $0xa20] ss:$56 sps:$4 sm:$0xff]  }
 0x6bc   : > { %13756 = vmatpush1.bf16.msra.mxu0 %v17510_v34  ;;  %v17572_v34 = vld [vmem:[%s19313_s0 + $0xe84] ss:$56 sps:$4 sm:$0xff]  }
 0x6bd   : > { %13729 = vmatpush1.bf16.msra.mxu1 %v17513_v40  ;;  %13757 = vmatprep.subr.bf16.mxu0 %v17518_v61  ;;  %v17575_v40 = vld [vmem:[%s19313_s0 + $0xa94] ss:$56 sps:$4 sm:$0xff]   ;;  %v17570_v61 = vld [vmem:[%s19313_s0 + $0xe80] ss:$56 sps:$4 sm:$0xff]  }
 0x6be   : > { %13730 = vmatprep.subr.bf16.mxu1 %v17521_v14  ;;  %v17573_v14 = vld [vmem:[%s19313_s0 + $0xa90] ss:$56 sps:$4 sm:$0xff]  }
 0x6c0   : > { %13758 = vmatpush1.bf16.msra.mxu0 %v17516_v31  ;;  %v17578_v31 = vld [vmem:[%s19313_s0 + $0xef4] ss:$56 sps:$4 sm:$0xff]  }
 0x6c1   : > { %13731 = vmatpush1.bf16.msra.mxu1 %v17519_v21  ;;  %13759 = vmatprep.subr.bf16.mxu0 %v17524_v4  ;;  %v17581_v21 = vld [vmem:[%s19313_s0 + $0xb04] ss:$56 sps:$4 sm:$0xff]   ;;  %v17576_v4 = vld [vmem:[%s19313_s0 + $0xef0] ss:$56 sps:$4 sm:$0xff]  }
 0x6c2   : > { %13782 = vmatprep.subr.bf16.mxu1 %v17527_v36  ;;  %v17579_v36 = vld [vmem:[%s19313_s0 + $0xb00] ss:$56 sps:$4 sm:$0xff]  }
 0x6c4   : > { %13733 = vmatmul.mubr.bf16.vlgmr.msra.gmra.mrb[32].mxu1 %v20703_v2  ;;  %13760 = vmatpush1.bf16.msra.mxu0 %v17522_v28  ;;  %v17584_v28 = vld [vmem:[%s19313_s0 + $0xf64] ss:$56 sps:$4 sm:$0xff]  }
 0x6c5   : > { %13783 = vmatpush1.bf16.msra.mxu1 %v17525_v42  ;;  %13814 = vmatprep.mubr.bf16.mxu1 %v20544_v33  ;;  %v17587_v42 = vld [vmem:[%s19313_s0 + $0xb74] ss:$56 sps:$4 sm:$0xff]  }
 0x6c6   : > { %13761 = vmatprep.subr.bf16.mxu0 %v17530_v1  ;;  %13784 = vmatprep.subr.bf16.mxu1 %v17533_v54  ;;  %v17582_v1 = vld [vmem:[%s19313_s0 + $0xf60] ss:$56 sps:$4 sm:$0xff]   ;;  %v17585_v54 = vld [vmem:[%s19313_s0 + $0xb70] ss:$56 sps:$4 sm:$0xff]  }
 0x6c8   : > { %13762 = vmatpush1.bf16.msra.mxu0 %v17528_v44  ;;  %v17590_v44 = vld [vmem:[%s19313_s0 + $0xfd4] ss:$56 sps:$4 sm:$0xff]  }
 0x6c9   : > { %13785 = vmatpush1.bf16.msra.mxu1 %v17531_v6  ;;  %13763 = vmatprep.subr.bf16.mxu0 %v17536_v56  ;;  %v17593_v6 = vld [vmem:[%s19313_s0 + $0xbe4] ss:$56 sps:$4 sm:$0xff]   ;;  %v17588_v56 = vld [vmem:[%s19313_s0 + $0xfd0] ss:$56 sps:$4 sm:$0xff]  }
 0x6ca   : > { %13786 = vmatprep.subr.bf16.mxu1 %v17539_v46  ;;  %v17591_v46 = vld [vmem:[%s19313_s0 + $0xbe0] ss:$56 sps:$4 sm:$0xff]  }
 0x6cc   : > { %13764 = vmatpush1.bf16.msra.mxu0 %v17534_v35  ;;  %v17596_v35 = vld [vmem:[%s19313_s0 + $0x1044] ss:$56 sps:$4 sm:$0xff]  }
 0x6cd   : > { %13787 = vmatpush1.bf16.msra.mxu1 %v17537_v47  ;;  %13765 = vmatprep.subr.bf16.mxu0 %v17542_v51  ;;  %v17599_v47 = vld [vmem:[%s19313_s0 + $0xc54] ss:$56 sps:$4 sm:$0xff]   ;;  %v17594_v51 = vld [vmem:[%s19313_s0 + $0x1040] ss:$56 sps:$4 sm:$0xff]  }
 0x6ce   : > { %13788 = vmatprep.subr.bf16.mxu1 %v17545_v37  ;;  %v17597_v37 = vld [vmem:[%s19313_s0 + $0xc50] ss:$56 sps:$4 sm:$0xff]  }
 0x6d0   : > { %13766 = vmatpush1.bf16.msra.mxu0 %v17540_v57  ;;  %v17602_v57 = vld [vmem:[%s19313_s0 + $0x10b4] ss:$56 sps:$4 sm:$0xff]  }
 0x6d1   : > { %13789 = vmatpush1.bf16.msra.mxu1 %v17543_v48  ;;  %13767 = vmatprep.subr.bf16.mxu0 %v17548_v0  ;;  %v17605_v0 = vld [vmem:[%s19313_s0 + $0xcc4] ss:$56 sps:$4 sm:$0xff]  }
 0x6d2   : > { %13790 = vmatprep.subr.bf16.mxu1 %v17551_v32 }
 0x6d4   : > { %13768 = vmatpush1.bf16.msra.mxu0 %v17546_v49 }
 0x6d5   : > { %13791 = vmatpush1.bf16.msra.mxu1 %v17549_v50  ;;  %13769 = vmatprep.subr.bf16.mxu0 %v17554_v3 }
 0x6d6   : > { %13792 = vmatprep.subr.bf16.mxu1 %v17557_v22  ;;  %v17600_v22 = vld [vmem:[%s19313_s0 + $0x10b0] ss:$56 sps:$4 sm:$0xff]  }
 0x6d8   : > { %13770 = vmatpush1.bf16.msra.mxu0 %v17552_v9 }
 0x6d9   : > { %13793 = vmatpush1.bf16.msra.mxu1 %v17555_v24  ;;  %13771 = vmatprep.subr.bf16.mxu0 %v17560_v55  ;;  %v17603_v24 = vld [vmem:[%s19313_s0 + $0xcc0] ss:$56 sps:$4 sm:$0xff]   ;;  %v17608_v55 = vld [vmem:[%s19313_s0 + $0x1124] ss:$56 sps:$4 sm:$0xff]  }
 0x6da   : > { %13794 = vmatprep.subr.bf16.mxu1 %v17563_v20  ;;  %v17606_v20 = vld [vmem:[%s19313_s0 + $0x1120] ss:$56 sps:$4 sm:$0xff]  }
 0x6dc   : > { %13772 = vmatpush1.bf16.msra.mxu0 %v17558_v16  ;;  %v17614_v16 = vld [vmem:[%s19313_s0 + $0x1194] ss:$56 sps:$4 sm:$0xff]  }
 0x6dd   : > { %13795 = vmatpush1.bf16.msra.mxu1 %v17561_v60  ;;  %13823 = vmatprep.subr.bf16.mxu0 %v17566_v62  ;;  %v17617_v60 = vld [vmem:[%s19313_s0 + $0xda4] ss:$56 sps:$4 sm:$0xff]   ;;  %v17612_v62 = vld [vmem:[%s19313_s0 + $0x1190] ss:$56 sps:$4 sm:$0xff]  }
 0x6de   : > { %13796 = vmatprep.subr.bf16.mxu1 %v17569_v39  ;;  %v17615_v39 = vld [vmem:[%s19313_s0 + $0xda0] ss:$56 sps:$4 sm:$0xff]  }
 0x6df   : > { %13774 = vmatmul.mubr.bf16.vlgmr.msra.gmra.mrb[32].mxu0 %v20576_v5 }
 0x6e0   : > { %13824 = vmatpush1.bf16.msra.mxu0 %v17564_v27  ;;  %13855 = vmatprep.mubr.bf16.mxu0 %v20670_v25  ;;  %v17620_v27 = vld [vmem:[%s19313_s0 + $0x1204] ss:$56 sps:$4 sm:$0xff]  }
 0x6e1   : > { %13797 = vmatpush1.bf16.msra.mxu1 %v17567_v7  ;;  %13825 = vmatprep.subr.bf16.mxu0 %v17572_v34  ;;  %v17623_v7 = vld [vmem:[%s19313_s0 + $0x1514] ss:$56 sps:$4 sm:$0xff]   ;;  %v17618_v34 = vld [vmem:[%s19313_s0 + $0x1200] ss:$56 sps:$4 sm:$0xff]  }
 0x6e2   : > { %13798 = vmatprep.subr.bf16.mxu1 %v17575_v40  ;;  %v17621_v40 = vld [vmem:[%s19313_s0 + $0x1510] ss:$56 sps:$4 sm:$0xff]  }
 0x6e4   : > { %13826 = vmatpush1.bf16.msra.mxu0 %v17570_v61  ;;  %v17626_v61 = vld [vmem:[%s19313_s0 + $0x1274] ss:$56 sps:$4 sm:$0xff]  }
 0x6e5   : > { %13799 = vmatpush1.bf16.msra.mxu1 %v17573_v14  ;;  %13827 = vmatprep.subr.bf16.mxu0 %v17578_v31  ;;  %v17629_v14 = vld [vmem:[%s19313_s0 + $0x1584] ss:$56 sps:$4 sm:$0xff]   ;;  %v17624_v31 = vld [vmem:[%s19313_s0 + $0x1270] ss:$56 sps:$4 sm:$0xff]  }
 0x6e6   : > { %13800 = vmatprep.subr.bf16.mxu1 %v17581_v21  ;;  %v17627_v21 = vld [vmem:[%s19313_s0 + $0x1580] ss:$56 sps:$4 sm:$0xff]  }
 0x6e8   : > { %13828 = vmatpush1.bf16.msra.mxu0 %v17576_v4  ;;  %v17632_v4 = vld [vmem:[%s19313_s0 + $0x12e4] ss:$56 sps:$4 sm:$0xff]  }
 0x6e9   : > { %13801 = vmatpush1.bf16.msra.mxu1 %v17579_v36  ;;  %13829 = vmatprep.subr.bf16.mxu0 %v17584_v28  ;;  %v17635_v36 = vld [vmem:[%s19313_s0 + $0x15f4] ss:$56 sps:$4 sm:$0xff]   ;;  %v17630_v28 = vld [vmem:[%s19313_s0 + $0x12e0] ss:$56 sps:$4 sm:$0xff]  }
 0x6ea   : > { %13802 = vmatprep.subr.bf16.mxu1 %v17587_v42  ;;  %v17633_v42 = vld [vmem:[%s19313_s0 + $0x15f0] ss:$56 sps:$4 sm:$0xff]  }
 0x6ec   : > { %13830 = vmatpush1.bf16.msra.mxu0 %v17582_v1  ;;  %v17638_v1 = vld [vmem:[%s19313_s0 + $0x1354] ss:$56 sps:$4 sm:$0xff]  }
 0x6ed   : > { %13803 = vmatpush1.bf16.msra.mxu1 %v17585_v54  ;;  %13831 = vmatprep.subr.bf16.mxu0 %v17590_v44  ;;  %v17641_v54 = vld [vmem:[%s19313_s0 + $0x1664] ss:$56 sps:$4 sm:$0xff]   ;;  %v17636_v44 = vld [vmem:[%s19313_s0 + $0x1350] ss:$56 sps:$4 sm:$0xff]  }
 0x6ee   : > { %13804 = vmatprep.subr.bf16.mxu1 %v17593_v6  ;;  %v17639_v6 = vld [vmem:[%s19313_s0 + $0x1660] ss:$56 sps:$4 sm:$0xff]  }
 0x6f0   : > { %13832 = vmatpush1.bf16.msra.mxu0 %v17588_v56  ;;  %v17644_v56 = vld [vmem:[%s19313_s0 + $0x13c4] ss:$56 sps:$4 sm:$0xff]  }
 0x6f1   : > { %13805 = vmatpush1.bf16.msra.mxu1 %v17591_v46  ;;  %13833 = vmatprep.subr.bf16.mxu0 %v17596_v35  ;;  %v17647_v46 = vld [vmem:[%s19313_s0 + $0x16d4] ss:$56 sps:$4 sm:$0xff]   ;;  %v17642_v35 = vld [vmem:[%s19313_s0 + $0x13c0] ss:$56 sps:$4 sm:$0xff]  }
 0x6f2   : > { %v13529_v48 = vpop.f32.mrb[20].mxu0  ;;  %13806 = vmatprep.subr.bf16.mxu1 %v17599_v47  ;;  %v17645_v47 = vld [vmem:[%s19313_s0 + $0x16d0] ss:$56 sps:$4 sm:$0xff]  }
 0x6f3   : > { %v20914_v32 = vadd.f32 %v13529_v48, %v20781_v10  ;;  %v13531_v49 = vpop.f32.mrb[21].mxu0  ;;  %v17611_v10 = vld [vmem:[%s19313_s0 + $0xd34] ss:$56 sps:$4 sm:$0xff]   ;;  %v17651_v48 = vld [vmem:[%s19313_s0 + $0x1740] ss:$56 sps:$4 sm:$0xff]  }
 0x6f4   : > { %v20917_v50 = vadd.f32 %v13531_v49, %v20784_v17  ;;  %13834 = vmatpush1.bf16.msra.mxu0 %v17594_v51  ;;  %v13533_v3 = vpop.f32.mrb[22].mxu0  ;;  %v17609_v17 = vld [vmem:[%s19313_s0 + $0xd30] ss:$56 sps:$4 sm:$0xff]   ;;  %v17650_v51 = vld [vmem:[%s19313_s0 + $0x1434] ss:$56 sps:$4 sm:$0xff]  }
 0x6f5   : > { %13807 = vmatpush1.bf16.msra.mxu1 %v17597_v37  ;;  %v13534_v9 = vpop.f32.mrb[23].mxu0  ;;  %13835 = vmatprep.subr.bf16.mxu0 %v17602_v57  ;;  %v17653_v37 = vld [vmem:[%s19313_s0 + $0x1744] ss:$56 sps:$4 sm:$0xff]   ;;  %v17648_v57 = vld [vmem:[%s19313_s0 + $0x1430] ss:$56 sps:$4 sm:$0xff]  }
 0x6f6   : > { %13808 = vmatprep.subr.bf16.mxu1 %v17605_v0  ;;  %v17656_v0 = vld [vmem:[%s19313_s0 + $0x14a4] ss:$56 sps:$4 sm:$0xff]   ;;  %v17659_v49 = vld [vmem:[%s19313_s0 + $0x17b4] ss:$56 sps:$4 sm:$0xff]  }
 0x6f8   : > { %13836 = vmatpush1.bf16.msra.mxu0 %v17600_v22 }
 0x6f9   : > { %13809 = vmatpush1.bf16.msra.mxu1 %v17603_v24  ;;  %13837 = vmatprep.subr.bf16.mxu0 %v17608_v55  ;;  %v17654_v24 = vld [vmem:[%s19313_s0 + $0x14a0] ss:$56 sps:$4 sm:$0xff]  }
 0x6fa   : > { %13810 = vmatprep.subr.bf16.mxu1 %v17611_v10 }
 0x6fc   : > { %13838 = vmatpush1.bf16.msra.mxu0 %v17606_v20  ;;  %v17657_v20 = vld [vmem:[%s19313_s0 + $0x17b0] ss:$56 sps:$4 sm:$0xff]  }
 0x6fd   : > { %13811 = vmatpush1.bf16.msra.mxu1 %v17609_v17  ;;  %13839 = vmatprep.subr.bf16.mxu0 %v17614_v16  ;;  %v17662_v17 = vld [vmem:[%s19313_s0 + $0x1c] ss:$56 sps:$4 sm:$0xff]  }
 0x6fe   : > { %13812 = vmatprep.subr.bf16.mxu1 %v17617_v60  ;;  %v17660_v60 = vld [vmem:[%s19313_s0 + $0x18] ss:$56 sps:$4 sm:$0xff]  }
 0x700   : > { %13840 = vmatpush1.bf16.msra.mxu0 %v17612_v62  ;;  %v17668_v62 = vld [vmem:[%s19313_s0 + $0x8c] ss:$56 sps:$4 sm:$0xff]  }
 0x701   : > { %13813 = vmatpush1.bf16.msra.mxu1 %v17615_v39  ;;  %13841 = vmatprep.subr.bf16.mxu0 %v17620_v27  ;;  %v17671_v39 = vld [vmem:[%s19313_s0 + $0x1894] ss:$56 sps:$4 sm:$0xff]   ;;  %v17666_v27 = vld [vmem:[%s19313_s0 + $0x88] ss:$56 sps:$4 sm:$0xff]  }
 0x702   : > { %13864 = vmatprep.subr.bf16.mxu1 %v17623_v7  ;;  %v17669_v7 = vld [vmem:[%s19313_s0 + $0x1890] ss:$56 sps:$4 sm:$0xff]  }
 0x704   : > { %13815 = vmatmul.mubr.bf16.vlgmr.msra.gmra.mrb[36].mxu1 %v20620_v53  ;;  %13842 = vmatpush1.bf16.msra.mxu0 %v17618_v34  ;;  %v17674_v34 = vld [vmem:[%s19313_s0 + $0xfc] ss:$56 sps:$4 sm:$0xff]  }
 0x705   : > { %13865 = vmatpush1.bf16.msra.mxu1 %v17621_v40  ;;  %13896 = vmatprep.mubr.bf16.mxu1 %v20700_v63  ;;  %v17677_v40 = vld [vmem:[%s19313_s0 + $0x1904] ss:$56 sps:$4 sm:$0xff]  }
 0x706   : > { %13843 = vmatprep.subr.bf16.mxu0 %v17626_v61  ;;  %13866 = vmatprep.subr.bf16.mxu1 %v17629_v14  ;;  %v17672_v61 = vld [vmem:[%s19313_s0 + $0xf8] ss:$56 sps:$4 sm:$0xff]  }
 0x707   : > { %v17675_v14 = vld [vmem:[%s19313_s0 + $0x1900] ss:$56 sps:$4 sm:$0xff]  }
 0x708   : > { %13844 = vmatpush1.bf16.msra.mxu0 %v17624_v31  ;;  %v17680_v31 = vld [vmem:[%s19313_s0 + $0x16c] ss:$56 sps:$4 sm:$0xff]  }
 0x709   : > { %13867 = vmatpush1.bf16.msra.mxu1 %v17627_v21  ;;  %13845 = vmatprep.subr.bf16.mxu0 %v17632_v4  ;;  %v17683_v21 = vld [vmem:[%s19313_s0 + $0x1974] ss:$56 sps:$4 sm:$0xff]   ;;  %v17678_v4 = vld [vmem:[%s19313_s0 + $0x168] ss:$56 sps:$4 sm:$0xff]  }
 0x70a   : > { %13868 = vmatprep.subr.bf16.mxu1 %v17635_v36  ;;  %v17681_v36 = vld [vmem:[%s19313_s0 + $0x1970] ss:$56 sps:$4 sm:$0xff]  }
 0x70c   : > { %13846 = vmatpush1.bf16.msra.mxu0 %v17630_v28  ;;  %v17686_v28 = vld [vmem:[%s19313_s0 + $0x1dc] ss:$56 sps:$4 sm:$0xff]  }
 0x70d   : > { %13869 = vmatpush1.bf16.msra.mxu1 %v17633_v42  ;;  %13847 = vmatprep.subr.bf16.mxu0 %v17638_v1  ;;  %v17689_v42 = vld [vmem:[%s19313_s0 + $0x19e4] ss:$56 sps:$4 sm:$0xff]   ;;  %v17684_v1 = vld [vmem:[%s19313_s0 + $0x1d8] ss:$56 sps:$4 sm:$0xff]  }
 0x70e   : > { %13870 = vmatprep.subr.bf16.mxu1 %v17641_v54  ;;  %v17687_v54 = vld [vmem:[%s19313_s0 + $0x19e0] ss:$56 sps:$4 sm:$0xff]  }
 0x710   : > { %13848 = vmatpush1.bf16.msra.mxu0 %v17636_v44  ;;  %v17692_v44 = vld [vmem:[%s19313_s0 + $0x24c] ss:$56 sps:$4 sm:$0xff]  }
 0x711   : > { %13871 = vmatpush1.bf16.msra.mxu1 %v17639_v6  ;;  %13849 = vmatprep.subr.bf16.mxu0 %v17644_v56  ;;  %v17695_v6 = vld [vmem:[%s19313_s0 + $0x1a54] ss:$56 sps:$4 sm:$0xff]   ;;  %v17690_v56 = vld [vmem:[%s19313_s0 + $0x248] ss:$56 sps:$4 sm:$0xff]  }
 0x712   : > { %13872 = vmatprep.subr.bf16.mxu1 %v17647_v46  ;;  %v17693_v46 = vld [vmem:[%s19313_s0 + $0x1a50] ss:$56 sps:$4 sm:$0xff]  }
 0x714   : > { %13850 = vmatpush1.bf16.msra.mxu0 %v17642_v35  ;;  %v17698_v35 = vld [vmem:[%s19313_s0 + $0x2bc] ss:$56 sps:$4 sm:$0xff]  }
 0x715   : > { %13873 = vmatpush1.bf16.msra.mxu1 %v17645_v47  ;;  %13851 = vmatprep.subr.bf16.mxu0 %v17650_v51  ;;  %v17701_v51 = vld [vmem:[%s19313_s0 + $0x1ac4] ss:$56 sps:$4 sm:$0xff]  }
 0x716   : > { %13874 = vmatprep.subr.bf16.mxu1 %v17653_v37 }
 0x717   : > { %v13570_v3 = vpop.f32.mrb[24].mxu1 }
 0x718   : > { %v20958_v22 = vadd.f32 %v13570_v3, %v20914_v32  ;;  %13852 = vmatpush1.bf16.msra.mxu0 %v17648_v57  ;;  %v13572_v9 = vpop.f32.mrb[25].mxu1  ;;  %v17665_v32 = vld [vmem:[%s19313_s0 + $0x1824] ss:$56 sps:$4 sm:$0xff]  }
 0x719   : > { %v20962_v55 = vadd.f32 %v13572_v9, %v20917_v50  ;;  %13875 = vmatpush1.bf16.msra.mxu1 %v17651_v48  ;;  %v13574_v10 = vpop.f32.mrb[26].mxu1  ;;  %13853 = vmatprep.subr.bf16.mxu0 %v17656_v0  ;;  %v17663_v50 = vld [vmem:[%s19313_s0 + $0x1820] ss:$56 sps:$4 sm:$0xff]   ;;  %v17704_v3 = vld [vmem:[%s19313_s0 + $0x32c] ss:$56 sps:$4 sm:$0xff]  }
 0x71a   : > { %v13575_v16 = vpop.f32.mrb[27].mxu1  ;;  %13876 = vmatprep.subr.bf16.mxu1 %v17659_v49  ;;  %v17696_v48 = vld [vmem:[%s19313_s0 + $0x2b8] ss:$56 sps:$4 sm:$0xff]   ;;  %v17707_v9 = vld [vmem:[%s19313_s0 + $0x1b34] ss:$56 sps:$4 sm:$0xff]  }
 0x71b   : > { %v17699_v49 = vld [vmem:[%s19313_s0 + $0x1ac0] ss:$56 sps:$4 sm:$0xff]   ;;  %v17705_v10 = vld [vmem:[%s19313_s0 + $0x1b30] ss:$56 sps:$4 sm:$0xff]  }
 0x71c   : > { %13854 = vmatpush1.bf16.msra.mxu0 %v17654_v24  ;;  %v17702_v24 = vld [vmem:[%s19313_s0 + $0x328] ss:$56 sps:$4 sm:$0xff]   ;;  %v17708_v16 = vld [vmem:[%s19313_s0 + $0x398] ss:$56 sps:$4 sm:$0xff]  }
 0x71d   : > { %13877 = vmatpush1.bf16.msra.mxu1 %v17657_v20  ;;  %13905 = vmatprep.subr.bf16.mxu0 %v17662_v17  ;;  %v17710_v20 = vld [vmem:[%s19313_s0 + $0x39c] ss:$56 sps:$4 sm:$0xff]  }
 0x71e   : > { %13878 = vmatprep.subr.bf16.mxu1 %v17665_v32  ;;  %v17713_v17 = vld [vmem:[%s19313_s0 + $0x1ba4] ss:$56 sps:$4 sm:$0xff]   ;;  %v17711_v32 = vld [vmem:[%s19313_s0 + $0x1ba0] ss:$56 sps:$4 sm:$0xff]  }
 0x71f   : > { %13856 = vmatmul.mubr.bf16.vlgmr.msra.gmra.mrb[36].mxu0 %v20673_v29 }
 0x720   : > { %13906 = vmatpush1.bf16.msra.mxu0 %v17660_v60  ;;  %13937 = vmatprep.mubr.bf16.mxu0 %v20502_v23  ;;  %v17716_v60 = vld [vmem:[%s19313_s0 + $0x40c] ss:$56 sps:$4 sm:$0xff]  }
 0x721   : > { %13879 = vmatpush1.bf16.msra.mxu1 %v17663_v50  ;;  %13907 = vmatprep.subr.bf16.mxu0 %v17668_v62  ;;  %v17719_v50 = vld [vmem:[%s19313_s0 + $0x71c] ss:$56 sps:$4 sm:$0xff]   ;;  %v17714_v62 = vld [vmem:[%s19313_s0 + $0x408] ss:$56 sps:$4 sm:$0xff]  }
 0x722   : > { %13880 = vmatprep.subr.bf16.mxu1 %v17671_v39  ;;  %v17717_v39 = vld [vmem:[%s19313_s0 + $0x718] ss:$56 sps:$4 sm:$0xff]  }
 0x724   : > { %13908 = vmatpush1.bf16.msra.mxu0 %v17666_v27  ;;  %v17722_v27 = vld [vmem:[%s19313_s0 + $0x47c] ss:$56 sps:$4 sm:$0xff]  }
 0x725   : > { %13881 = vmatpush1.bf16.msra.mxu1 %v17669_v7  ;;  %13909 = vmatprep.subr.bf16.mxu0 %v17674_v34  ;;  %v17725_v7 = vld [vmem:[%s19313_s0 + $0x78c] ss:$56 sps:$4 sm:$0xff]   ;;  %v17720_v34 = vld [vmem:[%s19313_s0 + $0x478] ss:$56 sps:$4 sm:$0xff]  }
 0x726   : > { %13882 = vmatprep.subr.bf16.mxu1 %v17677_v40  ;;  %v17723_v40 = vld [vmem:[%s19313_s0 + $0x788] ss:$56 sps:$4 sm:$0xff]  }
 0x728   : > { %13910 = vmatpush1.bf16.msra.mxu0 %v17672_v61  ;;  %v17728_v61 = vld [vmem:[%s19313_s0 + $0x4ec] ss:$56 sps:$4 sm:$0xff]  }
 0x729   : > { %13883 = vmatpush1.bf16.msra.mxu1 %v17675_v14  ;;  %13911 = vmatprep.subr.bf16.mxu0 %v17680_v31  ;;  %v17731_v14 = vld [vmem:[%s19313_s0 + $0x7fc] ss:$56 sps:$4 sm:$0xff]   ;;  %v17726_v31 = vld [vmem:[%s19313_s0 + $0x4e8] ss:$56 sps:$4 sm:$0xff]  }
 0x72a   : > { %13884 = vmatprep.subr.bf16.mxu1 %v17683_v21  ;;  %v17729_v21 = vld [vmem:[%s19313_s0 + $0x7f8] ss:$56 sps:$4 sm:$0xff]  }
 0x72c   : > { %13912 = vmatpush1.bf16.msra.mxu0 %v17678_v4  ;;  %v17734_v4 = vld [vmem:[%s19313_s0 + $0x55c] ss:$56 sps:$4 sm:$0xff]  }
 0x72d   : > { %13885 = vmatpush1.bf16.msra.mxu1 %v17681_v36  ;;  %13913 = vmatprep.subr.bf16.mxu0 %v17686_v28  ;;  %v17737_v36 = vld [vmem:[%s19313_s0 + $0x86c] ss:$56 sps:$4 sm:$0xff]   ;;  %v17732_v28 = vld [vmem:[%s19313_s0 + $0x558] ss:$56 sps:$4 sm:$0xff]  }
 0x72e   : > { %13886 = vmatprep.subr.bf16.mxu1 %v17689_v42  ;;  %v17735_v42 = vld [vmem:[%s19313_s0 + $0x868] ss:$56 sps:$4 sm:$0xff]  }
 0x730   : > { %13914 = vmatpush1.bf16.msra.mxu0 %v17684_v1  ;;  %v17740_v1 = vld [vmem:[%s19313_s0 + $0x5cc] ss:$56 sps:$4 sm:$0xff]  }
 0x731   : > { %13887 = vmatpush1.bf16.msra.mxu1 %v17687_v54  ;;  %13915 = vmatprep.subr.bf16.mxu0 %v17692_v44  ;;  %v17743_v54 = vld [vmem:[%s19313_s0 + $0x8dc] ss:$56 sps:$4 sm:$0xff]   ;;  %v17738_v44 = vld [vmem:[%s19313_s0 + $0x5c8] ss:$56 sps:$4 sm:$0xff]  }
 0x732   : > { %v20992_v47 = vpop.f32.mrb[24].mxu0  ;;  %13888 = vmatprep.subr.bf16.mxu1 %v17695_v6  ;;  %v17741_v6 = vld [vmem:[%s19313_s0 + $0x8d8] ss:$56 sps:$4 sm:$0xff]  }
 0x733   : > { %v20995_v37 = vpop.f32.mrb[25].mxu0 }
 0x734   : > { %v13615_v57 = vpop.f32.mrb[26].mxu0  ;;  %13916 = vmatpush1.bf16.msra.mxu0 %v17690_v56  ;;  %v17746_v56 = vld [vmem:[%s19313_s0 + $0x63c] ss:$56 sps:$4 sm:$0xff]  }
 0x735   : > { %v13616_v0 = vpop.f32.mrb[27].mxu0  ;;  %13889 = vmatpush1.bf16.msra.mxu1 %v17693_v46  ;;  %13917 = vmatprep.subr.bf16.mxu0 %v17698_v35  ;;  %v8874_v46 = vrot.slane %v20765_v30, %v19529_v18  ;;  %v17749_v35 = vld [vmem:[%s19313_s0 + $0x94c] ss:$56 sps:$4 sm:$0xff]   ;;  %v17744_v57 = vld [vmem:[%s19313_s0 + $0x638] ss:$56 sps:$4 sm:$0xff]  }
 0x736   : > { %13890 = vmatprep.subr.bf16.mxu1 %v17701_v51  ;;  %v8878_v51 = vrot.slane %v20765_v30, %v19427_v26  ;;  %v17752_v0 = vld [vmem:[%s19313_s0 + $0x6ac] ss:$56 sps:$4 sm:$0xff]  }
 0x738   : > { %13918 = vmatpush1.bf16.msra.mxu0 %v17696_v48  ;;  %v17747_v48 = vld [vmem:[%s19313_s0 + $0x948] ss:$56 sps:$4 sm:$0xff]  }
 0x739   : > { %13891 = vmatpush1.bf16.msra.mxu1 %v17699_v49  ;;  %13919 = vmatprep.subr.bf16.mxu0 %v17704_v3  ;;  %v13612_v49 = vadd.f32 %v20992_v47, %v8874_v46  ;;  %v17755_v3 = vld [vmem:[%s19313_s0 + $0x9bc] ss:$56 sps:$4 sm:$0xff]   ;;  %v17753_v47 = vld [vmem:[%s19313_s0 + $0x9b8] ss:$56 sps:$4 sm:$0xff]   ;;  %v17786_v46 = vld [vmem:[%s19313_s0 + $0x1048] ss:$56 sps:$4 sm:$0xff]  }
 0x73a   : > { %13892 = vmatprep.subr.bf16.mxu1 %v17707_v9  ;;  %v13614_v9 = vadd.f32 %v20995_v37, %v8878_v51  ;;  %v17761_v37 = vld [vmem:[%s19313_s0 + $0xa2c] ss:$56 sps:$4 sm:$0xff]   ;;  %v17794_v51 = vld [vmem:[%s19313_s0 + $0x10bc] ss:$56 sps:$4 sm:$0xff]  }
 0x73c   : > { %13920 = vmatpush1.bf16.msra.mxu0 %v17702_v24 }
 0x73d   : > { %13893 = vmatpush1.bf16.msra.mxu1 %v17705_v10  ;;  %13921 = vmatprep.subr.bf16.mxu0 %v17710_v20  ;;  %v17750_v20 = vld [vmem:[%s19313_s0 + $0x6a8] ss:$56 sps:$4 sm:$0xff]  }
 0x73e   : > { %13894 = vmatprep.subr.bf16.mxu1 %v17713_v17 }
 0x740   : > { %13922 = vmatpush1.bf16.msra.mxu0 %v17708_v16 }
 0x741   : > { %13895 = vmatpush1.bf16.msra.mxu1 %v17711_v32  ;;  %13923 = vmatprep.subr.bf16.mxu0 %v17716_v60  ;;  %v17758_v32 = vld [vmem:[%s19313_s0 + $0xe1c] ss:$56 sps:$4 sm:$0xff]  }
 0x742   : > { %13946 = vmatprep.subr.bf16.mxu1 %v17719_v50  ;;  %v17756_v50 = vld [vmem:[%s19313_s0 + $0xe18] ss:$56 sps:$4 sm:$0xff]  }
 0x744   : > { %13897 = vmatmul.mubr.bf16.vlgmr.msra.gmra.mrb[40].mxu1 %v20703_v2  ;;  %13924 = vmatpush1.bf16.msra.mxu0 %v17714_v62  ;;  %v17759_v62 = vld [vmem:[%s19313_s0 + $0xa28] ss:$56 sps:$4 sm:$0xff]  }
 0x745   : > { %13947 = vmatpush1.bf16.msra.mxu1 %v17717_v39  ;;  %13978 = vmatprep.mubr.bf16.mxu1 %v20544_v33  ;;  %v17764_v39 = vld [vmem:[%s19313_s0 + $0xe8c] ss:$56 sps:$4 sm:$0xff]  }
 0x746   : > { %13925 = vmatprep.subr.bf16.mxu0 %v17722_v27  ;;  %13948 = vmatprep.subr.bf16.mxu1 %v17725_v7  ;;  %v17767_v27 = vld [vmem:[%s19313_s0 + $0xa9c] ss:$56 sps:$4 sm:$0xff]   ;;  %v17762_v7 = vld [vmem:[%s19313_s0 + $0xe88] ss:$56 sps:$4 sm:$0xff]  }
 0x748   : > { %13926 = vmatpush1.bf16.msra.mxu0 %v17720_v34  ;;  %v17765_v34 = vld [vmem:[%s19313_s0 + $0xa98] ss:$56 sps:$4 sm:$0xff]  }
 0x749   : > { %13949 = vmatpush1.bf16.msra.mxu1 %v17723_v40  ;;  %13927 = vmatprep.subr.bf16.mxu0 %v17728_v61  ;;  %v17770_v40 = vld [vmem:[%s19313_s0 + $0xefc] ss:$56 sps:$4 sm:$0xff]   ;;  %v17773_v61 = vld [vmem:[%s19313_s0 + $0xb0c] ss:$56 sps:$4 sm:$0xff]  }
 0x74a   : > { %13950 = vmatprep.subr.bf16.mxu1 %v17731_v14  ;;  %v17768_v14 = vld [vmem:[%s19313_s0 + $0xef8] ss:$56 sps:$4 sm:$0xff]  }
 0x74c   : > { %13928 = vmatpush1.bf16.msra.mxu0 %v17726_v31  ;;  %v17771_v31 = vld [vmem:[%s19313_s0 + $0xb08] ss:$56 sps:$4 sm:$0xff]  }
 0x74d   : > { %13951 = vmatpush1.bf16.msra.mxu1 %v17729_v21  ;;  %13929 = vmatprep.subr.bf16.mxu0 %v17734_v4  ;;  %v17776_v21 = vld [vmem:[%s19313_s0 + $0xf6c] ss:$56 sps:$4 sm:$0xff]   ;;  %v17779_v4 = vld [vmem:[%s19313_s0 + $0xb7c] ss:$56 sps:$4 sm:$0xff]  }
 0x74e   : > { %13952 = vmatprep.subr.bf16.mxu1 %v17737_v36  ;;  %v17774_v36 = vld [vmem:[%s19313_s0 + $0xf68] ss:$56 sps:$4 sm:$0xff]  }
 0x750   : > { %13930 = vmatpush1.bf16.msra.mxu0 %v17732_v28  ;;  %v17777_v28 = vld [vmem:[%s19313_s0 + $0xb78] ss:$56 sps:$4 sm:$0xff]  }
 0x751   : > { %13953 = vmatpush1.bf16.msra.mxu1 %v17735_v42  ;;  %13931 = vmatprep.subr.bf16.mxu0 %v17740_v1  ;;  %v17782_v42 = vld [vmem:[%s19313_s0 + $0xfdc] ss:$56 sps:$4 sm:$0xff]   ;;  %v17785_v1 = vld [vmem:[%s19313_s0 + $0xbec] ss:$56 sps:$4 sm:$0xff]  }
 0x752   : > { %13954 = vmatprep.subr.bf16.mxu1 %v17743_v54  ;;  %v17780_v54 = vld [vmem:[%s19313_s0 + $0xfd8] ss:$56 sps:$4 sm:$0xff]  }
 0x754   : > { %13932 = vmatpush1.bf16.msra.mxu0 %v17738_v44  ;;  %v17783_v44 = vld [vmem:[%s19313_s0 + $0xbe8] ss:$56 sps:$4 sm:$0xff]  }
 0x755   : > { %13955 = vmatpush1.bf16.msra.mxu1 %v17741_v6  ;;  %13933 = vmatprep.subr.bf16.mxu0 %v17746_v56  ;;  %v17788_v6 = vld [vmem:[%s19313_s0 + $0x104c] ss:$56 sps:$4 sm:$0xff]   ;;  %v17791_v56 = vld [vmem:[%s19313_s0 + $0xc5c] ss:$56 sps:$4 sm:$0xff]  }
 0x756   : > { %13956 = vmatprep.subr.bf16.mxu1 %v17749_v35  ;;  %v17789_v35 = vld [vmem:[%s19313_s0 + $0xc58] ss:$56 sps:$4 sm:$0xff]  }
 0x757   : > { %v13652_v24 = vpop.f32.mrb[28].mxu1 }
 0x758   : > { %v21041_v10 = vadd.f32 %v13652_v24, %v13612_v49  ;;  %v13654_v30 = vpop.f32.mrb[29].mxu1  ;;  %13934 = vmatpush1.bf16.msra.mxu0 %v17744_v57  ;;  %v17792_v24 = vld [vmem:[%s19313_s0 + $0x10b8] ss:$56 sps:$4 sm:$0xff]  }
 0x759   : > { %v13655_v17 = vadd.f32 %v13654_v30, %v13614_v9  ;;  %v13656_v16 = vpop.f32.mrb[30].mxu1  ;;  %13957 = vmatpush1.bf16.msra.mxu1 %v17747_v48  ;;  %13935 = vmatprep.subr.bf16.mxu0 %v17752_v0  ;;  %v17797_v48 = vld [vmem:[%s19313_s0 + $0xccc] ss:$56 sps:$4 sm:$0xff]  }
 0x75a   : > { %v13657_v60 = vpop.f32.mrb[31].mxu1  ;;  %13958 = vmatprep.subr.bf16.mxu1 %v17755_v3  ;;  %v17800_v16 = vld [vmem:[%s19313_s0 + $0x112c] ss:$56 sps:$4 sm:$0xff]  }
 0x75b   : > { %v17809_v60 = vld [vmem:[%s19313_s0 + $0xdac] ss:$56 sps:$4 sm:$0xff]  }
 0x75c   : > { %13936 = vmatpush1.bf16.msra.mxu0 %v17750_v20  ;;  %v17795_v20 = vld [vmem:[%s19313_s0 + $0xcc8] ss:$56 sps:$4 sm:$0xff]  }
 0x75d   : > { %13959 = vmatpush1.bf16.msra.mxu1 %v17753_v47  ;;  %13987 = vmatprep.subr.bf16.mxu0 %v17758_v32  ;;  %v17798_v47 = vld [vmem:[%s19313_s0 + $0x1128] ss:$56 sps:$4 sm:$0xff]   ;;  %v17806_v32 = vld [vmem:[%s19313_s0 + $0x119c] ss:$56 sps:$4 sm:$0xff]  }
 0x75e   : > { %13960 = vmatprep.subr.bf16.mxu1 %v17761_v37  ;;  %v17804_v37 = vld [vmem:[%s19313_s0 + $0x1198] ss:$56 sps:$4 sm:$0xff]  }
 0x75f   : > { %13938 = vmatmul.mubr.bf16.vlgmr.msra.gmra.mrb[40].mxu0 %v20576_v5 }
 0x760   : > { %13988 = vmatpush1.bf16.msra.mxu0 %v17756_v50  ;;  %14019 = vmatprep.mubr.bf16.mxu0 %v20670_v25  ;;  %v17807_v50 = vld [vmem:[%s19313_s0 + $0xda8] ss:$56 sps:$4 sm:$0xff]  }
 0x761   : > { %13961 = vmatpush1.bf16.msra.mxu1 %v17759_v62  ;;  %13989 = vmatprep.subr.bf16.mxu0 %v17764_v39  ;;  %v17812_v62 = vld [vmem:[%s19313_s0 + $0x120c] ss:$56 sps:$4 sm:$0xff]   ;;  %v17815_v39 = vld [vmem:[%s19313_s0 + $0x151c] ss:$56 sps:$4 sm:$0xff]  }
 0x762   : > { %13962 = vmatprep.subr.bf16.mxu1 %v17767_v27  ;;  %v17810_v27 = vld [vmem:[%s19313_s0 + $0x1208] ss:$56 sps:$4 sm:$0xff]  }
 0x764   : > { %13990 = vmatpush1.bf16.msra.mxu0 %v17762_v7  ;;  %v17813_v7 = vld [vmem:[%s19313_s0 + $0x1518] ss:$56 sps:$4 sm:$0xff]  }
 0x765   : > { %13963 = vmatpush1.bf16.msra.mxu1 %v17765_v34  ;;  %13991 = vmatprep.subr.bf16.mxu0 %v17770_v40  ;;  %v17818_v34 = vld [vmem:[%s19313_s0 + $0x127c] ss:$56 sps:$4 sm:$0xff]   ;;  %v17821_v40 = vld [vmem:[%s19313_s0 + $0x158c] ss:$56 sps:$4 sm:$0xff]  }
 0x766   : > { %13964 = vmatprep.subr.bf16.mxu1 %v17773_v61  ;;  %v17816_v61 = vld [vmem:[%s19313_s0 + $0x1278] ss:$56 sps:$4 sm:$0xff]  }
 0x768   : > { %13992 = vmatpush1.bf16.msra.mxu0 %v17768_v14  ;;  %v17819_v14 = vld [vmem:[%s19313_s0 + $0x1588] ss:$56 sps:$4 sm:$0xff]  }
 0x769   : > { %13965 = vmatpush1.bf16.msra.mxu1 %v17771_v31  ;;  %13993 = vmatprep.subr.bf16.mxu0 %v17776_v21  ;;  %v17824_v31 = vld [vmem:[%s19313_s0 + $0x12ec] ss:$56 sps:$4 sm:$0xff]   ;;  %v17827_v21 = vld [vmem:[%s19313_s0 + $0x15fc] ss:$56 sps:$4 sm:$0xff]  }
 0x76a   : > { %13966 = vmatprep.subr.bf16.mxu1 %v17779_v4  ;;  %v17822_v4 = vld [vmem:[%s19313_s0 + $0x12e8] ss:$56 sps:$4 sm:$0xff]  }
 0x76c   : > { %13994 = vmatpush1.bf16.msra.mxu0 %v17774_v36  ;;  %v17825_v36 = vld [vmem:[%s19313_s0 + $0x15f8] ss:$56 sps:$4 sm:$0xff]  }
 0x76d   : > { %13967 = vmatpush1.bf16.msra.mxu1 %v17777_v28  ;;  %13995 = vmatprep.subr.bf16.mxu0 %v17782_v42  ;;  %v17830_v28 = vld [vmem:[%s19313_s0 + $0x135c] ss:$56 sps:$4 sm:$0xff]   ;;  %v17833_v42 = vld [vmem:[%s19313_s0 + $0x166c] ss:$56 sps:$4 sm:$0xff]  }
 0x76e   : > { %13968 = vmatprep.subr.bf16.mxu1 %v17785_v1  ;;  %v17828_v1 = vld [vmem:[%s19313_s0 + $0x1358] ss:$56 sps:$4 sm:$0xff]  }
 0x770   : > { %13996 = vmatpush1.bf16.msra.mxu0 %v17780_v54  ;;  %v17831_v54 = vld [vmem:[%s19313_s0 + $0x1668] ss:$56 sps:$4 sm:$0xff]  }
 0x771   : > { %13969 = vmatpush1.bf16.msra.mxu1 %v17783_v44  ;;  %13997 = vmatprep.subr.bf16.mxu0 %v17788_v6  ;;  %v17836_v44 = vld [vmem:[%s19313_s0 + $0x13cc] ss:$56 sps:$4 sm:$0xff]   ;;  %v17839_v6 = vld [vmem:[%s19313_s0 + $0x16dc] ss:$56 sps:$4 sm:$0xff]  }
 0x772   : > { %v13693_v57 = vpop.f32.mrb[28].mxu0  ;;  %13970 = vmatprep.subr.bf16.mxu1 %v17791_v56  ;;  %v17834_v56 = vld [vmem:[%s19313_s0 + $0x13c8] ss:$56 sps:$4 sm:$0xff]  }
 0x773   : > { %v21074_v0 = vadd.f32 %v13693_v57, %v21041_v10  ;;  %v13695_v49 = vpop.f32.mrb[29].mxu0  ;;  %v17803_v10 = vld [vmem:[%s19313_s0 + $0xd3c] ss:$56 sps:$4 sm:$0xff]   ;;  %v17840_v57 = vld [vmem:[%s19313_s0 + $0x1438] ss:$56 sps:$4 sm:$0xff]  }
 0x774   : > { %v21076_v3 = vadd.f32 %v13695_v49, %v13655_v17  ;;  %v13697_v9 = vpop.f32.mrb[30].mxu0  ;;  %13998 = vmatpush1.bf16.msra.mxu0 %v17786_v46  ;;  %v17801_v17 = vld [vmem:[%s19313_s0 + $0xd38] ss:$56 sps:$4 sm:$0xff]   ;;  %v17848_v49 = vld [vmem:[%s19313_s0 + $0x14ac] ss:$56 sps:$4 sm:$0xff]  }
 0x775   : > { %v13698_v30 = vpop.f32.mrb[31].mxu0  ;;  %13971 = vmatpush1.bf16.msra.mxu1 %v17789_v35  ;;  %13999 = vmatprep.subr.bf16.mxu0 %v17794_v51  ;;  %v17837_v46 = vld [vmem:[%s19313_s0 + $0x16d8] ss:$56 sps:$4 sm:$0xff]   ;;  %v17842_v35 = vld [vmem:[%s19313_s0 + $0x143c] ss:$56 sps:$4 sm:$0xff]  }
 0x776   : > { %13972 = vmatprep.subr.bf16.mxu1 %v17797_v48  ;;  %v17845_v51 = vld [vmem:[%s19313_s0 + $0x174c] ss:$56 sps:$4 sm:$0xff]   ;;  %v17843_v48 = vld [vmem:[%s19313_s0 + $0x1748] ss:$56 sps:$4 sm:$0xff]   ;;  %v17851_v9 = vld [vmem:[%s19313_s0 + $0x17bc] ss:$56 sps:$4 sm:$0xff]  }
 0x778   : > { %14000 = vmatpush1.bf16.msra.mxu0 %v17792_v24 }
 0x779   : > { %13973 = vmatpush1.bf16.msra.mxu1 %v17795_v20  ;;  %14001 = vmatprep.subr.bf16.mxu0 %v17800_v16  ;;  %v17846_v16 = vld [vmem:[%s19313_s0 + $0x14a8] ss:$56 sps:$4 sm:$0xff]  }
 0x77a   : > { %13974 = vmatprep.subr.bf16.mxu1 %v17803_v10 }
 0x77c   : > { %14002 = vmatpush1.bf16.msra.mxu0 %v17798_v47 }
 0x77d   : > { %13975 = vmatpush1.bf16.msra.mxu1 %v17801_v17  ;;  %14003 = vmatprep.subr.bf16.mxu0 %v17806_v32  ;;  %v17849_v17 = vld [vmem:[%s19313_s0 + $0x17b8] ss:$56 sps:$4 sm:$0xff]   ;;  %v17854_v32 = vld [vmem:[%s19313_s0 + $0x24] ss:$56 sps:$4 sm:$0xff]  }
 0x77e   : > { %13976 = vmatprep.subr.bf16.mxu1 %v17809_v60 }
 0x780   : > { %14004 = vmatpush1.bf16.msra.mxu0 %v17804_v37  ;;  %v17852_v37 = vld [vmem:[%s19313_s0 + $0x20] ss:$56 sps:$4 sm:$0xff]  }
 0x781   : > { %13977 = vmatpush1.bf16.msra.mxu1 %v17807_v50  ;;  %14005 = vmatprep.subr.bf16.mxu0 %v17812_v62  ;;  %v17860_v50 = vld [vmem:[%s19313_s0 + $0x94] ss:$56 sps:$4 sm:$0xff]  }
 0x782   : > { %14028 = vmatprep.subr.bf16.mxu1 %v17815_v39  ;;  %v17863_v62 = vld [vmem:[%s19313_s0 + $0x189c] ss:$56 sps:$4 sm:$0xff]   ;;  %v17858_v39 = vld [vmem:[%s19313_s0 + $0x90] ss:$56 sps:$4 sm:$0xff]  }
 0x784   : > { %13979 = vmatmul.mubr.bf16.vlgmr.msra.gmra.mrb[44].mxu1 %v20620_v53  ;;  %14006 = vmatpush1.bf16.msra.mxu0 %v17810_v27  ;;  %v17861_v27 = vld [vmem:[%s19313_s0 + $0x1898] ss:$56 sps:$4 sm:$0xff]  }
 0x785   : > { %14029 = vmatpush1.bf16.msra.mxu1 %v17813_v7  ;;  %14060 = vmatprep.mubr.bf16.mxu1 %v20700_v63  ;;  %v17866_v7 = vld [vmem:[%s19313_s0 + $0x104] ss:$56 sps:$4 sm:$0xff]  }
 0x786   : > { %14007 = vmatprep.subr.bf16.mxu0 %v17818_v34  ;;  %14030 = vmatprep.subr.bf16.mxu1 %v17821_v40  ;;  %v17869_v34 = vld [vmem:[%s19313_s0 + $0x190c] ss:$56 sps:$4 sm:$0xff]   ;;  %v17864_v40 = vld [vmem:[%s19313_s0 + $0x100] ss:$56 sps:$4 sm:$0xff]  }
 0x788   : > { %14008 = vmatpush1.bf16.msra.mxu0 %v17816_v61  ;;  %v17867_v61 = vld [vmem:[%s19313_s0 + $0x1908] ss:$56 sps:$4 sm:$0xff]  }
 0x789   : > { %14031 = vmatpush1.bf16.msra.mxu1 %v17819_v14  ;;  %14009 = vmatprep.subr.bf16.mxu0 %v17824_v31  ;;  %v17872_v14 = vld [vmem:[%s19313_s0 + $0x174] ss:$56 sps:$4 sm:$0xff]  }
 0x78a   : > { %14032 = vmatprep.subr.bf16.mxu1 %v17827_v21  ;;  %v17875_v31 = vld [vmem:[%s19313_s0 + $0x197c] ss:$56 sps:$4 sm:$0xff]   ;;  %v17870_v21 = vld [vmem:[%s19313_s0 + $0x170] ss:$56 sps:$4 sm:$0xff]  }
 0x78c   : > { %14010 = vmatpush1.bf16.msra.mxu0 %v17822_v4  ;;  %v17873_v4 = vld [vmem:[%s19313_s0 + $0x1978] ss:$56 sps:$4 sm:$0xff]  }
 0x78d   : > { %14033 = vmatpush1.bf16.msra.mxu1 %v17825_v36  ;;  %14011 = vmatprep.subr.bf16.mxu0 %v17830_v28  ;;  %v17878_v36 = vld [vmem:[%s19313_s0 + $0x1e4] ss:$56 sps:$4 sm:$0xff]  }
 0x78e   : > { %14034 = vmatprep.subr.bf16.mxu1 %v17833_v42  ;;  %v17881_v28 = vld [vmem:[%s19313_s0 + $0x19ec] ss:$56 sps:$4 sm:$0xff]   ;;  %v17876_v42 = vld [vmem:[%s19313_s0 + $0x1e0] ss:$56 sps:$4 sm:$0xff]  }
 0x790   : > { %14012 = vmatpush1.bf16.msra.mxu0 %v17828_v1  ;;  %v17879_v1 = vld [vmem:[%s19313_s0 + $0x19e8] ss:$56 sps:$4 sm:$0xff]  }
 0x791   : > { %14035 = vmatpush1.bf16.msra.mxu1 %v17831_v54  ;;  %14013 = vmatprep.subr.bf16.mxu0 %v17836_v44  ;;  %v17884_v54 = vld [vmem:[%s19313_s0 + $0x254] ss:$56 sps:$4 sm:$0xff]  }
 0x792   : > { %14036 = vmatprep.subr.bf16.mxu1 %v17839_v6  ;;  %v17887_v44 = vld [vmem:[%s19313_s0 + $0x1a5c] ss:$56 sps:$4 sm:$0xff]   ;;  %v17882_v6 = vld [vmem:[%s19313_s0 + $0x250] ss:$56 sps:$4 sm:$0xff]  }
 0x794   : > { %14014 = vmatpush1.bf16.msra.mxu0 %v17834_v56  ;;  %v17885_v56 = vld [vmem:[%s19313_s0 + $0x1a58] ss:$56 sps:$4 sm:$0xff]  }
 0x795   : > { %14037 = vmatpush1.bf16.msra.mxu1 %v17837_v46  ;;  %14015 = vmatprep.subr.bf16.mxu0 %v17842_v35  ;;  %v17890_v46 = vld [vmem:[%s19313_s0 + $0x2c4] ss:$56 sps:$4 sm:$0xff]  }
 0x796   : > { %14038 = vmatprep.subr.bf16.mxu1 %v17845_v51  ;;  %v17893_v51 = vld [vmem:[%s19313_s0 + $0x1acc] ss:$56 sps:$4 sm:$0xff]  }
 0x797   : > { %v13734_v24 = vpop.f32.mrb[32].mxu1 }
 0x798   : > { %v21117_v30 = vadd.f32 %v13734_v24, %v21074_v0  ;;  %v13736_v20 = vpop.f32.mrb[33].mxu1  ;;  %14016 = vmatpush1.bf16.msra.mxu0 %v17840_v57  ;;  %v17857_v0 = vld [vmem:[%s19313_s0 + $0x182c] ss:$56 sps:$4 sm:$0xff]   ;;  %v17891_v24 = vld [vmem:[%s19313_s0 + $0x1ac8] ss:$56 sps:$4 sm:$0xff]  }
 0x799   : > { %v21121_v10 = vadd.f32 %v13736_v20, %v21076_v3  ;;  %v13738_v47 = vpop.f32.mrb[34].mxu1  ;;  %14039 = vmatpush1.bf16.msra.mxu1 %v17843_v48  ;;  %14017 = vmatprep.subr.bf16.mxu0 %v17848_v49  ;;  %v17855_v3 = vld [vmem:[%s19313_s0 + $0x1828] ss:$56 sps:$4 sm:$0xff]   ;;  %v17896_v20 = vld [vmem:[%s19313_s0 + $0x334] ss:$56 sps:$4 sm:$0xff]  }
 0x79a   : > { %v13739_v60 = vpop.f32.mrb[35].mxu1  ;;  %14040 = vmatprep.subr.bf16.mxu1 %v17851_v9  ;;  %v17888_v49 = vld [vmem:[%s19313_s0 + $0x2c0] ss:$56 sps:$4 sm:$0xff]   ;;  %v17894_v47 = vld [vmem:[%s19313_s0 + $0x330] ss:$56 sps:$4 sm:$0xff]  }
 0x79b   : > { %v17905_v60 = vld [vmem:[%s19313_s0 + $0x1bac] ss:$56 sps:$4 sm:$0xff]  }
 0x79c   : > { %14018 = vmatpush1.bf16.msra.mxu0 %v17846_v16  ;;  %v17899_v16 = vld [vmem:[%s19313_s0 + $0x1b3c] ss:$56 sps:$4 sm:$0xff]  }
 0x79d   : > { %14041 = vmatpush1.bf16.msra.mxu1 %v17849_v17  ;;  %14069 = vmatprep.subr.bf16.mxu0 %v17854_v32  ;;  %v17897_v17 = vld [vmem:[%s19313_s0 + $0x1b38] ss:$56 sps:$4 sm:$0xff]   ;;  %v17902_v32 = vld [vmem:[%s19313_s0 + $0x3a4] ss:$56 sps:$4 sm:$0xff]  }
 0x79e   : > { %14042 = vmatprep.subr.bf16.mxu1 %v17857_v0  ;;  %v17900_v0 = vld [vmem:[%s19313_s0 + $0x3a0] ss:$56 sps:$4 sm:$0xff]  }
 0x79f   : > { %14020 = vmatmul.mubr.bf16.vlgmr.msra.gmra.mrb[44].mxu0 %v20673_v29 }
 0x7a0   : > { %14070 = vmatpush1.bf16.msra.mxu0 %v17852_v37  ;;  %14101 = vmatprep.mubr.bf16.mxu0 %v20502_v23  ;;  %v17903_v37 = vld [vmem:[%s19313_s0 + $0x1ba8] ss:$56 sps:$4 sm:$0xff]  }
 0x7a1   : > { %14043 = vmatpush1.bf16.msra.mxu1 %v17855_v3  ;;  %14071 = vmatprep.subr.bf16.mxu0 %v17860_v50  ;;  %v17908_v3 = vld [vmem:[%s19313_s0 + $0x414] ss:$56 sps:$4 sm:$0xff]  }
 0x7a2   : > { %14044 = vmatprep.subr.bf16.mxu1 %v17863_v62  ;;  %v17911_v50 = vld [vmem:[%s19313_s0 + $0x2c] ss:$56 sps:$4 sm:$0xff]   ;;  %v17906_v62 = vld [vmem:[%s19313_s0 + $0x410] ss:$56 sps:$4 sm:$0xff]  }
 0x7a4   : > { %14072 = vmatpush1.bf16.msra.mxu0 %v17858_v39  ;;  %v17909_v39 = vld [vmem:[%s19313_s0 + $0x28] ss:$56 sps:$4 sm:$0xff]  }
 0x7a5   : > { %14045 = vmatpush1.bf16.msra.mxu1 %v17861_v27  ;;  %14073 = vmatprep.subr.bf16.mxu0 %v17866_v7  ;;  %v17914_v27 = vld [vmem:[%s19313_s0 + $0x484] ss:$56 sps:$4 sm:$0xff]  }
 0x7a6   : > { %14046 = vmatprep.subr.bf16.mxu1 %v17869_v34  ;;  %v17917_v7 = vld [vmem:[%s19313_s0 + $0x9c] ss:$56 sps:$4 sm:$0xff]   ;;  %v17912_v34 = vld [vmem:[%s19313_s0 + $0x480] ss:$56 sps:$4 sm:$0xff]  }
 0x7a8   : > { %14074 = vmatpush1.bf16.msra.mxu0 %v17864_v40  ;;  %v17915_v40 = vld [vmem:[%s19313_s0 + $0x98] ss:$56 sps:$4 sm:$0xff]  }
 0x7a9   : > { %14047 = vmatpush1.bf16.msra.mxu1 %v17867_v61  ;;  %14075 = vmatprep.subr.bf16.mxu0 %v17872_v14  ;;  %v17920_v61 = vld [vmem:[%s19313_s0 + $0x4f4] ss:$56 sps:$4 sm:$0xff]  }
 0x7aa   : > { %14048 = vmatprep.subr.bf16.mxu1 %v17875_v31  ;;  %v17923_v14 = vld [vmem:[%s19313_s0 + $0x10c] ss:$56 sps:$4 sm:$0xff]   ;;  %v17918_v31 = vld [vmem:[%s19313_s0 + $0x4f0] ss:$56 sps:$4 sm:$0xff]  }
 0x7ac   : > { %14076 = vmatpush1.bf16.msra.mxu0 %v17870_v21  ;;  %v17921_v21 = vld [vmem:[%s19313_s0 + $0x108] ss:$56 sps:$4 sm:$0xff]  }
 0x7ad   : > { %14049 = vmatpush1.bf16.msra.mxu1 %v17873_v4  ;;  %14077 = vmatprep.subr.bf16.mxu0 %v17878_v36  ;;  %v17926_v4 = vld [vmem:[%s19313_s0 + $0x564] ss:$56 sps:$4 sm:$0xff]  }
 0x7ae   : > { %14050 = vmatprep.subr.bf16.mxu1 %v17881_v28  ;;  %v17929_v36 = vld [vmem:[%s19313_s0 + $0x17c] ss:$56 sps:$4 sm:$0xff]   ;;  %v17924_v28 = vld [vmem:[%s19313_s0 + $0x560] ss:$56 sps:$4 sm:$0xff]  }
 0x7b0   : > { %14078 = vmatpush1.bf16.msra.mxu0 %v17876_v42  ;;  %v17927_v42 = vld [vmem:[%s19313_s0 + $0x178] ss:$56 sps:$4 sm:$0xff]  }
 0x7b1   : > { %14051 = vmatpush1.bf16.msra.mxu1 %v17879_v1  ;;  %14079 = vmatprep.subr.bf16.mxu0 %v17884_v54  ;;  %v17932_v1 = vld [vmem:[%s19313_s0 + $0x5d4] ss:$56 sps:$4 sm:$0xff]  }
 0x7b2   : > { %v21151_v35 = vpop.f32.mrb[32].mxu0  ;;  %14052 = vmatprep.subr.bf16.mxu1 %v17887_v44  ;;  %v17935_v54 = vld [vmem:[%s19313_s0 + $0x1ec] ss:$56 sps:$4 sm:$0xff]   ;;  %v17930_v44 = vld [vmem:[%s19313_s0 + $0x5d0] ss:$56 sps:$4 sm:$0xff]  }
 0x7b3   : > { %v21154_v57 = vpop.f32.mrb[33].mxu0 }
 0x7b4   : > { %v13779_v48 = vpop.f32.mrb[34].mxu0  ;;  %14080 = vmatpush1.bf16.msra.mxu0 %v17882_v6  ;;  %v17933_v6 = vld [vmem:[%s19313_s0 + $0x1e8] ss:$56 sps:$4 sm:$0xff]  }
 0x7b5   : > { %v13780_v9 = vpop.f32.mrb[35].mxu0  ;;  %14053 = vmatpush1.bf16.msra.mxu1 %v17885_v56  ;;  %14081 = vmatprep.subr.bf16.mxu0 %v17890_v46  ;;  %v17938_v56 = vld [vmem:[%s19313_s0 + $0x644] ss:$56 sps:$4 sm:$0xff]  }
 0x7b6   : > { %14054 = vmatprep.subr.bf16.mxu1 %v17893_v51  ;;  %v21190_v46 = vld [vmem:[%s19315_s13] sm:$0xff] }
 0x7b7   : > { %v8882_v51 = vrot.slane %v21190_v46, %v19418_v15  ;;  %v17941_v48 = vld [vmem:[%s19313_s0 + $0x25c] ss:$56 sps:$4 sm:$0xff]   ;;  %v17936_v9 = vld [vmem:[%s19313_s0 + $0x640] ss:$56 sps:$4 sm:$0xff]  }
 0x7b8   : > { %14082 = vmatpush1.bf16.msra.mxu0 %v17888_v49  ;;  %v8886_v49 = vrot.slane %v21190_v46, %v19356_v59 }
 0x7b9   : > { %14055 = vmatpush1.bf16.msra.mxu1 %v17891_v24  ;;  %14083 = vmatprep.subr.bf16.mxu0 %v17896_v20  ;;  %v17939_v24 = vld [vmem:[%s19313_s0 + $0x258] ss:$56 sps:$4 sm:$0xff]   ;;  %v17944_v20 = vld [vmem:[%s19313_s0 + $0x6b4] ss:$56 sps:$4 sm:$0xff]  }
 0x7ba   : > { %14056 = vmatprep.subr.bf16.mxu1 %v17899_v16  ;;  %v13776_v16 = vadd.f32 %v21151_v35, %v8882_v51  ;;  %v17945_v35 = vld [vmem:[%s19313_s0 + $0x2c8] ss:$56 sps:$4 sm:$0xff]   ;;  %v17975_v51 = vld [vmem:[%s19313_s0 + $0x4f8] ss:$56 sps:$4 sm:$0xff]  }
 0x7bc   : > { %14084 = vmatpush1.bf16.msra.mxu0 %v17894_v47  ;;  %v17947_v47 = vld [vmem:[%s19313_s0 + $0x2cc] ss:$56 sps:$4 sm:$0xff]  }
 0x7bd   : > { %14057 = vmatpush1.bf16.msra.mxu1 %v17897_v17  ;;  %14085 = vmatprep.subr.bf16.mxu0 %v17902_v32  ;;  %v13778_v17 = vadd.f32 %v21154_v57, %v8886_v49  ;;  %v17953_v57 = vld [vmem:[%s19313_s0 + $0x33c] ss:$56 sps:$4 sm:$0xff]   ;;  %v17983_v49 = vld [vmem:[%s19313_s0 + $0x56c] ss:$56 sps:$4 sm:$0xff]  }
 0x7be   : > { %14058 = vmatprep.subr.bf16.mxu1 %v17905_v60 }
 0x7c0   : > { %14086 = vmatpush1.bf16.msra.mxu0 %v17900_v0 }
 0x7c1   : > { %14059 = vmatpush1.bf16.msra.mxu1 %v17903_v37  ;;  %14087 = vmatprep.subr.bf16.mxu0 %v17908_v3  ;;  %v17942_v37 = vld [vmem:[%s19313_s0 + $0x6b0] ss:$56 sps:$4 sm:$0xff]  }
 0x7c2   : > { %14233 = vmatprep.subr.bf16.mxu1 %v17911_v50 }
 0x7c4   : > { %14061 = vmatmul.mubr.bf16.vlgmr.msra.gmra.mrb[48].mxu1 %v20703_v2  ;;  %14088 = vmatpush1.bf16.msra.mxu0 %v17906_v62  ;;  %v17950_v62 = vld [vmem:[%s19313_s0 + $0x724] ss:$56 sps:$4 sm:$0xff]  }
 0x7c5   : > { %14234 = vmatpush1.bf16.msra.mxu1 %v17909_v39  ;;  %14265 = vmatprep.mubr.bf16.mxu1 %v20502_v23 }
 0x7c6   : > { %14089 = vmatprep.subr.bf16.mxu0 %v17914_v27  ;;  %14235 = vmatprep.subr.bf16.mxu1 %v17917_v7  ;;  %v17948_v27 = vld [vmem:[%s19313_s0 + $0x720] ss:$56 sps:$4 sm:$0xff]  }
 0x7c7   : > { %v17951_v7 = vld [vmem:[%s19313_s0 + $0x338] ss:$56 sps:$4 sm:$0xff]  }
 0x7c8   : > { %14090 = vmatpush1.bf16.msra.mxu0 %v17912_v34  ;;  %v17956_v34 = vld [vmem:[%s19313_s0 + $0x794] ss:$56 sps:$4 sm:$0xff]  }
 0x7c9   : > { %14236 = vmatpush1.bf16.msra.mxu1 %v17915_v40  ;;  %14091 = vmatprep.subr.bf16.mxu0 %v17920_v61  ;;  %v17959_v40 = vld [vmem:[%s19313_s0 + $0x3ac] ss:$56 sps:$4 sm:$0xff]   ;;  %v17954_v61 = vld [vmem:[%s19313_s0 + $0x790] ss:$56 sps:$4 sm:$0xff]  }
 0x7ca   : > { %14237 = vmatprep.subr.bf16.mxu1 %v17923_v14  ;;  %v17957_v14 = vld [vmem:[%s19313_s0 + $0x3a8] ss:$56 sps:$4 sm:$0xff]  }
 0x7cc   : > { %14092 = vmatpush1.bf16.msra.mxu0 %v17918_v31  ;;  %v17962_v31 = vld [vmem:[%s19313_s0 + $0x804] ss:$56 sps:$4 sm:$0xff]  }
 0x7cd   : > { %14238 = vmatpush1.bf16.msra.mxu1 %v17921_v21  ;;  %14093 = vmatprep.subr.bf16.mxu0 %v17926_v4  ;;  %v17965_v21 = vld [vmem:[%s19313_s0 + $0x41c] ss:$56 sps:$4 sm:$0xff]   ;;  %v17960_v4 = vld [vmem:[%s19313_s0 + $0x800] ss:$56 sps:$4 sm:$0xff]  }
 0x7ce   : > { %14239 = vmatprep.subr.bf16.mxu1 %v17929_v36  ;;  %v17963_v36 = vld [vmem:[%s19313_s0 + $0x418] ss:$56 sps:$4 sm:$0xff]  }
 0x7d0   : > { %14094 = vmatpush1.bf16.msra.mxu0 %v17924_v28  ;;  %v17968_v28 = vld [vmem:[%s19313_s0 + $0x874] ss:$56 sps:$4 sm:$0xff]  }
 0x7d1   : > { %14240 = vmatpush1.bf16.msra.mxu1 %v17927_v42  ;;  %14095 = vmatprep.subr.bf16.mxu0 %v17932_v1  ;;  %v17971_v42 = vld [vmem:[%s19313_s0 + $0x48c] ss:$56 sps:$4 sm:$0xff]   ;;  %v17966_v1 = vld [vmem:[%s19313_s0 + $0x870] ss:$56 sps:$4 sm:$0xff]  }
 0x7d2   : > { %14241 = vmatprep.subr.bf16.mxu1 %v17935_v54  ;;  %v17969_v54 = vld [vmem:[%s19313_s0 + $0x488] ss:$56 sps:$4 sm:$0xff]  }
 0x7d4   : > { %14096 = vmatpush1.bf16.msra.mxu0 %v17930_v44  ;;  %v17974_v44 = vld [vmem:[%s19313_s0 + $0x8e4] ss:$56 sps:$4 sm:$0xff]  }
 0x7d5   : > { %14242 = vmatpush1.bf16.msra.mxu1 %v17933_v6  ;;  %14097 = vmatprep.subr.bf16.mxu0 %v17938_v56  ;;  %v17977_v6 = vld [vmem:[%s19313_s0 + $0x4fc] ss:$56 sps:$4 sm:$0xff]   ;;  %v17972_v56 = vld [vmem:[%s19313_s0 + $0x8e0] ss:$56 sps:$4 sm:$0xff]  }
 0x7d6   : > { %14243 = vmatprep.subr.bf16.mxu1 %v17941_v48  ;;  %v17980_v48 = vld [vmem:[%s19313_s0 + $0x954] ss:$56 sps:$4 sm:$0xff]  }
 0x7d7   : > { %v13816_v32 = vpop.f32.mrb[36].mxu1 }
 0x7d8   : > { %v21203_v60 = vadd.f32 %v13816_v32, %v13776_v16  ;;  %v13818_v0 = vpop.f32.mrb[37].mxu1  ;;  %14098 = vmatpush1.bf16.msra.mxu0 %v17936_v9  ;;  %v17978_v9 = vld [vmem:[%s19313_s0 + $0x950] ss:$56 sps:$4 sm:$0xff]  }
 0x7d9   : > { %v13819_v3 = vadd.f32 %v13818_v0, %v13778_v17  ;;  %v13820_v50 = vpop.f32.mrb[38].mxu1  ;;  %14244 = vmatpush1.bf16.msra.mxu1 %v17939_v24  ;;  %14099 = vmatprep.subr.bf16.mxu0 %v17944_v20  ;;  %v17981_v24 = vld [vmem:[%s19313_s0 + $0x568] ss:$56 sps:$4 sm:$0xff]   ;;  %v17986_v20 = vld [vmem:[%s19313_s0 + $0x9c4] ss:$56 sps:$4 sm:$0xff]  }
 0x7da   : > { %v13821_v39 = vpop.f32.mrb[39].mxu1  ;;  %14245 = vmatprep.subr.bf16.mxu1 %v17947_v47  ;;  %v17989_v47 = vld [vmem:[%s19313_s0 + $0x5dc] ss:$56 sps:$4 sm:$0xff]   ;;  %v17984_v50 = vld [vmem:[%s19313_s0 + $0x9c0] ss:$56 sps:$4 sm:$0xff]  }
 0x7db   : > { %v17992_v39 = vld [vmem:[%s19313_s0 + $0xa34] ss:$56 sps:$4 sm:$0xff]  }
 0x7dc   : > { %14100 = vmatpush1.bf16.msra.mxu0 %v17942_v37 }
 0x7dd   : > { %14246 = vmatpush1.bf16.msra.mxu1 %v17945_v35  ;;  %14110 = vmatprep.subr.bf16.mxu0 %v17950_v62  ;;  %v17987_v62 = vld [vmem:[%s19313_s0 + $0x5d8] ss:$56 sps:$4 sm:$0xff]  }
 0x7de   : > { %14247 = vmatprep.subr.bf16.mxu1 %v17953_v57  ;;  %v17990_v57 = vld [vmem:[%s19313_s0 + $0xa30] ss:$56 sps:$4 sm:$0xff]  }
 0x7df   : > { %14102 = vmatmul.mubr.bf16.vlgmr.msra.gmra.mrb[48].mxu0 %v20576_v5 }
 0x7e0   : > { %14111 = vmatpush1.bf16.msra.mxu0 %v17948_v27  ;;  %14142 = vmatprep.mubr.bf16.mxu0 %v20544_v33  ;;  %v17998_v27 = vld [vmem:[%s19313_s0 + $0xaa4] ss:$56 sps:$4 sm:$0xff]  }
 0x7e1   : > { %14248 = vmatpush1.bf16.msra.mxu1 %v17951_v7  ;;  %14112 = vmatprep.subr.bf16.mxu0 %v17956_v34  ;;  %v18001_v7 = vld [vmem:[%s19313_s0 + $0x6bc] ss:$56 sps:$4 sm:$0xff]   ;;  %v17996_v34 = vld [vmem:[%s19313_s0 + $0xaa0] ss:$56 sps:$4 sm:$0xff]  }
 0x7e2   : > { %14249 = vmatprep.subr.bf16.mxu1 %v17959_v40  ;;  %v17999_v40 = vld [vmem:[%s19313_s0 + $0x6b8] ss:$56 sps:$4 sm:$0xff]  }
 0x7e4   : > { %14113 = vmatpush1.bf16.msra.mxu0 %v17954_v61  ;;  %v18004_v61 = vld [vmem:[%s19313_s0 + $0xb14] ss:$56 sps:$4 sm:$0xff]  }
 0x7e5   : > { %14250 = vmatpush1.bf16.msra.mxu1 %v17957_v14  ;;  %14114 = vmatprep.subr.bf16.mxu0 %v17962_v31  ;;  %v18007_v14 = vld [vmem:[%s19313_s0 + $0x72c] ss:$56 sps:$4 sm:$0xff]   ;;  %v18002_v31 = vld [vmem:[%s19313_s0 + $0xb10] ss:$56 sps:$4 sm:$0xff]  }
 0x7e6   : > { %14251 = vmatprep.subr.bf16.mxu1 %v17965_v21  ;;  %v18005_v21 = vld [vmem:[%s19313_s0 + $0x728] ss:$56 sps:$4 sm:$0xff]  }
 0x7e8   : > { %14115 = vmatpush1.bf16.msra.mxu0 %v17960_v4  ;;  %v18010_v4 = vld [vmem:[%s19313_s0 + $0xb84] ss:$56 sps:$4 sm:$0xff]  }
 0x7e9   : > { %14252 = vmatpush1.bf16.msra.mxu1 %v17963_v36  ;;  %14116 = vmatprep.subr.bf16.mxu0 %v17968_v28  ;;  %v18013_v36 = vld [vmem:[%s19313_s0 + $0x79c] ss:$56 sps:$4 sm:$0xff]   ;;  %v18008_v28 = vld [vmem:[%s19313_s0 + $0xb80] ss:$56 sps:$4 sm:$0xff]  }
 0x7ea   : > { %14253 = vmatprep.subr.bf16.mxu1 %v17971_v42  ;;  %v18011_v42 = vld [vmem:[%s19313_s0 + $0x798] ss:$56 sps:$4 sm:$0xff]  }
 0x7ec   : > { %14117 = vmatpush1.bf16.msra.mxu0 %v17966_v1  ;;  %v18016_v1 = vld [vmem:[%s19313_s0 + $0xbf4] ss:$56 sps:$4 sm:$0xff]  }
 0x7ed   : > { %14254 = vmatpush1.bf16.msra.mxu1 %v17969_v54  ;;  %14118 = vmatprep.subr.bf16.mxu0 %v17974_v44  ;;  %v18019_v54 = vld [vmem:[%s19313_s0 + $0x80c] ss:$56 sps:$4 sm:$0xff]   ;;  %v18014_v44 = vld [vmem:[%s19313_s0 + $0xbf0] ss:$56 sps:$4 sm:$0xff]  }
 0x7ee   : > { %14255 = vmatprep.subr.bf16.mxu1 %v17977_v6  ;;  %v18017_v6 = vld [vmem:[%s19313_s0 + $0x808] ss:$56 sps:$4 sm:$0xff]  }
 0x7f0   : > { %14119 = vmatpush1.bf16.msra.mxu0 %v17972_v56  ;;  %v18022_v56 = vld [vmem:[%s19313_s0 + $0xc64] ss:$56 sps:$4 sm:$0xff]  }
 0x7f1   : > { %14256 = vmatpush1.bf16.msra.mxu1 %v17975_v51  ;;  %14120 = vmatprep.subr.bf16.mxu0 %v17980_v48  ;;  %v18025_v51 = vld [vmem:[%s19313_s0 + $0x87c] ss:$56 sps:$4 sm:$0xff]   ;;  %v18020_v48 = vld [vmem:[%s19313_s0 + $0xc60] ss:$56 sps:$4 sm:$0xff]  }
 0x7f2   : > { %v13857_v16 = vpop.f32.mrb[36].mxu0  ;;  %14257 = vmatprep.subr.bf16.mxu1 %v17983_v49  ;;  %v18023_v49 = vld [vmem:[%s19313_s0 + $0x878] ss:$56 sps:$4 sm:$0xff]  }
 0x7f3   : > { %v21236_v17 = vadd.f32 %v13857_v16, %v21203_v60  ;;  %v13859_v32 = vpop.f32.mrb[37].mxu0  ;;  %v17995_v60 = vld [vmem:[%s19313_s0 + $0x64c] ss:$56 sps:$4 sm:$0xff]   ;;  %v18029_v16 = vld [vmem:[%s19313_s0 + $0x8e8] ss:$56 sps:$4 sm:$0xff]  }
 0x7f4   : > { %v21238_v0 = vadd.f32 %v13859_v32, %v13819_v3  ;;  %v13861_v37 = vpop.f32.mrb[38].mxu0  ;;  %14121 = vmatpush1.bf16.msra.mxu0 %v17978_v9  ;;  %v17993_v3 = vld [vmem:[%s19313_s0 + $0x648] ss:$56 sps:$4 sm:$0xff]   ;;  %v18028_v9 = vld [vmem:[%s19313_s0 + $0xcd4] ss:$56 sps:$4 sm:$0xff]  }
 0x7f5   : > { %v13862_v35 = vpop.f32.mrb[39].mxu0  ;;  %14258 = vmatpush1.bf16.msra.mxu1 %v17981_v24  ;;  %14122 = vmatprep.subr.bf16.mxu0 %v17986_v20  ;;  %v18031_v24 = vld [vmem:[%s19313_s0 + $0x8ec] ss:$56 sps:$4 sm:$0xff]   ;;  %v18026_v20 = vld [vmem:[%s19313_s0 + $0xcd0] ss:$56 sps:$4 sm:$0xff]  }
 0x7f6   : > { %14259 = vmatprep.subr.bf16.mxu1 %v17989_v47  ;;  %v18034_v47 = vld [vmem:[%s19313_s0 + $0xd44] ss:$56 sps:$4 sm:$0xff]   ;;  %v18032_v37 = vld [vmem:[%s19313_s0 + $0xd40] ss:$56 sps:$4 sm:$0xff]   ;;  %v18040_v35 = vld [vmem:[%s19313_s0 + $0xdb4] ss:$56 sps:$4 sm:$0xff]  }
 0x7f7   : > { %v18037_v32 = vld [vmem:[%s19313_s0 + $0x95c] ss:$56 sps:$4 sm:$0xff]  }
 0x7f8   : > { %14123 = vmatpush1.bf16.msra.mxu0 %v17984_v50  ;;  %v18035_v50 = vld [vmem:[%s19313_s0 + $0x958] ss:$56 sps:$4 sm:$0xff]  }
 0x7f9   : > { %14260 = vmatpush1.bf16.msra.mxu1 %v17987_v62  ;;  %14124 = vmatprep.subr.bf16.mxu0 %v17992_v39  ;;  %v18043_v62 = vld [vmem:[%s19313_s0 + $0x9cc] ss:$56 sps:$4 sm:$0xff]  }
 0x7fa   : > { %14261 = vmatprep.subr.bf16.mxu1 %v17995_v60 }
 0x7fc   : > { %14125 = vmatpush1.bf16.msra.mxu0 %v17990_v57 }
 0x7fd   : > { %14262 = vmatpush1.bf16.msra.mxu1 %v17993_v3  ;;  %14126 = vmatprep.subr.bf16.mxu0 %v17998_v27  ;;  %v18038_v3 = vld [vmem:[%s19313_s0 + $0xdb0] ss:$56 sps:$4 sm:$0xff]  }
 0x7fe   : > { %14263 = vmatprep.subr.bf16.mxu1 %v18001_v7 }
 0x800   : > { %14127 = vmatpush1.bf16.msra.mxu0 %v17996_v34  ;;  %v18041_v34 = vld [vmem:[%s19313_s0 + $0x9c8] ss:$56 sps:$4 sm:$0xff]  }
 0x801   : > { %14264 = vmatpush1.bf16.msra.mxu1 %v17999_v40  ;;  %14128 = vmatprep.subr.bf16.mxu0 %v18004_v61  ;;  %v18046_v40 = vld [vmem:[%s19313_s0 + $0xe24] ss:$56 sps:$4 sm:$0xff]  }
 0x802   : > { %14274 = vmatprep.subr.bf16.mxu1 %v18007_v14  ;;  %v18044_v14 = vld [vmem:[%s19313_s0 + $0xe20] ss:$56 sps:$4 sm:$0xff]  }
 0x804   : > { %14129 = vmatpush1.bf16.msra.mxu0 %v18002_v31  ;;  %14266 = vmatmul.mubr.bf16.vlgmr.msra.gmra.mrb[52].mxu1 %v20576_v5  ;;  %v18052_v31 = vld [vmem:[%s19313_s0 + $0xe94] ss:$56 sps:$4 sm:$0xff]  }
 0x805   : > { %14275 = vmatpush1.bf16.msra.mxu1 %v18005_v21  ;;  %14306 = vmatprep.mubr.bf16.mxu1 %v20544_v33  ;;  %v18055_v21 = vld [vmem:[%s19313_s0 + $0xaac] ss:$56 sps:$4 sm:$0xff]  }
 0x806   : > { %14130 = vmatprep.subr.bf16.mxu0 %v18010_v4  ;;  %14276 = vmatprep.subr.bf16.mxu1 %v18013_v36  ;;  %v18050_v4 = vld [vmem:[%s19313_s0 + $0xe90] ss:$56 sps:$4 sm:$0xff]  }
 0x807   : > { %v18053_v36 = vld [vmem:[%s19313_s0 + $0xaa8] ss:$56 sps:$4 sm:$0xff]  }
 0x808   : > { %14131 = vmatpush1.bf16.msra.mxu0 %v18008_v28  ;;  %v18058_v28 = vld [vmem:[%s19313_s0 + $0xf04] ss:$56 sps:$4 sm:$0xff]  }
 0x809   : > { %14277 = vmatpush1.bf16.msra.mxu1 %v18011_v42  ;;  %14132 = vmatprep.subr.bf16.mxu0 %v18016_v1  ;;  %v18061_v42 = vld [vmem:[%s19313_s0 + $0xb1c] ss:$56 sps:$4 sm:$0xff]   ;;  %v18056_v1 = vld [vmem:[%s19313_s0 + $0xf00] ss:$56 sps:$4 sm:$0xff]  }
 0x80a   : > { %14278 = vmatprep.subr.bf16.mxu1 %v18019_v54  ;;  %v18059_v54 = vld [vmem:[%s19313_s0 + $0xb18] ss:$56 sps:$4 sm:$0xff]  }
 0x80c   : > { %14133 = vmatpush1.bf16.msra.mxu0 %v18014_v44  ;;  %v18064_v44 = vld [vmem:[%s19313_s0 + $0xf74] ss:$56 sps:$4 sm:$0xff]  }
 0x80d   : > { %14279 = vmatpush1.bf16.msra.mxu1 %v18017_v6  ;;  %14134 = vmatprep.subr.bf16.mxu0 %v18022_v56  ;;  %v18067_v6 = vld [vmem:[%s19313_s0 + $0xb8c] ss:$56 sps:$4 sm:$0xff]   ;;  %v18062_v56 = vld [vmem:[%s19313_s0 + $0xf70] ss:$56 sps:$4 sm:$0xff]  }
 0x80e   : > { %14280 = vmatprep.subr.bf16.mxu1 %v18025_v51  ;;  %v18065_v51 = vld [vmem:[%s19313_s0 + $0xb88] ss:$56 sps:$4 sm:$0xff]  }
 0x810   : > { %14135 = vmatpush1.bf16.msra.mxu0 %v18020_v48  ;;  %v18070_v48 = vld [vmem:[%s19313_s0 + $0xfe4] ss:$56 sps:$4 sm:$0xff]  }
 0x811   : > { %14281 = vmatpush1.bf16.msra.mxu1 %v18023_v49  ;;  %14136 = vmatprep.subr.bf16.mxu0 %v18028_v9  ;;  %v18073_v49 = vld [vmem:[%s19313_s0 + $0xbfc] ss:$56 sps:$4 sm:$0xff]   ;;  %v18068_v9 = vld [vmem:[%s19313_s0 + $0xfe0] ss:$56 sps:$4 sm:$0xff]  }
 0x812   : > { %14282 = vmatprep.subr.bf16.mxu1 %v18031_v24  ;;  %v18071_v24 = vld [vmem:[%s19313_s0 + $0xbf8] ss:$56 sps:$4 sm:$0xff]  }
 0x814   : > { %14137 = vmatpush1.bf16.msra.mxu0 %v18026_v20  ;;  %v18076_v20 = vld [vmem:[%s19313_s0 + $0x1054] ss:$56 sps:$4 sm:$0xff]  }
 0x815   : > { %14283 = vmatpush1.bf16.msra.mxu1 %v18029_v16  ;;  %14138 = vmatprep.subr.bf16.mxu0 %v18034_v47  ;;  %v18079_v16 = vld [vmem:[%s19313_s0 + $0xc6c] ss:$56 sps:$4 sm:$0xff]   ;;  %v18074_v47 = vld [vmem:[%s19313_s0 + $0x1050] ss:$56 sps:$4 sm:$0xff]  }
 0x816   : > { %14284 = vmatprep.subr.bf16.mxu1 %v18037_v32  ;;  %v18077_v32 = vld [vmem:[%s19313_s0 + $0xc68] ss:$56 sps:$4 sm:$0xff]  }
 0x817   : > { %v13898_v39 = vpop.f32.mrb[40].mxu1 }
 0x818   : > { %v21279_v60 = vadd.f32 %v13898_v39, %v21236_v17  ;;  %v13900_v57 = vpop.f32.mrb[41].mxu1  ;;  %14139 = vmatpush1.bf16.msra.mxu0 %v18032_v37  ;;  %v18049_v17 = vld [vmem:[%s19313_s0 + $0xa3c] ss:$56 sps:$4 sm:$0xff]  }
 0x819   : > { %v21283_v27 = vadd.f32 %v13900_v57, %v21238_v0  ;;  %v13902_v7 = vpop.f32.mrb[42].mxu1  ;;  %14285 = vmatpush1.bf16.msra.mxu1 %v18035_v50  ;;  %14140 = vmatprep.subr.bf16.mxu0 %v18040_v35  ;;  %v18047_v0 = vld [vmem:[%s19313_s0 + $0xa38] ss:$56 sps:$4 sm:$0xff]   ;;  %v18082_v37 = vld [vmem:[%s19313_s0 + $0x10c4] ss:$56 sps:$4 sm:$0xff]  }
 0x81a   : > { %v13903_v61 = vpop.f32.mrb[43].mxu1  ;;  %14286 = vmatprep.subr.bf16.mxu1 %v18043_v62  ;;  %v18085_v35 = vld [vmem:[%s19313_s0 + $0xcdc] ss:$56 sps:$4 sm:$0xff]   ;;  %v18080_v57 = vld [vmem:[%s19313_s0 + $0x10c0] ss:$56 sps:$4 sm:$0xff]  }
 0x81b   : > { %v18083_v7 = vld [vmem:[%s19313_s0 + $0xcd8] ss:$56 sps:$4 sm:$0xff]  }
 0x81c   : > { %14141 = vmatpush1.bf16.msra.mxu0 %v18038_v3  ;;  %v18086_v61 = vld [vmem:[%s19313_s0 + $0x1130] ss:$56 sps:$4 sm:$0xff]  }
 0x81d   : > { %14287 = vmatpush1.bf16.msra.mxu1 %v18041_v34  ;;  %14151 = vmatprep.subr.bf16.mxu0 %v18046_v40  ;;  %v18088_v34 = vld [vmem:[%s19313_s0 + $0x1134] ss:$56 sps:$4 sm:$0xff]  }
 0x81e   : > { %14288 = vmatprep.subr.bf16.mxu1 %v18049_v17  ;;  %v18091_v40 = vld [vmem:[%s19313_s0 + $0xd4c] ss:$56 sps:$4 sm:$0xff]   ;;  %v18089_v17 = vld [vmem:[%s19313_s0 + $0xd48] ss:$56 sps:$4 sm:$0xff]  }
 0x81f   : > { %14143 = vmatmul.mubr.bf16.vlgmr.msra.gmra.mrb[48].mxu0 %v20620_v53 }
 0x820   : > { %14152 = vmatpush1.bf16.msra.mxu0 %v18044_v14  ;;  %14183 = vmatprep.mubr.bf16.mxu0 %v20670_v25  ;;  %v18094_v14 = vld [vmem:[%s19313_s0 + $0x11a4] ss:$56 sps:$4 sm:$0xff]  }
 0x821   : > { %14289 = vmatpush1.bf16.msra.mxu1 %v18047_v0  ;;  %14153 = vmatprep.subr.bf16.mxu0 %v18052_v31  ;;  %v18097_v0 = vld [vmem:[%s19313_s0 + $0xdbc] ss:$56 sps:$4 sm:$0xff]   ;;  %v18092_v31 = vld [vmem:[%s19313_s0 + $0x11a0] ss:$56 sps:$4 sm:$0xff]  }
 0x822   : > { %14290 = vmatprep.subr.bf16.mxu1 %v18055_v21  ;;  %v18095_v21 = vld [vmem:[%s19313_s0 + $0xdb8] ss:$56 sps:$4 sm:$0xff]  }
 0x824   : > { %14154 = vmatpush1.bf16.msra.mxu0 %v18050_v4  ;;  %v18100_v4 = vld [vmem:[%s19313_s0 + $0x1214] ss:$56 sps:$4 sm:$0xff]  }
 0x825   : > { %14291 = vmatpush1.bf16.msra.mxu1 %v18053_v36  ;;  %14155 = vmatprep.subr.bf16.mxu0 %v18058_v28  ;;  %v18103_v36 = vld [vmem:[%s19313_s0 + $0xe2c] ss:$56 sps:$4 sm:$0xff]   ;;  %v18098_v28 = vld [vmem:[%s19313_s0 + $0x1210] ss:$56 sps:$4 sm:$0xff]  }
 0x826   : > { %14292 = vmatprep.subr.bf16.mxu1 %v18061_v42  ;;  %v18101_v42 = vld [vmem:[%s19313_s0 + $0xe28] ss:$56 sps:$4 sm:$0xff]  }
 0x828   : > { %14156 = vmatpush1.bf16.msra.mxu0 %v18056_v1  ;;  %v18106_v1 = vld [vmem:[%s19313_s0 + $0x1284] ss:$56 sps:$4 sm:$0xff]  }
 0x829   : > { %14293 = vmatpush1.bf16.msra.mxu1 %v18059_v54  ;;  %14157 = vmatprep.subr.bf16.mxu0 %v18064_v44  ;;  %v18109_v54 = vld [vmem:[%s19313_s0 + $0xe9c] ss:$56 sps:$4 sm:$0xff]   ;;  %v18104_v44 = vld [vmem:[%s19313_s0 + $0x1280] ss:$56 sps:$4 sm:$0xff]  }
 0x82a   : > { %14294 = vmatprep.subr.bf16.mxu1 %v18067_v6  ;;  %v18107_v6 = vld [vmem:[%s19313_s0 + $0xe98] ss:$56 sps:$4 sm:$0xff]  }
 0x82c   : > { %14158 = vmatpush1.bf16.msra.mxu0 %v18062_v56  ;;  %v18112_v56 = vld [vmem:[%s19313_s0 + $0x12f4] ss:$56 sps:$4 sm:$0xff]  }
 0x82d   : > { %14295 = vmatpush1.bf16.msra.mxu1 %v18065_v51  ;;  %14159 = vmatprep.subr.bf16.mxu0 %v18070_v48  ;;  %v18115_v51 = vld [vmem:[%s19313_s0 + $0xf0c] ss:$56 sps:$4 sm:$0xff]   ;;  %v18110_v48 = vld [vmem:[%s19313_s0 + $0x12f0] ss:$56 sps:$4 sm:$0xff]  }
 0x82e   : > { %14296 = vmatprep.subr.bf16.mxu1 %v18073_v49  ;;  %v18113_v49 = vld [vmem:[%s19313_s0 + $0xf08] ss:$56 sps:$4 sm:$0xff]  }
 0x830   : > { %14160 = vmatpush1.bf16.msra.mxu0 %v18068_v9  ;;  %v18118_v9 = vld [vmem:[%s19313_s0 + $0x1364] ss:$56 sps:$4 sm:$0xff]  }
 0x831   : > { %14297 = vmatpush1.bf16.msra.mxu1 %v18071_v24  ;;  %14161 = vmatprep.subr.bf16.mxu0 %v18076_v20  ;;  %v18121_v24 = vld [vmem:[%s19313_s0 + $0xf7c] ss:$56 sps:$4 sm:$0xff]   ;;  %v18116_v20 = vld [vmem:[%s19313_s0 + $0x1360] ss:$56 sps:$4 sm:$0xff]  }
 0x832   : > { %v21313_v50 = vpop.f32.mrb[40].mxu0  ;;  %14298 = vmatprep.subr.bf16.mxu1 %v18079_v16  ;;  %v18119_v16 = vld [vmem:[%s19313_s0 + $0xf78] ss:$56 sps:$4 sm:$0xff]  }
 0x833   : > { %v21316_v62 = vpop.f32.mrb[41].mxu0 }
 0x834   : > { %v13943_v39 = vpop.f32.mrb[42].mxu0  ;;  %14162 = vmatpush1.bf16.msra.mxu0 %v18074_v47  ;;  %v18124_v47 = vld [vmem:[%s19313_s0 + $0x13d4] ss:$56 sps:$4 sm:$0xff]  }
 0x835   : > { %v13944_v3 = vpop.f32.mrb[43].mxu0  ;;  %14299 = vmatpush1.bf16.msra.mxu1 %v18077_v32  ;;  %14163 = vmatprep.subr.bf16.mxu0 %v18082_v37  ;;  %v18127_v32 = vld [vmem:[%s19313_s0 + $0xfec] ss:$56 sps:$4 sm:$0xff]   ;;  %v18122_v37 = vld [vmem:[%s19313_s0 + $0x13d0] ss:$56 sps:$4 sm:$0xff]  }
 0x836   : > { %14300 = vmatprep.subr.bf16.mxu1 %v18085_v35  ;;  %v18125_v35 = vld [vmem:[%s19313_s0 + $0xfe8] ss:$56 sps:$4 sm:$0xff]   ;;  %v18130_v39 = vld [vmem:[%s19313_s0 + $0x1444] ss:$56 sps:$4 sm:$0xff]  }
 0x837   : > { %v18133_v3 = vld [vmem:[%s19313_s0 + $0x105c] ss:$56 sps:$4 sm:$0xff]  }
 0x838   : > { %14164 = vmatpush1.bf16.msra.mxu0 %v18080_v57  ;;  %v8890_v57 = vrot.slane %v21190_v46, %v19484_v45 }
 0x839   : > { %14301 = vmatpush1.bf16.msra.mxu1 %v18083_v7  ;;  %14165 = vmatprep.subr.bf16.mxu0 %v18088_v34  ;;  %v8894_v7 = vrot.slane %v21190_v46, %v20195_v19  ;;  %v18128_v34 = vld [vmem:[%s19313_s0 + $0x1440] ss:$56 sps:$4 sm:$0xff]   ;;  %v18134_v46 = vld [vmem:[%s19313_s0 + $0x14b0] ss:$56 sps:$4 sm:$0xff]  }
 0x83a   : > { %14302 = vmatprep.subr.bf16.mxu1 %v18091_v40  ;;  %v18131_v40 = vld [vmem:[%s19313_s0 + $0x1058] ss:$56 sps:$4 sm:$0xff]  }
 0x83c   : > { %14166 = vmatpush1.bf16.msra.mxu0 %v18086_v61  ;;  %v18136_v61 = vld [vmem:[%s19313_s0 + $0x14b4] ss:$56 sps:$4 sm:$0xff]  }
 0x83d   : > { %14303 = vmatpush1.bf16.msra.mxu1 %v18089_v17  ;;  %14167 = vmatprep.subr.bf16.mxu0 %v18094_v14  ;;  %v13940_v17 = vadd.f32 %v21313_v50, %v8890_v57  ;;  %v18139_v14 = vld [vmem:[%s19313_s0 + $0x10cc] ss:$56 sps:$4 sm:$0xff]   ;;  %v18137_v50 = vld [vmem:[%s19313_s0 + $0x10c8] ss:$56 sps:$4 sm:$0xff]   ;;  %v18167_v57 = vld [vmem:[%s19313_s0 + $0x12f8] ss:$56 sps:$4 sm:$0xff]  }
 0x83e   : > { %14304 = vmatprep.subr.bf16.mxu1 %v18097_v0  ;;  %v13942_v0 = vadd.f32 %v21316_v62, %v8894_v7  ;;  %v18145_v62 = vld [vmem:[%s19313_s0 + $0x113c] ss:$56 sps:$4 sm:$0xff]   ;;  %v18175_v7 = vld [vmem:[%s19313_s0 + $0x136c] ss:$56 sps:$4 sm:$0xff]  }
 0x840   : > { %14168 = vmatpush1.bf16.msra.mxu0 %v18092_v31 }
 0x841   : > { %14305 = vmatpush1.bf16.msra.mxu1 %v18095_v21  ;;  %14169 = vmatprep.subr.bf16.mxu0 %v18100_v4 }
 0x842   : > { %14315 = vmatprep.subr.bf16.mxu1 %v18103_v36 }
 0x844   : > { %14170 = vmatpush1.bf16.msra.mxu0 %v18098_v28  ;;  %14307 = vmatmul.mubr.bf16.vlgmr.msra.gmra.mrb[52].mxu1 %v20620_v53  ;;  %v18142_v28 = vld [vmem:[%s19313_s0 + $0x1524] ss:$56 sps:$4 sm:$0xff]  }
 0x845   : > { %14316 = vmatpush1.bf16.msra.mxu1 %v18101_v42  ;;  %14347 = vmatprep.mubr.bf16.mxu1 %v20670_v25 }
 0x846   : > { %14171 = vmatprep.subr.bf16.mxu0 %v18106_v1  ;;  %14317 = vmatprep.subr.bf16.mxu1 %v18109_v54  ;;  %v18140_v1 = vld [vmem:[%s19313_s0 + $0x1520] ss:$56 sps:$4 sm:$0xff]  }
 0x847   : > { %v18143_v54 = vld [vmem:[%s19313_s0 + $0x1138] ss:$56 sps:$4 sm:$0xff]  }
 0x848   : > { %14172 = vmatpush1.bf16.msra.mxu0 %v18104_v44  ;;  %v18148_v44 = vld [vmem:[%s19313_s0 + $0x1594] ss:$56 sps:$4 sm:$0xff]  }
 0x849   : > { %14318 = vmatpush1.bf16.msra.mxu1 %v18107_v6  ;;  %14173 = vmatprep.subr.bf16.mxu0 %v18112_v56  ;;  %v18151_v6 = vld [vmem:[%s19313_s0 + $0x11ac] ss:$56 sps:$4 sm:$0xff]   ;;  %v18146_v56 = vld [vmem:[%s19313_s0 + $0x1590] ss:$56 sps:$4 sm:$0xff]  }
 0x84a   : > { %14319 = vmatprep.subr.bf16.mxu1 %v18115_v51  ;;  %v18149_v51 = vld [vmem:[%s19313_s0 + $0x11a8] ss:$56 sps:$4 sm:$0xff]  }
 0x84c   : > { %14174 = vmatpush1.bf16.msra.mxu0 %v18110_v48  ;;  %v18154_v48 = vld [vmem:[%s19313_s0 + $0x1604] ss:$56 sps:$4 sm:$0xff]  }
 0x84d   : > { %14320 = vmatpush1.bf16.msra.mxu1 %v18113_v49  ;;  %14175 = vmatprep.subr.bf16.mxu0 %v18118_v9  ;;  %v18157_v49 = vld [vmem:[%s19313_s0 + $0x121c] ss:$56 sps:$4 sm:$0xff]   ;;  %v18152_v9 = vld [vmem:[%s19313_s0 + $0x1600] ss:$56 sps:$4 sm:$0xff]  }
 0x84e   : > { %14321 = vmatprep.subr.bf16.mxu1 %v18121_v24  ;;  %v18155_v24 = vld [vmem:[%s19313_s0 + $0x1218] ss:$56 sps:$4 sm:$0xff]  }
 0x850   : > { %14176 = vmatpush1.bf16.msra.mxu0 %v18116_v20  ;;  %v18160_v20 = vld [vmem:[%s19313_s0 + $0x1674] ss:$56 sps:$4 sm:$0xff]  }
 0x851   : > { %14322 = vmatpush1.bf16.msra.mxu1 %v18119_v16  ;;  %14177 = vmatprep.subr.bf16.mxu0 %v18124_v47  ;;  %v18163_v16 = vld [vmem:[%s19313_s0 + $0x128c] ss:$56 sps:$4 sm:$0xff]   ;;  %v18158_v47 = vld [vmem:[%s19313_s0 + $0x1670] ss:$56 sps:$4 sm:$0xff]  }
 0x852   : > { %14323 = vmatprep.subr.bf16.mxu1 %v18127_v32  ;;  %v18161_v32 = vld [vmem:[%s19313_s0 + $0x1288] ss:$56 sps:$4 sm:$0xff]  }
 0x854   : > { %14178 = vmatpush1.bf16.msra.mxu0 %v18122_v37  ;;  %v18166_v37 = vld [vmem:[%s19313_s0 + $0x16e4] ss:$56 sps:$4 sm:$0xff]  }
 0x855   : > { %14324 = vmatpush1.bf16.msra.mxu1 %v18125_v35  ;;  %14179 = vmatprep.subr.bf16.mxu0 %v18130_v39  ;;  %v18169_v35 = vld [vmem:[%s19313_s0 + $0x12fc] ss:$56 sps:$4 sm:$0xff]   ;;  %v18164_v39 = vld [vmem:[%s19313_s0 + $0x16e0] ss:$56 sps:$4 sm:$0xff]  }
 0x856   : > { %14325 = vmatprep.subr.bf16.mxu1 %v18133_v3  ;;  %v18172_v3 = vld [vmem:[%s19313_s0 + $0x1754] ss:$56 sps:$4 sm:$0xff]  }
 0x857   : > { %v13980_v31 = vpop.f32.mrb[44].mxu1 }
 0x858   : > { %v21362_v21 = vadd.f32 %v13980_v31, %v13940_v17  ;;  %v13982_v19 = vpop.f32.mrb[45].mxu1  ;;  %14180 = vmatpush1.bf16.msra.mxu0 %v18128_v34  ;;  %v18170_v34 = vld [vmem:[%s19313_s0 + $0x1750] ss:$56 sps:$4 sm:$0xff]  }
 0x859   : > { %v13983_v4 = vadd.f32 %v13982_v19, %v13942_v0  ;;  %v13984_v36 = vpop.f32.mrb[46].mxu1  ;;  %14326 = vmatpush1.bf16.msra.mxu1 %v18131_v40  ;;  %14181 = vmatprep.subr.bf16.mxu0 %v18136_v61  ;;  %v18173_v40 = vld [vmem:[%s19313_s0 + $0x1368] ss:$56 sps:$4 sm:$0xff]   ;;  %v18178_v61 = vld [vmem:[%s19313_s0 + $0x17c4] ss:$56 sps:$4 sm:$0xff]  }
 0x85a   : > { %v13985_v42 = vpop.f32.mrb[47].mxu1  ;;  %14327 = vmatprep.subr.bf16.mxu1 %v18139_v14  ;;  %v18181_v14 = vld [vmem:[%s19313_s0 + $0x13dc] ss:$56 sps:$4 sm:$0xff]   ;;  %v18176_v36 = vld [vmem:[%s19313_s0 + $0x17c0] ss:$56 sps:$4 sm:$0xff]  }
 0x85b   : > { %v18184_v42 = vld [vmem:[%s19313_s0 + $0x1834] ss:$56 sps:$4 sm:$0xff]  }
 0x85c   : > { %14182 = vmatpush1.bf16.msra.mxu0 %v18134_v46 }
 0x85d   : > { %14328 = vmatpush1.bf16.msra.mxu1 %v18137_v50  ;;  %14192 = vmatprep.subr.bf16.mxu0 %v18142_v28  ;;  %v18179_v28 = vld [vmem:[%s19313_s0 + $0x13d8] ss:$56 sps:$4 sm:$0xff]  }
 0x85e   : > { %14329 = vmatprep.subr.bf16.mxu1 %v18145_v62  ;;  %v18182_v62 = vld [vmem:[%s19313_s0 + $0x1830] ss:$56 sps:$4 sm:$0xff]  }
 0x85f   : > { %14184 = vmatmul.mubr.bf16.vlgmr.msra.gmra.mrb[48].mxu0 %v20673_v29 }
 0x860   : > { %14193 = vmatpush1.bf16.msra.mxu0 %v18140_v1  ;;  %14224 = vmatprep.mubr.bf16.mxu0 %v20700_v63  ;;  %v18190_v1 = vld [vmem:[%s19313_s0 + $0x18a4] ss:$56 sps:$4 sm:$0xff]  }
 0x861   : > { %14330 = vmatpush1.bf16.msra.mxu1 %v18143_v54  ;;  %14194 = vmatprep.subr.bf16.mxu0 %v18148_v44  ;;  %v18193_v54 = vld [vmem:[%s19313_s0 + $0x14bc] ss:$56 sps:$4 sm:$0xff]   ;;  %v18188_v44 = vld [vmem:[%s19313_s0 + $0x18a0] ss:$56 sps:$4 sm:$0xff]  }
 0x862   : > { %14331 = vmatprep.subr.bf16.mxu1 %v18151_v6  ;;  %v18191_v6 = vld [vmem:[%s19313_s0 + $0x14b8] ss:$56 sps:$4 sm:$0xff]  }
 0x864   : > { %14195 = vmatpush1.bf16.msra.mxu0 %v18146_v56  ;;  %v18196_v56 = vld [vmem:[%s19313_s0 + $0x1914] ss:$56 sps:$4 sm:$0xff]  }
 0x865   : > { %14332 = vmatpush1.bf16.msra.mxu1 %v18149_v51  ;;  %14196 = vmatprep.subr.bf16.mxu0 %v18154_v48  ;;  %v18199_v51 = vld [vmem:[%s19313_s0 + $0x152c] ss:$56 sps:$4 sm:$0xff]   ;;  %v18194_v48 = vld [vmem:[%s19313_s0 + $0x1910] ss:$56 sps:$4 sm:$0xff]  }
 0x866   : > { %14333 = vmatprep.subr.bf16.mxu1 %v18157_v49  ;;  %v18197_v49 = vld [vmem:[%s19313_s0 + $0x1528] ss:$56 sps:$4 sm:$0xff]  }
 0x868   : > { %14197 = vmatpush1.bf16.msra.mxu0 %v18152_v9  ;;  %v18202_v9 = vld [vmem:[%s19313_s0 + $0x1984] ss:$56 sps:$4 sm:$0xff]  }
 0x869   : > { %14334 = vmatpush1.bf16.msra.mxu1 %v18155_v24  ;;  %14198 = vmatprep.subr.bf16.mxu0 %v18160_v20  ;;  %v18205_v24 = vld [vmem:[%s19313_s0 + $0x159c] ss:$56 sps:$4 sm:$0xff]   ;;  %v18200_v20 = vld [vmem:[%s19313_s0 + $0x1980] ss:$56 sps:$4 sm:$0xff]  }
 0x86a   : > { %14335 = vmatprep.subr.bf16.mxu1 %v18163_v16  ;;  %v18203_v16 = vld [vmem:[%s19313_s0 + $0x1598] ss:$56 sps:$4 sm:$0xff]  }
 0x86c   : > { %14199 = vmatpush1.bf16.msra.mxu0 %v18158_v47  ;;  %v18208_v47 = vld [vmem:[%s19313_s0 + $0x19f4] ss:$56 sps:$4 sm:$0xff]  }
 0x86d   : > { %14336 = vmatpush1.bf16.msra.mxu1 %v18161_v32  ;;  %14200 = vmatprep.subr.bf16.mxu0 %v18166_v37  ;;  %v18211_v32 = vld [vmem:[%s19313_s0 + $0x160c] ss:$56 sps:$4 sm:$0xff]   ;;  %v18206_v37 = vld [vmem:[%s19313_s0 + $0x19f0] ss:$56 sps:$4 sm:$0xff]  }
 0x86e   : > { %14337 = vmatprep.subr.bf16.mxu1 %v18169_v35  ;;  %v18209_v35 = vld [vmem:[%s19313_s0 + $0x1608] ss:$56 sps:$4 sm:$0xff]  }
 0x870   : > { %14201 = vmatpush1.bf16.msra.mxu0 %v18164_v39  ;;  %v18214_v39 = vld [vmem:[%s19313_s0 + $0x1a64] ss:$56 sps:$4 sm:$0xff]  }
 0x871   : > { %14338 = vmatpush1.bf16.msra.mxu1 %v18167_v57  ;;  %14202 = vmatprep.subr.bf16.mxu0 %v18172_v3  ;;  %v18217_v57 = vld [vmem:[%s19313_s0 + $0x167c] ss:$56 sps:$4 sm:$0xff]   ;;  %v18212_v3 = vld [vmem:[%s19313_s0 + $0x1a60] ss:$56 sps:$4 sm:$0xff]  }
 0x872   : > { %v14021_v17 = vpop.f32.mrb[44].mxu0  ;;  %14339 = vmatprep.subr.bf16.mxu1 %v18175_v7  ;;  %v18215_v7 = vld [vmem:[%s19313_s0 + $0x1678] ss:$56 sps:$4 sm:$0xff]  }
 0x873   : > { %v21395_v0 = vadd.f32 %v14021_v17, %v21362_v21  ;;  %v14023_v31 = vpop.f32.mrb[45].mxu0  ;;  %v18187_v21 = vld [vmem:[%s19313_s0 + $0x144c] ss:$56 sps:$4 sm:$0xff]   ;;  %v18221_v17 = vld [vmem:[%s19313_s0 + $0x16e8] ss:$56 sps:$4 sm:$0xff]  }
 0x874   : > { %v21397_v19 = vadd.f32 %v14023_v31, %v13983_v4  ;;  %v14025_v46 = vpop.f32.mrb[46].mxu0  ;;  %14203 = vmatpush1.bf16.msra.mxu0 %v18170_v34  ;;  %v18185_v4 = vld [vmem:[%s19313_s0 + $0x1448] ss:$56 sps:$4 sm:$0xff]   ;;  %v18220_v34 = vld [vmem:[%s19313_s0 + $0x1ad4] ss:$56 sps:$4 sm:$0xff]  }
 0x875   : > { %v14026_v50 = vpop.f32.mrb[47].mxu0  ;;  %14340 = vmatpush1.bf16.msra.mxu1 %v18173_v40  ;;  %14204 = vmatprep.subr.bf16.mxu0 %v18178_v61  ;;  %v18223_v40 = vld [vmem:[%s19313_s0 + $0x16ec] ss:$56 sps:$4 sm:$0xff]   ;;  %v18218_v61 = vld [vmem:[%s19313_s0 + $0x1ad0] ss:$56 sps:$4 sm:$0xff]  }
 0x876   : > { %14341 = vmatprep.subr.bf16.mxu1 %v18181_v14  ;;  %v18226_v14 = vld [vmem:[%s19313_s0 + $0x1b44] ss:$56 sps:$4 sm:$0xff]   ;;  %v18224_v46 = vld [vmem:[%s19313_s0 + $0x1b40] ss:$56 sps:$4 sm:$0xff]   ;;  %v18232_v50 = vld [vmem:[%s19313_s0 + $0x1bb4] ss:$56 sps:$4 sm:$0xff]  }
 0x877   : > { %v18229_v31 = vld [vmem:[%s19313_s0 + $0x175c] ss:$56 sps:$4 sm:$0xff]  }
 0x878   : > { %14205 = vmatpush1.bf16.msra.mxu0 %v18176_v36  ;;  %v18227_v36 = vld [vmem:[%s19313_s0 + $0x1758] ss:$56 sps:$4 sm:$0xff]  }
 0x879   : > { %14342 = vmatpush1.bf16.msra.mxu1 %v18179_v28  ;;  %14206 = vmatprep.subr.bf16.mxu0 %v18184_v42  ;;  %v18235_v28 = vld [vmem:[%s19313_s0 + $0x17cc] ss:$56 sps:$4 sm:$0xff]  }
 0x87a   : > { %14343 = vmatprep.subr.bf16.mxu1 %v18187_v21 }
 0x87c   : > { %14207 = vmatpush1.bf16.msra.mxu0 %v18182_v62 }
 0x87d   : > { %14344 = vmatpush1.bf16.msra.mxu1 %v18185_v4  ;;  %14208 = vmatprep.subr.bf16.mxu0 %v18190_v1  ;;  %v18230_v4 = vld [vmem:[%s19313_s0 + $0x1bb0] ss:$56 sps:$4 sm:$0xff]  }
 0x87e   : > { %14345 = vmatprep.subr.bf16.mxu1 %v18193_v54 }
 0x880   : > { %14209 = vmatpush1.bf16.msra.mxu0 %v18188_v44  ;;  %v18233_v44 = vld [vmem:[%s19313_s0 + $0x17c8] ss:$56 sps:$4 sm:$0xff]  }
 0x881   : > { %14346 = vmatpush1.bf16.msra.mxu1 %v18191_v6  ;;  %14210 = vmatprep.subr.bf16.mxu0 %v18196_v56  ;;  %v18238_v6 = vld [vmem:[%s19313_s0 + $0x34] ss:$56 sps:$4 sm:$0xff]  }
 0x882   : > { %14356 = vmatprep.subr.bf16.mxu1 %v18199_v51  ;;  %v18241_v51 = vld [vmem:[%s19313_s0 + $0x183c] ss:$56 sps:$4 sm:$0xff]  }
 0x884   : > { %14211 = vmatpush1.bf16.msra.mxu0 %v18194_v48  ;;  %14348 = vmatmul.mubr.bf16.vlgmr.msra.gmra.mrb[52].mxu1 %v20673_v29  ;;  %v18244_v48 = vld [vmem:[%s19313_s0 + $0xa4] ss:$56 sps:$4 sm:$0xff]  }
 0x885   : > { %14357 = vmatpush1.bf16.msra.mxu1 %v18197_v49  ;;  %14388 = vmatprep.mubr.bf16.mxu1 %v20700_v63  ;;  %v18247_v49 = vld [vmem:[%s19313_s0 + $0x18ac] ss:$56 sps:$4 sm:$0xff]  }
 0x886   : > { %14212 = vmatprep.subr.bf16.mxu0 %v18202_v9  ;;  %14358 = vmatprep.subr.bf16.mxu1 %v18205_v24  ;;  %v18486_v9 = vld [vmem:[%s546_s29] sm:$0xff]  ;;  %s18732_s29 = scalar_lea.vmem %s14687_s24, 896 }
 0x887   : > { %v21451_v24 = vsub.f32 1.0, %v18486_v9  ;;  %v18281_v9 = vld [vmem:[%s19313_s0 + $0x1b48] ss:$56 sps:$4 sm:$0xff]   ;;  %p18733_p4 = scmp.ne.s32.totalorder %s14687_s24, %s18732_s29  ;;  %p18740_p12 = scmp.lt.s32.totalorder %s18732_s29, %s18732_s29 }
 0x888   : > { %14213 = vmatpush1.bf16.msra.mxu0 %v18200_v20  ;;  %v18242_v20 = vld [vmem:[%s19313_s0 + $0xa0] ss:$56 sps:$4 sm:$0xff]  }
 0x889   : > { %14359 = vmatpush1.bf16.msra.mxu1 %v18203_v16  ;;  %14214 = vmatprep.subr.bf16.mxu0 %v18208_v47  ;;  %v18245_v16 = vld [vmem:[%s19313_s0 + $0x18a8] ss:$56 sps:$4 sm:$0xff]   ;;  %v18250_v47 = vld [vmem:[%s19313_s0 + $0x114] ss:$56 sps:$4 sm:$0xff]   ;;  %p18734_p3 = pnand %p18733_p4, %p17030_p2  ;;  %p18741_p0 = por %p18740_p12, %p18739_p9 }
 0x88a   : > { %14360 = vmatprep.subr.bf16.mxu1 %v18211_v32  ;;  %v18253_v32 = vld [vmem:[%s19313_s0 + $0x191c] ss:$56 sps:$4 sm:$0xff]  }
 0x88b   : > { %p18735_p13 = pneg %p18734_p3 }
 0x88c   : > { %14215 = vmatpush1.bf16.msra.mxu0 %v18206_v37  ;;  %v14600_v37 = vrot.slane %v21451_v24, %v19415_v11 }
 0x88d   : > { %14361 = vmatpush1.bf16.msra.mxu1 %v18209_v35  ;;  %14216 = vmatprep.subr.bf16.mxu0 %v18214_v39  ;;  %v18248_v35 = vld [vmem:[%s19313_s0 + $0x110] ss:$56 sps:$4 sm:$0xff]   ;;  %p18742_p6 = pnand %p18741_p0, %p18735_p13 }
 0x88e   : > { %14362 = vmatprep.subr.bf16.mxu1 %v18217_v57  ;;  %v18256_v57 = vld [vmem:[%s19313_s0 + $0x184] ss:$56 sps:$4 sm:$0xff]  }
 0x890   : > { %14217 = vmatpush1.bf16.msra.mxu0 %v18212_v3 }
 0x891   : > { %14363 = vmatpush1.bf16.msra.mxu1 %v18215_v7  ;;  %14218 = vmatprep.subr.bf16.mxu0 %v18220_v34  ;;  %v18259_v7 = vld [vmem:[%s19313_s0 + $0x198c] ss:$56 sps:$4 sm:$0xff]  }
 0x892   : > { %14364 = vmatprep.subr.bf16.mxu1 %v18223_v40  ;;  %v18254_v40 = vld [vmem:[%s19313_s0 + $0x180] ss:$56 sps:$4 sm:$0xff]  }
 0x894   : > { %14219 = vmatpush1.bf16.msra.mxu0 %v18218_v61  ;;  %v18257_v61 = vld [vmem:[%s19313_s0 + $0x1988] ss:$56 sps:$4 sm:$0xff]  }
 0x895   : > { %14365 = vmatpush1.bf16.msra.mxu1 %v18221_v17  ;;  %14220 = vmatprep.subr.bf16.mxu0 %v18226_v14  ;;  %v18262_v17 = vld [vmem:[%s19313_s0 + $0x1f4] ss:$56 sps:$4 sm:$0xff]  }
 0x896   : > { %14366 = vmatprep.subr.bf16.mxu1 %v18229_v31  ;;  %v18265_v14 = vld [vmem:[%s19313_s0 + $0x19fc] ss:$56 sps:$4 sm:$0xff]   ;;  %v18260_v31 = vld [vmem:[%s19313_s0 + $0x1f0] ss:$56 sps:$4 sm:$0xff]  }
 0x897   : > { %v14062_v42 = vpop.f32.mrb[48].mxu1 }
 0x898   : > { %v21438_v21 = vadd.f32 %v14062_v42, %v21395_v0  ;;  %v14064_v62 = vpop.f32.mrb[49].mxu1  ;;  %14221 = vmatpush1.bf16.msra.mxu0 %v18224_v46  ;;  %v18236_v0 = vld [vmem:[%s19313_s0 + $0x30] ss:$56 sps:$4 sm:$0xff]  }
 0x899   : > { %v14065_v1 = vadd.f32 %v14064_v62, %v21397_v19  ;;  %v14066_v54 = vpop.f32.mrb[50].mxu1  ;;  %14367 = vmatpush1.bf16.msra.mxu1 %v18227_v36  ;;  %14222 = vmatprep.subr.bf16.mxu0 %v18232_v50  ;;  %v18239_v19 = vld [vmem:[%s19313_s0 + $0x1838] ss:$56 sps:$4 sm:$0xff]   ;;  %v18268_v36 = vld [vmem:[%s19313_s0 + $0x264] ss:$56 sps:$4 sm:$0xff]  }
 0x89a   : > { %v14067_v56 = vpop.f32.mrb[51].mxu1  ;;  %14368 = vmatprep.subr.bf16.mxu1 %v18235_v28  ;;  %v18263_v46 = vld [vmem:[%s19313_s0 + $0x19f8] ss:$56 sps:$4 sm:$0xff]   ;;  %v18271_v50 = vld [vmem:[%s19313_s0 + $0x1a6c] ss:$56 sps:$4 sm:$0xff]   ;;  %v18487_v54 = vld [vmem:[#allocation13] sm:$0xff] }
 0x89b   : > { %18455 = vtanh.f32 %v14065_v1  ;;  %v18266_v28 = vld [vmem:[%s19313_s0 + $0x260] ss:$56 sps:$4 sm:$0xff]   ;;  %v18274_v62 = vld [vmem:[%s19313_s0 + $0x2d4] ss:$56 sps:$4 sm:$0xff]  }
 0x89c   : > { %14223 = vmatpush1.bf16.msra.mxu0 %v18230_v4  ;;  %v18269_v42 = vld [vmem:[%s19313_s0 + $0x1a68] ss:$56 sps:$4 sm:$0xff]   ;;  %v18277_v1 = vld [vmem:[%s19313_s0 + $0x1adc] ss:$56 sps:$4 sm:$0xff]   ;;  %v18275_v56 = vld [vmem:[%s19313_s0 + $0x1ad8] ss:$56 sps:$4 sm:$0xff]  }
 0x89d   : > { %14369 = vmatpush1.bf16.msra.mxu1 %v18233_v44  ;;  %14397 = vmatprep.subr.bf16.mxu0 %v18238_v6  ;;  %v18272_v6 = vld [vmem:[%s19313_s0 + $0x2d0] ss:$56 sps:$4 sm:$0xff]  }
 0x89e   : > { %14370 = vmatprep.subr.bf16.mxu1 %v18241_v51  ;;  %v18280_v51 = vld [vmem:[%s19313_s0 + $0x344] ss:$56 sps:$4 sm:$0xff]  }
 0x89f   : > { %14225 = vmatmul.mubr.bf16.vlgmr.msra.gmra.mrb[48].mxu0 %v20703_v2 }
 0x8a0   : > { %14398 = vmatpush1.bf16.msra.mxu0 %v18236_v0  ;;  %14429 = vmatprep.mubr.bf16.mxu0 %v20502_v23  ;;  %v18251_v23 = vld [vmem:[%s19313_s0 + $0x1918] ss:$56 sps:$4 sm:$0xff]  }
 0x8a1   : > { %14371 = vmatpush1.bf16.msra.mxu1 %v18239_v19  ;;  %14399 = vmatprep.subr.bf16.mxu0 %v18244_v48  ;;  %v18283_v19 = vld [vmem:[%s19313_s0 + $0x1b4c] ss:$56 sps:$4 sm:$0xff]  }
 0x8a2   : > { %14372 = vmatprep.subr.bf16.mxu1 %v18247_v49  ;;  %v18278_v49 = vld [vmem:[%s19313_s0 + $0x340] ss:$56 sps:$4 sm:$0xff]  }
 0x8a4   : > { %14400 = vmatpush1.bf16.msra.mxu0 %v18242_v20  ;;  %v18286_v20 = vld [vmem:[%s19313_s0 + $0x3b4] ss:$56 sps:$4 sm:$0xff]  }
 0x8a5   : > { %v18456_v39 = vpop.eup %18455  ;;  %14373 = vmatpush1.bf16.msra.mxu1 %v18245_v16  ;;  %14401 = vmatprep.subr.bf16.mxu0 %v18250_v47  ;;  %v18289_v47 = vld [vmem:[%s19313_s0 + $0x1bbc] ss:$56 sps:$4 sm:$0xff]  }
 0x8a6   : > { %v14568_v3 = vmul.f32 1.442695, %v18456_v39  ;;  %14374 = vmatprep.subr.bf16.mxu1 %v18253_v32  ;;  %v21465_v34 = vmul.f32 %v18456_v39, %v14600_v37  ;;  %v18287_v32 = vld [vmem:[%s19313_s0 + $0x1bb8] ss:$56 sps:$4 sm:$0xff]  }
 0x8a7   : > { %v18293_v39 = vld [vmem:[%s19313_s0 + $0x490] ss:$56 sps:$4 sm:$0xff]  }
 0x8a8   : > { %18457 = vpow2.f32 %v14568_v3  ;;  %14402 = vmatpush1.bf16.msra.mxu0 %v18248_v35  ;;  %v18290_v35 = vld [vmem:[%s19313_s0 + $0x420] ss:$56 sps:$4 sm:$0xff]   ;;  %v18301_v3 = vld [vmem:[%s19313_s0 + $0x574] ss:$56 sps:$4 sm:$0xff]  }
 0x8a9   : > { %14375 = vmatpush1.bf16.msra.mxu1 %v18251_v23  ;;  %14403 = vmatprep.subr.bf16.mxu0 %v18256_v57  ;;  %v18298_v23 = vld [vmem:[%s19313_s0 + $0x504] ss:$56 sps:$4 sm:$0xff]   ;;  %v18296_v57 = vld [vmem:[%s19313_s0 + $0x500] ss:$56 sps:$4 sm:$0xff]  }
 0x8aa   : > { %14376 = vmatprep.subr.bf16.mxu1 %v18259_v7  ;;  %v18299_v7 = vld [vmem:[%s19313_s0 + $0x570] ss:$56 sps:$4 sm:$0xff]  }
 0x8ac   : > { %14404 = vmatpush1.bf16.msra.mxu0 %v18254_v40  ;;  %v18304_v40 = vld [vmem:[%s19313_s0 + $0x5e4] ss:$56 sps:$4 sm:$0xff]  }
 0x8ad   : > { %14377 = vmatpush1.bf16.msra.mxu1 %v18257_v61  ;;  %14405 = vmatprep.subr.bf16.mxu0 %v18262_v17  ;;  %v18302_v61 = vld [vmem:[%s19313_s0 + $0x5e0] ss:$56 sps:$4 sm:$0xff]   ;;  %v18307_v17 = vld [vmem:[%s19313_s0 + $0x654] ss:$56 sps:$4 sm:$0xff]  }
 0x8ae   : > { %14378 = vmatprep.subr.bf16.mxu1 %v18265_v14  ;;  %v18305_v14 = vld [vmem:[%s19313_s0 + $0x650] ss:$56 sps:$4 sm:$0xff]  }
 0x8b0   : > { %14406 = vmatpush1.bf16.msra.mxu0 %v18260_v31  ;;  %v18310_v31 = vld [vmem:[%s19313_s0 + $0x6c4] ss:$56 sps:$4 sm:$0xff]  }
 0x8b1   : > { %14379 = vmatpush1.bf16.msra.mxu1 %v18263_v46  ;;  %14407 = vmatprep.subr.bf16.mxu0 %v18268_v36  ;;  %v18308_v46 = vld [vmem:[%s19313_s0 + $0x6c0] ss:$56 sps:$4 sm:$0xff]   ;;  %v18313_v36 = vld [vmem:[%s19313_s0 + $0x734] ss:$56 sps:$4 sm:$0xff]  }
 0x8b2   : > { %v18458_v4 = vpop.eup %18457  ;;  %14380 = vmatprep.subr.bf16.mxu1 %v18271_v50  ;;  %v18311_v50 = vld [vmem:[%s19313_s0 + $0x730] ss:$56 sps:$4 sm:$0xff]  }
 0x8b3   : > { %v14582_v44 = vmul.f32 %v18487_v54, %v18458_v4  ;;  %v18317_v4 = vld [vmem:[%s19313_s0 + $0x810] ss:$56 sps:$4 sm:$0xff]   ;;  %v18320_v54 = vld [vmem:[%s19313_s0 + $0x880] ss:$56 sps:$4 sm:$0xff]  }
 0x8b4   : > { %14408 = vmatpush1.bf16.msra.mxu0 %v18266_v28  ;;  %v18316_v28 = vld [vmem:[%s19313_s0 + $0x7a4] ss:$56 sps:$4 sm:$0xff]  }
 0x8b5   : > { %14381 = vmatpush1.bf16.msra.mxu1 %v18269_v42  ;;  %14409 = vmatprep.subr.bf16.mxu0 %v18274_v62  ;;  %v14589_v0 = vadd.f32 %v14582_v44, %v20958_v22  ;;  %v18284_v22 = vld [vmem:[%s19313_s0 + $0x3b0] ss:$56 sps:$4 sm:$0xff]   ;;  %v18314_v42 = vld [vmem:[%s19313_s0 + $0x7a0] ss:$56 sps:$4 sm:$0xff]   ;;  %v18319_v62 = vld [vmem:[%s19313_s0 + $0x814] ss:$56 sps:$4 sm:$0xff]  }
 0x8b6   : > { %14382 = vmatprep.subr.bf16.mxu1 %v18277_v1  ;;  %v18322_v1 = vld [vmem:[%s19313_s0 + $0x884] ss:$56 sps:$4 sm:$0xff]   ;;  %v18323_v44 = vld [vmem:[%s19313_s0 + $0x8f0] ss:$56 sps:$4 sm:$0xff]  }
 0x8b7   : > { %v14632_v48 = vmul.f32 %v14600_v37, %v14589_v0  ;;  %v18292_v37 = vld [vmem:[%s19313_s0 + $0x424] ss:$56 sps:$4 sm:$0xff]  }
 0x8b8   : > { %14410 = vmatpush1.bf16.msra.mxu0 %v18272_v6  ;;  %v18326_v6 = vld [vmem:[%s19313_s0 + $0x960] ss:$56 sps:$4 sm:$0xff]   ;;  %v18334_v0 = vld [vmem:[%s19313_s0 + $0xa44] ss:$56 sps:$4 sm:$0xff]  }
 0x8b9   : > { %14383 = vmatpush1.bf16.msra.mxu1 %v18275_v56  ;;  %14411 = vmatprep.subr.bf16.mxu0 %v18280_v51  ;;  %v14639_v16 = vadd.f32 %v14632_v48, %v19435_v38  ;;  %v18295_v38 = vld [vmem:[%s19313_s0 + $0x494] ss:$56 sps:$4 sm:$0xff]   ;;  %v18329_v51 = vld [vmem:[%s19313_s0 + $0x9d0] ss:$56 sps:$4 sm:$0xff]  }
 0x8ba   : > { %14384 = vmatprep.subr.bf16.mxu1 %v18283_v19  ;;  %v18331_v56 = vld [vmem:[%s19313_s0 + $0x9d4] ss:$56 sps:$4 sm:$0xff]   ;;  %v18332_v19 = vld [vmem:[%s19313_s0 + $0xa40] ss:$56 sps:$4 sm:$0xff]  }
 0x8bb   : > { %14646 = vst [vmem:[#allocation13] sm:$0xff] %v14639_v16  ;;  %v18337_v48 = vld [vmem:[%s19313_s0 + $0xab4] ss:$56 sps:$4 sm:$0xff]  }
 0x8bc   : > { %14412 = vmatpush1.bf16.msra.mxu0 %v18278_v49  ;;  %v18335_v49 = vld [vmem:[%s19313_s0 + $0xab0] ss:$56 sps:$4 sm:$0xff]   ;;  %v18343_v16 = vld [vmem:[%s19313_s0 + $0xb94] ss:$56 sps:$4 sm:$0xff]  }
 0x8bd   : > { %14385 = vmatpush1.bf16.msra.mxu1 %v18281_v9  ;;  %14413 = vmatprep.subr.bf16.mxu0 %v18286_v20  ;;  %v18340_v9 = vld [vmem:[%s19313_s0 + $0xb24] ss:$56 sps:$4 sm:$0xff]   ;;  %v18338_v20 = vld [vmem:[%s19313_s0 + $0xb20] ss:$56 sps:$4 sm:$0xff]  }
 0x8be   : > { %14386 = vmatprep.subr.bf16.mxu1 %v18289_v47  ;;  %v18341_v47 = vld [vmem:[%s19313_s0 + $0xb90] ss:$56 sps:$4 sm:$0xff]  }
 0x8c0   : > { %14414 = vmatpush1.bf16.msra.mxu0 %v18284_v22  ;;  %v18346_v22 = vld [vmem:[%s19313_s0 + $0xc04] ss:$56 sps:$4 sm:$0xff]  }
 0x8c1   : > { %14387 = vmatpush1.bf16.msra.mxu1 %v18287_v32  ;;  %14415 = vmatprep.subr.bf16.mxu0 %v18292_v37  ;;  %v18344_v32 = vld [vmem:[%s19313_s0 + $0xc00] ss:$56 sps:$4 sm:$0xff]   ;;  %v18349_v37 = vld [vmem:[%s19313_s0 + $0xc74] ss:$56 sps:$4 sm:$0xff]  }
 0x8c4   : > { %14389 = vmatmul.mubr.bf16.vlgmr.msra.gmra.mrb[52].mxu1 %v20703_v2  ;;  %14416 = vmatpush1.bf16.msra.mxu0 %v18290_v35  ;;  %v18347_v35 = vld [vmem:[%s19313_s0 + $0xc70] ss:$56 sps:$4 sm:$0xff]  }
 0x8c5   : > { %14417 = vmatprep.subr.bf16.mxu0 %v18295_v38  ;;  %v18352_v38 = vld [vmem:[%s19313_s0 + $0xce4] ss:$56 sps:$4 sm:$0xff]  }
 0x8c8   : > { %14418 = vmatpush1.bf16.msra.mxu0 %v18293_v39  ;;  %v18350_v39 = vld [vmem:[%s19313_s0 + $0xce0] ss:$56 sps:$4 sm:$0xff]  }
 0x8c9   : > { %14419 = vmatprep.subr.bf16.mxu0 %v18298_v23  ;;  %v18355_v23 = vld [vmem:[%s19313_s0 + $0xd54] ss:$56 sps:$4 sm:$0xff]  }
 0x8cc   : > { %14420 = vmatpush1.bf16.msra.mxu0 %v18296_v57  ;;  %v18353_v57 = vld [vmem:[%s19313_s0 + $0xd50] ss:$56 sps:$4 sm:$0xff]  }
 0x8cd   : > { %14421 = vmatprep.subr.bf16.mxu0 %v18301_v3  ;;  %v18358_v3 = vld [vmem:[%s19313_s0 + $0xdc4] ss:$56 sps:$4 sm:$0xff]  }
 0x8d0   : > { %14422 = vmatpush1.bf16.msra.mxu0 %v18299_v7  ;;  %v18356_v7 = vld [vmem:[%s19313_s0 + $0xdc0] ss:$56 sps:$4 sm:$0xff]  }
 0x8d1   : > { %14423 = vmatprep.subr.bf16.mxu0 %v18304_v40  ;;  %v18361_v40 = vld [vmem:[%s19313_s0 + $0xe34] ss:$56 sps:$4 sm:$0xff]  }
 0x8d4   : > { %14424 = vmatpush1.bf16.msra.mxu0 %v18302_v61  ;;  %v18359_v61 = vld [vmem:[%s19313_s0 + $0xe30] ss:$56 sps:$4 sm:$0xff]  }
 0x8d5   : > { %14425 = vmatprep.subr.bf16.mxu0 %v18307_v17  ;;  %v18364_v17 = vld [vmem:[%s19313_s0 + $0xea4] ss:$56 sps:$4 sm:$0xff]  }
 0x8d8   : > { %14426 = vmatpush1.bf16.msra.mxu0 %v18305_v14  ;;  %v18362_v14 = vld [vmem:[%s19313_s0 + $0xea0] ss:$56 sps:$4 sm:$0xff]  }
 0x8d9   : > { %14427 = vmatprep.subr.bf16.mxu0 %v18310_v31  ;;  %v18367_v31 = vld [vmem:[%s19313_s0 + $0xf14] ss:$56 sps:$4 sm:$0xff]  }
 0x8dc   : > { %14428 = vmatpush1.bf16.msra.mxu0 %v18308_v46  ;;  %v18365_v46 = vld [vmem:[%s19313_s0 + $0xf10] ss:$56 sps:$4 sm:$0xff]  }
 0x8dd   : > { %14438 = vmatprep.subr.bf16.mxu0 %v18313_v36  ;;  %v18370_v36 = vld [vmem:[%s19313_s0 + $0xf84] ss:$56 sps:$4 sm:$0xff]  }
 0x8df   : > { %14430 = vmatmul.mubr.bf16.vlgmr.msra.gmra.mrb[52].mxu0 %v20576_v5  ;;  %v18325_v5 = vld [vmem:[%s19313_s0 + $0x8f4] ss:$56 sps:$4 sm:$0xff]  }
 0x8e0   : > { %14439 = vmatpush1.bf16.msra.mxu0 %v18311_v50  ;;  %14470 = vmatprep.mubr.bf16.mxu0 %v20544_v33  ;;  %v18328_v33 = vld [vmem:[%s19313_s0 + $0x964] ss:$56 sps:$4 sm:$0xff]   ;;  %v18368_v50 = vld [vmem:[%s19313_s0 + $0xf80] ss:$56 sps:$4 sm:$0xff]  }
 0x8e1   : > { %14440 = vmatprep.subr.bf16.mxu0 %v18316_v28  ;;  %v18371_v28 = vld [vmem:[%s19313_s0 + $0xff0] ss:$56 sps:$4 sm:$0xff]  }
 0x8e4   : > { %14441 = vmatpush1.bf16.msra.mxu0 %v18314_v42  ;;  %v18374_v42 = vld [vmem:[%s19313_s0 + $0x1060] ss:$56 sps:$4 sm:$0xff]  }
 0x8e5   : > { %14442 = vmatprep.subr.bf16.mxu0 %v18319_v62  ;;  %v18379_v62 = vld [vmem:[%s19313_s0 + $0x10d4] ss:$56 sps:$4 sm:$0xff]  }
 0x8e8   : > { %14443 = vmatpush1.bf16.msra.mxu0 %v18317_v4  ;;  %v18377_v4 = vld [vmem:[%s19313_s0 + $0x10d0] ss:$56 sps:$4 sm:$0xff]  }
 0x8e9   : > { %14444 = vmatprep.subr.bf16.mxu0 %v18322_v1  ;;  %v18382_v1 = vld [vmem:[%s19313_s0 + $0x1144] ss:$56 sps:$4 sm:$0xff]  }
 0x8ec   : > { %14445 = vmatpush1.bf16.msra.mxu0 %v18320_v54  ;;  %v18380_v54 = vld [vmem:[%s19313_s0 + $0x1140] ss:$56 sps:$4 sm:$0xff]  }
 0x8ed   : > { %14446 = vmatprep.subr.bf16.mxu0 %v18325_v5  ;;  %v18385_v5 = vld [vmem:[%s19313_s0 + $0x11b4] ss:$56 sps:$4 sm:$0xff]  }
 0x8f0   : > { %14447 = vmatpush1.bf16.msra.mxu0 %v18323_v44  ;;  %v18383_v44 = vld [vmem:[%s19313_s0 + $0x11b0] ss:$56 sps:$4 sm:$0xff]  }
 0x8f1   : > { %14448 = vmatprep.subr.bf16.mxu0 %v18328_v33  ;;  %v18388_v33 = vld [vmem:[%s19313_s0 + $0x1224] ss:$56 sps:$4 sm:$0xff]  }
 0x8f4   : > { %14449 = vmatpush1.bf16.msra.mxu0 %v18326_v6  ;;  %v18386_v6 = vld [vmem:[%s19313_s0 + $0x1220] ss:$56 sps:$4 sm:$0xff]  }
 0x8f5   : > { %14450 = vmatprep.subr.bf16.mxu0 %v18331_v56  ;;  %v18391_v56 = vld [vmem:[%s19313_s0 + $0x1294] ss:$56 sps:$4 sm:$0xff]  }
 0x8f8   : > { %14451 = vmatpush1.bf16.msra.mxu0 %v18329_v51  ;;  %v18389_v51 = vld [vmem:[%s19313_s0 + $0x1290] ss:$56 sps:$4 sm:$0xff]  }
 0x8f9   : > { %14452 = vmatprep.subr.bf16.mxu0 %v18334_v0  ;;  %v18394_v0 = vld [vmem:[%s19313_s0 + $0x1304] ss:$56 sps:$4 sm:$0xff]  }
 0x8fc   : > { %14453 = vmatpush1.bf16.msra.mxu0 %v18332_v19  ;;  %v18392_v19 = vld [vmem:[%s19313_s0 + $0x1300] ss:$56 sps:$4 sm:$0xff]  }
 0x8fd   : > { %14454 = vmatprep.subr.bf16.mxu0 %v18337_v48  ;;  %v18397_v48 = vld [vmem:[%s19313_s0 + $0x1374] ss:$56 sps:$4 sm:$0xff]  }
 0x900   : > { %14455 = vmatpush1.bf16.msra.mxu0 %v18335_v49  ;;  %v18395_v49 = vld [vmem:[%s19313_s0 + $0x1370] ss:$56 sps:$4 sm:$0xff]  }
 0x901   : > { %14456 = vmatprep.subr.bf16.mxu0 %v18340_v9  ;;  %v18400_v9 = vld [vmem:[%s19313_s0 + $0x13e4] ss:$56 sps:$4 sm:$0xff]  }
 0x904   : > { %14457 = vmatpush1.bf16.msra.mxu0 %v18338_v20  ;;  %v18398_v20 = vld [vmem:[%s19313_s0 + $0x13e0] ss:$56 sps:$4 sm:$0xff]  }
 0x905   : > { %14458 = vmatprep.subr.bf16.mxu0 %v18343_v16  ;;  %v18403_v16 = vld [vmem:[%s19313_s0 + $0x1454] ss:$56 sps:$4 sm:$0xff]  }
 0x908   : > { %14459 = vmatpush1.bf16.msra.mxu0 %v18341_v47  ;;  %v18401_v47 = vld [vmem:[%s19313_s0 + $0x1450] ss:$56 sps:$4 sm:$0xff]  }
 0x909   : > { %14460 = vmatprep.subr.bf16.mxu0 %v18346_v22  ;;  %v18406_v22 = vld [vmem:[%s19313_s0 + $0x14c4] ss:$56 sps:$4 sm:$0xff]  }
 0x90c   : > { %14461 = vmatpush1.bf16.msra.mxu0 %v18344_v32  ;;  %v18404_v32 = vld [vmem:[%s19313_s0 + $0x14c0] ss:$56 sps:$4 sm:$0xff]  }
 0x90d   : > { %14462 = vmatprep.subr.bf16.mxu0 %v18349_v37  ;;  %v18409_v37 = vld [vmem:[%s19313_s0 + $0x1534] ss:$56 sps:$4 sm:$0xff]  }
 0x910   : > { %14463 = vmatpush1.bf16.msra.mxu0 %v18347_v35  ;;  %v18407_v35 = vld [vmem:[%s19313_s0 + $0x1530] ss:$56 sps:$4 sm:$0xff]  }
 0x911   : > { %14464 = vmatprep.subr.bf16.mxu0 %v18352_v38  ;;  %v18412_v38 = vld [vmem:[%s19313_s0 + $0x15a4] ss:$56 sps:$4 sm:$0xff]  }
 0x914   : > { %14465 = vmatpush1.bf16.msra.mxu0 %v18350_v39  ;;  %v18410_v39 = vld [vmem:[%s19313_s0 + $0x15a0] ss:$56 sps:$4 sm:$0xff]  }
 0x915   : > { %14466 = vmatprep.subr.bf16.mxu0 %v18355_v23  ;;  %v18415_v23 = vld [vmem:[%s19313_s0 + $0x1614] ss:$56 sps:$4 sm:$0xff]  }
 0x918   : > { %14467 = vmatpush1.bf16.msra.mxu0 %v18353_v57  ;;  %v18413_v57 = vld [vmem:[%s19313_s0 + $0x1610] ss:$56 sps:$4 sm:$0xff]  }
 0x919   : > { %14468 = vmatprep.subr.bf16.mxu0 %v18358_v3  ;;  %v18418_v3 = vld [vmem:[%s19313_s0 + $0x1684] ss:$56 sps:$4 sm:$0xff]  }
 0x91c   : > { %14469 = vmatpush1.bf16.msra.mxu0 %v18356_v7  ;;  %v18416_v7 = vld [vmem:[%s19313_s0 + $0x1680] ss:$56 sps:$4 sm:$0xff]  }
 0x91d   : > { %14479 = vmatprep.subr.bf16.mxu0 %v18361_v40  ;;  %v18421_v40 = vld [vmem:[%s19313_s0 + $0x16f4] ss:$56 sps:$4 sm:$0xff]  }
 0x91f   : > { %14471 = vmatmul.mubr.bf16.vlgmr.msra.gmra.mrb[52].mxu0 %v20620_v53  ;;  %v18373_v53 = vld [vmem:[%s19313_s0 + $0xff4] ss:$56 sps:$4 sm:$0xff]  }
 0x920   : > { %14480 = vmatpush1.bf16.msra.mxu0 %v18359_v61  ;;  %14511 = vmatprep.mubr.bf16.mxu0 %v20670_v25  ;;  %v18376_v25 = vld [vmem:[%s19313_s0 + $0x1064] ss:$56 sps:$4 sm:$0xff]   ;;  %v21587_v61 = vld [vmem:[%s19315_s13 + $0x8] sm:$0x3f] }
 0x921   : > { %14481 = vmatprep.subr.bf16.mxu0 %v18364_v17  ;;  %v8898_v17 = vrot.slane %v21587_v61, %v19415_v11 }
 0x924   : > { %14482 = vmatpush1.bf16.msra.mxu0 %v18362_v14  ;;  %v8902_v14 = vrot.slane %v21587_v61, %v19353_v58 }
 0x925   : > { %14483 = vmatprep.subr.bf16.mxu0 %v18367_v31  ;;  %v18422_v31 = vld [vmem:[%s19313_s0 + $0x1760] ss:$56 sps:$4 sm:$0xff]  }
 0x928   : > { %14484 = vmatpush1.bf16.msra.mxu0 %v18365_v46  ;;  %v18427_v46 = vld [vmem:[%s19313_s0 + $0x17d4] ss:$56 sps:$4 sm:$0xff]  }
 0x929   : > { %14485 = vmatprep.subr.bf16.mxu0 %v18370_v36 }
 0x92c   : > { %14486 = vmatpush1.bf16.msra.mxu0 %v18368_v50 }
 0x92d   : > { %14487 = vmatprep.subr.bf16.mxu0 %v18373_v53 }
 0x930   : > { %14488 = vmatpush1.bf16.msra.mxu0 %v18371_v28 }
 0x931   : > { %14489 = vmatprep.subr.bf16.mxu0 %v18376_v25 }
 0x934   : > { %14490 = vmatpush1.bf16.msra.mxu0 %v18374_v42  ;;  %v18425_v42 = vld [vmem:[%s19313_s0 + $0x17d0] ss:$56 sps:$4 sm:$0xff]  }
 0x935   : > { %14491 = vmatprep.subr.bf16.mxu0 %v18379_v62  ;;  %v18430_v62 = vld [vmem:[%s19313_s0 + $0x1844] ss:$56 sps:$4 sm:$0xff]  }
 0x938   : > { %14492 = vmatpush1.bf16.msra.mxu0 %v18377_v4  ;;  %v18428_v4 = vld [vmem:[%s19313_s0 + $0x1840] ss:$56 sps:$4 sm:$0xff]  }
 0x939   : > { %14493 = vmatprep.subr.bf16.mxu0 %v18382_v1  ;;  %v18433_v1 = vld [vmem:[%s19313_s0 + $0x18b4] ss:$56 sps:$4 sm:$0xff]  }
 0x93c   : > { %14494 = vmatpush1.bf16.msra.mxu0 %v18380_v54  ;;  %v18431_v54 = vld [vmem:[%s19313_s0 + $0x18b0] ss:$56 sps:$4 sm:$0xff]  }
 0x93d   : > { %14495 = vmatprep.subr.bf16.mxu0 %v18385_v5  ;;  %v14604_v5 = vrot.slane %v21451_v24, %v19353_v58 }
 0x940   : > { %14496 = vmatpush1.bf16.msra.mxu0 %v18383_v44  ;;  %v18436_v44 = vld [vmem:[%s19313_s0 + $0x1924] ss:$56 sps:$4 sm:$0xff]  }
 0x941   : > { %14497 = vmatprep.subr.bf16.mxu0 %v18388_v33  ;;  %v14608_v33 = vrot.slane %v21451_v24, %v19529_v18 }
 0x944   : > { %14498 = vmatpush1.bf16.msra.mxu0 %v18386_v6 }
 0x945   : > { %14499 = vmatprep.subr.bf16.mxu0 %v18391_v56 }
 0x948   : > { %14500 = vmatpush1.bf16.msra.mxu0 %v18389_v51 }
 0x949   : > { %14501 = vmatprep.subr.bf16.mxu0 %v18394_v0  ;;  %v18434_v0 = vld [vmem:[%s19313_s0 + $0x1920] ss:$56 sps:$4 sm:$0xff]  }
 0x94c   : > { %14502 = vmatpush1.bf16.msra.mxu0 %v18392_v19 }
 0x94d   : > { %14503 = vmatprep.subr.bf16.mxu0 %v18397_v48 }
 0x950   : > { %14504 = vmatpush1.bf16.msra.mxu0 %v18395_v49  ;;  %v18439_v49 = vld [vmem:[%s19313_s0 + $0x1994] ss:$56 sps:$4 sm:$0xff]  }
 0x951   : > { %14505 = vmatprep.subr.bf16.mxu0 %v18400_v9 }
 0x954   : > { %14506 = vmatpush1.bf16.msra.mxu0 %v18398_v20  ;;  %v18437_v20 = vld [vmem:[%s19313_s0 + $0x1990] ss:$56 sps:$4 sm:$0xff]  }
 0x955   : > { %14507 = vmatprep.subr.bf16.mxu0 %v18403_v16 }
 0x958   : > { %14508 = vmatpush1.bf16.msra.mxu0 %v18401_v47  ;;  %v18442_v47 = vld [vmem:[%s19313_s0 + $0x1a04] ss:$56 sps:$4 sm:$0xff]  }
 0x959   : > { %14509 = vmatprep.subr.bf16.mxu0 %v18406_v22  ;;  %v18440_v22 = vld [vmem:[%s19313_s0 + $0x1a00] ss:$56 sps:$4 sm:$0xff]  }
 0x95c   : > { %14510 = vmatpush1.bf16.msra.mxu0 %v18404_v32  ;;  %v18445_v32 = vld [vmem:[%s19313_s0 + $0x1a74] ss:$56 sps:$4 sm:$0xff]  }
 0x95d   : > { %14520 = vmatprep.subr.bf16.mxu0 %v18409_v37 }
 0x95f   : > { %14512 = vmatmul.mubr.bf16.vlgmr.msra.gmra.mrb[52].mxu0 %v20673_v29  ;;  %v18419_v29 = vld [vmem:[%s19313_s0 + $0x16f0] ss:$56 sps:$4 sm:$0xff]  }
 0x960   : > { %14521 = vmatpush1.bf16.msra.mxu0 %v18407_v35  ;;  %14552 = vmatprep.mubr.bf16.mxu0 %v20700_v63  ;;  %v18424_v63 = vld [vmem:[%s19313_s0 + $0x1764] ss:$56 sps:$4 sm:$0xff]   ;;  %v18443_v35 = vld [vmem:[%s19313_s0 + $0x1a70] ss:$56 sps:$4 sm:$0xff]  }
 0x961   : > { %14522 = vmatprep.subr.bf16.mxu0 %v18412_v38 }
 0x964   : > { %14523 = vmatpush1.bf16.msra.mxu0 %v18410_v39  ;;  %v18448_v39 = vld [vmem:[%s19313_s0 + $0x1ae4] ss:$56 sps:$4 sm:$0xff]  }
 0x965   : > { %14524 = vmatprep.subr.bf16.mxu0 %v18415_v23 }
 0x968   : > { %14525 = vmatpush1.bf16.msra.mxu0 %v18413_v57  ;;  %v18489_v57 = vld [vmem:[#allocation13 + $0x10] sm:$0xff] }
 0x969   : > { %14526 = vmatprep.subr.bf16.mxu0 %v18418_v3 }
 0x96c   : > { %14527 = vmatpush1.bf16.msra.mxu0 %v18416_v7 }
 0x96d   : > { %14528 = vmatprep.subr.bf16.mxu0 %v18421_v40  ;;  %v18446_v40 = vld [vmem:[%s19313_s0 + $0x1ae0] ss:$56 sps:$4 sm:$0xff]  }
 0x970   : > { %14529 = vmatpush1.bf16.msra.mxu0 %v18419_v29 }
 0x971   : > { %14530 = vmatprep.subr.bf16.mxu0 %v18424_v63  ;;  %v18451_v63 = vld [vmem:[%s19313_s0 + $0x1b54] ss:$56 sps:$4 sm:$0xff]  }
 0x972   : > { %v14226_v36 = vpop.f32.mrb[48].mxu0 }
 0x973   : > { %v16833_v50 = vadd.f32 %v14226_v36, %v8898_v17  ;;  %v14228_v53 = vpop.f32.mrb[49].mxu0  ;;  %v18449_v36 = vld [vmem:[%s19313_s0 + $0x1b50] ss:$56 sps:$4 sm:$0xff]  }
 0x974   : > { %v16834_v28 = vadd.f32 %v14228_v53, %v8902_v14  ;;  %v14230_v25 = vpop.f32.mrb[50].mxu0  ;;  %14531 = vmatpush1.bf16.msra.mxu0 %v18422_v31  ;;  %v18454_v53 = vld [vmem:[%s19313_s0 + $0x1bc4] ss:$56 sps:$4 sm:$0xff]  }
 0x975   : > { %18459 = vtanh.f32 %v16833_v50  ;;  %v14231_v11 = vpop.f32.mrb[51].mxu0  ;;  %14532 = vmatprep.subr.bf16.mxu0 %v18427_v46  ;;  %v8906_v46 = vrot.slane %v21587_v61, %v19529_v18 }
 0x976   : > { %18461 = vtanh.f32 %v16834_v28 }
 0x978   : > { %14533 = vmatpush1.bf16.msra.mxu0 %v18425_v42  ;;  %v18452_v42 = vld [vmem:[%s19313_s0 + $0x1bc0] ss:$56 sps:$4 sm:$0xff]  }
 0x979   : > { %14534 = vmatprep.subr.bf16.mxu0 %v18430_v62  ;;  %v14616_v62 = vrot.slane %v21451_v24, %v19418_v15 }
 0x97c   : > { %14535 = vmatpush1.bf16.msra.mxu0 %v18428_v4 }
 0x97d   : > { %14536 = vmatprep.subr.bf16.mxu0 %v18433_v1 }
 0x97f   : > { %v18460_v6 = vpop.eup %18459 }
 0x980   : > { %v18462_v56 = vpop.eup %18461  ;;  %v14570_v51 = vmul.f32 1.442695, %v18460_v6  ;;  %14537 = vmatpush1.bf16.msra.mxu0 %v18431_v54  ;;  %v14655_v19 = vmul.f32 %v18460_v6, %v14604_v5 }
 0x981   : > { %v14572_v48 = vmul.f32 1.442695, %v18462_v56  ;;  %14538 = vmatprep.subr.bf16.mxu0 %v18436_v44  ;;  %v14656_v58 = vmul.f32 %v18462_v56, %v14608_v33 }
 0x982   : > { %18463 = vpow2.f32 %v14570_v51  ;;  %v14661_v9 = vadd.f32 %v14655_v19, %v21465_v34  ;;  %v18488_v34 = vld [vmem:[#allocation13 + $0x8] sm:$0xff]  ;;  %v18490_v19 = vld [vmem:[#allocation13 + $0x18] sm:$0xff] }
 0x983   : > { %18465 = vpow2.f32 %v14572_v48  ;;  %v18491_v48 = vld [vmem:[#allocation13 + $0x20] sm:$0xff] }
 0x984   : > { %14539 = vmatpush1.bf16.msra.mxu0 %v18434_v0  ;;  %v14662_v16 = vadd.f32 %v14661_v9, %v14656_v58 }
 0x985   : > { %14540 = vmatprep.subr.bf16.mxu0 %v18439_v49 }
 0x988   : > { %14541 = vmatpush1.bf16.msra.mxu0 %v18437_v20 }
 0x989   : > { %14542 = vmatprep.subr.bf16.mxu0 %v18442_v47 }
 0x98c   : > { %v18464_v37 = vpop.eup %18463  ;;  %14543 = vmatpush1.bf16.msra.mxu0 %v18440_v22 }
 0x98d   : > { %v18466_v38 = vpop.eup %18465  ;;  %14544 = vmatprep.subr.bf16.mxu0 %v18445_v32  ;;  %v14583_v23 = vmul.f32 %v18488_v34, %v18464_v37  ;;  %v8918_v32 = vrot.slane %v21587_v61, %v19356_v59 }
 0x98e   : > { %v14584_v3 = vmul.f32 %v18489_v57, %v18466_v38 }
 0x98f   : > { %v14590_v7 = vadd.f32 %v14583_v23, %v20962_v55  ;;  %v8910_v55 = vrot.slane %v21587_v61, %v19427_v26 }
 0x990   : > { %14545 = vmatpush1.bf16.msra.mxu0 %v18443_v35  ;;  %v14591_v29 = vadd.f32 %v14584_v3, %v21117_v30 }
 0x991   : > { %14546 = vmatprep.subr.bf16.mxu0 %v18448_v39  ;;  %v14633_v17 = vmul.f32 %v14604_v5, %v14590_v7 }
 0x992   : > { %v14634_v14 = vmul.f32 %v14608_v33, %v14591_v29 }
 0x993   : > { %v14640_v31 = vadd.f32 %v14633_v17, %v19372_v12  ;;  %v18492_v17 = vld [vmem:[#allocation13 + $0x28] sm:$0xff] }
 0x994   : > { %14547 = vmatpush1.bf16.msra.mxu0 %v18446_v40  ;;  %v14641_v50 = vadd.f32 %v14634_v14, %v19541_v43  ;;  %v14612_v43 = vrot.slane %v21451_v24, %v19427_v26 }
 0x995   : > { %14548 = vmatprep.subr.bf16.mxu0 %v18451_v63  ;;  %14647 = vst [vmem:[#allocation13 + $0x8] sm:$0xff] %v14640_v31 }
 0x996   : > { %14648 = vst [vmem:[#allocation13 + $0x10] sm:$0xff] %v14641_v50 }
 0x997   : > { %v14390_v30 = vpop.f32.mrb[52].mxu1 }
 0x998   : > { %v16835_v28 = vadd.f32 %v14390_v30, %v8906_v46  ;;  %v14392_v25 = vpop.f32.mrb[53].mxu1  ;;  %14549 = vmatpush1.bf16.msra.mxu0 %v18449_v36 }
 0x999   : > { %v16836_v12 = vadd.f32 %v14392_v25, %v8910_v55  ;;  %v14394_v11 = vpop.f32.mrb[54].mxu1  ;;  %14550 = vmatprep.subr.bf16.mxu0 %v18454_v53 }
 0x99a   : > { %18467 = vtanh.f32 %v16835_v28  ;;  %v14395_v18 = vpop.f32.mrb[55].mxu1 }
 0x99b   : > { %18469 = vtanh.f32 %v16836_v12 }
 0x99c   : > { %14551 = vmatpush1.bf16.msra.mxu0 %v18452_v42 }
 0x99f   : > { %14553 = vmatmul.mubr.bf16.vlgmr.msra.gmra.mrb[52].mxu0 %v20703_v2 }
 0x9a4   : > { %v18468_v4 = vpop.eup %18467 }
 0x9a5   : > { %v18470_v1 = vpop.eup %18469  ;;  %v14574_v54 = vmul.f32 1.442695, %v18468_v4  ;;  %v14657_v5 = vmul.f32 %v18468_v4, %v14612_v43 }
 0x9a6   : > { %v14576_v44 = vmul.f32 1.442695, %v18470_v1  ;;  %v14658_v33 = vmul.f32 %v18470_v1, %v14616_v62 }
 0x9a7   : > { %18471 = vpow2.f32 %v14574_v54  ;;  %v14663_v6 = vadd.f32 %v14662_v16, %v14657_v5  ;;  %v8914_v16 = vrot.slane %v21587_v61, %v19418_v15 }
 0x9a8   : > { %18473 = vpow2.f32 %v14576_v44 }
 0x9a9   : > { %v14664_v56 = vadd.f32 %v14663_v6, %v14658_v33 }
 0x9b1   : > { %v18472_v51 = vpop.eup %18471 }
 0x9b2   : > { %v18474_v0 = vpop.eup %18473  ;;  %v14585_v2 = vmul.f32 %v18490_v19, %v18472_v51 }
 0x9b3   : > { %v14586_v49 = vmul.f32 %v18491_v48, %v18474_v0 }
 0x9b4   : > { %v14592_v26 = vadd.f32 %v14585_v2, %v21121_v10 }
 0x9b5   : > { %v14593_v58 = vadd.f32 %v14586_v49, %v21279_v60 }
 0x9b6   : > { %v14635_v9 = vmul.f32 %v14612_v43, %v14592_v26 }
 0x9b7   : > { %v14636_v20 = vmul.f32 %v14616_v62, %v14593_v58 }
 0x9b8   : > { %v14642_v47 = vadd.f32 %v14635_v9, %v19449_v52  ;;  %v14620_v52 = vrot.slane %v21451_v24, %v19356_v59  ;;  %v18493_v59 = vld [vmem:[#allocation13 + $0x30] sm:$0xff] }
 0x9b9   : > { %v14643_v22 = vadd.f32 %v14636_v20, %v19439_v41  ;;  %v14624_v41 = vrot.slane %v21451_v24, %v19484_v45 }
 0x9ba   : > { %14649 = vst [vmem:[#allocation13 + $0x18] sm:$0xff] %v14642_v47 }
 0x9bb   : > { %14650 = vst [vmem:[#allocation13 + $0x20] sm:$0xff] %v14643_v22 }
 0xa72   : > { %v14554_v37 = vpop.f32.mrb[52].mxu0 }
 0xa73   : > { %v16837_v35 = vadd.f32 %v14554_v37, %v8914_v16  ;;  %v14556_v38 = vpop.f32.mrb[53].mxu0 }
 0xa74   : > { %v16838_v10 = vadd.f32 %v14556_v38, %v8918_v32  ;;  %v14558_v39 = vpop.f32.mrb[54].mxu0 }
 0xa75   : > { %18475 = vtanh.f32 %v16837_v35  ;;  %v14559_v60 = vpop.f32.mrb[55].mxu0 }
 0xa76   : > { %18477 = vtanh.f32 %v16838_v10 }
 0xa7f   : > { %v18476_v34 = vpop.eup %18475 }
 0xa80   : > { %v18478_v23 = vpop.eup %18477  ;;  %v14578_v15 = vmul.f32 1.442695, %v18476_v34  ;;  %v14659_v57 = vmul.f32 %v18476_v34, %v14620_v52 }
 0xa81   : > { %v14580_v3 = vmul.f32 1.442695, %v18478_v23  ;;  %v14660_v61 = vmul.f32 %v18478_v23, %v14624_v41 }
 0xa82   : > { %18479 = vpow2.f32 %v14578_v15  ;;  %v14665_v7 = vadd.f32 %v14664_v56, %v14659_v57 }
 0xa83   : > { %18481 = vpow2.f32 %v14580_v3 }
 0xa84   : > { %v14666_v40 = vadd.f32 %v14665_v7, %v14660_v61 }
 0xa86   : > { %14667 = vadd.xlane.f32.xlu0 %v14666_v40 }
 0xa8c   : > { %v18480_v29 = vpop.eup %18479 }
 0xa8d   : > { %v18482_v63 = vpop.eup %18481  ;;  %v14587_v14 = vmul.f32 %v18492_v17, %v18480_v29 }
 0xa8e   : > { %v14588_v31 = vmul.f32 %v18493_v59, %v18482_v63 }
 0xa8f   : > { %v14594_v45 = vadd.f32 %v14587_v14, %v21283_v27 }
 0xa90   : > { %v14595_v24 = vadd.f32 %v14588_v31, %v21438_v21 }
 0xa91   : > { %v14637_v46 = vmul.f32 %v14620_v52, %v14594_v45 }
 0xa92   : > { %v14638_v36 = vmul.f32 %v14624_v41, %v14595_v24 }
 0xa93   : > { %v14644_v50 = vadd.f32 %v14637_v46, %v19374_v13 }
 0xa94   : > { %v14645_v55 = vadd.f32 %v14638_v36, %v19496_v8 }
 0xa95   : > { %14651 = vst [vmem:[#allocation13 + $0x28] sm:$0xff] %v14644_v50 }
 0xa96   : > { %14652 = vst [vmem:[#allocation13 + $0x30] sm:$0xff] %v14645_v55 }
 0xa97   : > { %18745 = shalt.err (!%p18742_p6)
}
 0xa98   : > { %s21770_s12 = sld [smem:[#allocation27_spill]] }
 0xa9e   : > { %s18746_s25 = scalar_lea.hbm %s21770_s12, 896 }
 0xa9f   : > { %p18747_p8 = scmp.ne.s32.totalorder %s21770_s12, %s18746_s25  ;;  %p18752_p11 = scmp.lt.u32.totalorder %s18746_s25, %s21770_s12 }
 0xaa1   : > { %p18748_p1 = pnand %p18747_p8, %p17030_p2 }
 0xaa3   : > { %p18749_p5 = pneg %p18748_p1 }
 0xaa5   : > { %p18754_p7 = pnand %p18752_p11, %p18749_p5 }
 0xaa7   : > { %18757 = shalt.err (!%p18754_p7)
}
 0xaa8   : > { %16998 = dma.vmem_to_hbm [thread:$0]  (%p17030_p2), %s14687_s24, 896, %s21770_s12, [#allocation4]   ;;  %vm14670_vm1 = vcmask 7168  }
 0xaa9   : > { %s21771_s2 = sld [smem:[#allocation28_spill]] }
 0xaaf   : > { %v14653_v13 = vld [vmem:[%s21771_s2] sm:$0xff] }
 0xb13   : > { %v14668_v8 = vpop.xlane.xlu0 %14667 }
 0xb14   : > { %v14669_v27 = vadd.f32 %v14668_v8, %v14653_v13 }
 0xb16   : > { %14671 = vst.msk [vmem:[%s21771_s2] sm:$0xff] %vm14670_vm1, %v14669_v27 }
 0xb17   : > { %18807 = dma.done.wait (%p17030_p2), [#allocation4], 896  }
 0xb18   : > { %18809 = vsyncadd (%p17030_p2), [#allocation4], 4294966400 }
 0xb19 PF: > { %s26_s21 = sadd.s32 1, %s18844_s21   ;;  %s21772_s19 = sld [smem:[#allocation20_spill]] }
 0xb1a   : > { %p23_p10 = scmp.ge.s32.totalorder %s26_s21, 10   ;;  %s21773_s18 = sld [smem:[#allocation18_spill]] }
 0xb1b   : > { %s21774_s4 = sld [smem:[#allocation21_spill]]  ;;  %s21775_s5 = sld [smem:[#allocation19_spill]] }
 0xb1c   : > { %s21776_s13 = smov %s18816_s14  ;;  %s21777_s14 = smov %s18820_s15 }
 0xb1d   : > { %s21779_s16 = smov %s18828_s17  ;;  %25 = sbr.rel (!%p23_p10) target bundleno = 16 (0x10), region = 184 }
 0xb1f   : > { %s21778_s15 = smov %s21772_s19  ;;  %s21782_s19 = smov %s18840_s20 }
 0xb20   : > { %s21780_s17 = smov %s21773_s18 }
 0xb21   : > { %s21781_s18 = smov %s21774_s4  ;;  %s21783_s20 = smov %s21775_s5 }
 0xb24   :  { %14709 = vsyncpa [#allocation3], 1 }
 0xb25   :  { %14711 = vsyncpa [#allocation3 + $0x1], 1 }
 0xb26   :  { %14712 = vsyncpa [#allocation6], 1 }
 0xb27   :  { %14713 = vsyncpa [#allocation4], 1 }
 0xb28   :  { %14715 = vsyncpa [#allocation4 + $0x1], 1 }

</bundles_post_ra>
